<compile_context>
chip_gen: v5e
topology: v5e:2x2
jax: 0.10.0
libtpu: 0.0.40
codegen_flags: <defaults>
</compile_context>

<pallas_src>
import functools

import jax
import jax.numpy as jnp
from jax.experimental import pallas as pl
from jax.experimental.pallas import tpu as pltpu


_MASK_VALUE = -1e30  # effectively -inf for softmax masking


# ----------------------------------------------------------------------------
# LSTM cell math (gate order: i, f, o, g  -- sigmoid gates first, tanh gate last)
# ----------------------------------------------------------------------------
def _cell(gates_f, gates_b, c_f, c_b, H):
    def one(g, c):
        # sigmoid(x) = 0.5 * tanh(0.5 x) + 0.5  -> one EUP op for i, f, o together.
        s = 0.5 * jnp.tanh(0.5 * g[:, :3 * H]) + 0.5
        gg = jnp.tanh(g[:, 3 * H:])
        i = s[:, :H]
        f = s[:, H:2 * H]
        o = s[:, 2 * H:3 * H]
        c_new = f * c + i * gg
        h_new = o * jnp.tanh(c_new)
        return h_new, c_new

    h_f, c_f_new = one(gates_f, c_f)
    h_b, c_b_new = one(gates_b, c_b)
    return h_f, h_b, c_f_new, c_b_new


# ----------------------------------------------------------------------------
# Pallas kernel: one full bidirectional LSTM layer (optionally + FC + LogSoftmax)
# ----------------------------------------------------------------------------
def _bilstm_layer_kernel(*refs, T, B, H, n_classes, fuse_fc):
    """One bidirectional LSTM layer in a single kernel invocation.

    refs (in order):
      x_ref      : (T*B, Fin) f32, time-major rows (row = t*B + b), B % 8 == 0
      w_ih_ref   : (Fin, 8H)  bf16, columns = [fw i,f,o,g | bw i,f,o,g]
      w_hh_f_ref : (H, 4H)    bf16
      w_hh_b_ref : (H, 4H)    bf16
      b_ref      : (1, 8H)    f32, b_ih + b_hh, [fw | bw]
      (fc_w_ref  : (2H, Cp)   bf16, fc_b_ref: (1, Cp) f32   -- only if fuse_fc)
      out_ref    : (T*B, 2H) f32      if not fuse_fc
                   (T*B, Cp) f32      if fuse_fc (log-probs, padded classes masked)
      gx_scr     : (T*B, 8H) bf16 scratch (hoisted input projection, bias folded)
      (hcat_scr  : (T*B, 2H) f32 scratch  -- only if fuse_fc)
    """
    if fuse_fc:
        (x_ref, w_ih_ref, w_hh_f_ref, w_hh_b_ref, b_ref, fc_w_ref, fc_b_ref,
         out_ref, gx_scr, hcat_scr) = refs
    else:
        (x_ref, w_ih_ref, w_hh_f_ref, w_hh_b_ref, b_ref,
         out_ref, gx_scr) = refs
        hcat_scr = out_ref  # write the layer output directly

    G = 4 * H

    # ---- Hoisted input projection for both directions: bf16 x bf16 -> f32 acc.
    x_bf = x_ref[...].astype(jnp.bfloat16)
    gx = jnp.dot(x_bf, w_ih_ref[...], preferred_element_type=jnp.float32)
    gx = gx + b_ref[...]
    gx_scr[...] = gx.astype(gx_scr.dtype)          # bf16 storage halves the scratch

    # Recurrent weights stay bf16 (native MXU rate); loaded once.
    w_hh_f = w_hh_f_ref[...]
    w_hh_b = w_hh_b_ref[...]

    def read_gx(t):
        row_f = pl.multiple_of(t * B, B)
        row_b = pl.multiple_of((T - 1 - t) * B, B)
        gf = gx_scr[pl.ds(row_f, B), pl.ds(0, G)].astype(jnp.float32)
        gb = gx_scr[pl.ds(row_b, B), pl.ds(G, G)].astype(jnp.float32)
        return gf, gb

    def write_h(t, h_f, h_b):
        row_f = pl.multiple_of(t * B, B)
        row_b = pl.multiple_of((T - 1 - t) * B, B)
        hcat_scr[pl.ds(row_f, B), pl.ds(0, H)] = h_f.astype(hcat_scr.dtype)
        hcat_scr[pl.ds(row_b, B), pl.ds(H, H)] = h_b.astype(hcat_scr.dtype)

    # ---- t = 0 peeled: h == 0 so the recurrent matmuls are skipped entirely.
    gf0, gb0 = read_gx(0)
    zeros = jnp.zeros((B, H), jnp.float32)
    h_f, h_b, c_f, c_b = _cell(gf0, gb0, zeros, zeros, H)
    write_h(0, h_f, h_b)

    # ---- t = 1 .. T-1 : serial recurrence, carries kept as loop values (vregs).
    def step(t, carry):
        h_f, h_b, c_f, c_b = carry
        rec_f = jnp.dot(h_f.astype(jnp.bfloat16), w_hh_f,
                        preferred_element_type=jnp.float32)
        rec_b = jnp.dot(h_b.astype(jnp.bfloat16), w_hh_b,
                        preferred_element_type=jnp.float32)
        gf, gb = read_gx(t)
        h_f, h_b, c_f, c_b = _cell(gf + rec_f, gb + rec_b, c_f, c_b, H)
        write_h(t, h_f, h_b)
        return (h_f, h_b, c_f, c_b)

    unroll = True if T <= 16 else 4        # partial unroll for larger T
    jax.lax.fori_loop(1, T, step, (h_f, h_b, c_f, c_b), unroll=unroll)

    # ---- Fused FC + LogSoftmax on the VMEM-resident activations (last layer).
    if fuse_fc:
        logits = jnp.dot(hcat_scr[...].astype(jnp.bfloat16), fc_w_ref[...],
                         preferred_element_type=jnp.float32) + fc_b_ref[...]
        col = jax.lax.broadcasted_iota(jnp.int32, logits.shape, 1)
        logits = jnp.where(col < n_classes, logits, _MASK_VALUE)
        m = jnp.max(logits, axis=-1, keepdims=True)
        shifted = logits - m
        lse = jnp.log(jnp.sum(jnp.exp(shifted), axis=-1, keepdims=True))
        out_ref[...] = shifted - lse


# ----------------------------------------------------------------------------
# Wrapper around pallas_call
# ----------------------------------------------------------------------------
def bilstm_layer(x_2d, w_ih_cat, w_hh_f, w_hh_b, b_cat, *, T, B, H,
                 fc_w=None, fc_b=None, n_classes=0):
    """x_2d: (T*B, Fin) -> (T*B, 2H), or (T*B, Cp) log-probs when fc_w is given."""
    N, Fin = x_2d.shape
    assert N == T * B and B % 8 == 0, (N, T, B)
    fuse_fc = fc_w is not None
    out_cols = fc_w.shape[1] if fuse_fc else 2 * H

    inputs = [x_2d, w_ih_cat, w_hh_f, w_hh_b, b_cat]
    if fuse_fc:
        inputs += [fc_w, fc_b]
    in_specs = [pl.BlockSpec(a.shape, lambda i: (0, 0)) for a in inputs]

    scratch = [pltpu.VMEM((N, 8 * H), jnp.bfloat16)]        # hoisted gx (bf16)
    if fuse_fc:
        scratch.append(pltpu.VMEM((N, 2 * H), jnp.float32))  # hidden staging

    # VMEM budget sized from the actual buffers (x2 for pipeline buffers) + slack.
    def nbytes(a):
        return int(a.size) * a.dtype.itemsize
    total = 2 * sum(nbytes(a) for a in inputs)
    total += 2 * N * out_cols * 4
    total += N * 8 * H * 2 + (N * 2 * H * 4 if fuse_fc else 0)
    vmem_limit = min(int(1.5 * total) + (4 << 20), 96 * 1024 * 1024)

    kernel = functools.partial(_bilstm_layer_kernel, T=T, B=B, H=H,
                               n_classes=n_classes, fuse_fc=fuse_fc)
    return pl.pallas_call(
        kernel,
        out_shape=jax.ShapeDtypeStruct((N, out_cols), jnp.float32),
        grid=(1,),
        in_specs=in_specs,
        out_specs=pl.BlockSpec((N, out_cols), lambda i: (0, 0)),
        scratch_shapes=scratch,
        compiler_params=pltpu.CompilerParams(
            dimension_semantics=("arbitrary",),
            vmem_limit_bytes=vmem_limit),
    )(*inputs)


# ----------------------------------------------------------------------------
# Params (mirrors nn.LSTM / nn.Linear shapes; pre-transposed, direction-fused,
# bf16 weight storage). Internal gate order is [i, f, o, g].
# ----------------------------------------------------------------------------
def init_params(key, input_size, hidden_size, num_layers, num_classes):
    H = hidden_size
    params = {"lstm": []}
    k_lstm = 1.0 / (H ** 0.5)
    for layer in range(num_layers):
        in_dim = input_size if layer == 0 else 2 * H
        w_ih_dirs, w_hh_dirs, b_dirs = [], [], []
        for _ in range(2):  # forward, backward
            key, k1, k2, k3, k4 = jax.random.split(key, 5)
            w_ih = jax.random.uniform(k1, (4 * H, in_dim), minval=-k_lstm, maxval=k_lstm)
            w_hh = jax.random.uniform(k2, (4 * H, H), minval=-k_lstm, maxval=k_lstm)
            b_ih = jax.random.uniform(k3, (4 * H,), minval=-k_lstm, maxval=k_lstm)
            b_hh = jax.random.uniform(k4, (4 * H,), minval=-k_lstm, maxval=k_lstm)
            w_ih_dirs.append(w_ih.T)          # (in, 4H)
            w_hh_dirs.append(w_hh.T)          # (H, 4H)
            b_dirs.append(b_ih + b_hh)        # (4H,)
        params["lstm"].append({
            # bf16 weight storage (MXU operands); f32 biases / carries / gate math.
            "w_ih_cat": jnp.concatenate(w_ih_dirs, axis=1).astype(jnp.bfloat16),  # (in, 8H)
            "w_hh_f": w_hh_dirs[0].astype(jnp.bfloat16),                          # (H, 4H)
            "w_hh_b": w_hh_dirs[1].astype(jnp.bfloat16),                          # (H, 4H)
            "b_cat": jnp.concatenate(b_dirs).reshape(1, 8 * H).astype(jnp.float32),
        })

    k_fc = 1.0 / ((2 * H) ** 0.5)
    key, k1, k2 = jax.random.split(key, 3)
    w_fc = jax.random.uniform(k1, (num_classes, 2 * H), minval=-k_fc, maxval=k_fc)
    b_fc = jax.random.uniform(k2, (num_classes,), minval=-k_fc, maxval=k_fc)

    Cp = -(-num_classes // 128) * 128          # lane-dense class padding
    w_pad = jnp.zeros((2 * H, Cp), jnp.float32).at[:, :num_classes].set(w_fc.T)
    b_pad = jnp.zeros((1, Cp), jnp.float32).at[0, :num_classes].set(b_fc)
    params["fc_w_pad"] = w_pad.astype(jnp.bfloat16)   # (2H, Cp) bf16
    params["fc_b_pad"] = b_pad                        # (1, Cp) f32
    return params


# ----------------------------------------------------------------------------
# Full model
# ----------------------------------------------------------------------------
@functools.partial(jax.jit, static_argnames=("num_classes",))
def lstm_temporal_classification(params, x_btf, *, num_classes):
    """x_btf: (B, T, F) -> (B, T, num_classes) log-probabilities."""
    B, T, F = x_btf.shape
    Bp = ((B + 7) // 8) * 8            # pad batch to sublane granularity (rows of 8)
    x = x_btf.astype(jnp.float32)
    if Bp != B:
        x = jnp.pad(x, ((0, Bp - B), (0, 0), (0, 0)))
    # time-major rows: row = t*Bp + b
    h = jnp.transpose(x, (1, 0, 2)).reshape(T * Bp, F)

    n_layers = len(params["lstm"])
    for li, lp in enumerate(params["lstm"]):
        H = lp["w_hh_f"].shape[0]
        last = li == n_layers - 1
        h = bilstm_layer(
            h, lp["w_ih_cat"], lp["w_hh_f"], lp["w_hh_b"], lp["b_cat"],
            T=T, B=Bp, H=H,
            fc_w=params["fc_w_pad"] if last else None,
            fc_b=params["fc_b_pad"] if last else None,
            n_classes=num_classes)

    Cp = h.shape[1]
    out = h.reshape(T, Bp, Cp)[:, :B, :num_classes]   # drop batch & class padding
    return jnp.transpose(out, (1, 0, 2))              # (B, T, C)


# ----------------------------------------------------------------------------
# Pure-JAX f32 reference (same parameters / same gate order) for correctness
# ----------------------------------------------------------------------------
def _lstm_dir_ref(x_tbf, w_ih_t, w_hh_t, b, reverse):
    T, B, _ = x_tbf.shape
    H = w_hh_t.shape[0]
    h = jnp.zeros((B, H), jnp.float32)
    c = jnp.zeros((B, H), jnp.float32)
    outs = [None] * T
    order = range(T - 1, -1, -1) if reverse else range(T)
    for t in order:
        gates = x_tbf[t] @ w_ih_t + h @ w_hh_t + b
        i = jax.nn.sigmoid(gates[:, :H])
        f = jax.nn.sigmoid(gates[:, H:2 * H])
        o = jax.nn.sigmoid(gates[:, 2 * H:3 * H])
        g = jnp.tanh(gates[:, 3 * H:4 * H])
        c = f * c + i * g
        h = o * jnp.tanh(c)
        outs[t] = h
    return jnp.stack(outs, 0)


def reference_model(params, x_btf, num_classes):
    h = jnp.transpose(x_btf, (1, 0, 2)).astype(jnp.float32)   # (T, B, F)
    for lp in params["lstm"]:
        w_ih = lp["w_ih_cat"].astype(jnp.float32)
        w_hh_f = lp["w_hh_f"].astype(jnp.float32)
        w_hh_b = lp["w_hh_b"].astype(jnp.float32)
        b = lp["b_cat"]
        H = w_hh_f.shape[0]
        G = 4 * H
        fw = _lstm_dir_ref(h, w_ih[:, :G], w_hh_f, b[:, :G], False)
        bw = _lstm_dir_ref(h, w_ih[:, G:], w_hh_b, b[:, G:], True)
        h = jnp.concatenate([fw, bw], axis=-1)
    w_fc = params["fc_w_pad"].astype(jnp.float32)[:, :num_classes]
    b_fc = params["fc_b_pad"][:, :num_classes]
    logits = h @ w_fc + b_fc
    out = jax.nn.log_softmax(logits, axis=-1)
    return jnp.transpose(out, (1, 0, 2))


# ----------------------------------------------------------------------------
if __name__ == "__main__":
    # Small shapes consistent with the module: B=2, T=8, F=4 (input_size default),
    # hidden=128 (small but lane-aligned), 2 bidirectional layers, 109 classes.
    B, T, F = 2, 8, 4
    HIDDEN, LAYERS, CLASSES = 128, 2, 109

    key = jax.random.PRNGKey(0)
    key, pkey, xkey = jax.random.split(key, 3)
    params = init_params(pkey, F, HIDDEN, LAYERS, CLASSES)
    x = jax.random.normal(xkey, (B, T, F), dtype=jnp.float32)

    out = lstm_temporal_classification(params, x, num_classes=CLASSES)
    out = jax.block_until_ready(out)

    ref = reference_model(params, x, CLASSES)
    assert out.shape == (B, T, CLASSES), out.shape
    err = float(jnp.abs(out - ref).max())
    # Kernel uses bf16 MXU operands (x, h, gx, FC input) vs. the f32 reference,
    # so tolerances are loosened (documented deviation from PyTorch f32 LSTM).
    assert err < 2e-2, err
    # log-softmax rows should sum (in prob space) to ~1
    assert jnp.allclose(jnp.exp(out).sum(-1), 1.0, atol=1e-3)

    print("KERNEL_OK")
</pallas_src>

<mosaic_0001>
module attributes {stable_mosaic.version = 11 : i64} {
  func.func @_bilstm_layer_kernel(%arg0: i32, %arg1: memref<64x4xf32, #tpu.memory_space<vmem>>, %arg2: memref<4x1024xbf16, #tpu.memory_space<vmem>>, %arg3: memref<128x512xbf16, #tpu.memory_space<vmem>>, %arg4: memref<128x512xbf16, #tpu.memory_space<vmem>>, %arg5: memref<1x1024xf32, #tpu.memory_space<vmem>>, %arg6: memref<64x256xf32, #tpu.memory_space<vmem>>, %arg7: memref<64x1024xbf16, #tpu.memory_space<vmem>>) attributes {dimension_semantics = [#tpu.dimension_semantics<arbitrary>], iteration_bounds = array<i64: 1>, scalar_prefetch = 0 : i64, scratch_operands = 1 : i64, tpu.core_type = #tpu.core_type<tc>, window_params = [{pipeline_mode = #tpu.pipeline_mode<synchronous>, transform_indices = @transform_0, window_bounds = array<i64: 64, 4>}, {pipeline_mode = #tpu.pipeline_mode<synchronous>, transform_indices = @transform_1, window_bounds = array<i64: 4, 1024>}, {pipeline_mode = #tpu.pipeline_mode<synchronous>, transform_indices = @transform_2, window_bounds = array<i64: 128, 512>}, {pipeline_mode = #tpu.pipeline_mode<synchronous>, transform_indices = @transform_3, window_bounds = array<i64: 128, 512>}, {pipeline_mode = #tpu.pipeline_mode<synchronous>, transform_indices = @transform_4, window_bounds = array<i64: 1, 1024>}, {pipeline_mode = #tpu.pipeline_mode<synchronous>, transform_indices = @transform_5, window_bounds = array<i64: 64, 256>}]} {
    %c0 = arith.constant 0 : index
    %c0_0 = arith.constant 0 : index
    %0 = vector.load %arg1[%c0, %c0_0] : memref<64x4xf32, #tpu.memory_space<vmem>>, vector<64x4xf32>
    %1 = arith.truncf %0 : vector<64x4xf32> to vector<64x4xbf16>
    %c0_1 = arith.constant 0 : index
    %c0_2 = arith.constant 0 : index
    %2 = vector.load %arg2[%c0_1, %c0_2] : memref<4x1024xbf16, #tpu.memory_space<vmem>>, vector<4x1024xbf16>
    %cst = arith.constant dense<0.000000e+00> : vector<64x1024xf32>
    %3 = tpu.matmul %1, %2, %cst {dimension_numbers = #tpu.dot_dimension_numbers<[1], [0], [0], [1], [0, 0, 1, 1], [], []>} : vector<64x4xbf16>, vector<4x1024xbf16>, vector<64x1024xf32> -> vector<64x1024xf32>
    %c0_3 = arith.constant 0 : index
    %c0_4 = arith.constant 0 : index
    %4 = vector.load %arg5[%c0_3, %c0_4] : memref<1x1024xf32, #tpu.memory_space<vmem>>, vector<1x1024xf32>
    %5 = vector.broadcast %4 : vector<1x1024xf32> to vector<64x1024xf32>
    %6 = arith.addf %3, %5 : vector<64x1024xf32>
    %7 = arith.truncf %6 : vector<64x1024xf32> to vector<64x1024xbf16>
    %c0_5 = arith.constant 0 : index
    %c0_6 = arith.constant 0 : index
    %8 = vector.load %arg7[%c0_5, %c0_6] : memref<64x1024xbf16, #tpu.memory_space<vmem>>, vector<64x1024xbf16>
    tpu.vector_store %arg7[%c0_5, %c0_6], %7 {strides = array<i32>} : memref<64x1024xbf16, #tpu.memory_space<vmem>>, vector<64x1024xbf16>,
    %c0_7 = arith.constant 0 : index
    %c0_8 = arith.constant 0 : index
    %9 = vector.load %arg3[%c0_7, %c0_8] : memref<128x512xbf16, #tpu.memory_space<vmem>>, vector<128x512xbf16>
    %c0_9 = arith.constant 0 : index
    %c0_10 = arith.constant 0 : index
    %10 = vector.load %arg4[%c0_9, %c0_10] : memref<128x512xbf16, #tpu.memory_space<vmem>>, vector<128x512xbf16>
    %c0_i32 = arith.constant 0 : i32
    %11 = tpu.assume_multiple %c0_i32, 8 : i32
    %c56_i32 = arith.constant 56 : i32
    %12 = tpu.assume_multiple %c56_i32, 8 : i32
    %13 = arith.index_cast %11 : i32 to index
    %c0_11 = arith.constant 0 : index
    %14 = vector.load %arg7[%13, %c0_11] : memref<64x1024xbf16, #tpu.memory_space<vmem>>, vector<8x512xbf16>
    %15 = arith.extf %14 : vector<8x512xbf16> to vector<8x512xf32>
    %16 = arith.index_cast %12 : i32 to index
    %c512 = arith.constant 512 : index
    %17 = vector.load %arg7[%16, %c512] : memref<64x1024xbf16, #tpu.memory_space<vmem>>, vector<8x512xbf16>
    %18 = arith.extf %17 : vector<8x512xbf16> to vector<8x512xf32>
    %cst_12 = arith.constant 0.000000e+00 : f32
    %19 = vector.broadcast %cst_12 : f32 to vector<8x128xf32>
    %20 = vector.extract_strided_slice %15 {offsets = [0, 0], sizes = [8, 384], strides = [1, 1]} : vector<8x512xf32> to vector<8x384xf32>
    %cst_13 = arith.constant 5.000000e-01 : f32
    %21 = vector.broadcast %cst_13 : f32 to vector<8x384xf32>
    %22 = arith.mulf %21, %20 : vector<8x384xf32>
    %23 = math.tanh %22 : vector<8x384xf32>
    %cst_14 = arith.constant 5.000000e-01 : f32
    %24 = vector.broadcast %cst_14 : f32 to vector<8x384xf32>
    %25 = arith.mulf %24, %23 : vector<8x384xf32>
    %cst_15 = arith.constant 5.000000e-01 : f32
    %26 = vector.broadcast %cst_15 : f32 to vector<8x384xf32>
    %27 = arith.addf %25, %26 : vector<8x384xf32>
    %28 = vector.extract_strided_slice %15 {offsets = [0, 384], sizes = [8, 128], strides = [1, 1]} : vector<8x512xf32> to vector<8x128xf32>
    %29 = math.tanh %28 : vector<8x128xf32>
    %30 = vector.extract_strided_slice %27 {offsets = [0, 0], sizes = [8, 128], strides = [1, 1]} : vector<8x384xf32> to vector<8x128xf32>
    %31 = vector.extract_strided_slice %27 {offsets = [0, 128], sizes = [8, 128], strides = [1, 1]} : vector<8x384xf32> to vector<8x128xf32>
    %32 = vector.extract_strided_slice %27 {offsets = [0, 256], sizes = [8, 128], strides = [1, 1]} : vector<8x384xf32> to vector<8x128xf32>
    %33 = arith.mulf %31, %19 : vector<8x128xf32>
    %34 = arith.mulf %30, %29 : vector<8x128xf32>
    %35 = arith.addf %33, %34 : vector<8x128xf32>
    %36 = math.tanh %35 : vector<8x128xf32>
    %37 = arith.mulf %32, %36 : vector<8x128xf32>
    %38 = vector.extract_strided_slice %18 {offsets = [0, 0], sizes = [8, 384], strides = [1, 1]} : vector<8x512xf32> to vector<8x384xf32>
    %cst_16 = arith.constant 5.000000e-01 : f32
    %39 = vector.broadcast %cst_16 : f32 to vector<8x384xf32>
    %40 = arith.mulf %39, %38 : vector<8x384xf32>
    %41 = math.tanh %40 : vector<8x384xf32>
    %cst_17 = arith.constant 5.000000e-01 : f32
    %42 = vector.broadcast %cst_17 : f32 to vector<8x384xf32>
    %43 = arith.mulf %42, %41 : vector<8x384xf32>
    %cst_18 = arith.constant 5.000000e-01 : f32
    %44 = vector.broadcast %cst_18 : f32 to vector<8x384xf32>
    %45 = arith.addf %43, %44 : vector<8x384xf32>
    %46 = vector.extract_strided_slice %18 {offsets = [0, 384], sizes = [8, 128], strides = [1, 1]} : vector<8x512xf32> to vector<8x128xf32>
    %47 = math.tanh %46 : vector<8x128xf32>
    %48 = vector.extract_strided_slice %45 {offsets = [0, 0], sizes = [8, 128], strides = [1, 1]} : vector<8x384xf32> to vector<8x128xf32>
    %49 = vector.extract_strided_slice %45 {offsets = [0, 128], sizes = [8, 128], strides = [1, 1]} : vector<8x384xf32> to vector<8x128xf32>
    %50 = vector.extract_strided_slice %45 {offsets = [0, 256], sizes = [8, 128], strides = [1, 1]} : vector<8x384xf32> to vector<8x128xf32>
    %51 = arith.mulf %49, %19 : vector<8x128xf32>
    %52 = arith.mulf %48, %47 : vector<8x128xf32>
    %53 = arith.addf %51, %52 : vector<8x128xf32>
    %54 = math.tanh %53 : vector<8x128xf32>
    %55 = arith.mulf %50, %54 : vector<8x128xf32>
    %c0_i32_19 = arith.constant 0 : i32
    %56 = tpu.assume_multiple %c0_i32_19, 8 : i32
    %c56_i32_20 = arith.constant 56 : i32
    %57 = tpu.assume_multiple %c56_i32_20, 8 : i32
    %58 = arith.index_cast %56 : i32 to index
    %c0_21 = arith.constant 0 : index
    %59 = vector.load %arg6[%58, %c0_21] : memref<64x256xf32, #tpu.memory_space<vmem>>, vector<8x128xf32>
    tpu.vector_store %arg6[%58, %c0_21], %37 {strides = array<i32>} : memref<64x256xf32, #tpu.memory_space<vmem>>, vector<8x128xf32>,
    %60 = arith.index_cast %57 : i32 to index
    %c128 = arith.constant 128 : index
    %61 = vector.load %arg6[%60, %c128] : memref<64x256xf32, #tpu.memory_space<vmem>>, vector<8x128xf32>
    tpu.vector_store %arg6[%60, %c128], %55 {strides = array<i32>} : memref<64x256xf32, #tpu.memory_space<vmem>>, vector<8x128xf32>,
    %c1_i32 = arith.constant 1 : i32
    %62 = arith.truncf %37 : vector<8x128xf32> to vector<8x128xbf16>
    %cst_22 = arith.constant dense<0.000000e+00> : vector<8x512xf32>
    %63 = tpu.matmul %62, %9, %cst_22 {dimension_numbers = #tpu.dot_dimension_numbers<[1], [0], [0], [1], [0, 0, 1, 1], [], []>} : vector<8x128xbf16>, vector<128x512xbf16>, vector<8x512xf32> -> vector<8x512xf32>
    %64 = arith.truncf %55 : vector<8x128xf32> to vector<8x128xbf16>
    %cst_23 = arith.constant dense<0.000000e+00> : vector<8x512xf32>
    %65 = tpu.matmul %64, %10, %cst_23 {dimension_numbers = #tpu.dot_dimension_numbers<[1], [0], [0], [1], [0, 0, 1, 1], [], []>} : vector<8x128xbf16>, vector<128x512xbf16>, vector<8x512xf32> -> vector<8x512xf32>
    %c8_i32 = arith.constant 8 : i32
    %66 = arith.muli %c1_i32, %c8_i32 : i32
    %67 = tpu.assume_multiple %66, 8 : i32
    %c7_i32 = arith.constant 7 : i32
    %68 = arith.subi %c7_i32, %c1_i32 : i32
    %c8_i32_24 = arith.constant 8 : i32
    %69 = arith.muli %68, %c8_i32_24 : i32
    %70 = tpu.assume_multiple %69, 8 : i32
    %71 = arith.index_cast %67 : i32 to index
    %c0_25 = arith.constant 0 : index
    %72 = vector.load %arg7[%71, %c0_25] : memref<64x1024xbf16, #tpu.memory_space<vmem>>, vector<8x512xbf16>
    %73 = arith.extf %72 : vector<8x512xbf16> to vector<8x512xf32>
    %74 = arith.index_cast %70 : i32 to index
    %c512_26 = arith.constant 512 : index
    %75 = vector.load %arg7[%74, %c512_26] : memref<64x1024xbf16, #tpu.memory_space<vmem>>, vector<8x512xbf16>
    %76 = arith.extf %75 : vector<8x512xbf16> to vector<8x512xf32>
    %77 = arith.addf %73, %63 : vector<8x512xf32>
    %78 = arith.addf %76, %65 : vector<8x512xf32>
    %79 = vector.extract_strided_slice %77 {offsets = [0, 0], sizes = [8, 384], strides = [1, 1]} : vector<8x512xf32> to vector<8x384xf32>
    %cst_27 = arith.constant 5.000000e-01 : f32
    %80 = vector.broadcast %cst_27 : f32 to vector<8x384xf32>
    %81 = arith.mulf %80, %79 : vector<8x384xf32>
    %82 = math.tanh %81 : vector<8x384xf32>
    %cst_28 = arith.constant 5.000000e-01 : f32
    %83 = vector.broadcast %cst_28 : f32 to vector<8x384xf32>
    %84 = arith.mulf %83, %82 : vector<8x384xf32>
    %cst_29 = arith.constant 5.000000e-01 : f32
    %85 = vector.broadcast %cst_29 : f32 to vector<8x384xf32>
    %86 = arith.addf %84, %85 : vector<8x384xf32>
    %87 = vector.extract_strided_slice %77 {offsets = [0, 384], sizes = [8, 128], strides = [1, 1]} : vector<8x512xf32> to vector<8x128xf32>
    %88 = math.tanh %87 : vector<8x128xf32>
    %89 = vector.extract_strided_slice %86 {offsets = [0, 0], sizes = [8, 128], strides = [1, 1]} : vector<8x384xf32> to vector<8x128xf32>
    %90 = vector.extract_strided_slice %86 {offsets = [0, 128], sizes = [8, 128], strides = [1, 1]} : vector<8x384xf32> to vector<8x128xf32>
    %91 = vector.extract_strided_slice %86 {offsets = [0, 256], sizes = [8, 128], strides = [1, 1]} : vector<8x384xf32> to vector<8x128xf32>
    %92 = arith.mulf %90, %35 : vector<8x128xf32>
    %93 = arith.mulf %89, %88 : vector<8x128xf32>
    %94 = arith.addf %92, %93 : vector<8x128xf32>
    %95 = math.tanh %94 : vector<8x128xf32>
    %96 = arith.mulf %91, %95 : vector<8x128xf32>
    %97 = vector.extract_strided_slice %78 {offsets = [0, 0], sizes = [8, 384], strides = [1, 1]} : vector<8x512xf32> to vector<8x384xf32>
    %cst_30 = arith.constant 5.000000e-01 : f32
    %98 = vector.broadcast %cst_30 : f32 to vector<8x384xf32>
    %99 = arith.mulf %98, %97 : vector<8x384xf32>
    %100 = math.tanh %99 : vector<8x384xf32>
    %cst_31 = arith.constant 5.000000e-01 : f32
    %101 = vector.broadcast %cst_31 : f32 to vector<8x384xf32>
    %102 = arith.mulf %101, %100 : vector<8x384xf32>
    %cst_32 = arith.constant 5.000000e-01 : f32
    %103 = vector.broadcast %cst_32 : f32 to vector<8x384xf32>
    %104 = arith.addf %102, %103 : vector<8x384xf32>
    %105 = vector.extract_strided_slice %78 {offsets = [0, 384], sizes = [8, 128], strides = [1, 1]} : vector<8x512xf32> to vector<8x128xf32>
    %106 = math.tanh %105 : vector<8x128xf32>
    %107 = vector.extract_strided_slice %104 {offsets = [0, 0], sizes = [8, 128], strides = [1, 1]} : vector<8x384xf32> to vector<8x128xf32>
    %108 = vector.extract_strided_slice %104 {offsets = [0, 128], sizes = [8, 128], strides = [1, 1]} : vector<8x384xf32> to vector<8x128xf32>
    %109 = vector.extract_strided_slice %104 {offsets = [0, 256], sizes = [8, 128], strides = [1, 1]} : vector<8x384xf32> to vector<8x128xf32>
    %110 = arith.mulf %108, %53 : vector<8x128xf32>
    %111 = arith.mulf %107, %106 : vector<8x128xf32>
    %112 = arith.addf %110, %111 : vector<8x128xf32>
    %113 = math.tanh %112 : vector<8x128xf32>
    %114 = arith.mulf %109, %113 : vector<8x128xf32>
    %c8_i32_33 = arith.constant 8 : i32
    %115 = arith.muli %c1_i32, %c8_i32_33 : i32
    %116 = tpu.assume_multiple %115, 8 : i32
    %c7_i32_34 = arith.constant 7 : i32
    %117 = arith.subi %c7_i32_34, %c1_i32 : i32
    %c8_i32_35 = arith.constant 8 : i32
    %118 = arith.muli %117, %c8_i32_35 : i32
    %119 = tpu.assume_multiple %118, 8 : i32
    %120 = arith.index_cast %116 : i32 to index
    %c0_36 = arith.constant 0 : index
    %121 = vector.load %arg6[%120, %c0_36] : memref<64x256xf32, #tpu.memory_space<vmem>>, vector<8x128xf32>
    tpu.vector_store %arg6[%120, %c0_36], %96 {strides = array<i32>} : memref<64x256xf32, #tpu.memory_space<vmem>>, vector<8x128xf32>,
    %122 = arith.index_cast %119 : i32 to index
    %c128_37 = arith.constant 128 : index
    %123 = vector.load %arg6[%122, %c128_37] : memref<64x256xf32, #tpu.memory_space<vmem>>, vector<8x128xf32>
    tpu.vector_store %arg6[%122, %c128_37], %114 {strides = array<i32>} : memref<64x256xf32, #tpu.memory_space<vmem>>, vector<8x128xf32>,
    %c2_i32 = arith.constant 2 : i32
    %124 = arith.truncf %96 : vector<8x128xf32> to vector<8x128xbf16>
    %cst_38 = arith.constant dense<0.000000e+00> : vector<8x512xf32>
    %125 = tpu.matmul %124, %9, %cst_38 {dimension_numbers = #tpu.dot_dimension_numbers<[1], [0], [0], [1], [0, 0, 1, 1], [], []>} : vector<8x128xbf16>, vector<128x512xbf16>, vector<8x512xf32> -> vector<8x512xf32>
    %126 = arith.truncf %114 : vector<8x128xf32> to vector<8x128xbf16>
    %cst_39 = arith.constant dense<0.000000e+00> : vector<8x512xf32>
    %127 = tpu.matmul %126, %10, %cst_39 {dimension_numbers = #tpu.dot_dimension_numbers<[1], [0], [0], [1], [0, 0, 1, 1], [], []>} : vector<8x128xbf16>, vector<128x512xbf16>, vector<8x512xf32> -> vector<8x512xf32>
    %c8_i32_40 = arith.constant 8 : i32
    %128 = arith.muli %c2_i32, %c8_i32_40 : i32
    %129 = tpu.assume_multiple %128, 8 : i32
    %c7_i32_41 = arith.constant 7 : i32
    %130 = arith.subi %c7_i32_41, %c2_i32 : i32
    %c8_i32_42 = arith.constant 8 : i32
    %131 = arith.muli %130, %c8_i32_42 : i32
    %132 = tpu.assume_multiple %131, 8 : i32
    %133 = arith.index_cast %129 : i32 to index
    %c0_43 = arith.constant 0 : index
    %134 = vector.load %arg7[%133, %c0_43] : memref<64x1024xbf16, #tpu.memory_space<vmem>>, vector<8x512xbf16>
    %135 = arith.extf %134 : vector<8x512xbf16> to vector<8x512xf32>
    %136 = arith.index_cast %132 : i32 to index
    %c512_44 = arith.constant 512 : index
    %137 = vector.load %arg7[%136, %c512_44] : memref<64x1024xbf16, #tpu.memory_space<vmem>>, vector<8x512xbf16>
    %138 = arith.extf %137 : vector<8x512xbf16> to vector<8x512xf32>
    %139 = arith.addf %135, %125 : vector<8x512xf32>
    %140 = arith.addf %138, %127 : vector<8x512xf32>
    %141 = vector.extract_strided_slice %139 {offsets = [0, 0], sizes = [8, 384], strides = [1, 1]} : vector<8x512xf32> to vector<8x384xf32>
    %cst_45 = arith.constant 5.000000e-01 : f32
    %142 = vector.broadcast %cst_45 : f32 to vector<8x384xf32>
    %143 = arith.mulf %142, %141 : vector<8x384xf32>
    %144 = math.tanh %143 : vector<8x384xf32>
    %cst_46 = arith.constant 5.000000e-01 : f32
    %145 = vector.broadcast %cst_46 : f32 to vector<8x384xf32>
    %146 = arith.mulf %145, %144 : vector<8x384xf32>
    %cst_47 = arith.constant 5.000000e-01 : f32
    %147 = vector.broadcast %cst_47 : f32 to vector<8x384xf32>
    %148 = arith.addf %146, %147 : vector<8x384xf32>
    %149 = vector.extract_strided_slice %139 {offsets = [0, 384], sizes = [8, 128], strides = [1, 1]} : vector<8x512xf32> to vector<8x128xf32>
    %150 = math.tanh %149 : vector<8x128xf32>
    %151 = vector.extract_strided_slice %148 {offsets = [0, 0], sizes = [8, 128], strides = [1, 1]} : vector<8x384xf32> to vector<8x128xf32>
    %152 = vector.extract_strided_slice %148 {offsets = [0, 128], sizes = [8, 128], strides = [1, 1]} : vector<8x384xf32> to vector<8x128xf32>
    %153 = vector.extract_strided_slice %148 {offsets = [0, 256], sizes = [8, 128], strides = [1, 1]} : vector<8x384xf32> to vector<8x128xf32>
    %154 = arith.mulf %152, %94 : vector<8x128xf32>
    %155 = arith.mulf %151, %150 : vector<8x128xf32>
    %156 = arith.addf %154, %155 : vector<8x128xf32>
    %157 = math.tanh %156 : vector<8x128xf32>
    %158 = arith.mulf %153, %157 : vector<8x128xf32>
    %159 = vector.extract_strided_slice %140 {offsets = [0, 0], sizes = [8, 384], strides = [1, 1]} : vector<8x512xf32> to vector<8x384xf32>
    %cst_48 = arith.constant 5.000000e-01 : f32
    %160 = vector.broadcast %cst_48 : f32 to vector<8x384xf32>
    %161 = arith.mulf %160, %159 : vector<8x384xf32>
    %162 = math.tanh %161 : vector<8x384xf32>
    %cst_49 = arith.constant 5.000000e-01 : f32
    %163 = vector.broadcast %cst_49 : f32 to vector<8x384xf32>
    %164 = arith.mulf %163, %162 : vector<8x384xf32>
    %cst_50 = arith.constant 5.000000e-01 : f32
    %165 = vector.broadcast %cst_50 : f32 to vector<8x384xf32>
    %166 = arith.addf %164, %165 : vector<8x384xf32>
    %167 = vector.extract_strided_slice %140 {offsets = [0, 384], sizes = [8, 128], strides = [1, 1]} : vector<8x512xf32> to vector<8x128xf32>
    %168 = math.tanh %167 : vector<8x128xf32>
    %169 = vector.extract_strided_slice %166 {offsets = [0, 0], sizes = [8, 128], strides = [1, 1]} : vector<8x384xf32> to vector<8x128xf32>
    %170 = vector.extract_strided_slice %166 {offsets = [0, 128], sizes = [8, 128], strides = [1, 1]} : vector<8x384xf32> to vector<8x128xf32>
    %171 = vector.extract_strided_slice %166 {offsets = [0, 256], sizes = [8, 128], strides = [1, 1]} : vector<8x384xf32> to vector<8x128xf32>
    %172 = arith.mulf %170, %112 : vector<8x128xf32>
    %173 = arith.mulf %169, %168 : vector<8x128xf32>
    %174 = arith.addf %172, %173 : vector<8x128xf32>
    %175 = math.tanh %174 : vector<8x128xf32>
    %176 = arith.mulf %171, %175 : vector<8x128xf32>
    %c8_i32_51 = arith.constant 8 : i32
    %177 = arith.muli %c2_i32, %c8_i32_51 : i32
    %178 = tpu.assume_multiple %177, 8 : i32
    %c7_i32_52 = arith.constant 7 : i32
    %179 = arith.subi %c7_i32_52, %c2_i32 : i32
    %c8_i32_53 = arith.constant 8 : i32
    %180 = arith.muli %179, %c8_i32_53 : i32
    %181 = tpu.assume_multiple %180, 8 : i32
    %182 = arith.index_cast %178 : i32 to index
    %c0_54 = arith.constant 0 : index
    %183 = vector.load %arg6[%182, %c0_54] : memref<64x256xf32, #tpu.memory_space<vmem>>, vector<8x128xf32>
    tpu.vector_store %arg6[%182, %c0_54], %158 {strides = array<i32>} : memref<64x256xf32, #tpu.memory_space<vmem>>, vector<8x128xf32>,
    %184 = arith.index_cast %181 : i32 to index
    %c128_55 = arith.constant 128 : index
    %185 = vector.load %arg6[%184, %c128_55] : memref<64x256xf32, #tpu.memory_space<vmem>>, vector<8x128xf32>
    tpu.vector_store %arg6[%184, %c128_55], %176 {strides = array<i32>} : memref<64x256xf32, #tpu.memory_space<vmem>>, vector<8x128xf32>,
    %c3_i32 = arith.constant 3 : i32
    %186 = arith.truncf %158 : vector<8x128xf32> to vector<8x128xbf16>
    %cst_56 = arith.constant dense<0.000000e+00> : vector<8x512xf32>
    %187 = tpu.matmul %186, %9, %cst_56 {dimension_numbers = #tpu.dot_dimension_numbers<[1], [0], [0], [1], [0, 0, 1, 1], [], []>} : vector<8x128xbf16>, vector<128x512xbf16>, vector<8x512xf32> -> vector<8x512xf32>
    %188 = arith.truncf %176 : vector<8x128xf32> to vector<8x128xbf16>
    %cst_57 = arith.constant dense<0.000000e+00> : vector<8x512xf32>
    %189 = tpu.matmul %188, %10, %cst_57 {dimension_numbers = #tpu.dot_dimension_numbers<[1], [0], [0], [1], [0, 0, 1, 1], [], []>} : vector<8x128xbf16>, vector<128x512xbf16>, vector<8x512xf32> -> vector<8x512xf32>
    %c8_i32_58 = arith.constant 8 : i32
    %190 = arith.muli %c3_i32, %c8_i32_58 : i32
    %191 = tpu.assume_multiple %190, 8 : i32
    %c7_i32_59 = arith.constant 7 : i32
    %192 = arith.subi %c7_i32_59, %c3_i32 : i32
    %c8_i32_60 = arith.constant 8 : i32
    %193 = arith.muli %192, %c8_i32_60 : i32
    %194 = tpu.assume_multiple %193, 8 : i32
    %195 = arith.index_cast %191 : i32 to index
    %c0_61 = arith.constant 0 : index
    %196 = vector.load %arg7[%195, %c0_61] : memref<64x1024xbf16, #tpu.memory_space<vmem>>, vector<8x512xbf16>
    %197 = arith.extf %196 : vector<8x512xbf16> to vector<8x512xf32>
    %198 = arith.index_cast %194 : i32 to index
    %c512_62 = arith.constant 512 : index
    %199 = vector.load %arg7[%198, %c512_62] : memref<64x1024xbf16, #tpu.memory_space<vmem>>, vector<8x512xbf16>
    %200 = arith.extf %199 : vector<8x512xbf16> to vector<8x512xf32>
    %201 = arith.addf %197, %187 : vector<8x512xf32>
    %202 = arith.addf %200, %189 : vector<8x512xf32>
    %203 = vector.extract_strided_slice %201 {offsets = [0, 0], sizes = [8, 384], strides = [1, 1]} : vector<8x512xf32> to vector<8x384xf32>
    %cst_63 = arith.constant 5.000000e-01 : f32
    %204 = vector.broadcast %cst_63 : f32 to vector<8x384xf32>
    %205 = arith.mulf %204, %203 : vector<8x384xf32>
    %206 = math.tanh %205 : vector<8x384xf32>
    %cst_64 = arith.constant 5.000000e-01 : f32
    %207 = vector.broadcast %cst_64 : f32 to vector<8x384xf32>
    %208 = arith.mulf %207, %206 : vector<8x384xf32>
    %cst_65 = arith.constant 5.000000e-01 : f32
    %209 = vector.broadcast %cst_65 : f32 to vector<8x384xf32>
    %210 = arith.addf %208, %209 : vector<8x384xf32>
    %211 = vector.extract_strided_slice %201 {offsets = [0, 384], sizes = [8, 128], strides = [1, 1]} : vector<8x512xf32> to vector<8x128xf32>
    %212 = math.tanh %211 : vector<8x128xf32>
    %213 = vector.extract_strided_slice %210 {offsets = [0, 0], sizes = [8, 128], strides = [1, 1]} : vector<8x384xf32> to vector<8x128xf32>
    %214 = vector.extract_strided_slice %210 {offsets = [0, 128], sizes = [8, 128], strides = [1, 1]} : vector<8x384xf32> to vector<8x128xf32>
    %215 = vector.extract_strided_slice %210 {offsets = [0, 256], sizes = [8, 128], strides = [1, 1]} : vector<8x384xf32> to vector<8x128xf32>
    %216 = arith.mulf %214, %156 : vector<8x128xf32>
    %217 = arith.mulf %213, %212 : vector<8x128xf32>
    %218 = arith.addf %216, %217 : vector<8x128xf32>
    %219 = math.tanh %218 : vector<8x128xf32>
    %220 = arith.mulf %215, %219 : vector<8x128xf32>
    %221 = vector.extract_strided_slice %202 {offsets = [0, 0], sizes = [8, 384], strides = [1, 1]} : vector<8x512xf32> to vector<8x384xf32>
    %cst_66 = arith.constant 5.000000e-01 : f32
    %222 = vector.broadcast %cst_66 : f32 to vector<8x384xf32>
    %223 = arith.mulf %222, %221 : vector<8x384xf32>
    %224 = math.tanh %223 : vector<8x384xf32>
    %cst_67 = arith.constant 5.000000e-01 : f32
    %225 = vector.broadcast %cst_67 : f32 to vector<8x384xf32>
    %226 = arith.mulf %225, %224 : vector<8x384xf32>
    %cst_68 = arith.constant 5.000000e-01 : f32
    %227 = vector.broadcast %cst_68 : f32 to vector<8x384xf32>
    %228 = arith.addf %226, %227 : vector<8x384xf32>
    %229 = vector.extract_strided_slice %202 {offsets = [0, 384], sizes = [8, 128], strides = [1, 1]} : vector<8x512xf32> to vector<8x128xf32>
    %230 = math.tanh %229 : vector<8x128xf32>
    %231 = vector.extract_strided_slice %228 {offsets = [0, 0], sizes = [8, 128], strides = [1, 1]} : vector<8x384xf32> to vector<8x128xf32>
    %232 = vector.extract_strided_slice %228 {offsets = [0, 128], sizes = [8, 128], strides = [1, 1]} : vector<8x384xf32> to vector<8x128xf32>
    %233 = vector.extract_strided_slice %228 {offsets = [0, 256], sizes = [8, 128], strides = [1, 1]} : vector<8x384xf32> to vector<8x128xf32>
    %234 = arith.mulf %232, %174 : vector<8x128xf32>
    %235 = arith.mulf %231, %230 : vector<8x128xf32>
    %236 = arith.addf %234, %235 : vector<8x128xf32>
    %237 = math.tanh %236 : vector<8x128xf32>
    %238 = arith.mulf %233, %237 : vector<8x128xf32>
    %c8_i32_69 = arith.constant 8 : i32
    %239 = arith.muli %c3_i32, %c8_i32_69 : i32
    %240 = tpu.assume_multiple %239, 8 : i32
    %c7_i32_70 = arith.constant 7 : i32
    %241 = arith.subi %c7_i32_70, %c3_i32 : i32
    %c8_i32_71 = arith.constant 8 : i32
    %242 = arith.muli %241, %c8_i32_71 : i32
    %243 = tpu.assume_multiple %242, 8 : i32
    %244 = arith.index_cast %240 : i32 to index
    %c0_72 = arith.constant 0 : index
    %245 = vector.load %arg6[%244, %c0_72] : memref<64x256xf32, #tpu.memory_space<vmem>>, vector<8x128xf32>
    tpu.vector_store %arg6[%244, %c0_72], %220 {strides = array<i32>} : memref<64x256xf32, #tpu.memory_space<vmem>>, vector<8x128xf32>,
    %246 = arith.index_cast %243 : i32 to index
    %c128_73 = arith.constant 128 : index
    %247 = vector.load %arg6[%246, %c128_73] : memref<64x256xf32, #tpu.memory_space<vmem>>, vector<8x128xf32>
    tpu.vector_store %arg6[%246, %c128_73], %238 {strides = array<i32>} : memref<64x256xf32, #tpu.memory_space<vmem>>, vector<8x128xf32>,
    %c4_i32 = arith.constant 4 : i32
    %248 = arith.truncf %220 : vector<8x128xf32> to vector<8x128xbf16>
    %cst_74 = arith.constant dense<0.000000e+00> : vector<8x512xf32>
    %249 = tpu.matmul %248, %9, %cst_74 {dimension_numbers = #tpu.dot_dimension_numbers<[1], [0], [0], [1], [0, 0, 1, 1], [], []>} : vector<8x128xbf16>, vector<128x512xbf16>, vector<8x512xf32> -> vector<8x512xf32>
    %250 = arith.truncf %238 : vector<8x128xf32> to vector<8x128xbf16>
    %cst_75 = arith.constant dense<0.000000e+00> : vector<8x512xf32>
    %251 = tpu.matmul %250, %10, %cst_75 {dimension_numbers = #tpu.dot_dimension_numbers<[1], [0], [0], [1], [0, 0, 1, 1], [], []>} : vector<8x128xbf16>, vector<128x512xbf16>, vector<8x512xf32> -> vector<8x512xf32>
    %c8_i32_76 = arith.constant 8 : i32
    %252 = arith.muli %c4_i32, %c8_i32_76 : i32
    %253 = tpu.assume_multiple %252, 8 : i32
    %c7_i32_77 = arith.constant 7 : i32
    %254 = arith.subi %c7_i32_77, %c4_i32 : i32
    %c8_i32_78 = arith.constant 8 : i32
    %255 = arith.muli %254, %c8_i32_78 : i32
    %256 = tpu.assume_multiple %255, 8 : i32
    %257 = arith.index_cast %253 : i32 to index
    %c0_79 = arith.constant 0 : index
    %258 = vector.load %arg7[%257, %c0_79] : memref<64x1024xbf16, #tpu.memory_space<vmem>>, vector<8x512xbf16>
    %259 = arith.extf %258 : vector<8x512xbf16> to vector<8x512xf32>
    %260 = arith.index_cast %256 : i32 to index
    %c512_80 = arith.constant 512 : index
    %261 = vector.load %arg7[%260, %c512_80] : memref<64x1024xbf16, #tpu.memory_space<vmem>>, vector<8x512xbf16>
    %262 = arith.extf %261 : vector<8x512xbf16> to vector<8x512xf32>
    %263 = arith.addf %259, %249 : vector<8x512xf32>
    %264 = arith.addf %262, %251 : vector<8x512xf32>
    %265 = vector.extract_strided_slice %263 {offsets = [0, 0], sizes = [8, 384], strides = [1, 1]} : vector<8x512xf32> to vector<8x384xf32>
    %cst_81 = arith.constant 5.000000e-01 : f32
    %266 = vector.broadcast %cst_81 : f32 to vector<8x384xf32>
    %267 = arith.mulf %266, %265 : vector<8x384xf32>
    %268 = math.tanh %267 : vector<8x384xf32>
    %cst_82 = arith.constant 5.000000e-01 : f32
    %269 = vector.broadcast %cst_82 : f32 to vector<8x384xf32>
    %270 = arith.mulf %269, %268 : vector<8x384xf32>
    %cst_83 = arith.constant 5.000000e-01 : f32
    %271 = vector.broadcast %cst_83 : f32 to vector<8x384xf32>
    %272 = arith.addf %270, %271 : vector<8x384xf32>
    %273 = vector.extract_strided_slice %263 {offsets = [0, 384], sizes = [8, 128], strides = [1, 1]} : vector<8x512xf32> to vector<8x128xf32>
    %274 = math.tanh %273 : vector<8x128xf32>
    %275 = vector.extract_strided_slice %272 {offsets = [0, 0], sizes = [8, 128], strides = [1, 1]} : vector<8x384xf32> to vector<8x128xf32>
    %276 = vector.extract_strided_slice %272 {offsets = [0, 128], sizes = [8, 128], strides = [1, 1]} : vector<8x384xf32> to vector<8x128xf32>
    %277 = vector.extract_strided_slice %272 {offsets = [0, 256], sizes = [8, 128], strides = [1, 1]} : vector<8x384xf32> to vector<8x128xf32>
    %278 = arith.mulf %276, %218 : vector<8x128xf32>
    %279 = arith.mulf %275, %274 : vector<8x128xf32>
    %280 = arith.addf %278, %279 : vector<8x128xf32>
    %281 = math.tanh %280 : vector<8x128xf32>
    %282 = arith.mulf %277, %281 : vector<8x128xf32>
    %283 = vector.extract_strided_slice %264 {offsets = [0, 0], sizes = [8, 384], strides = [1, 1]} : vector<8x512xf32> to vector<8x384xf32>
    %cst_84 = arith.constant 5.000000e-01 : f32
    %284 = vector.broadcast %cst_84 : f32 to vector<8x384xf32>
    %285 = arith.mulf %284, %283 : vector<8x384xf32>
    %286 = math.tanh %285 : vector<8x384xf32>
    %cst_85 = arith.constant 5.000000e-01 : f32
    %287 = vector.broadcast %cst_85 : f32 to vector<8x384xf32>
    %288 = arith.mulf %287, %286 : vector<8x384xf32>
    %cst_86 = arith.constant 5.000000e-01 : f32
    %289 = vector.broadcast %cst_86 : f32 to vector<8x384xf32>
    %290 = arith.addf %288, %289 : vector<8x384xf32>
    %291 = vector.extract_strided_slice %264 {offsets = [0, 384], sizes = [8, 128], strides = [1, 1]} : vector<8x512xf32> to vector<8x128xf32>
    %292 = math.tanh %291 : vector<8x128xf32>
    %293 = vector.extract_strided_slice %290 {offsets = [0, 0], sizes = [8, 128], strides = [1, 1]} : vector<8x384xf32> to vector<8x128xf32>
    %294 = vector.extract_strided_slice %290 {offsets = [0, 128], sizes = [8, 128], strides = [1, 1]} : vector<8x384xf32> to vector<8x128xf32>
    %295 = vector.extract_strided_slice %290 {offsets = [0, 256], sizes = [8, 128], strides = [1, 1]} : vector<8x384xf32> to vector<8x128xf32>
    %296 = arith.mulf %294, %236 : vector<8x128xf32>
    %297 = arith.mulf %293, %292 : vector<8x128xf32>
    %298 = arith.addf %296, %297 : vector<8x128xf32>
    %299 = math.tanh %298 : vector<8x128xf32>
    %300 = arith.mulf %295, %299 : vector<8x128xf32>
    %c8_i32_87 = arith.constant 8 : i32
    %301 = arith.muli %c4_i32, %c8_i32_87 : i32
    %302 = tpu.assume_multiple %301, 8 : i32
    %c7_i32_88 = arith.constant 7 : i32
    %303 = arith.subi %c7_i32_88, %c4_i32 : i32
    %c8_i32_89 = arith.constant 8 : i32
    %304 = arith.muli %303, %c8_i32_89 : i32
    %305 = tpu.assume_multiple %304, 8 : i32
    %306 = arith.index_cast %302 : i32 to index
    %c0_90 = arith.constant 0 : index
    %307 = vector.load %arg6[%306, %c0_90] : memref<64x256xf32, #tpu.memory_space<vmem>>, vector<8x128xf32>
    tpu.vector_store %arg6[%306, %c0_90], %282 {strides = array<i32>} : memref<64x256xf32, #tpu.memory_space<vmem>>, vector<8x128xf32>,
    %308 = arith.index_cast %305 : i32 to index
    %c128_91 = arith.constant 128 : index
    %309 = vector.load %arg6[%308, %c128_91] : memref<64x256xf32, #tpu.memory_space<vmem>>, vector<8x128xf32>
    tpu.vector_store %arg6[%308, %c128_91], %300 {strides = array<i32>} : memref<64x256xf32, #tpu.memory_space<vmem>>, vector<8x128xf32>,
    %c5_i32 = arith.constant 5 : i32
    %310 = arith.truncf %282 : vector<8x128xf32> to vector<8x128xbf16>
    %cst_92 = arith.constant dense<0.000000e+00> : vector<8x512xf32>
    %311 = tpu.matmul %310, %9, %cst_92 {dimension_numbers = #tpu.dot_dimension_numbers<[1], [0], [0], [1], [0, 0, 1, 1], [], []>} : vector<8x128xbf16>, vector<128x512xbf16>, vector<8x512xf32> -> vector<8x512xf32>
    %312 = arith.truncf %300 : vector<8x128xf32> to vector<8x128xbf16>
    %cst_93 = arith.constant dense<0.000000e+00> : vector<8x512xf32>
    %313 = tpu.matmul %312, %10, %cst_93 {dimension_numbers = #tpu.dot_dimension_numbers<[1], [0], [0], [1], [0, 0, 1, 1], [], []>} : vector<8x128xbf16>, vector<128x512xbf16>, vector<8x512xf32> -> vector<8x512xf32>
    %c8_i32_94 = arith.constant 8 : i32
    %314 = arith.muli %c5_i32, %c8_i32_94 : i32
    %315 = tpu.assume_multiple %314, 8 : i32
    %c7_i32_95 = arith.constant 7 : i32
    %316 = arith.subi %c7_i32_95, %c5_i32 : i32
    %c8_i32_96 = arith.constant 8 : i32
    %317 = arith.muli %316, %c8_i32_96 : i32
    %318 = tpu.assume_multiple %317, 8 : i32
    %319 = arith.index_cast %315 : i32 to index
    %c0_97 = arith.constant 0 : index
    %320 = vector.load %arg7[%319, %c0_97] : memref<64x1024xbf16, #tpu.memory_space<vmem>>, vector<8x512xbf16>
    %321 = arith.extf %320 : vector<8x512xbf16> to vector<8x512xf32>
    %322 = arith.index_cast %318 : i32 to index
    %c512_98 = arith.constant 512 : index
    %323 = vector.load %arg7[%322, %c512_98] : memref<64x1024xbf16, #tpu.memory_space<vmem>>, vector<8x512xbf16>
    %324 = arith.extf %323 : vector<8x512xbf16> to vector<8x512xf32>
    %325 = arith.addf %321, %311 : vector<8x512xf32>
    %326 = arith.addf %324, %313 : vector<8x512xf32>
    %327 = vector.extract_strided_slice %325 {offsets = [0, 0], sizes = [8, 384], strides = [1, 1]} : vector<8x512xf32> to vector<8x384xf32>
    %cst_99 = arith.constant 5.000000e-01 : f32
    %328 = vector.broadcast %cst_99 : f32 to vector<8x384xf32>
    %329 = arith.mulf %328, %327 : vector<8x384xf32>
    %330 = math.tanh %329 : vector<8x384xf32>
    %cst_100 = arith.constant 5.000000e-01 : f32
    %331 = vector.broadcast %cst_100 : f32 to vector<8x384xf32>
    %332 = arith.mulf %331, %330 : vector<8x384xf32>
    %cst_101 = arith.constant 5.000000e-01 : f32
    %333 = vector.broadcast %cst_101 : f32 to vector<8x384xf32>
    %334 = arith.addf %332, %333 : vector<8x384xf32>
    %335 = vector.extract_strided_slice %325 {offsets = [0, 384], sizes = [8, 128], strides = [1, 1]} : vector<8x512xf32> to vector<8x128xf32>
    %336 = math.tanh %335 : vector<8x128xf32>
    %337 = vector.extract_strided_slice %334 {offsets = [0, 0], sizes = [8, 128], strides = [1, 1]} : vector<8x384xf32> to vector<8x128xf32>
    %338 = vector.extract_strided_slice %334 {offsets = [0, 128], sizes = [8, 128], strides = [1, 1]} : vector<8x384xf32> to vector<8x128xf32>
    %339 = vector.extract_strided_slice %334 {offsets = [0, 256], sizes = [8, 128], strides = [1, 1]} : vector<8x384xf32> to vector<8x128xf32>
    %340 = arith.mulf %338, %280 : vector<8x128xf32>
    %341 = arith.mulf %337, %336 : vector<8x128xf32>
    %342 = arith.addf %340, %341 : vector<8x128xf32>
    %343 = math.tanh %342 : vector<8x128xf32>
    %344 = arith.mulf %339, %343 : vector<8x128xf32>
    %345 = vector.extract_strided_slice %326 {offsets = [0, 0], sizes = [8, 384], strides = [1, 1]} : vector<8x512xf32> to vector<8x384xf32>
    %cst_102 = arith.constant 5.000000e-01 : f32
    %346 = vector.broadcast %cst_102 : f32 to vector<8x384xf32>
    %347 = arith.mulf %346, %345 : vector<8x384xf32>
    %348 = math.tanh %347 : vector<8x384xf32>
    %cst_103 = arith.constant 5.000000e-01 : f32
    %349 = vector.broadcast %cst_103 : f32 to vector<8x384xf32>
    %350 = arith.mulf %349, %348 : vector<8x384xf32>
    %cst_104 = arith.constant 5.000000e-01 : f32
    %351 = vector.broadcast %cst_104 : f32 to vector<8x384xf32>
    %352 = arith.addf %350, %351 : vector<8x384xf32>
    %353 = vector.extract_strided_slice %326 {offsets = [0, 384], sizes = [8, 128], strides = [1, 1]} : vector<8x512xf32> to vector<8x128xf32>
    %354 = math.tanh %353 : vector<8x128xf32>
    %355 = vector.extract_strided_slice %352 {offsets = [0, 0], sizes = [8, 128], strides = [1, 1]} : vector<8x384xf32> to vector<8x128xf32>
    %356 = vector.extract_strided_slice %352 {offsets = [0, 128], sizes = [8, 128], strides = [1, 1]} : vector<8x384xf32> to vector<8x128xf32>
    %357 = vector.extract_strided_slice %352 {offsets = [0, 256], sizes = [8, 128], strides = [1, 1]} : vector<8x384xf32> to vector<8x128xf32>
    %358 = arith.mulf %356, %298 : vector<8x128xf32>
    %359 = arith.mulf %355, %354 : vector<8x128xf32>
    %360 = arith.addf %358, %359 : vector<8x128xf32>
    %361 = math.tanh %360 : vector<8x128xf32>
    %362 = arith.mulf %357, %361 : vector<8x128xf32>
    %c8_i32_105 = arith.constant 8 : i32
    %363 = arith.muli %c5_i32, %c8_i32_105 : i32
    %364 = tpu.assume_multiple %363, 8 : i32
    %c7_i32_106 = arith.constant 7 : i32
    %365 = arith.subi %c7_i32_106, %c5_i32 : i32
    %c8_i32_107 = arith.constant 8 : i32
    %366 = arith.muli %365, %c8_i32_107 : i32
    %367 = tpu.assume_multiple %366, 8 : i32
    %368 = arith.index_cast %364 : i32 to index
    %c0_108 = arith.constant 0 : index
    %369 = vector.load %arg6[%368, %c0_108] : memref<64x256xf32, #tpu.memory_space<vmem>>, vector<8x128xf32>
    tpu.vector_store %arg6[%368, %c0_108], %344 {strides = array<i32>} : memref<64x256xf32, #tpu.memory_space<vmem>>, vector<8x128xf32>,
    %370 = arith.index_cast %367 : i32 to index
    %c128_109 = arith.constant 128 : index
    %371 = vector.load %arg6[%370, %c128_109] : memref<64x256xf32, #tpu.memory_space<vmem>>, vector<8x128xf32>
    tpu.vector_store %arg6[%370, %c128_109], %362 {strides = array<i32>} : memref<64x256xf32, #tpu.memory_space<vmem>>, vector<8x128xf32>,
    %c6_i32 = arith.constant 6 : i32
    %372 = arith.truncf %344 : vector<8x128xf32> to vector<8x128xbf16>
    %cst_110 = arith.constant dense<0.000000e+00> : vector<8x512xf32>
    %373 = tpu.matmul %372, %9, %cst_110 {dimension_numbers = #tpu.dot_dimension_numbers<[1], [0], [0], [1], [0, 0, 1, 1], [], []>} : vector<8x128xbf16>, vector<128x512xbf16>, vector<8x512xf32> -> vector<8x512xf32>
    %374 = arith.truncf %362 : vector<8x128xf32> to vector<8x128xbf16>
    %cst_111 = arith.constant dense<0.000000e+00> : vector<8x512xf32>
    %375 = tpu.matmul %374, %10, %cst_111 {dimension_numbers = #tpu.dot_dimension_numbers<[1], [0], [0], [1], [0, 0, 1, 1], [], []>} : vector<8x128xbf16>, vector<128x512xbf16>, vector<8x512xf32> -> vector<8x512xf32>
    %c8_i32_112 = arith.constant 8 : i32
    %376 = arith.muli %c6_i32, %c8_i32_112 : i32
    %377 = tpu.assume_multiple %376, 8 : i32
    %c7_i32_113 = arith.constant 7 : i32
    %378 = arith.subi %c7_i32_113, %c6_i32 : i32
    %c8_i32_114 = arith.constant 8 : i32
    %379 = arith.muli %378, %c8_i32_114 : i32
    %380 = tpu.assume_multiple %379, 8 : i32
    %381 = arith.index_cast %377 : i32 to index
    %c0_115 = arith.constant 0 : index
    %382 = vector.load %arg7[%381, %c0_115] : memref<64x1024xbf16, #tpu.memory_space<vmem>>, vector<8x512xbf16>
    %383 = arith.extf %382 : vector<8x512xbf16> to vector<8x512xf32>
    %384 = arith.index_cast %380 : i32 to index
    %c512_116 = arith.constant 512 : index
    %385 = vector.load %arg7[%384, %c512_116] : memref<64x1024xbf16, #tpu.memory_space<vmem>>, vector<8x512xbf16>
    %386 = arith.extf %385 : vector<8x512xbf16> to vector<8x512xf32>
    %387 = arith.addf %383, %373 : vector<8x512xf32>
    %388 = arith.addf %386, %375 : vector<8x512xf32>
    %389 = vector.extract_strided_slice %387 {offsets = [0, 0], sizes = [8, 384], strides = [1, 1]} : vector<8x512xf32> to vector<8x384xf32>
    %cst_117 = arith.constant 5.000000e-01 : f32
    %390 = vector.broadcast %cst_117 : f32 to vector<8x384xf32>
    %391 = arith.mulf %390, %389 : vector<8x384xf32>
    %392 = math.tanh %391 : vector<8x384xf32>
    %cst_118 = arith.constant 5.000000e-01 : f32
    %393 = vector.broadcast %cst_118 : f32 to vector<8x384xf32>
    %394 = arith.mulf %393, %392 : vector<8x384xf32>
    %cst_119 = arith.constant 5.000000e-01 : f32
    %395 = vector.broadcast %cst_119 : f32 to vector<8x384xf32>
    %396 = arith.addf %394, %395 : vector<8x384xf32>
    %397 = vector.extract_strided_slice %387 {offsets = [0, 384], sizes = [8, 128], strides = [1, 1]} : vector<8x512xf32> to vector<8x128xf32>
    %398 = math.tanh %397 : vector<8x128xf32>
    %399 = vector.extract_strided_slice %396 {offsets = [0, 0], sizes = [8, 128], strides = [1, 1]} : vector<8x384xf32> to vector<8x128xf32>
    %400 = vector.extract_strided_slice %396 {offsets = [0, 128], sizes = [8, 128], strides = [1, 1]} : vector<8x384xf32> to vector<8x128xf32>
    %401 = vector.extract_strided_slice %396 {offsets = [0, 256], sizes = [8, 128], strides = [1, 1]} : vector<8x384xf32> to vector<8x128xf32>
    %402 = arith.mulf %400, %342 : vector<8x128xf32>
    %403 = arith.mulf %399, %398 : vector<8x128xf32>
    %404 = arith.addf %402, %403 : vector<8x128xf32>
    %405 = math.tanh %404 : vector<8x128xf32>
    %406 = arith.mulf %401, %405 : vector<8x128xf32>
    %407 = vector.extract_strided_slice %388 {offsets = [0, 0], sizes = [8, 384], strides = [1, 1]} : vector<8x512xf32> to vector<8x384xf32>
    %cst_120 = arith.constant 5.000000e-01 : f32
    %408 = vector.broadcast %cst_120 : f32 to vector<8x384xf32>
    %409 = arith.mulf %408, %407 : vector<8x384xf32>
    %410 = math.tanh %409 : vector<8x384xf32>
    %cst_121 = arith.constant 5.000000e-01 : f32
    %411 = vector.broadcast %cst_121 : f32 to vector<8x384xf32>
    %412 = arith.mulf %411, %410 : vector<8x384xf32>
    %cst_122 = arith.constant 5.000000e-01 : f32
    %413 = vector.broadcast %cst_122 : f32 to vector<8x384xf32>
    %414 = arith.addf %412, %413 : vector<8x384xf32>
    %415 = vector.extract_strided_slice %388 {offsets = [0, 384], sizes = [8, 128], strides = [1, 1]} : vector<8x512xf32> to vector<8x128xf32>
    %416 = math.tanh %415 : vector<8x128xf32>
    %417 = vector.extract_strided_slice %414 {offsets = [0, 0], sizes = [8, 128], strides = [1, 1]} : vector<8x384xf32> to vector<8x128xf32>
    %418 = vector.extract_strided_slice %414 {offsets = [0, 128], sizes = [8, 128], strides = [1, 1]} : vector<8x384xf32> to vector<8x128xf32>
    %419 = vector.extract_strided_slice %414 {offsets = [0, 256], sizes = [8, 128], strides = [1, 1]} : vector<8x384xf32> to vector<8x128xf32>
    %420 = arith.mulf %418, %360 : vector<8x128xf32>
    %421 = arith.mulf %417, %416 : vector<8x128xf32>
    %422 = arith.addf %420, %421 : vector<8x128xf32>
    %423 = math.tanh %422 : vector<8x128xf32>
    %424 = arith.mulf %419, %423 : vector<8x128xf32>
    %c8_i32_123 = arith.constant 8 : i32
    %425 = arith.muli %c6_i32, %c8_i32_123 : i32
    %426 = tpu.assume_multiple %425, 8 : i32
    %c7_i32_124 = arith.constant 7 : i32
    %427 = arith.subi %c7_i32_124, %c6_i32 : i32
    %c8_i32_125 = arith.constant 8 : i32
    %428 = arith.muli %427, %c8_i32_125 : i32
    %429 = tpu.assume_multiple %428, 8 : i32
    %430 = arith.index_cast %426 : i32 to index
    %c0_126 = arith.constant 0 : index
    %431 = vector.load %arg6[%430, %c0_126] : memref<64x256xf32, #tpu.memory_space<vmem>>, vector<8x128xf32>
    tpu.vector_store %arg6[%430, %c0_126], %406 {strides = array<i32>} : memref<64x256xf32, #tpu.memory_space<vmem>>, vector<8x128xf32>,
    %432 = arith.index_cast %429 : i32 to index
    %c128_127 = arith.constant 128 : index
    %433 = vector.load %arg6[%432, %c128_127] : memref<64x256xf32, #tpu.memory_space<vmem>>, vector<8x128xf32>
    tpu.vector_store %arg6[%432, %c128_127], %424 {strides = array<i32>} : memref<64x256xf32, #tpu.memory_space<vmem>>, vector<8x128xf32>,
    %c7_i32_128 = arith.constant 7 : i32
    %434 = arith.truncf %406 : vector<8x128xf32> to vector<8x128xbf16>
    %cst_129 = arith.constant dense<0.000000e+00> : vector<8x512xf32>
    %435 = tpu.matmul %434, %9, %cst_129 {dimension_numbers = #tpu.dot_dimension_numbers<[1], [0], [0], [1], [0, 0, 1, 1], [], []>} : vector<8x128xbf16>, vector<128x512xbf16>, vector<8x512xf32> -> vector<8x512xf32>
    %436 = arith.truncf %424 : vector<8x128xf32> to vector<8x128xbf16>
    %cst_130 = arith.constant dense<0.000000e+00> : vector<8x512xf32>
    %437 = tpu.matmul %436, %10, %cst_130 {dimension_numbers = #tpu.dot_dimension_numbers<[1], [0], [0], [1], [0, 0, 1, 1], [], []>} : vector<8x128xbf16>, vector<128x512xbf16>, vector<8x512xf32> -> vector<8x512xf32>
    %c8_i32_131 = arith.constant 8 : i32
    %438 = arith.muli %c7_i32_128, %c8_i32_131 : i32
    %439 = tpu.assume_multiple %438, 8 : i32
    %c7_i32_132 = arith.constant 7 : i32
    %440 = arith.subi %c7_i32_132, %c7_i32_128 : i32
    %c8_i32_133 = arith.constant 8 : i32
    %441 = arith.muli %440, %c8_i32_133 : i32
    %442 = tpu.assume_multiple %441, 8 : i32
    %443 = arith.index_cast %439 : i32 to index
    %c0_134 = arith.constant 0 : index
    %444 = vector.load %arg7[%443, %c0_134] : memref<64x1024xbf16, #tpu.memory_space<vmem>>, vector<8x512xbf16>
    %445 = arith.extf %444 : vector<8x512xbf16> to vector<8x512xf32>
    %446 = arith.index_cast %442 : i32 to index
    %c512_135 = arith.constant 512 : index
    %447 = vector.load %arg7[%446, %c512_135] : memref<64x1024xbf16, #tpu.memory_space<vmem>>, vector<8x512xbf16>
    %448 = arith.extf %447 : vector<8x512xbf16> to vector<8x512xf32>
    %449 = arith.addf %445, %435 : vector<8x512xf32>
    %450 = arith.addf %448, %437 : vector<8x512xf32>
    %451 = vector.extract_strided_slice %449 {offsets = [0, 0], sizes = [8, 384], strides = [1, 1]} : vector<8x512xf32> to vector<8x384xf32>
    %cst_136 = arith.constant 5.000000e-01 : f32
    %452 = vector.broadcast %cst_136 : f32 to vector<8x384xf32>
    %453 = arith.mulf %452, %451 : vector<8x384xf32>
    %454 = math.tanh %453 : vector<8x384xf32>
    %cst_137 = arith.constant 5.000000e-01 : f32
    %455 = vector.broadcast %cst_137 : f32 to vector<8x384xf32>
    %456 = arith.mulf %455, %454 : vector<8x384xf32>
    %cst_138 = arith.constant 5.000000e-01 : f32
    %457 = vector.broadcast %cst_138 : f32 to vector<8x384xf32>
    %458 = arith.addf %456, %457 : vector<8x384xf32>
    %459 = vector.extract_strided_slice %449 {offsets = [0, 384], sizes = [8, 128], strides = [1, 1]} : vector<8x512xf32> to vector<8x128xf32>
    %460 = math.tanh %459 : vector<8x128xf32>
    %461 = vector.extract_strided_slice %458 {offsets = [0, 0], sizes = [8, 128], strides = [1, 1]} : vector<8x384xf32> to vector<8x128xf32>
    %462 = vector.extract_strided_slice %458 {offsets = [0, 128], sizes = [8, 128], strides = [1, 1]} : vector<8x384xf32> to vector<8x128xf32>
    %463 = vector.extract_strided_slice %458 {offsets = [0, 256], sizes = [8, 128], strides = [1, 1]} : vector<8x384xf32> to vector<8x128xf32>
    %464 = arith.mulf %462, %404 : vector<8x128xf32>
    %465 = arith.mulf %461, %460 : vector<8x128xf32>
    %466 = arith.addf %464, %465 : vector<8x128xf32>
    %467 = math.tanh %466 : vector<8x128xf32>
    %468 = arith.mulf %463, %467 : vector<8x128xf32>
    %469 = vector.extract_strided_slice %450 {offsets = [0, 0], sizes = [8, 384], strides = [1, 1]} : vector<8x512xf32> to vector<8x384xf32>
    %cst_139 = arith.constant 5.000000e-01 : f32
    %470 = vector.broadcast %cst_139 : f32 to vector<8x384xf32>
    %471 = arith.mulf %470, %469 : vector<8x384xf32>
    %472 = math.tanh %471 : vector<8x384xf32>
    %cst_140 = arith.constant 5.000000e-01 : f32
    %473 = vector.broadcast %cst_140 : f32 to vector<8x384xf32>
    %474 = arith.mulf %473, %472 : vector<8x384xf32>
    %cst_141 = arith.constant 5.000000e-01 : f32
    %475 = vector.broadcast %cst_141 : f32 to vector<8x384xf32>
    %476 = arith.addf %474, %475 : vector<8x384xf32>
    %477 = vector.extract_strided_slice %450 {offsets = [0, 384], sizes = [8, 128], strides = [1, 1]} : vector<8x512xf32> to vector<8x128xf32>
    %478 = math.tanh %477 : vector<8x128xf32>
    %479 = vector.extract_strided_slice %476 {offsets = [0, 0], sizes = [8, 128], strides = [1, 1]} : vector<8x384xf32> to vector<8x128xf32>
    %480 = vector.extract_strided_slice %476 {offsets = [0, 128], sizes = [8, 128], strides = [1, 1]} : vector<8x384xf32> to vector<8x128xf32>
    %481 = vector.extract_strided_slice %476 {offsets = [0, 256], sizes = [8, 128], strides = [1, 1]} : vector<8x384xf32> to vector<8x128xf32>
    %482 = arith.mulf %480, %422 : vector<8x128xf32>
    %483 = arith.mulf %479, %478 : vector<8x128xf32>
    %484 = arith.addf %482, %483 : vector<8x128xf32>
    %485 = math.tanh %484 : vector<8x128xf32>
    %486 = arith.mulf %481, %485 : vector<8x128xf32>
    %c8_i32_142 = arith.constant 8 : i32
    %487 = arith.muli %c7_i32_128, %c8_i32_142 : i32
    %488 = tpu.assume_multiple %487, 8 : i32
    %c7_i32_143 = arith.constant 7 : i32
    %489 = arith.subi %c7_i32_143, %c7_i32_128 : i32
    %c8_i32_144 = arith.constant 8 : i32
    %490 = arith.muli %489, %c8_i32_144 : i32
    %491 = tpu.assume_multiple %490, 8 : i32
    %492 = arith.index_cast %488 : i32 to index
    %c0_145 = arith.constant 0 : index
    %493 = vector.load %arg6[%492, %c0_145] : memref<64x256xf32, #tpu.memory_space<vmem>>, vector<8x128xf32>
    tpu.vector_store %arg6[%492, %c0_145], %468 {strides = array<i32>} : memref<64x256xf32, #tpu.memory_space<vmem>>, vector<8x128xf32>,
    %494 = arith.index_cast %491 : i32 to index
    %c128_146 = arith.constant 128 : index
    %495 = vector.load %arg6[%494, %c128_146] : memref<64x256xf32, #tpu.memory_space<vmem>>, vector<8x128xf32>
    tpu.vector_store %arg6[%494, %c128_146], %486 {strides = array<i32>} : memref<64x256xf32, #tpu.memory_space<vmem>>, vector<8x128xf32>,
    %c7_i32_147 = arith.constant 7 : i32
    return
  }
  func.func @transform_0(%arg0: i32) -> (i32, i32) {
    %c0_i32 = arith.constant 0 : i32
    %c0_i32_0 = arith.constant 0 : i32
    %c0_i32_1 = arith.constant 0 : i32
    return %c0_i32, %c0_i32_0 : i32, i32
  }
  func.func @transform_1(%arg0: i32) -> (i32, i32) {
    %c0_i32 = arith.constant 0 : i32
    %c0_i32_0 = arith.constant 0 : i32
    %c0_i32_1 = arith.constant 0 : i32
    return %c0_i32, %c0_i32_0 : i32, i32
  }
  func.func @transform_2(%arg0: i32) -> (i32, i32) {
    %c0_i32 = arith.constant 0 : i32
    %c0_i32_0 = arith.constant 0 : i32
    %c0_i32_1 = arith.constant 0 : i32
    return %c0_i32, %c0_i32_0 : i32, i32
  }
  func.func @transform_3(%arg0: i32) -> (i32, i32) {
    %c0_i32 = arith.constant 0 : i32
    %c0_i32_0 = arith.constant 0 : i32
    %c0_i32_1 = arith.constant 0 : i32
    return %c0_i32, %c0_i32_0 : i32, i32
  }
  func.func @transform_4(%arg0: i32) -> (i32, i32) {
    %c0_i32 = arith.constant 0 : i32
    %c0_i32_0 = arith.constant 0 : i32
    %c0_i32_1 = arith.constant 0 : i32
    return %c0_i32, %c0_i32_0 : i32, i32
  }
  func.func @transform_5(%arg0: i32) -> (i32, i32) {
    %c0_i32 = arith.constant 0 : i32
    %c0_i32_0 = arith.constant 0 : i32
    %c0_i32_1 = arith.constant 0 : i32
    return %c0_i32, %c0_i32_0 : i32, i32
  }
}

module attributes {stable_mosaic.version = 11 : i64} {
  func.func @_bilstm_layer_kernel(%arg0: i32, %arg1: memref<64x256xf32, #tpu.memory_space<vmem>>, %arg2: memref<256x1024xbf16, #tpu.memory_space<vmem>>, %arg3: memref<128x512xbf16, #tpu.memory_space<vmem>>, %arg4: memref<128x512xbf16, #tpu.memory_space<vmem>>, %arg5: memref<1x1024xf32, #tpu.memory_space<vmem>>, %arg6: memref<256x128xbf16, #tpu.memory_space<vmem>>, %arg7: memref<1x128xf32, #tpu.memory_space<vmem>>, %arg8: memref<64x128xf32, #tpu.memory_space<vmem>>, %arg9: memref<64x1024xbf16, #tpu.memory_space<vmem>>, %arg10: memref<64x256xf32, #tpu.memory_space<vmem>>) attributes {dimension_semantics = [#tpu.dimension_semantics<arbitrary>], iteration_bounds = array<i64: 1>, scalar_prefetch = 0 : i64, scratch_operands = 2 : i64, tpu.core_type = #tpu.core_type<tc>, window_params = [{pipeline_mode = #tpu.pipeline_mode<synchronous>, transform_indices = @transform_0, window_bounds = array<i64: 64, 256>}, {pipeline_mode = #tpu.pipeline_mode<synchronous>, transform_indices = @transform_1, window_bounds = array<i64: 256, 1024>}, {pipeline_mode = #tpu.pipeline_mode<synchronous>, transform_indices = @transform_2, window_bounds = array<i64: 128, 512>}, {pipeline_mode = #tpu.pipeline_mode<synchronous>, transform_indices = @transform_3, window_bounds = array<i64: 128, 512>}, {pipeline_mode = #tpu.pipeline_mode<synchronous>, transform_indices = @transform_4, window_bounds = array<i64: 1, 1024>}, {pipeline_mode = #tpu.pipeline_mode<synchronous>, transform_indices = @transform_5, window_bounds = array<i64: 256, 128>}, {pipeline_mode = #tpu.pipeline_mode<synchronous>, transform_indices = @transform_6, window_bounds = array<i64: 1, 128>}, {pipeline_mode = #tpu.pipeline_mode<synchronous>, transform_indices = @transform_7, window_bounds = array<i64: 64, 128>}]} {
    %c0 = arith.constant 0 : index
    %c0_0 = arith.constant 0 : index
    %0 = vector.load %arg1[%c0, %c0_0] : memref<64x256xf32, #tpu.memory_space<vmem>>, vector<64x256xf32>
    %1 = arith.truncf %0 : vector<64x256xf32> to vector<64x256xbf16>
    %c0_1 = arith.constant 0 : index
    %c0_2 = arith.constant 0 : index
    %2 = vector.load %arg2[%c0_1, %c0_2] : memref<256x1024xbf16, #tpu.memory_space<vmem>>, vector<256x1024xbf16>
    %cst = arith.constant dense<0.000000e+00> : vector<64x1024xf32>
    %3 = tpu.matmul %1, %2, %cst {dimension_numbers = #tpu.dot_dimension_numbers<[1], [0], [0], [1], [0, 0, 1, 1], [], []>} : vector<64x256xbf16>, vector<256x1024xbf16>, vector<64x1024xf32> -> vector<64x1024xf32>
    %c0_3 = arith.constant 0 : index
    %c0_4 = arith.constant 0 : index
    %4 = vector.load %arg5[%c0_3, %c0_4] : memref<1x1024xf32, #tpu.memory_space<vmem>>, vector<1x1024xf32>
    %5 = vector.broadcast %4 : vector<1x1024xf32> to vector<64x1024xf32>
    %6 = arith.addf %3, %5 : vector<64x1024xf32>
    %7 = arith.truncf %6 : vector<64x1024xf32> to vector<64x1024xbf16>
    %c0_5 = arith.constant 0 : index
    %c0_6 = arith.constant 0 : index
    %8 = vector.load %arg9[%c0_5, %c0_6] : memref<64x1024xbf16, #tpu.memory_space<vmem>>, vector<64x1024xbf16>
    tpu.vector_store %arg9[%c0_5, %c0_6], %7 {strides = array<i32>} : memref<64x1024xbf16, #tpu.memory_space<vmem>>, vector<64x1024xbf16>,
    %c0_7 = arith.constant 0 : index
    %c0_8 = arith.constant 0 : index
    %9 = vector.load %arg3[%c0_7, %c0_8] : memref<128x512xbf16, #tpu.memory_space<vmem>>, vector<128x512xbf16>
    %c0_9 = arith.constant 0 : index
    %c0_10 = arith.constant 0 : index
    %10 = vector.load %arg4[%c0_9, %c0_10] : memref<128x512xbf16, #tpu.memory_space<vmem>>, vector<128x512xbf16>
    %c0_i32 = arith.constant 0 : i32
    %11 = tpu.assume_multiple %c0_i32, 8 : i32
    %c56_i32 = arith.constant 56 : i32
    %12 = tpu.assume_multiple %c56_i32, 8 : i32
    %13 = arith.index_cast %11 : i32 to index
    %c0_11 = arith.constant 0 : index
    %14 = vector.load %arg9[%13, %c0_11] : memref<64x1024xbf16, #tpu.memory_space<vmem>>, vector<8x512xbf16>
    %15 = arith.extf %14 : vector<8x512xbf16> to vector<8x512xf32>
    %16 = arith.index_cast %12 : i32 to index
    %c512 = arith.constant 512 : index
    %17 = vector.load %arg9[%16, %c512] : memref<64x1024xbf16, #tpu.memory_space<vmem>>, vector<8x512xbf16>
    %18 = arith.extf %17 : vector<8x512xbf16> to vector<8x512xf32>
    %cst_12 = arith.constant 0.000000e+00 : f32
    %19 = vector.broadcast %cst_12 : f32 to vector<8x128xf32>
    %20 = vector.extract_strided_slice %15 {offsets = [0, 0], sizes = [8, 384], strides = [1, 1]} : vector<8x512xf32> to vector<8x384xf32>
    %cst_13 = arith.constant 5.000000e-01 : f32
    %21 = vector.broadcast %cst_13 : f32 to vector<8x384xf32>
    %22 = arith.mulf %21, %20 : vector<8x384xf32>
    %23 = math.tanh %22 : vector<8x384xf32>
    %cst_14 = arith.constant 5.000000e-01 : f32
    %24 = vector.broadcast %cst_14 : f32 to vector<8x384xf32>
    %25 = arith.mulf %24, %23 : vector<8x384xf32>
    %cst_15 = arith.constant 5.000000e-01 : f32
    %26 = vector.broadcast %cst_15 : f32 to vector<8x384xf32>
    %27 = arith.addf %25, %26 : vector<8x384xf32>
    %28 = vector.extract_strided_slice %15 {offsets = [0, 384], sizes = [8, 128], strides = [1, 1]} : vector<8x512xf32> to vector<8x128xf32>
    %29 = math.tanh %28 : vector<8x128xf32>
    %30 = vector.extract_strided_slice %27 {offsets = [0, 0], sizes = [8, 128], strides = [1, 1]} : vector<8x384xf32> to vector<8x128xf32>
    %31 = vector.extract_strided_slice %27 {offsets = [0, 128], sizes = [8, 128], strides = [1, 1]} : vector<8x384xf32> to vector<8x128xf32>
    %32 = vector.extract_strided_slice %27 {offsets = [0, 256], sizes = [8, 128], strides = [1, 1]} : vector<8x384xf32> to vector<8x128xf32>
    %33 = arith.mulf %31, %19 : vector<8x128xf32>
    %34 = arith.mulf %30, %29 : vector<8x128xf32>
    %35 = arith.addf %33, %34 : vector<8x128xf32>
    %36 = math.tanh %35 : vector<8x128xf32>
    %37 = arith.mulf %32, %36 : vector<8x128xf32>
    %38 = vector.extract_strided_slice %18 {offsets = [0, 0], sizes = [8, 384], strides = [1, 1]} : vector<8x512xf32> to vector<8x384xf32>
    %cst_16 = arith.constant 5.000000e-01 : f32
    %39 = vector.broadcast %cst_16 : f32 to vector<8x384xf32>
    %40 = arith.mulf %39, %38 : vector<8x384xf32>
    %41 = math.tanh %40 : vector<8x384xf32>
    %cst_17 = arith.constant 5.000000e-01 : f32
    %42 = vector.broadcast %cst_17 : f32 to vector<8x384xf32>
    %43 = arith.mulf %42, %41 : vector<8x384xf32>
    %cst_18 = arith.constant 5.000000e-01 : f32
    %44 = vector.broadcast %cst_18 : f32 to vector<8x384xf32>
    %45 = arith.addf %43, %44 : vector<8x384xf32>
    %46 = vector.extract_strided_slice %18 {offsets = [0, 384], sizes = [8, 128], strides = [1, 1]} : vector<8x512xf32> to vector<8x128xf32>
    %47 = math.tanh %46 : vector<8x128xf32>
    %48 = vector.extract_strided_slice %45 {offsets = [0, 0], sizes = [8, 128], strides = [1, 1]} : vector<8x384xf32> to vector<8x128xf32>
    %49 = vector.extract_strided_slice %45 {offsets = [0, 128], sizes = [8, 128], strides = [1, 1]} : vector<8x384xf32> to vector<8x128xf32>
    %50 = vector.extract_strided_slice %45 {offsets = [0, 256], sizes = [8, 128], strides = [1, 1]} : vector<8x384xf32> to vector<8x128xf32>
    %51 = arith.mulf %49, %19 : vector<8x128xf32>
    %52 = arith.mulf %48, %47 : vector<8x128xf32>
    %53 = arith.addf %51, %52 : vector<8x128xf32>
    %54 = math.tanh %53 : vector<8x128xf32>
    %55 = arith.mulf %50, %54 : vector<8x128xf32>
    %c0_i32_19 = arith.constant 0 : i32
    %56 = tpu.assume_multiple %c0_i32_19, 8 : i32
    %c56_i32_20 = arith.constant 56 : i32
    %57 = tpu.assume_multiple %c56_i32_20, 8 : i32
    %58 = arith.index_cast %56 : i32 to index
    %c0_21 = arith.constant 0 : index
    %59 = vector.load %arg10[%58, %c0_21] : memref<64x256xf32, #tpu.memory_space<vmem>>, vector<8x128xf32>
    tpu.vector_store %arg10[%58, %c0_21], %37 {strides = array<i32>} : memref<64x256xf32, #tpu.memory_space<vmem>>, vector<8x128xf32>,
    %60 = arith.index_cast %57 : i32 to index
    %c128 = arith.constant 128 : index
    %61 = vector.load %arg10[%60, %c128] : memref<64x256xf32, #tpu.memory_space<vmem>>, vector<8x128xf32>
    tpu.vector_store %arg10[%60, %c128], %55 {strides = array<i32>} : memref<64x256xf32, #tpu.memory_space<vmem>>, vector<8x128xf32>,
    %c1_i32 = arith.constant 1 : i32
    %62 = arith.truncf %37 : vector<8x128xf32> to vector<8x128xbf16>
    %cst_22 = arith.constant dense<0.000000e+00> : vector<8x512xf32>
    %63 = tpu.matmul %62, %9, %cst_22 {dimension_numbers = #tpu.dot_dimension_numbers<[1], [0], [0], [1], [0, 0, 1, 1], [], []>} : vector<8x128xbf16>, vector<128x512xbf16>, vector<8x512xf32> -> vector<8x512xf32>
    %64 = arith.truncf %55 : vector<8x128xf32> to vector<8x128xbf16>
    %cst_23 = arith.constant dense<0.000000e+00> : vector<8x512xf32>
    %65 = tpu.matmul %64, %10, %cst_23 {dimension_numbers = #tpu.dot_dimension_numbers<[1], [0], [0], [1], [0, 0, 1, 1], [], []>} : vector<8x128xbf16>, vector<128x512xbf16>, vector<8x512xf32> -> vector<8x512xf32>
    %c8_i32 = arith.constant 8 : i32
    %66 = arith.muli %c1_i32, %c8_i32 : i32
    %67 = tpu.assume_multiple %66, 8 : i32
    %c7_i32 = arith.constant 7 : i32
    %68 = arith.subi %c7_i32, %c1_i32 : i32
    %c8_i32_24 = arith.constant 8 : i32
    %69 = arith.muli %68, %c8_i32_24 : i32
    %70 = tpu.assume_multiple %69, 8 : i32
    %71 = arith.index_cast %67 : i32 to index
    %c0_25 = arith.constant 0 : index
    %72 = vector.load %arg9[%71, %c0_25] : memref<64x1024xbf16, #tpu.memory_space<vmem>>, vector<8x512xbf16>
    %73 = arith.extf %72 : vector<8x512xbf16> to vector<8x512xf32>
    %74 = arith.index_cast %70 : i32 to index
    %c512_26 = arith.constant 512 : index
    %75 = vector.load %arg9[%74, %c512_26] : memref<64x1024xbf16, #tpu.memory_space<vmem>>, vector<8x512xbf16>
    %76 = arith.extf %75 : vector<8x512xbf16> to vector<8x512xf32>
    %77 = arith.addf %73, %63 : vector<8x512xf32>
    %78 = arith.addf %76, %65 : vector<8x512xf32>
    %79 = vector.extract_strided_slice %77 {offsets = [0, 0], sizes = [8, 384], strides = [1, 1]} : vector<8x512xf32> to vector<8x384xf32>
    %cst_27 = arith.constant 5.000000e-01 : f32
    %80 = vector.broadcast %cst_27 : f32 to vector<8x384xf32>
    %81 = arith.mulf %80, %79 : vector<8x384xf32>
    %82 = math.tanh %81 : vector<8x384xf32>
    %cst_28 = arith.constant 5.000000e-01 : f32
    %83 = vector.broadcast %cst_28 : f32 to vector<8x384xf32>
    %84 = arith.mulf %83, %82 : vector<8x384xf32>
    %cst_29 = arith.constant 5.000000e-01 : f32
    %85 = vector.broadcast %cst_29 : f32 to vector<8x384xf32>
    %86 = arith.addf %84, %85 : vector<8x384xf32>
    %87 = vector.extract_strided_slice %77 {offsets = [0, 384], sizes = [8, 128], strides = [1, 1]} : vector<8x512xf32> to vector<8x128xf32>
    %88 = math.tanh %87 : vector<8x128xf32>
    %89 = vector.extract_strided_slice %86 {offsets = [0, 0], sizes = [8, 128], strides = [1, 1]} : vector<8x384xf32> to vector<8x128xf32>
    %90 = vector.extract_strided_slice %86 {offsets = [0, 128], sizes = [8, 128], strides = [1, 1]} : vector<8x384xf32> to vector<8x128xf32>
    %91 = vector.extract_strided_slice %86 {offsets = [0, 256], sizes = [8, 128], strides = [1, 1]} : vector<8x384xf32> to vector<8x128xf32>
    %92 = arith.mulf %90, %35 : vector<8x128xf32>
    %93 = arith.mulf %89, %88 : vector<8x128xf32>
    %94 = arith.addf %92, %93 : vector<8x128xf32>
    %95 = math.tanh %94 : vector<8x128xf32>
    %96 = arith.mulf %91, %95 : vector<8x128xf32>
    %97 = vector.extract_strided_slice %78 {offsets = [0, 0], sizes = [8, 384], strides = [1, 1]} : vector<8x512xf32> to vector<8x384xf32>
    %cst_30 = arith.constant 5.000000e-01 : f32
    %98 = vector.broadcast %cst_30 : f32 to vector<8x384xf32>
    %99 = arith.mulf %98, %97 : vector<8x384xf32>
    %100 = math.tanh %99 : vector<8x384xf32>
    %cst_31 = arith.constant 5.000000e-01 : f32
    %101 = vector.broadcast %cst_31 : f32 to vector<8x384xf32>
    %102 = arith.mulf %101, %100 : vector<8x384xf32>
    %cst_32 = arith.constant 5.000000e-01 : f32
    %103 = vector.broadcast %cst_32 : f32 to vector<8x384xf32>
    %104 = arith.addf %102, %103 : vector<8x384xf32>
    %105 = vector.extract_strided_slice %78 {offsets = [0, 384], sizes = [8, 128], strides = [1, 1]} : vector<8x512xf32> to vector<8x128xf32>
    %106 = math.tanh %105 : vector<8x128xf32>
    %107 = vector.extract_strided_slice %104 {offsets = [0, 0], sizes = [8, 128], strides = [1, 1]} : vector<8x384xf32> to vector<8x128xf32>
    %108 = vector.extract_strided_slice %104 {offsets = [0, 128], sizes = [8, 128], strides = [1, 1]} : vector<8x384xf32> to vector<8x128xf32>
    %109 = vector.extract_strided_slice %104 {offsets = [0, 256], sizes = [8, 128], strides = [1, 1]} : vector<8x384xf32> to vector<8x128xf32>
    %110 = arith.mulf %108, %53 : vector<8x128xf32>
    %111 = arith.mulf %107, %106 : vector<8x128xf32>
    %112 = arith.addf %110, %111 : vector<8x128xf32>
    %113 = math.tanh %112 : vector<8x128xf32>
    %114 = arith.mulf %109, %113 : vector<8x128xf32>
    %c8_i32_33 = arith.constant 8 : i32
    %115 = arith.muli %c1_i32, %c8_i32_33 : i32
    %116 = tpu.assume_multiple %115, 8 : i32
    %c7_i32_34 = arith.constant 7 : i32
    %117 = arith.subi %c7_i32_34, %c1_i32 : i32
    %c8_i32_35 = arith.constant 8 : i32
    %118 = arith.muli %117, %c8_i32_35 : i32
    %119 = tpu.assume_multiple %118, 8 : i32
    %120 = arith.index_cast %116 : i32 to index
    %c0_36 = arith.constant 0 : index
    %121 = vector.load %arg10[%120, %c0_36] : memref<64x256xf32, #tpu.memory_space<vmem>>, vector<8x128xf32>
    tpu.vector_store %arg10[%120, %c0_36], %96 {strides = array<i32>} : memref<64x256xf32, #tpu.memory_space<vmem>>, vector<8x128xf32>,
    %122 = arith.index_cast %119 : i32 to index
    %c128_37 = arith.constant 128 : index
    %123 = vector.load %arg10[%122, %c128_37] : memref<64x256xf32, #tpu.memory_space<vmem>>, vector<8x128xf32>
    tpu.vector_store %arg10[%122, %c128_37], %114 {strides = array<i32>} : memref<64x256xf32, #tpu.memory_space<vmem>>, vector<8x128xf32>,
    %c2_i32 = arith.constant 2 : i32
    %124 = arith.truncf %96 : vector<8x128xf32> to vector<8x128xbf16>
    %cst_38 = arith.constant dense<0.000000e+00> : vector<8x512xf32>
    %125 = tpu.matmul %124, %9, %cst_38 {dimension_numbers = #tpu.dot_dimension_numbers<[1], [0], [0], [1], [0, 0, 1, 1], [], []>} : vector<8x128xbf16>, vector<128x512xbf16>, vector<8x512xf32> -> vector<8x512xf32>
    %126 = arith.truncf %114 : vector<8x128xf32> to vector<8x128xbf16>
    %cst_39 = arith.constant dense<0.000000e+00> : vector<8x512xf32>
    %127 = tpu.matmul %126, %10, %cst_39 {dimension_numbers = #tpu.dot_dimension_numbers<[1], [0], [0], [1], [0, 0, 1, 1], [], []>} : vector<8x128xbf16>, vector<128x512xbf16>, vector<8x512xf32> -> vector<8x512xf32>
    %c8_i32_40 = arith.constant 8 : i32
    %128 = arith.muli %c2_i32, %c8_i32_40 : i32
    %129 = tpu.assume_multiple %128, 8 : i32
    %c7_i32_41 = arith.constant 7 : i32
    %130 = arith.subi %c7_i32_41, %c2_i32 : i32
    %c8_i32_42 = arith.constant 8 : i32
    %131 = arith.muli %130, %c8_i32_42 : i32
    %132 = tpu.assume_multiple %131, 8 : i32
    %133 = arith.index_cast %129 : i32 to index
    %c0_43 = arith.constant 0 : index
    %134 = vector.load %arg9[%133, %c0_43] : memref<64x1024xbf16, #tpu.memory_space<vmem>>, vector<8x512xbf16>
    %135 = arith.extf %134 : vector<8x512xbf16> to vector<8x512xf32>
    %136 = arith.index_cast %132 : i32 to index
    %c512_44 = arith.constant 512 : index
    %137 = vector.load %arg9[%136, %c512_44] : memref<64x1024xbf16, #tpu.memory_space<vmem>>, vector<8x512xbf16>
    %138 = arith.extf %137 : vector<8x512xbf16> to vector<8x512xf32>
    %139 = arith.addf %135, %125 : vector<8x512xf32>
    %140 = arith.addf %138, %127 : vector<8x512xf32>
    %141 = vector.extract_strided_slice %139 {offsets = [0, 0], sizes = [8, 384], strides = [1, 1]} : vector<8x512xf32> to vector<8x384xf32>
    %cst_45 = arith.constant 5.000000e-01 : f32
    %142 = vector.broadcast %cst_45 : f32 to vector<8x384xf32>
    %143 = arith.mulf %142, %141 : vector<8x384xf32>
    %144 = math.tanh %143 : vector<8x384xf32>
    %cst_46 = arith.constant 5.000000e-01 : f32
    %145 = vector.broadcast %cst_46 : f32 to vector<8x384xf32>
    %146 = arith.mulf %145, %144 : vector<8x384xf32>
    %cst_47 = arith.constant 5.000000e-01 : f32
    %147 = vector.broadcast %cst_47 : f32 to vector<8x384xf32>
    %148 = arith.addf %146, %147 : vector<8x384xf32>
    %149 = vector.extract_strided_slice %139 {offsets = [0, 384], sizes = [8, 128], strides = [1, 1]} : vector<8x512xf32> to vector<8x128xf32>
    %150 = math.tanh %149 : vector<8x128xf32>
    %151 = vector.extract_strided_slice %148 {offsets = [0, 0], sizes = [8, 128], strides = [1, 1]} : vector<8x384xf32> to vector<8x128xf32>
    %152 = vector.extract_strided_slice %148 {offsets = [0, 128], sizes = [8, 128], strides = [1, 1]} : vector<8x384xf32> to vector<8x128xf32>
    %153 = vector.extract_strided_slice %148 {offsets = [0, 256], sizes = [8, 128], strides = [1, 1]} : vector<8x384xf32> to vector<8x128xf32>
    %154 = arith.mulf %152, %94 : vector<8x128xf32>
    %155 = arith.mulf %151, %150 : vector<8x128xf32>
    %156 = arith.addf %154, %155 : vector<8x128xf32>
    %157 = math.tanh %156 : vector<8x128xf32>
    %158 = arith.mulf %153, %157 : vector<8x128xf32>
    %159 = vector.extract_strided_slice %140 {offsets = [0, 0], sizes = [8, 384], strides = [1, 1]} : vector<8x512xf32> to vector<8x384xf32>
    %cst_48 = arith.constant 5.000000e-01 : f32
    %160 = vector.broadcast %cst_48 : f32 to vector<8x384xf32>
    %161 = arith.mulf %160, %159 : vector<8x384xf32>
    %162 = math.tanh %161 : vector<8x384xf32>
    %cst_49 = arith.constant 5.000000e-01 : f32
    %163 = vector.broadcast %cst_49 : f32 to vector<8x384xf32>
    %164 = arith.mulf %163, %162 : vector<8x384xf32>
    %cst_50 = arith.constant 5.000000e-01 : f32
    %165 = vector.broadcast %cst_50 : f32 to vector<8x384xf32>
    %166 = arith.addf %164, %165 : vector<8x384xf32>
    %167 = vector.extract_strided_slice %140 {offsets = [0, 384], sizes = [8, 128], strides = [1, 1]} : vector<8x512xf32> to vector<8x128xf32>
    %168 = math.tanh %167 : vector<8x128xf32>
    %169 = vector.extract_strided_slice %166 {offsets = [0, 0], sizes = [8, 128], strides = [1, 1]} : vector<8x384xf32> to vector<8x128xf32>
    %170 = vector.extract_strided_slice %166 {offsets = [0, 128], sizes = [8, 128], strides = [1, 1]} : vector<8x384xf32> to vector<8x128xf32>
    %171 = vector.extract_strided_slice %166 {offsets = [0, 256], sizes = [8, 128], strides = [1, 1]} : vector<8x384xf32> to vector<8x128xf32>
    %172 = arith.mulf %170, %112 : vector<8x128xf32>
    %173 = arith.mulf %169, %168 : vector<8x128xf32>
    %174 = arith.addf %172, %173 : vector<8x128xf32>
    %175 = math.tanh %174 : vector<8x128xf32>
    %176 = arith.mulf %171, %175 : vector<8x128xf32>
    %c8_i32_51 = arith.constant 8 : i32
    %177 = arith.muli %c2_i32, %c8_i32_51 : i32
    %178 = tpu.assume_multiple %177, 8 : i32
    %c7_i32_52 = arith.constant 7 : i32
    %179 = arith.subi %c7_i32_52, %c2_i32 : i32
    %c8_i32_53 = arith.constant 8 : i32
    %180 = arith.muli %179, %c8_i32_53 : i32
    %181 = tpu.assume_multiple %180, 8 : i32
    %182 = arith.index_cast %178 : i32 to index
    %c0_54 = arith.constant 0 : index
    %183 = vector.load %arg10[%182, %c0_54] : memref<64x256xf32, #tpu.memory_space<vmem>>, vector<8x128xf32>
    tpu.vector_store %arg10[%182, %c0_54], %158 {strides = array<i32>} : memref<64x256xf32, #tpu.memory_space<vmem>>, vector<8x128xf32>,
    %184 = arith.index_cast %181 : i32 to index
    %c128_55 = arith.constant 128 : index
    %185 = vector.load %arg10[%184, %c128_55] : memref<64x256xf32, #tpu.memory_space<vmem>>, vector<8x128xf32>
    tpu.vector_store %arg10[%184, %c128_55], %176 {strides = array<i32>} : memref<64x256xf32, #tpu.memory_space<vmem>>, vector<8x128xf32>,
    %c3_i32 = arith.constant 3 : i32
    %186 = arith.truncf %158 : vector<8x128xf32> to vector<8x128xbf16>
    %cst_56 = arith.constant dense<0.000000e+00> : vector<8x512xf32>
    %187 = tpu.matmul %186, %9, %cst_56 {dimension_numbers = #tpu.dot_dimension_numbers<[1], [0], [0], [1], [0, 0, 1, 1], [], []>} : vector<8x128xbf16>, vector<128x512xbf16>, vector<8x512xf32> -> vector<8x512xf32>
    %188 = arith.truncf %176 : vector<8x128xf32> to vector<8x128xbf16>
    %cst_57 = arith.constant dense<0.000000e+00> : vector<8x512xf32>
    %189 = tpu.matmul %188, %10, %cst_57 {dimension_numbers = #tpu.dot_dimension_numbers<[1], [0], [0], [1], [0, 0, 1, 1], [], []>} : vector<8x128xbf16>, vector<128x512xbf16>, vector<8x512xf32> -> vector<8x512xf32>
    %c8_i32_58 = arith.constant 8 : i32
    %190 = arith.muli %c3_i32, %c8_i32_58 : i32
    %191 = tpu.assume_multiple %190, 8 : i32
    %c7_i32_59 = arith.constant 7 : i32
    %192 = arith.subi %c7_i32_59, %c3_i32 : i32
    %c8_i32_60 = arith.constant 8 : i32
    %193 = arith.muli %192, %c8_i32_60 : i32
    %194 = tpu.assume_multiple %193, 8 : i32
    %195 = arith.index_cast %191 : i32 to index
    %c0_61 = arith.constant 0 : index
    %196 = vector.load %arg9[%195, %c0_61] : memref<64x1024xbf16, #tpu.memory_space<vmem>>, vector<8x512xbf16>
    %197 = arith.extf %196 : vector<8x512xbf16> to vector<8x512xf32>
    %198 = arith.index_cast %194 : i32 to index
    %c512_62 = arith.constant 512 : index
    %199 = vector.load %arg9[%198, %c512_62] : memref<64x1024xbf16, #tpu.memory_space<vmem>>, vector<8x512xbf16>
    %200 = arith.extf %199 : vector<8x512xbf16> to vector<8x512xf32>
    %201 = arith.addf %197, %187 : vector<8x512xf32>
    %202 = arith.addf %200, %189 : vector<8x512xf32>
    %203 = vector.extract_strided_slice %201 {offsets = [0, 0], sizes = [8, 384], strides = [1, 1]} : vector<8x512xf32> to vector<8x384xf32>
    %cst_63 = arith.constant 5.000000e-01 : f32
    %204 = vector.broadcast %cst_63 : f32 to vector<8x384xf32>
    %205 = arith.mulf %204, %203 : vector<8x384xf32>
    %206 = math.tanh %205 : vector<8x384xf32>
    %cst_64 = arith.constant 5.000000e-01 : f32
    %207 = vector.broadcast %cst_64 : f32 to vector<8x384xf32>
    %208 = arith.mulf %207, %206 : vector<8x384xf32>
    %cst_65 = arith.constant 5.000000e-01 : f32
    %209 = vector.broadcast %cst_65 : f32 to vector<8x384xf32>
    %210 = arith.addf %208, %209 : vector<8x384xf32>
    %211 = vector.extract_strided_slice %201 {offsets = [0, 384], sizes = [8, 128], strides = [1, 1]} : vector<8x512xf32> to vector<8x128xf32>
    %212 = math.tanh %211 : vector<8x128xf32>
    %213 = vector.extract_strided_slice %210 {offsets = [0, 0], sizes = [8, 128], strides = [1, 1]} : vector<8x384xf32> to vector<8x128xf32>
    %214 = vector.extract_strided_slice %210 {offsets = [0, 128], sizes = [8, 128], strides = [1, 1]} : vector<8x384xf32> to vector<8x128xf32>
    %215 = vector.extract_strided_slice %210 {offsets = [0, 256], sizes = [8, 128], strides = [1, 1]} : vector<8x384xf32> to vector<8x128xf32>
    %216 = arith.mulf %214, %156 : vector<8x128xf32>
    %217 = arith.mulf %213, %212 : vector<8x128xf32>
    %218 = arith.addf %216, %217 : vector<8x128xf32>
    %219 = math.tanh %218 : vector<8x128xf32>
    %220 = arith.mulf %215, %219 : vector<8x128xf32>
    %221 = vector.extract_strided_slice %202 {offsets = [0, 0], sizes = [8, 384], strides = [1, 1]} : vector<8x512xf32> to vector<8x384xf32>
    %cst_66 = arith.constant 5.000000e-01 : f32
    %222 = vector.broadcast %cst_66 : f32 to vector<8x384xf32>
    %223 = arith.mulf %222, %221 : vector<8x384xf32>
    %224 = math.tanh %223 : vector<8x384xf32>
    %cst_67 = arith.constant 5.000000e-01 : f32
    %225 = vector.broadcast %cst_67 : f32 to vector<8x384xf32>
    %226 = arith.mulf %225, %224 : vector<8x384xf32>
    %cst_68 = arith.constant 5.000000e-01 : f32
    %227 = vector.broadcast %cst_68 : f32 to vector<8x384xf32>
    %228 = arith.addf %226, %227 : vector<8x384xf32>
    %229 = vector.extract_strided_slice %202 {offsets = [0, 384], sizes = [8, 128], strides = [1, 1]} : vector<8x512xf32> to vector<8x128xf32>
    %230 = math.tanh %229 : vector<8x128xf32>
    %231 = vector.extract_strided_slice %228 {offsets = [0, 0], sizes = [8, 128], strides = [1, 1]} : vector<8x384xf32> to vector<8x128xf32>
    %232 = vector.extract_strided_slice %228 {offsets = [0, 128], sizes = [8, 128], strides = [1, 1]} : vector<8x384xf32> to vector<8x128xf32>
    %233 = vector.extract_strided_slice %228 {offsets = [0, 256], sizes = [8, 128], strides = [1, 1]} : vector<8x384xf32> to vector<8x128xf32>
    %234 = arith.mulf %232, %174 : vector<8x128xf32>
    %235 = arith.mulf %231, %230 : vector<8x128xf32>
    %236 = arith.addf %234, %235 : vector<8x128xf32>
    %237 = math.tanh %236 : vector<8x128xf32>
    %238 = arith.mulf %233, %237 : vector<8x128xf32>
    %c8_i32_69 = arith.constant 8 : i32
    %239 = arith.muli %c3_i32, %c8_i32_69 : i32
    %240 = tpu.assume_multiple %239, 8 : i32
    %c7_i32_70 = arith.constant 7 : i32
    %241 = arith.subi %c7_i32_70, %c3_i32 : i32
    %c8_i32_71 = arith.constant 8 : i32
    %242 = arith.muli %241, %c8_i32_71 : i32
    %243 = tpu.assume_multiple %242, 8 : i32
    %244 = arith.index_cast %240 : i32 to index
    %c0_72 = arith.constant 0 : index
    %245 = vector.load %arg10[%244, %c0_72] : memref<64x256xf32, #tpu.memory_space<vmem>>, vector<8x128xf32>
    tpu.vector_store %arg10[%244, %c0_72], %220 {strides = array<i32>} : memref<64x256xf32, #tpu.memory_space<vmem>>, vector<8x128xf32>,
    %246 = arith.index_cast %243 : i32 to index
    %c128_73 = arith.constant 128 : index
    %247 = vector.load %arg10[%246, %c128_73] : memref<64x256xf32, #tpu.memory_space<vmem>>, vector<8x128xf32>
    tpu.vector_store %arg10[%246, %c128_73], %238 {strides = array<i32>} : memref<64x256xf32, #tpu.memory_space<vmem>>, vector<8x128xf32>,
    %c4_i32 = arith.constant 4 : i32
    %248 = arith.truncf %220 : vector<8x128xf32> to vector<8x128xbf16>
    %cst_74 = arith.constant dense<0.000000e+00> : vector<8x512xf32>
    %249 = tpu.matmul %248, %9, %cst_74 {dimension_numbers = #tpu.dot_dimension_numbers<[1], [0], [0], [1], [0, 0, 1, 1], [], []>} : vector<8x128xbf16>, vector<128x512xbf16>, vector<8x512xf32> -> vector<8x512xf32>
    %250 = arith.truncf %238 : vector<8x128xf32> to vector<8x128xbf16>
    %cst_75 = arith.constant dense<0.000000e+00> : vector<8x512xf32>
    %251 = tpu.matmul %250, %10, %cst_75 {dimension_numbers = #tpu.dot_dimension_numbers<[1], [0], [0], [1], [0, 0, 1, 1], [], []>} : vector<8x128xbf16>, vector<128x512xbf16>, vector<8x512xf32> -> vector<8x512xf32>
    %c8_i32_76 = arith.constant 8 : i32
    %252 = arith.muli %c4_i32, %c8_i32_76 : i32
    %253 = tpu.assume_multiple %252, 8 : i32
    %c7_i32_77 = arith.constant 7 : i32
    %254 = arith.subi %c7_i32_77, %c4_i32 : i32
    %c8_i32_78 = arith.constant 8 : i32
    %255 = arith.muli %254, %c8_i32_78 : i32
    %256 = tpu.assume_multiple %255, 8 : i32
    %257 = arith.index_cast %253 : i32 to index
    %c0_79 = arith.constant 0 : index
    %258 = vector.load %arg9[%257, %c0_79] : memref<64x1024xbf16, #tpu.memory_space<vmem>>, vector<8x512xbf16>
    %259 = arith.extf %258 : vector<8x512xbf16> to vector<8x512xf32>
    %260 = arith.index_cast %256 : i32 to index
    %c512_80 = arith.constant 512 : index
    %261 = vector.load %arg9[%260, %c512_80] : memref<64x1024xbf16, #tpu.memory_space<vmem>>, vector<8x512xbf16>
    %262 = arith.extf %261 : vector<8x512xbf16> to vector<8x512xf32>
    %263 = arith.addf %259, %249 : vector<8x512xf32>
    %264 = arith.addf %262, %251 : vector<8x512xf32>
    %265 = vector.extract_strided_slice %263 {offsets = [0, 0], sizes = [8, 384], strides = [1, 1]} : vector<8x512xf32> to vector<8x384xf32>
    %cst_81 = arith.constant 5.000000e-01 : f32
    %266 = vector.broadcast %cst_81 : f32 to vector<8x384xf32>
    %267 = arith.mulf %266, %265 : vector<8x384xf32>
    %268 = math.tanh %267 : vector<8x384xf32>
    %cst_82 = arith.constant 5.000000e-01 : f32
    %269 = vector.broadcast %cst_82 : f32 to vector<8x384xf32>
    %270 = arith.mulf %269, %268 : vector<8x384xf32>
    %cst_83 = arith.constant 5.000000e-01 : f32
    %271 = vector.broadcast %cst_83 : f32 to vector<8x384xf32>
    %272 = arith.addf %270, %271 : vector<8x384xf32>
    %273 = vector.extract_strided_slice %263 {offsets = [0, 384], sizes = [8, 128], strides = [1, 1]} : vector<8x512xf32> to vector<8x128xf32>
    %274 = math.tanh %273 : vector<8x128xf32>
    %275 = vector.extract_strided_slice %272 {offsets = [0, 0], sizes = [8, 128], strides = [1, 1]} : vector<8x384xf32> to vector<8x128xf32>
    %276 = vector.extract_strided_slice %272 {offsets = [0, 128], sizes = [8, 128], strides = [1, 1]} : vector<8x384xf32> to vector<8x128xf32>
    %277 = vector.extract_strided_slice %272 {offsets = [0, 256], sizes = [8, 128], strides = [1, 1]} : vector<8x384xf32> to vector<8x128xf32>
    %278 = arith.mulf %276, %218 : vector<8x128xf32>
    %279 = arith.mulf %275, %274 : vector<8x128xf32>
    %280 = arith.addf %278, %279 : vector<8x128xf32>
    %281 = math.tanh %280 : vector<8x128xf32>
    %282 = arith.mulf %277, %281 : vector<8x128xf32>
    %283 = vector.extract_strided_slice %264 {offsets = [0, 0], sizes = [8, 384], strides = [1, 1]} : vector<8x512xf32> to vector<8x384xf32>
    %cst_84 = arith.constant 5.000000e-01 : f32
    %284 = vector.broadcast %cst_84 : f32 to vector<8x384xf32>
    %285 = arith.mulf %284, %283 : vector<8x384xf32>
    %286 = math.tanh %285 : vector<8x384xf32>
    %cst_85 = arith.constant 5.000000e-01 : f32
    %287 = vector.broadcast %cst_85 : f32 to vector<8x384xf32>
    %288 = arith.mulf %287, %286 : vector<8x384xf32>
    %cst_86 = arith.constant 5.000000e-01 : f32
    %289 = vector.broadcast %cst_86 : f32 to vector<8x384xf32>
    %290 = arith.addf %288, %289 : vector<8x384xf32>
    %291 = vector.extract_strided_slice %264 {offsets = [0, 384], sizes = [8, 128], strides = [1, 1]} : vector<8x512xf32> to vector<8x128xf32>
    %292 = math.tanh %291 : vector<8x128xf32>
    %293 = vector.extract_strided_slice %290 {offsets = [0, 0], sizes = [8, 128], strides = [1, 1]} : vector<8x384xf32> to vector<8x128xf32>
    %294 = vector.extract_strided_slice %290 {offsets = [0, 128], sizes = [8, 128], strides = [1, 1]} : vector<8x384xf32> to vector<8x128xf32>
    %295 = vector.extract_strided_slice %290 {offsets = [0, 256], sizes = [8, 128], strides = [1, 1]} : vector<8x384xf32> to vector<8x128xf32>
    %296 = arith.mulf %294, %236 : vector<8x128xf32>
    %297 = arith.mulf %293, %292 : vector<8x128xf32>
    %298 = arith.addf %296, %297 : vector<8x128xf32>
    %299 = math.tanh %298 : vector<8x128xf32>
    %300 = arith.mulf %295, %299 : vector<8x128xf32>
    %c8_i32_87 = arith.constant 8 : i32
    %301 = arith.muli %c4_i32, %c8_i32_87 : i32
    %302 = tpu.assume_multiple %301, 8 : i32
    %c7_i32_88 = arith.constant 7 : i32
    %303 = arith.subi %c7_i32_88, %c4_i32 : i32
    %c8_i32_89 = arith.constant 8 : i32
    %304 = arith.muli %303, %c8_i32_89 : i32
    %305 = tpu.assume_multiple %304, 8 : i32
    %306 = arith.index_cast %302 : i32 to index
    %c0_90 = arith.constant 0 : index
    %307 = vector.load %arg10[%306, %c0_90] : memref<64x256xf32, #tpu.memory_space<vmem>>, vector<8x128xf32>
    tpu.vector_store %arg10[%306, %c0_90], %282 {strides = array<i32>} : memref<64x256xf32, #tpu.memory_space<vmem>>, vector<8x128xf32>,
    %308 = arith.index_cast %305 : i32 to index
    %c128_91 = arith.constant 128 : index
    %309 = vector.load %arg10[%308, %c128_91] : memref<64x256xf32, #tpu.memory_space<vmem>>, vector<8x128xf32>
    tpu.vector_store %arg10[%308, %c128_91], %300 {strides = array<i32>} : memref<64x256xf32, #tpu.memory_space<vmem>>, vector<8x128xf32>,
    %c5_i32 = arith.constant 5 : i32
    %310 = arith.truncf %282 : vector<8x128xf32> to vector<8x128xbf16>
    %cst_92 = arith.constant dense<0.000000e+00> : vector<8x512xf32>
    %311 = tpu.matmul %310, %9, %cst_92 {dimension_numbers = #tpu.dot_dimension_numbers<[1], [0], [0], [1], [0, 0, 1, 1], [], []>} : vector<8x128xbf16>, vector<128x512xbf16>, vector<8x512xf32> -> vector<8x512xf32>
    %312 = arith.truncf %300 : vector<8x128xf32> to vector<8x128xbf16>
    %cst_93 = arith.constant dense<0.000000e+00> : vector<8x512xf32>
    %313 = tpu.matmul %312, %10, %cst_93 {dimension_numbers = #tpu.dot_dimension_numbers<[1], [0], [0], [1], [0, 0, 1, 1], [], []>} : vector<8x128xbf16>, vector<128x512xbf16>, vector<8x512xf32> -> vector<8x512xf32>
    %c8_i32_94 = arith.constant 8 : i32
    %314 = arith.muli %c5_i32, %c8_i32_94 : i32
    %315 = tpu.assume_multiple %314, 8 : i32
    %c7_i32_95 = arith.constant 7 : i32
    %316 = arith.subi %c7_i32_95, %c5_i32 : i32
    %c8_i32_96 = arith.constant 8 : i32
    %317 = arith.muli %316, %c8_i32_96 : i32
    %318 = tpu.assume_multiple %317, 8 : i32
    %319 = arith.index_cast %315 : i32 to index
    %c0_97 = arith.constant 0 : index
    %320 = vector.load %arg9[%319, %c0_97] : memref<64x1024xbf16, #tpu.memory_space<vmem>>, vector<8x512xbf16>
    %321 = arith.extf %320 : vector<8x512xbf16> to vector<8x512xf32>
    %322 = arith.index_cast %318 : i32 to index
    %c512_98 = arith.constant 512 : index
    %323 = vector.load %arg9[%322, %c512_98] : memref<64x1024xbf16, #tpu.memory_space<vmem>>, vector<8x512xbf16>
    %324 = arith.extf %323 : vector<8x512xbf16> to vector<8x512xf32>
    %325 = arith.addf %321, %311 : vector<8x512xf32>
    %326 = arith.addf %324, %313 : vector<8x512xf32>
    %327 = vector.extract_strided_slice %325 {offsets = [0, 0], sizes = [8, 384], strides = [1, 1]} : vector<8x512xf32> to vector<8x384xf32>
    %cst_99 = arith.constant 5.000000e-01 : f32
    %328 = vector.broadcast %cst_99 : f32 to vector<8x384xf32>
    %329 = arith.mulf %328, %327 : vector<8x384xf32>
    %330 = math.tanh %329 : vector<8x384xf32>
    %cst_100 = arith.constant 5.000000e-01 : f32
    %331 = vector.broadcast %cst_100 : f32 to vector<8x384xf32>
    %332 = arith.mulf %331, %330 : vector<8x384xf32>
    %cst_101 = arith.constant 5.000000e-01 : f32
    %333 = vector.broadcast %cst_101 : f32 to vector<8x384xf32>
    %334 = arith.addf %332, %333 : vector<8x384xf32>
    %335 = vector.extract_strided_slice %325 {offsets = [0, 384], sizes = [8, 128], strides = [1, 1]} : vector<8x512xf32> to vector<8x128xf32>
    %336 = math.tanh %335 : vector<8x128xf32>
    %337 = vector.extract_strided_slice %334 {offsets = [0, 0], sizes = [8, 128], strides = [1, 1]} : vector<8x384xf32> to vector<8x128xf32>
    %338 = vector.extract_strided_slice %334 {offsets = [0, 128], sizes = [8, 128], strides = [1, 1]} : vector<8x384xf32> to vector<8x128xf32>
    %339 = vector.extract_strided_slice %334 {offsets = [0, 256], sizes = [8, 128], strides = [1, 1]} : vector<8x384xf32> to vector<8x128xf32>
    %340 = arith.mulf %338, %280 : vector<8x128xf32>
    %341 = arith.mulf %337, %336 : vector<8x128xf32>
    %342 = arith.addf %340, %341 : vector<8x128xf32>
    %343 = math.tanh %342 : vector<8x128xf32>
    %344 = arith.mulf %339, %343 : vector<8x128xf32>
    %345 = vector.extract_strided_slice %326 {offsets = [0, 0], sizes = [8, 384], strides = [1, 1]} : vector<8x512xf32> to vector<8x384xf32>
    %cst_102 = arith.constant 5.000000e-01 : f32
    %346 = vector.broadcast %cst_102 : f32 to vector<8x384xf32>
    %347 = arith.mulf %346, %345 : vector<8x384xf32>
    %348 = math.tanh %347 : vector<8x384xf32>
    %cst_103 = arith.constant 5.000000e-01 : f32
    %349 = vector.broadcast %cst_103 : f32 to vector<8x384xf32>
    %350 = arith.mulf %349, %348 : vector<8x384xf32>
    %cst_104 = arith.constant 5.000000e-01 : f32
    %351 = vector.broadcast %cst_104 : f32 to vector<8x384xf32>
    %352 = arith.addf %350, %351 : vector<8x384xf32>
    %353 = vector.extract_strided_slice %326 {offsets = [0, 384], sizes = [8, 128], strides = [1, 1]} : vector<8x512xf32> to vector<8x128xf32>
    %354 = math.tanh %353 : vector<8x128xf32>
    %355 = vector.extract_strided_slice %352 {offsets = [0, 0], sizes = [8, 128], strides = [1, 1]} : vector<8x384xf32> to vector<8x128xf32>
    %356 = vector.extract_strided_slice %352 {offsets = [0, 128], sizes = [8, 128], strides = [1, 1]} : vector<8x384xf32> to vector<8x128xf32>
    %357 = vector.extract_strided_slice %352 {offsets = [0, 256], sizes = [8, 128], strides = [1, 1]} : vector<8x384xf32> to vector<8x128xf32>
    %358 = arith.mulf %356, %298 : vector<8x128xf32>
    %359 = arith.mulf %355, %354 : vector<8x128xf32>
    %360 = arith.addf %358, %359 : vector<8x128xf32>
    %361 = math.tanh %360 : vector<8x128xf32>
    %362 = arith.mulf %357, %361 : vector<8x128xf32>
    %c8_i32_105 = arith.constant 8 : i32
    %363 = arith.muli %c5_i32, %c8_i32_105 : i32
    %364 = tpu.assume_multiple %363, 8 : i32
    %c7_i32_106 = arith.constant 7 : i32
    %365 = arith.subi %c7_i32_106, %c5_i32 : i32
    %c8_i32_107 = arith.constant 8 : i32
    %366 = arith.muli %365, %c8_i32_107 : i32
    %367 = tpu.assume_multiple %366, 8 : i32
    %368 = arith.index_cast %364 : i32 to index
    %c0_108 = arith.constant 0 : index
    %369 = vector.load %arg10[%368, %c0_108] : memref<64x256xf32, #tpu.memory_space<vmem>>, vector<8x128xf32>
    tpu.vector_store %arg10[%368, %c0_108], %344 {strides = array<i32>} : memref<64x256xf32, #tpu.memory_space<vmem>>, vector<8x128xf32>,
    %370 = arith.index_cast %367 : i32 to index
    %c128_109 = arith.constant 128 : index
    %371 = vector.load %arg10[%370, %c128_109] : memref<64x256xf32, #tpu.memory_space<vmem>>, vector<8x128xf32>
    tpu.vector_store %arg10[%370, %c128_109], %362 {strides = array<i32>} : memref<64x256xf32, #tpu.memory_space<vmem>>, vector<8x128xf32>,
    %c6_i32 = arith.constant 6 : i32
    %372 = arith.truncf %344 : vector<8x128xf32> to vector<8x128xbf16>
    %cst_110 = arith.constant dense<0.000000e+00> : vector<8x512xf32>
    %373 = tpu.matmul %372, %9, %cst_110 {dimension_numbers = #tpu.dot_dimension_numbers<[1], [0], [0], [1], [0, 0, 1, 1], [], []>} : vector<8x128xbf16>, vector<128x512xbf16>, vector<8x512xf32> -> vector<8x512xf32>
    %374 = arith.truncf %362 : vector<8x128xf32> to vector<8x128xbf16>
    %cst_111 = arith.constant dense<0.000000e+00> : vector<8x512xf32>
    %375 = tpu.matmul %374, %10, %cst_111 {dimension_numbers = #tpu.dot_dimension_numbers<[1], [0], [0], [1], [0, 0, 1, 1], [], []>} : vector<8x128xbf16>, vector<128x512xbf16>, vector<8x512xf32> -> vector<8x512xf32>
    %c8_i32_112 = arith.constant 8 : i32
    %376 = arith.muli %c6_i32, %c8_i32_112 : i32
    %377 = tpu.assume_multiple %376, 8 : i32
    %c7_i32_113 = arith.constant 7 : i32
    %378 = arith.subi %c7_i32_113, %c6_i32 : i32
    %c8_i32_114 = arith.constant 8 : i32
    %379 = arith.muli %378, %c8_i32_114 : i32
    %380 = tpu.assume_multiple %379, 8 : i32
    %381 = arith.index_cast %377 : i32 to index
    %c0_115 = arith.constant 0 : index
    %382 = vector.load %arg9[%381, %c0_115] : memref<64x1024xbf16, #tpu.memory_space<vmem>>, vector<8x512xbf16>
    %383 = arith.extf %382 : vector<8x512xbf16> to vector<8x512xf32>
    %384 = arith.index_cast %380 : i32 to index
    %c512_116 = arith.constant 512 : index
    %385 = vector.load %arg9[%384, %c512_116] : memref<64x1024xbf16, #tpu.memory_space<vmem>>, vector<8x512xbf16>
    %386 = arith.extf %385 : vector<8x512xbf16> to vector<8x512xf32>
    %387 = arith.addf %383, %373 : vector<8x512xf32>
    %388 = arith.addf %386, %375 : vector<8x512xf32>
    %389 = vector.extract_strided_slice %387 {offsets = [0, 0], sizes = [8, 384], strides = [1, 1]} : vector<8x512xf32> to vector<8x384xf32>
    %cst_117 = arith.constant 5.000000e-01 : f32
    %390 = vector.broadcast %cst_117 : f32 to vector<8x384xf32>
    %391 = arith.mulf %390, %389 : vector<8x384xf32>
    %392 = math.tanh %391 : vector<8x384xf32>
    %cst_118 = arith.constant 5.000000e-01 : f32
    %393 = vector.broadcast %cst_118 : f32 to vector<8x384xf32>
    %394 = arith.mulf %393, %392 : vector<8x384xf32>
    %cst_119 = arith.constant 5.000000e-01 : f32
    %395 = vector.broadcast %cst_119 : f32 to vector<8x384xf32>
    %396 = arith.addf %394, %395 : vector<8x384xf32>
    %397 = vector.extract_strided_slice %387 {offsets = [0, 384], sizes = [8, 128], strides = [1, 1]} : vector<8x512xf32> to vector<8x128xf32>
    %398 = math.tanh %397 : vector<8x128xf32>
    %399 = vector.extract_strided_slice %396 {offsets = [0, 0], sizes = [8, 128], strides = [1, 1]} : vector<8x384xf32> to vector<8x128xf32>
    %400 = vector.extract_strided_slice %396 {offsets = [0, 128], sizes = [8, 128], strides = [1, 1]} : vector<8x384xf32> to vector<8x128xf32>
    %401 = vector.extract_strided_slice %396 {offsets = [0, 256], sizes = [8, 128], strides = [1, 1]} : vector<8x384xf32> to vector<8x128xf32>
    %402 = arith.mulf %400, %342 : vector<8x128xf32>
    %403 = arith.mulf %399, %398 : vector<8x128xf32>
    %404 = arith.addf %402, %403 : vector<8x128xf32>
    %405 = math.tanh %404 : vector<8x128xf32>
    %406 = arith.mulf %401, %405 : vector<8x128xf32>
    %407 = vector.extract_strided_slice %388 {offsets = [0, 0], sizes = [8, 384], strides = [1, 1]} : vector<8x512xf32> to vector<8x384xf32>
    %cst_120 = arith.constant 5.000000e-01 : f32
    %408 = vector.broadcast %cst_120 : f32 to vector<8x384xf32>
    %409 = arith.mulf %408, %407 : vector<8x384xf32>
    %410 = math.tanh %409 : vector<8x384xf32>
    %cst_121 = arith.constant 5.000000e-01 : f32
    %411 = vector.broadcast %cst_121 : f32 to vector<8x384xf32>
    %412 = arith.mulf %411, %410 : vector<8x384xf32>
    %cst_122 = arith.constant 5.000000e-01 : f32
    %413 = vector.broadcast %cst_122 : f32 to vector<8x384xf32>
    %414 = arith.addf %412, %413 : vector<8x384xf32>
    %415 = vector.extract_strided_slice %388 {offsets = [0, 384], sizes = [8, 128], strides = [1, 1]} : vector<8x512xf32> to vector<8x128xf32>
    %416 = math.tanh %415 : vector<8x128xf32>
    %417 = vector.extract_strided_slice %414 {offsets = [0, 0], sizes = [8, 128], strides = [1, 1]} : vector<8x384xf32> to vector<8x128xf32>
    %418 = vector.extract_strided_slice %414 {offsets = [0, 128], sizes = [8, 128], strides = [1, 1]} : vector<8x384xf32> to vector<8x128xf32>
    %419 = vector.extract_strided_slice %414 {offsets = [0, 256], sizes = [8, 128], strides = [1, 1]} : vector<8x384xf32> to vector<8x128xf32>
    %420 = arith.mulf %418, %360 : vector<8x128xf32>
    %421 = arith.mulf %417, %416 : vector<8x128xf32>
    %422 = arith.addf %420, %421 : vector<8x128xf32>
    %423 = math.tanh %422 : vector<8x128xf32>
    %424 = arith.mulf %419, %423 : vector<8x128xf32>
    %c8_i32_123 = arith.constant 8 : i32
    %425 = arith.muli %c6_i32, %c8_i32_123 : i32
    %426 = tpu.assume_multiple %425, 8 : i32
    %c7_i32_124 = arith.constant 7 : i32
    %427 = arith.subi %c7_i32_124, %c6_i32 : i32
    %c8_i32_125 = arith.constant 8 : i32
    %428 = arith.muli %427, %c8_i32_125 : i32
    %429 = tpu.assume_multiple %428, 8 : i32
    %430 = arith.index_cast %426 : i32 to index
    %c0_126 = arith.constant 0 : index
    %431 = vector.load %arg10[%430, %c0_126] : memref<64x256xf32, #tpu.memory_space<vmem>>, vector<8x128xf32>
    tpu.vector_store %arg10[%430, %c0_126], %406 {strides = array<i32>} : memref<64x256xf32, #tpu.memory_space<vmem>>, vector<8x128xf32>,
    %432 = arith.index_cast %429 : i32 to index
    %c128_127 = arith.constant 128 : index
    %433 = vector.load %arg10[%432, %c128_127] : memref<64x256xf32, #tpu.memory_space<vmem>>, vector<8x128xf32>
    tpu.vector_store %arg10[%432, %c128_127], %424 {strides = array<i32>} : memref<64x256xf32, #tpu.memory_space<vmem>>, vector<8x128xf32>,
    %c7_i32_128 = arith.constant 7 : i32
    %434 = arith.truncf %406 : vector<8x128xf32> to vector<8x128xbf16>
    %cst_129 = arith.constant dense<0.000000e+00> : vector<8x512xf32>
    %435 = tpu.matmul %434, %9, %cst_129 {dimension_numbers = #tpu.dot_dimension_numbers<[1], [0], [0], [1], [0, 0, 1, 1], [], []>} : vector<8x128xbf16>, vector<128x512xbf16>, vector<8x512xf32> -> vector<8x512xf32>
    %436 = arith.truncf %424 : vector<8x128xf32> to vector<8x128xbf16>
    %cst_130 = arith.constant dense<0.000000e+00> : vector<8x512xf32>
    %437 = tpu.matmul %436, %10, %cst_130 {dimension_numbers = #tpu.dot_dimension_numbers<[1], [0], [0], [1], [0, 0, 1, 1], [], []>} : vector<8x128xbf16>, vector<128x512xbf16>, vector<8x512xf32> -> vector<8x512xf32>
    %c8_i32_131 = arith.constant 8 : i32
    %438 = arith.muli %c7_i32_128, %c8_i32_131 : i32
    %439 = tpu.assume_multiple %438, 8 : i32
    %c7_i32_132 = arith.constant 7 : i32
    %440 = arith.subi %c7_i32_132, %c7_i32_128 : i32
    %c8_i32_133 = arith.constant 8 : i32
    %441 = arith.muli %440, %c8_i32_133 : i32
    %442 = tpu.assume_multiple %441, 8 : i32
    %443 = arith.index_cast %439 : i32 to index
    %c0_134 = arith.constant 0 : index
    %444 = vector.load %arg9[%443, %c0_134] : memref<64x1024xbf16, #tpu.memory_space<vmem>>, vector<8x512xbf16>
    %445 = arith.extf %444 : vector<8x512xbf16> to vector<8x512xf32>
    %446 = arith.index_cast %442 : i32 to index
    %c512_135 = arith.constant 512 : index
    %447 = vector.load %arg9[%446, %c512_135] : memref<64x1024xbf16, #tpu.memory_space<vmem>>, vector<8x512xbf16>
    %448 = arith.extf %447 : vector<8x512xbf16> to vector<8x512xf32>
    %449 = arith.addf %445, %435 : vector<8x512xf32>
    %450 = arith.addf %448, %437 : vector<8x512xf32>
    %451 = vector.extract_strided_slice %449 {offsets = [0, 0], sizes = [8, 384], strides = [1, 1]} : vector<8x512xf32> to vector<8x384xf32>
    %cst_136 = arith.constant 5.000000e-01 : f32
    %452 = vector.broadcast %cst_136 : f32 to vector<8x384xf32>
    %453 = arith.mulf %452, %451 : vector<8x384xf32>
    %454 = math.tanh %453 : vector<8x384xf32>
    %cst_137 = arith.constant 5.000000e-01 : f32
    %455 = vector.broadcast %cst_137 : f32 to vector<8x384xf32>
    %456 = arith.mulf %455, %454 : vector<8x384xf32>
    %cst_138 = arith.constant 5.000000e-01 : f32
    %457 = vector.broadcast %cst_138 : f32 to vector<8x384xf32>
    %458 = arith.addf %456, %457 : vector<8x384xf32>
    %459 = vector.extract_strided_slice %449 {offsets = [0, 384], sizes = [8, 128], strides = [1, 1]} : vector<8x512xf32> to vector<8x128xf32>
    %460 = math.tanh %459 : vector<8x128xf32>
    %461 = vector.extract_strided_slice %458 {offsets = [0, 0], sizes = [8, 128], strides = [1, 1]} : vector<8x384xf32> to vector<8x128xf32>
    %462 = vector.extract_strided_slice %458 {offsets = [0, 128], sizes = [8, 128], strides = [1, 1]} : vector<8x384xf32> to vector<8x128xf32>
    %463 = vector.extract_strided_slice %458 {offsets = [0, 256], sizes = [8, 128], strides = [1, 1]} : vector<8x384xf32> to vector<8x128xf32>
    %464 = arith.mulf %462, %404 : vector<8x128xf32>
    %465 = arith.mulf %461, %460 : vector<8x128xf32>
    %466 = arith.addf %464, %465 : vector<8x128xf32>
    %467 = math.tanh %466 : vector<8x128xf32>
    %468 = arith.mulf %463, %467 : vector<8x128xf32>
    %469 = vector.extract_strided_slice %450 {offsets = [0, 0], sizes = [8, 384], strides = [1, 1]} : vector<8x512xf32> to vector<8x384xf32>
    %cst_139 = arith.constant 5.000000e-01 : f32
    %470 = vector.broadcast %cst_139 : f32 to vector<8x384xf32>
    %471 = arith.mulf %470, %469 : vector<8x384xf32>
    %472 = math.tanh %471 : vector<8x384xf32>
    %cst_140 = arith.constant 5.000000e-01 : f32
    %473 = vector.broadcast %cst_140 : f32 to vector<8x384xf32>
    %474 = arith.mulf %473, %472 : vector<8x384xf32>
    %cst_141 = arith.constant 5.000000e-01 : f32
    %475 = vector.broadcast %cst_141 : f32 to vector<8x384xf32>
    %476 = arith.addf %474, %475 : vector<8x384xf32>
    %477 = vector.extract_strided_slice %450 {offsets = [0, 384], sizes = [8, 128], strides = [1, 1]} : vector<8x512xf32> to vector<8x128xf32>
    %478 = math.tanh %477 : vector<8x128xf32>
    %479 = vector.extract_strided_slice %476 {offsets = [0, 0], sizes = [8, 128], strides = [1, 1]} : vector<8x384xf32> to vector<8x128xf32>
    %480 = vector.extract_strided_slice %476 {offsets = [0, 128], sizes = [8, 128], strides = [1, 1]} : vector<8x384xf32> to vector<8x128xf32>
    %481 = vector.extract_strided_slice %476 {offsets = [0, 256], sizes = [8, 128], strides = [1, 1]} : vector<8x384xf32> to vector<8x128xf32>
    %482 = arith.mulf %480, %422 : vector<8x128xf32>
    %483 = arith.mulf %479, %478 : vector<8x128xf32>
    %484 = arith.addf %482, %483 : vector<8x128xf32>
    %485 = math.tanh %484 : vector<8x128xf32>
    %486 = arith.mulf %481, %485 : vector<8x128xf32>
    %c8_i32_142 = arith.constant 8 : i32
    %487 = arith.muli %c7_i32_128, %c8_i32_142 : i32
    %488 = tpu.assume_multiple %487, 8 : i32
    %c7_i32_143 = arith.constant 7 : i32
    %489 = arith.subi %c7_i32_143, %c7_i32_128 : i32
    %c8_i32_144 = arith.constant 8 : i32
    %490 = arith.muli %489, %c8_i32_144 : i32
    %491 = tpu.assume_multiple %490, 8 : i32
    %492 = arith.index_cast %488 : i32 to index
    %c0_145 = arith.constant 0 : index
    %493 = vector.load %arg10[%492, %c0_145] : memref<64x256xf32, #tpu.memory_space<vmem>>, vector<8x128xf32>
    tpu.vector_store %arg10[%492, %c0_145], %468 {strides = array<i32>} : memref<64x256xf32, #tpu.memory_space<vmem>>, vector<8x128xf32>,
    %494 = arith.index_cast %491 : i32 to index
    %c128_146 = arith.constant 128 : index
    %495 = vector.load %arg10[%494, %c128_146] : memref<64x256xf32, #tpu.memory_space<vmem>>, vector<8x128xf32>
    tpu.vector_store %arg10[%494, %c128_146], %486 {strides = array<i32>} : memref<64x256xf32, #tpu.memory_space<vmem>>, vector<8x128xf32>,
    %c7_i32_147 = arith.constant 7 : i32
    %c0_148 = arith.constant 0 : index
    %c0_149 = arith.constant 0 : index
    %496 = vector.load %arg10[%c0_148, %c0_149] : memref<64x256xf32, #tpu.memory_space<vmem>>, vector<64x256xf32>
    %497 = arith.truncf %496 : vector<64x256xf32> to vector<64x256xbf16>
    %c0_150 = arith.constant 0 : index
    %c0_151 = arith.constant 0 : index
    %498 = vector.load %arg6[%c0_150, %c0_151] : memref<256x128xbf16, #tpu.memory_space<vmem>>, vector<256x128xbf16>
    %cst_152 = arith.constant dense<0.000000e+00> : vector<64x128xf32>
    %499 = tpu.matmul %497, %498, %cst_152 {dimension_numbers = #tpu.dot_dimension_numbers<[1], [0], [0], [1], [0, 0, 1, 1], [], []>} : vector<64x256xbf16>, vector<256x128xbf16>, vector<64x128xf32> -> vector<64x128xf32>
    %c0_153 = arith.constant 0 : index
    %c0_154 = arith.constant 0 : index
    %500 = vector.load %arg7[%c0_153, %c0_154] : memref<1x128xf32, #tpu.memory_space<vmem>>, vector<1x128xf32>
    %501 = vector.broadcast %500 : vector<1x128xf32> to vector<64x128xf32>
    %502 = arith.addf %499, %501 : vector<64x128xf32>
    %503 = tpu.iota {dimensions = array<i32: 1>} : vector<64x128xi32>
    %c109_i32 = arith.constant 109 : i32
    %504 = vector.broadcast %c109_i32 : i32 to vector<64x128xi32>
    %505 = arith.cmpi slt, %503, %504 : vector<64x128xi32>
    %cst_155 = arith.constant -1.000000e+30 : f32
    %506 = vector.broadcast %cst_155 : f32 to vector<64x128xf32>
    %507 = arith.select %505, %502, %506 : vector<64x128xi1>, vector<64x128xf32>
    %cst_156 = arith.constant dense<0xFF800000> : vector<64xf32>
    %508 = vector.multi_reduction <maximumf>, %507, %cst_156 [1] : vector<64x128xf32> to vector<64xf32>
    %509 = vector.shape_cast %508 : vector<64xf32> to vector<64x1xf32>
    %510 = vector.broadcast %509 : vector<64x1xf32> to vector<64x128xf32>
    %511 = arith.subf %507, %510 : vector<64x128xf32>
    %512 = math.exp %511 : vector<64x128xf32>
    %cst_157 = arith.constant dense<0.000000e+00> : vector<64xf32>
    %513 = vector.multi_reduction <add>, %512, %cst_157 [1] : vector<64x128xf32> to vector<64xf32>
    %514 = vector.shape_cast %513 : vector<64xf32> to vector<64x1xf32>
    %515 = math.log %514 : vector<64x1xf32>
    %516 = vector.broadcast %515 : vector<64x1xf32> to vector<64x128xf32>
    %517 = arith.subf %511, %516 : vector<64x128xf32>
    %c0_158 = arith.constant 0 : index
    %c0_159 = arith.constant 0 : index
    %518 = vector.load %arg8[%c0_158, %c0_159] : memref<64x128xf32, #tpu.memory_space<vmem>>, vector<64x128xf32>
    tpu.vector_store %arg8[%c0_158, %c0_159], %517 {strides = array<i32>} : memref<64x128xf32, #tpu.memory_space<vmem>>, vector<64x128xf32>,
    return
  }
  func.func @transform_0(%arg0: i32) -> (i32, i32) {
    %c0_i32 = arith.constant 0 : i32
    %c0_i32_0 = arith.constant 0 : i32
    %c0_i32_1 = arith.constant 0 : i32
    return %c0_i32, %c0_i32_0 : i32, i32
  }
  func.func @transform_1(%arg0: i32) -> (i32, i32) {
    %c0_i32 = arith.constant 0 : i32
    %c0_i32_0 = arith.constant 0 : i32
    %c0_i32_1 = arith.constant 0 : i32
    return %c0_i32, %c0_i32_0 : i32, i32
  }
  func.func @transform_2(%arg0: i32) -> (i32, i32) {
    %c0_i32 = arith.constant 0 : i32
    %c0_i32_0 = arith.constant 0 : i32
    %c0_i32_1 = arith.constant 0 : i32
    return %c0_i32, %c0_i32_0 : i32, i32
  }
  func.func @transform_3(%arg0: i32) -> (i32, i32) {
    %c0_i32 = arith.constant 0 : i32
    %c0_i32_0 = arith.constant 0 : i32
    %c0_i32_1 = arith.constant 0 : i32
    return %c0_i32, %c0_i32_0 : i32, i32
  }
  func.func @transform_4(%arg0: i32) -> (i32, i32) {
    %c0_i32 = arith.constant 0 : i32
    %c0_i32_0 = arith.constant 0 : i32
    %c0_i32_1 = arith.constant 0 : i32
    return %c0_i32, %c0_i32_0 : i32, i32
  }
  func.func @transform_5(%arg0: i32) -> (i32, i32) {
    %c0_i32 = arith.constant 0 : i32
    %c0_i32_0 = arith.constant 0 : i32
    %c0_i32_1 = arith.constant 0 : i32
    return %c0_i32, %c0_i32_0 : i32, i32
  }
  func.func @transform_6(%arg0: i32) -> (i32, i32) {
    %c0_i32 = arith.constant 0 : i32
    %c0_i32_0 = arith.constant 0 : i32
    %c0_i32_1 = arith.constant 0 : i32
    return %c0_i32, %c0_i32_0 : i32, i32
  }
  func.func @transform_7(%arg0: i32) -> (i32, i32) {
    %c0_i32 = arith.constant 0 : i32
    %c0_i32_0 = arith.constant 0 : i32
    %c0_i32_1 = arith.constant 0 : i32
    return %c0_i32, %c0_i32_0 : i32, i32
  }
}

</mosaic_0001>

<bundles_post_ra>
// kernel: lstm_temporal_classification.2
= control target key start
LH: loop header
LB: loop body
LE: loop exit
PB: predicated region body
PF: predicated region fallthrough
CT: control target
= control target key end

     0   :  { %10 = vsyncpa [#allocation4], 0  ;;  %s3697_s0 = inlined_call_operand.vmem [shape: f32[64,4], index: 0, kind: input, shape index: {}]   ;;  %s3698_s1 = inlined_call_operand.hbm [shape: bf16[4,1024], index: 1, kind: input, shape index: {}]   ;;  %s3699_s2 = inlined_call_operand.hbm [shape: bf16[128,512], index: 2, kind: input, shape index: {}]   ;;  %s3700_s3 = inlined_call_operand.hbm [shape: bf16[128,512], index: 3, kind: input, shape index: {}]   ;;  %s3701_s4 = inlined_call_operand.vmem [shape: f32[1,1024], index: 4, kind: input, shape index: {}]   ;;  %s3702_s5 = inlined_call_operand.vmem [shape: f32[64,256], index: 5, kind: output, shape index: {}]  }
   0x1   :  { %11 = vsyncpa [#allocation6], 0  ;;  %s29_s20 = sshll.u32 %s3699_s2, 4  ;;  %s2694_s21 = smov [#allocation5]   ;;  %s30_s20 = int_to_ptr.hbm [resolvable:$true] %s29_s20 }
   0x2   :  { %s31_s22 = sshll.u32 %s2694_s21, 4  ;;  %s19_s25 = sshll.u32 %s3698_s1, 4  ;;  %s32_s22 = int_to_ptr.vmem [resolvable:$true] %s31_s22  ;;  %s20_s25 = int_to_ptr.hbm [resolvable:$true] %s19_s25 }
   0x3   :  { %s2695_s26 = smov 256   ;;  %s2696_s27 = smov 16  }
   0x4   :  { %37 = dma.hbm_to_vmem [thread:$0]  %s30_s20, 4096, %s32_s22, [#allocation6], %s2695_s26, %s2695_s26, %s2696_s27  }
   0x5   :  { %s2697_s28 = smov [#allocation3]   ;;  %s42_s7 = sshll.u32 %s3700_s3, 4  ;;  %s43_s7 = int_to_ptr.hbm [resolvable:$true] %s42_s7 }
   0x6   :  { %s21_s29 = sshll.u32 %s2697_s28, 4  ;;  %s2698_s2 = smov [#allocation7]   ;;  %s22_s29 = int_to_ptr.vmem [resolvable:$true] %s21_s29 }
   0x7   :  { %24 = dma.hbm_to_vmem [thread:$0]  %s20_s25, 256, %s22_s29, [#allocation4]  }
   0x8   :  { %s44_s8 = sshll.u32 %s2698_s2, 4  ;;  %s45_s8 = int_to_ptr.vmem [resolvable:$true] %s44_s8 }
   0x9   :  { %50 = dma.hbm_to_vmem [thread:$0]  %s43_s7, 4096, %s45_s8, [#allocation6], %s2695_s26, %s2695_s26, %s2696_s27  }
   0xa   :  { %2690 = dma.done.wait [#allocation4], 256  }
   0xb   :  { %2691 = vsyncadd [#allocation4], 4294967040 }
   0xc   :  { %2692 = dma.done.wait [#allocation6], 8192  }
   0xd   :  { %2693 = vsyncadd [#allocation6], 4294959104  ;;  %v78_v0 = vld [vmem:[#allocation3] sm:$0xff]  ;;  %v79_v1 = vld [vmem:[#allocation3 + $0x8] sm:$0xff]  ;;  %vm124_vm0 = vcmask 1041408   ;;  %vm111_vm1 = vcmask 31744  }
   0xe   :  { %99 = vst [vmem:[#allocation1] ss:$4 sm:$0xff] %v78_v0  ;;  %v66_v2 = vld [vmem:[%s3697_s0] sm:$0xff]  ;;  %v67_v3 = vld [vmem:[%s3697_s0 + $0x8] sm:$0xff]  ;;  %v68_v21 = vld [vmem:[%s3697_s0 + $0x10] sm:$0xff] }
   0xf   :  { %102 = vst [vmem:[#allocation1 + $0x20] ss:$4 sm:$0xff] %v79_v1  ;;  %v74_v9 = vpack.c.bf16 %v67_v3, %v66_v2  ;;  %v69_v22 = vld [vmem:[%s3697_s0 + $0x18] sm:$0xff]  ;;  %v70_v24 = vld [vmem:[%s3697_s0 + $0x20] sm:$0xff]  ;;  %v71_v25 = vld [vmem:[%s3697_s0 + $0x28] sm:$0xff] }
  0x10   :  { %v75_v23 = vpack.c.bf16 %v69_v22, %v68_v21  ;;  %v76_v26 = vpack.c.bf16 %v71_v25, %v70_v24  ;;  %v72_v27 = vld [vmem:[%s3697_s0 + $0x30] sm:$0xff]  ;;  %v73_v28 = vld [vmem:[%s3697_s0 + $0x38] sm:$0xff]  ;;  %v2419_v31 = vld [vmem:[#allocation5 + $0xec] sm:$0xf0] }
  0x11   :  { %v2782_v29 = vpack.c.bf16 %v73_v28, %v72_v27  ;;  %v2234_v30 = vld [vmem:[#allocation5 + $0xe0] sm:$0xf]  ;;  %v2417_v32 = vld [vmem:[#allocation5 + $0xe4] sm:$0xf]  ;;  %v2236_v34 = vld [vmem:[#allocation5 + $0xf0] sm:$0xf0] }
  0x12   :  { %v2803_v33 = vor.u32 %v2419_v31, %v2234_v30  ;;  %v2242_v35 = vld [vmem:[#allocation5 + $0xe8] sm:$0xf]  ;;  %v2420_v36 = vld [vmem:[#allocation5 + $0xf4] sm:$0xf0]  ;;  %v2806_v37 = vor.u32 %v2417_v32, %v2236_v34  ;;  %v2418_v39 = vld [vmem:[#allocation5 + $0xec] sm:$0xf] }
  0x13   :  { %v2808_v38 = vor.u32 %v2420_v36, %v2242_v35  ;;  %v2244_v40 = vld [vmem:[#allocation5 + $0xf8] sm:$0xf0]  ;;  %v2218_v42 = vld [vmem:[#allocation5 + $0xc0] sm:$0xf]  ;;  %v2415_v43 = vld [vmem:[#allocation5 + $0xcc] sm:$0xf0] }
  0x14   :  { %v2811_v41 = vor.u32 %v2418_v39, %v2244_v40  ;;  %v2816_v44 = vor.u32 %v2415_v43, %v2218_v42  ;;  %v2413_v45 = vld [vmem:[#allocation5 + $0xc4] sm:$0xf]  ;;  %v2220_v46 = vld [vmem:[#allocation5 + $0xd0] sm:$0xf0]  ;;  %v2226_v47 = vld [vmem:[#allocation5 + $0xc8] sm:$0xf] }
  0x15   :  { %v103_v4 = vld.sshfl [vmem:[#allocation1] sm:$0xff pattern:$0x73625140]  ;;  %v104_v5 = vld.sshfl [vmem:[#allocation1 + $0x8] sm:$0xff pattern:$0x73625140]  ;;  %v2818_v48 = vor.u32 %v2413_v45, %v2220_v46 }
  0x16   :  { %v125_v6 = vsel %vm124_vm0, %v103_v4, 0  ;;  %v127_v7 = vsel %vm124_vm0, %v104_v5, 0  ;;  %v105_v8 = vld.sshfl [vmem:[#allocation1 + $0x10] sm:$0xff pattern:$0x73625140]  ;;  %v2880_v40 = vld [vmem:[%s3701_s4] sm:$0xff] }
  0x17   :  { %148 = vmatpush.bf16.msra.mxu0 %v125_v6  ;;  %177 = vmatpush.bf16.msra.mxu1 %v127_v7  ;;  %v129_v10 = vsel %vm124_vm0, %v105_v8, 0  ;;  %v106_v11 = vld.sshfl [vmem:[#allocation1 + $0x18] sm:$0xff pattern:$0x73625140]  ;;  %v2416_v49 = vld [vmem:[#allocation5 + $0xd4] sm:$0xf0] }
  0x18   :  { %206 = vmatpush.bf16.msra.mxu2 %v129_v10  ;;  %v131_v12 = vsel %vm124_vm0, %v106_v11, 0  ;;  %v107_v13 = vld.sshfl [vmem:[#allocation1 + $0x20] sm:$0xff pattern:$0x73625140]  ;;  %v2228_v51 = vld [vmem:[#allocation5 + $0xd8] sm:$0xf0]  ;;  %v2821_v52 = vor.u32 %v2416_v49, %v2226_v47 }
  0x19   :  { %235 = vmatpush.bf16.msra.mxu3 %v131_v12  ;;  %v133_v14 = vsel %vm124_vm0, %v107_v13, 0  ;;  %v108_v15 = vld.sshfl [vmem:[#allocation1 + $0x28] sm:$0xff pattern:$0x73625140]  ;;  %v2414_v50 = vld [vmem:[#allocation5 + $0xcc] sm:$0xf] }
  0x1a   :  { %2087 = vmatmul.msk.bf16.vlgmr.msra.gmra.mxu0 %vm111_vm1, %v74_v9  ;;  %2091 = vmatmul.msk.bf16.vlgmr.msra.gmra.mxu1 %vm111_vm1, %v74_v9  ;;  %v135_v16 = vsel %vm124_vm0, %v108_v15, 0  ;;  %v109_v17 = vld.sshfl [vmem:[#allocation1 + $0x30] sm:$0xff pattern:$0x73625140]  ;;  %v2823_v53 = vor.u32 %v2414_v50, %v2228_v51  ;;  %v2202_v54 = vld [vmem:[#allocation5 + $0xa0] sm:$0xf] }
  0x1b   :  { %2095 = vmatmul.msk.bf16.vlgmr.msra.gmra.mxu2 %vm111_vm1, %v74_v9  ;;  %264 = vmatpush.bf16.msrb.mxu0 %v133_v14  ;;  %v137_v18 = vsel %vm124_vm0, %v109_v17, 0  ;;  %v110_v19 = vld.sshfl [vmem:[#allocation1 + $0x38] sm:$0xff pattern:$0x73625140]  ;;  %v2411_v55 = vld [vmem:[#allocation5 + $0xac] sm:$0xf0] }
  0x1c   :  { %2099 = vmatmul.msk.bf16.vlgmr.msra.gmra.mxu3 %vm111_vm1, %v74_v9  ;;  %293 = vmatpush.bf16.msrb.mxu1 %v135_v16  ;;  %v139_v20 = vsel %vm124_vm0, %v110_v19, 0  ;;  %v2409_v56 = vld [vmem:[#allocation5 + $0xa4] sm:$0xf]  ;;  %v2828_v57 = vor.u32 %v2411_v55, %v2202_v54  ;;  %v2204_v58 = vld [vmem:[#allocation5 + $0xb0] sm:$0xf0]  ;;  %v2890_v54 = vperm.slane %v2880_v40, 0 }
  0x1d   :  { %322 = vmatpush.bf16.msrb.mxu2 %v137_v18  ;;  %351 = vmatpush.bf16.msrb.mxu3 %v139_v20  ;;  %v2210_v59 = vld [vmem:[#allocation5 + $0xa8] sm:$0xf]  ;;  %v2412_v60 = vld [vmem:[#allocation5 + $0xb4] sm:$0xf0]  ;;  %v2830_v61 = vor.u32 %v2409_v56, %v2204_v58  ;;  %v2410_v63 = vld [vmem:[#allocation5 + $0xac] sm:$0xf] }
  0x1e   :  { %v2832_v62 = vor.u32 %v2412_v60, %v2210_v59  ;;  %v2212_v0 = vld [vmem:[#allocation5 + $0xb8] sm:$0xf0]  ;;  %v2186_v2 = vld [vmem:[#allocation5 + $0x80] sm:$0xf]  ;;  %v2407_v3 = vld [vmem:[#allocation5 + $0x8c] sm:$0xf0] }
  0x1f   :  { %724 = vmatpush.bf16.msra.mxu0 %v2803_v33  ;;  %3816 = vst [vmem:[#allocation10_spill] sm:$0xff] %v2830_v61  ;;  %v2835_v1 = vor.u32 %v2410_v63, %v2212_v0  ;;  %v2405_v4 = vld [vmem:[#allocation5 + $0x84] sm:$0xf]  ;;  %v2840_v5 = vor.u32 %v2407_v3, %v2186_v2  ;;  %v2188_v6 = vld [vmem:[#allocation5 + $0x90] sm:$0xf0]  ;;  %v2893_v55 = vperm.slane %v2880_v40, 1 }
  0x20   :  { %737 = vmatpush.bf16.msra.mxu1 %v2806_v37  ;;  %3817 = vst [vmem:[#allocation11_spill] sm:$0xff] %v2832_v62  ;;  %v2194_v7 = vld [vmem:[#allocation5 + $0x88] sm:$0xf]  ;;  %v2408_v8 = vld [vmem:[#allocation5 + $0x94] sm:$0xf0] }
  0x21   :  { %750 = vmatpush.bf16.msra.mxu2 %v2808_v38  ;;  %763 = vmatpush.bf16.msra.mxu3 %v2811_v41  ;;  %3818 = vst [vmem:[#allocation12_spill] sm:$0xff] %v2835_v1  ;;  %v2844_v10 = vor.u32 %v2408_v8, %v2194_v7  ;;  %v2406_v11 = vld [vmem:[#allocation5 + $0x8c] sm:$0xf]  ;;  %v2196_v12 = vld [vmem:[#allocation5 + $0x98] sm:$0xf0] }
  0x22   :  { %3819 = vst [vmem:[#allocation13_spill] sm:$0xff] %v2840_v5  ;;  %v2847_v13 = vor.u32 %v2406_v11, %v2196_v12  ;;  %v2170_v14 = vld [vmem:[#allocation5 + $0x60] sm:$0xf]  ;;  %v2403_v15 = vld [vmem:[#allocation5 + $0x6c] sm:$0xf0] }
  0x23   :  { %725 = vmatpush.bf16.msra.mxu0 %v2816_v44  ;;  %3821 = vst [vmem:[#allocation15_spill] sm:$0xff] %v2844_v10  ;;  %v2401_v16 = vld [vmem:[#allocation5 + $0x64] sm:$0xf]  ;;  %v2856_v17 = vor.u32 %v2403_v15, %v2170_v14  ;;  %v2172_v18 = vld [vmem:[#allocation5 + $0x70] sm:$0xf0] }
  0x24   :  { %738 = vmatpush.bf16.msra.mxu1 %v2818_v48  ;;  %3822 = vst [vmem:[#allocation16_spill] sm:$0xff] %v2847_v13  ;;  %v2178_v19 = vld [vmem:[#allocation5 + $0x68] sm:$0xf]  ;;  %v2404_v20 = vld [vmem:[#allocation5 + $0x74] sm:$0xf0]  ;;  %v2861_v21 = vor.u32 %v2401_v16, %v2172_v18 }
  0x25   :  { %751 = vmatpush.bf16.msra.mxu2 %v2821_v52  ;;  %764 = vmatpush.bf16.msra.mxu3 %v2823_v53  ;;  %3823 = vst [vmem:[#allocation17_spill] sm:$0xff] %v2856_v17  ;;  %v2863_v22 = vor.u32 %v2404_v20, %v2178_v19  ;;  %v2180_v24 = vld [vmem:[#allocation5 + $0x78] sm:$0xf0]  ;;  %v2399_v27 = vld [vmem:[#allocation5 + $0x4c] sm:$0xf0] }
  0x26   :  { %3824 = vst [vmem:[#allocation18_spill] sm:$0xff] %v2861_v21  ;;  %v2397_v28 = vld [vmem:[#allocation5 + $0x44] sm:$0xf]  ;;  %v2156_v30 = vld [vmem:[#allocation5 + $0x50] sm:$0xf0] }
  0x27   :  { %726 = vmatpush.bf16.msra.mxu0 %v2828_v57  ;;  %3825 = vst [vmem:[#allocation19_spill] sm:$0xff] %v2863_v22  ;;  %v2162_v31 = vld [vmem:[#allocation5 + $0x48] sm:$0xf]  ;;  %v2400_v32 = vld [vmem:[#allocation5 + $0x54] sm:$0xf0]  ;;  %v2873_v34 = vor.u32 %v2397_v28, %v2156_v30  ;;  %v2923_v30 = vperm.slane %v2880_v40, 3 }
  0x28   :  { %739 = vmatpush.bf16.msra.mxu1 %v2830_v61  ;;  %v2875_v35 = vor.u32 %v2400_v32, %v2162_v31  ;;  %v2398_v36 = vld [vmem:[#allocation5 + $0x4c] sm:$0xf]  ;;  %v2164_v39 = vld [vmem:[#allocation5 + $0x58] sm:$0xf0]  ;;  %v2138_v43 = vld [vmem:[#allocation5 + $0x20] sm:$0xf] }
  0x29   :  { %752 = vmatpush.bf16.msra.mxu2 %v2832_v62  ;;  %765 = vmatpush.bf16.msra.mxu3 %v2835_v1  ;;  %3828 = vst [vmem:[#allocation22_spill] sm:$0xff] %v2873_v34  ;;  %v2884_v42 = vor.u32 %v2398_v36, %v2164_v39  ;;  %v2395_v45 = vld [vmem:[#allocation5 + $0x2c] sm:$0xf0]  ;;  %v2393_v46 = vld [vmem:[#allocation5 + $0x24] sm:$0xf] }
  0x2a   :  { %2088 = vmatmul.msk.bf16.gmra.mxu0 %vm111_vm1, %v75_v23  ;;  %2092 = vmatmul.msk.bf16.gmra.mxu1 %vm111_vm1, %v75_v23  ;;  %3829 = vst [vmem:[#allocation23_spill] sm:$0xff] %v2875_v35  ;;  %v2887_v47 = vor.u32 %v2395_v45, %v2138_v43  ;;  %v2140_v49 = vld [vmem:[#allocation5 + $0x30] sm:$0xf0]  ;;  %v2146_v50 = vld [vmem:[#allocation5 + $0x28] sm:$0xf] }
  0x2b   :  { %2096 = vmatmul.msk.bf16.gmra.mxu2 %vm111_vm1, %v75_v23  ;;  %727 = vmatpush.bf16.msra.mxu0 %v2840_v5  ;;  %3830 = vst [vmem:[#allocation24_spill] sm:$0xff] %v2884_v42  ;;  %v2396_v51 = vld [vmem:[#allocation5 + $0x34] sm:$0xf0]  ;;  %v2896_v56 = vor.u32 %v2393_v46, %v2140_v49  ;;  %v2394_v59 = vld [vmem:[#allocation5 + $0x2c] sm:$0xf] }
  0x2c   :  { %2100 = vmatmul.msk.bf16.gmra.mxu3 %vm111_vm1, %v75_v23  ;;  %3831 = vst [vmem:[#allocation25_spill] sm:$0xff] %v2887_v47  ;;  %v2898_v58 = vor.u32 %v2396_v51, %v2146_v50  ;;  %v2148_v60 = vld [vmem:[#allocation5 + $0x38] sm:$0xf0]  ;;  %v2122_v0 = vld [vmem:[#allocation5] sm:$0xf] }
  0x2d   :  { %753 = vmatpush.bf16.msra.mxu2 %v2844_v10  ;;  %766 = vmatpush.bf16.msra.mxu3 %v2847_v13  ;;  %3832 = vst [vmem:[#allocation26_spill] sm:$0xff] %v2896_v56  ;;  %v2902_v63 = vor.u32 %v2394_v59, %v2148_v60  ;;  %v2391_v2 = vld [vmem:[#allocation5 + $0xc] sm:$0xf0]  ;;  %v2389_v3 = vld [vmem:[#allocation5 + $0x4] sm:$0xf] }
  0x2e   :  { %3833 = vst [vmem:[#allocation27_spill] sm:$0xff] %v2898_v58  ;;  %v2905_v7 = vor.u32 %v2391_v2, %v2122_v0  ;;  %v2124_v8 = vld [vmem:[#allocation5 + $0x10] sm:$0xf0]  ;;  %v2130_v11 = vld [vmem:[#allocation5 + $0x8] sm:$0xf] }
  0x2f   :  { %728 = vmatpush.bf16.msra.mxu0 %v2856_v17  ;;  %3834 = vst [vmem:[#allocation28_spill] sm:$0xff] %v2902_v63  ;;  %v2392_v12 = vld [vmem:[#allocation5 + $0x14] sm:$0xf0]  ;;  %v2910_v16 = vor.u32 %v2389_v3, %v2124_v8  ;;  %v2390_v19 = vld [vmem:[#allocation5 + $0xc] sm:$0xf] }
  0x30   :  { %3835 = vst [vmem:[#allocation29_spill] sm:$0xff] %v2905_v7  ;;  %v2912_v18 = vor.u32 %v2392_v12, %v2130_v11  ;;  %v2132_v20 = vld [vmem:[#allocation5 + $0x18] sm:$0xf0] }
  0x31   :  { %754 = vmatpush.bf16.msra.mxu2 %v2863_v22  ;;  %3836 = vst [vmem:[#allocation30_spill] sm:$0xff] %v2910_v16 }
  0x32   :  { %3837 = vst [vmem:[#allocation31_spill] sm:$0xff] %v2912_v18 }
  0x35   :  { %755 = vmatpush.bf16.msra.mxu2 %v2875_v35 }
  0x39   :  { %756 = vmatpush.bf16.msra.mxu2 %v2898_v58 }
  0x3a   :  { %2089 = vmatmul.msk.bf16.gmra.mxu0 %vm111_vm1, %v76_v26  ;;  %2093 = vmatmul.msk.bf16.gmra.mxu1 %vm111_vm1, %v76_v26 }
  0x3b   :  { %2097 = vmatmul.msk.bf16.gmra.mxu2 %vm111_vm1, %v76_v26 }
  0x3c   :  { %2101 = vmatmul.msk.bf16.gmra.mxu3 %vm111_vm1, %v76_v26 }
  0x3d   :  { %757 = vmatpush.bf16.msra.mxu2 %v2912_v18 }
  0x4a   :  { %2090 = vmatmul.msk.bf16.gmra.mxu0 %vm111_vm1, %v2782_v29  ;;  %2094 = vmatmul.msk.bf16.gmra.mxu1 %vm111_vm1, %v2782_v29 }
  0x4b   :  { %2098 = vmatmul.msk.bf16.gmra.mxu2 %vm111_vm1, %v2782_v29 }
  0x4c   :  { %2102 = vmatmul.msk.bf16.gmra.mxu3 %vm111_vm1, %v2782_v29 }
  0x5a   :  { %2103 = vmatmul.msk.bf16.vlgmr.msrb.gmra.mxu0 %vm111_vm1, %v74_v9  ;;  %2107 = vmatmul.msk.bf16.vlgmr.msrb.gmra.mxu1 %vm111_vm1, %v74_v9 }
  0x5b   :  { %2111 = vmatmul.msk.bf16.vlgmr.msrb.gmra.mxu2 %vm111_vm1, %v74_v9 }
  0x5c   :  { %2115 = vmatmul.msk.bf16.vlgmr.msrb.gmra.mxu3 %vm111_vm1, %v74_v9  ;;  %v2842_v9 = vor.u32 %v2405_v4, %v2188_v6 }
  0x5e   :  { %3820 = vst [vmem:[#allocation14_spill] sm:$0xff] %v2842_v9  ;;  %740 = vmatpush.bf16.msra.mxu1 %v2842_v9 }
  0x62   :  { %741 = vmatpush.bf16.msra.mxu1 %v2861_v21 }
  0x66   :  { %742 = vmatpush.bf16.msra.mxu1 %v2873_v34 }
  0x6a   :  { %2104 = vmatmul.msk.bf16.gmra.mxu0 %vm111_vm1, %v75_v23  ;;  %2108 = vmatmul.msk.bf16.gmra.mxu1 %vm111_vm1, %v75_v23 }
  0x6b   :  { %2112 = vmatmul.msk.bf16.gmra.mxu2 %vm111_vm1, %v75_v23  ;;  %743 = vmatpush.bf16.msra.mxu1 %v2896_v56 }
  0x6c   :  { %2116 = vmatmul.msk.bf16.gmra.mxu3 %vm111_vm1, %v75_v23  ;;  %v2402_v23 = vld [vmem:[#allocation5 + $0x6c] sm:$0xf] }
  0x6d   :  { %v2867_v25 = vor.u32 %v2402_v23, %v2180_v24  ;;  %v2916_v23 = vor.u32 %v2390_v19, %v2132_v20 }
  0x6f   :  { %3826 = vst [vmem:[#allocation20_spill] sm:$0xff] %v2867_v25  ;;  %767 = vmatpush.bf16.msra.mxu3 %v2867_v25  ;;  %744 = vmatpush.bf16.msra.mxu1 %v2910_v16 }
  0x70   :  { %3838 = vst [vmem:[#allocation32_spill] sm:$0xff] %v2916_v23 }
  0x73   :  { %768 = vmatpush.bf16.msra.mxu3 %v2884_v42 }
  0x77   :  { %769 = vmatpush.bf16.msra.mxu3 %v2902_v63 }
  0x7a   :  { %2105 = vmatmul.msk.bf16.gmra.mxu0 %vm111_vm1, %v76_v26  ;;  %2109 = vmatmul.msk.bf16.gmra.mxu1 %vm111_vm1, %v76_v26 }
  0x7b   :  { %2113 = vmatmul.msk.bf16.gmra.mxu2 %vm111_vm1, %v76_v26  ;;  %770 = vmatpush.bf16.msra.mxu3 %v2916_v23 }
  0x7c   :  { %2117 = vmatmul.msk.bf16.gmra.mxu3 %vm111_vm1, %v76_v26  ;;  %v2154_v26 = vld [vmem:[#allocation5 + $0x40] sm:$0xf] }
  0x8a   :  { %2106 = vmatmul.msk.bf16.gmra.mxu0 %vm111_vm1, %v2782_v29  ;;  %2110 = vmatmul.msk.bf16.gmra.mxu1 %vm111_vm1, %v2782_v29 }
  0x8b   :  { %2114 = vmatmul.msk.bf16.gmra.mxu2 %vm111_vm1, %v2782_v29 }
  0x8c   :  { %2118 = vmatmul.msk.bf16.gmra.mxu3 %vm111_vm1, %v2782_v29  ;;  %v2870_v29 = vor.u32 %v2399_v27, %v2154_v26  ;;  %v2919_v26 = vperm.slane %v2880_v40, 2 }
  0x8e   :  { %3827 = vst [vmem:[#allocation21_spill] sm:$0xff] %v2870_v29  ;;  %729 = vmatpush.bf16.msra.mxu0 %v2870_v29 }
  0x92   :  { %730 = vmatpush.bf16.msra.mxu0 %v2887_v47 }
  0x96   :  { %731 = vmatpush.bf16.msra.mxu0 %v2905_v7 }
  0x97   :  { %v150_v4 = vpop.f32.mrf.mxu0  ;;  %v179_v6 = vpop.f32.mrf.mxu1 }
  0x98   :  { %v151_v14 = vadd.f32 %v150_v4, %v2890_v54  ;;  %v180_v15 = vadd.f32 %v179_v6, %v2893_v55 }
  0x9a   :  { %v373_v24 = vpack.c.bf16 %v180_v15, %v151_v14 }
  0x9c   :  { %v506_v27 = vunpack.c.l.bf16 %v373_v24  ;;  %v507_v28 = vunpack.c.h.bf16 %v373_v24 }
  0x9e   :  { %v519_v31 = vmul.f32 0.5, %v506_v27  ;;  %v520_v32 = vmul.f32 0.5, %v507_v28  ;;  %v208_v36 = vpop.f32.mrf.mxu2 }
  0x9f   :  { %v209_v39 = vadd.f32 %v208_v36, %v2919_v26  ;;  %v237_v43 = vpop.f32.mrf.mxu3  ;;  %v152_v45 = vpop.f32.mrf.mxu0 }
  0xa0   :  { %2458 = vtanh.f32 %v519_v31  ;;  %v238_v46 = vadd.f32 %v237_v43, %v2923_v30  ;;  %v153_v49 = vadd.f32 %v152_v45, %v2890_v54  ;;  %v181_v50 = vpop.f32.mrf.mxu1 }
  0xa1   :  { %2460 = vtanh.f32 %v520_v32  ;;  %v182_v51 = vadd.f32 %v181_v50, %v2893_v55 }
  0xa2   :  { %v374_v59 = vpack.c.bf16 %v238_v46, %v209_v39 }
  0xa3   :  { %v2931_v60 = vpack.c.bf16 %v182_v51, %v153_v49 }
  0xa4   :  { %v508_v0 = vunpack.c.l.bf16 %v374_v59  ;;  %v509_v2 = vunpack.c.h.bf16 %v374_v59 }
  0xa6   :  { %v2459_v3 = vpop.eup %2458  ;;  %v521_v4 = vmul.f32 0.5, %v508_v0  ;;  %2462 = vtanh.f32 %v509_v2  ;;  %v210_v6 = vpop.f32.mrf.mxu2 }
  0xa7   :  { %v2461_v8 = vpop.eup %2460  ;;  %v525_v11 = vmul.f32 0.5, %v2459_v3  ;;  %v211_v12 = vadd.f32 %v210_v6, %v2919_v26  ;;  %v239_v14 = vpop.f32.mrf.mxu3 }
  0xa8   :  { %v155_v15 = vpop.f32.mrf.mxu0  ;;  %v526_v19 = vmul.f32 0.5, %v2461_v8  ;;  %v240_v20 = vadd.f32 %v239_v14, %v2923_v30  ;;  %v184_v27 = vpop.f32.mrf.mxu1  ;;  %2464 = vtanh.f32 %v521_v4 }
  0xa9   :  { %v156_v24 = vadd.f32 %v155_v15, %v2890_v54  ;;  %v528_v28 = vadd.f32 0.5, %v525_v11  ;;  %v185_v31 = vadd.f32 %v184_v27, %v2893_v55 }
  0xaa   :  { %v529_v32 = vadd.f32 0.5, %v526_v19  ;;  %v2937_v36 = vpack.c.bf16 %v240_v20, %v211_v12 }
  0xab   :  { %v2939_v39 = vpack.c.bf16 %v185_v31, %v156_v24 }
  0xac   :  { %3839 = vst [vmem:[#allocation33_spill] sm:$0xff] %v2937_v36  ;;  %v2463_v43 = vpop.eup %2462  ;;  %v532_v45 = vmul.f32 0.0, %v529_v32 }
  0xad   :  { %3840 = vst [vmem:[#allocation34_spill] sm:$0xff] %v2939_v39  ;;  %v533_v46 = vmul.f32 %v2463_v43, %v528_v28  ;;  %v2440_v39 = vld [vmem:[#allocation7 + $0x94] sm:$0xf0] }
  0xae   :  { %v213_v49 = vpop.f32.mrf.mxu2  ;;  %v2465_v50 = vpop.eup %2464 }
  0xaf   :  { %v2941_v51 = vadd.f32 %v533_v46, %v532_v45  ;;  %v214_v59 = vadd.f32 %v213_v49, %v2919_v26  ;;  %v242_v0 = vpop.f32.mrf.mxu3  ;;  %v527_v11 = vmul.f32 0.5, %v2465_v50 }
  0xb0   :  { %v157_v2 = vpop.f32.mrf.mxu0  ;;  %v243_v3 = vadd.f32 %v242_v0, %v2923_v30  ;;  %v186_v6 = vpop.f32.mrf.mxu1 }
  0xb1   :  { %3841 = vst [vmem:[#allocation35_spill] sm:$0xff] %v2941_v51  ;;  %v158_v4 = vadd.f32 %v157_v2, %v2890_v54  ;;  %2466 = vtanh.f32 %v2941_v51  ;;  %v187_v8 = vadd.f32 %v186_v6, %v2893_v55  ;;  %v530_v15 = vadd.f32 0.5, %v527_v11 }
  0xb2   :  { %v2948_v12 = vpack.c.bf16 %v243_v3, %v214_v59 }
  0xb3   :  { %v2950_v14 = vpack.c.bf16 %v187_v8, %v158_v4 }
  0xb4   :  { %3842 = vst [vmem:[#allocation36_spill] sm:$0xff] %v2948_v12 }
  0xb5   :  { %3843 = vst [vmem:[#allocation37_spill] sm:$0xff] %v2950_v14 }
  0xb6   :  { %v215_v19 = vpop.f32.mrf.mxu2 }
  0xb7   :  { %v2467_v20 = vpop.eup %2466  ;;  %v216_v24 = vadd.f32 %v215_v19, %v2919_v26  ;;  %v244_v27 = vpop.f32.mrf.mxu3 }
  0xb8   :  { %v160_v28 = vpop.f32.mrf.mxu0  ;;  %v245_v31 = vadd.f32 %v244_v27, %v2923_v30  ;;  %v189_v43 = vpop.f32.mrf.mxu1  ;;  %v536_v45 = vmul.f32 %v2467_v20, %v530_v15 }
  0xb9   :  { %v161_v32 = vadd.f32 %v160_v28, %v2890_v54  ;;  %v190_v46 = vadd.f32 %v189_v43, %v2893_v55 }
  0xba   :  { %v2956_v49 = vpack.c.bf16 %v245_v31, %v216_v24  ;;  %558 = vst [vmem:[%s3702_s5] sm:$0xff] %v536_v45  ;;  %v563_v50 = vpack.c.bf16 %v536_v45, %v536_v45 }
  0xbb   :  { %v2961_v59 = vpack.c.bf16 %v190_v46, %v161_v32 }
  0xbc   :  { %3844 = vst [vmem:[#allocation38_spill] sm:$0xff] %v2956_v49  ;;  %732 = vmatmul.bf16.vlgmr.msra.gmra.mxu0 %v563_v50  ;;  %745 = vmatmul.bf16.vlgmr.msra.gmra.mxu1 %v563_v50  ;;  %v2356_v49 = vld [vmem:[#allocation7 + $0xd8] sm:$0xf0] }
  0xbd   :  { %3845 = vst [vmem:[#allocation39_spill] sm:$0xff] %v2961_v59  ;;  %758 = vmatmul.bf16.vlgmr.msra.gmra.mxu2 %v563_v50  ;;  %771 = vmatmul.bf16.vlgmr.msra.gmra.mxu3 %v563_v50  ;;  %v2446_v59 = vld [vmem:[#allocation7 + $0xcc] sm:$0xf] }
  0xbe   :  { %v218_v0 = vpop.f32.mrf.mxu2 }
  0xbf   :  { %v219_v2 = vadd.f32 %v218_v0, %v2919_v26  ;;  %v247_v3 = vpop.f32.mrf.mxu3 }
  0xc0   :  { %v162_v4 = vpop.f32.mrf.mxu0  ;;  %v248_v6 = vadd.f32 %v247_v3, %v2923_v30  ;;  %v191_v11 = vpop.f32.mrf.mxu1 }
  0xc1   :  { %v163_v8 = vadd.f32 %v162_v4, %v2890_v54  ;;  %v192_v15 = vadd.f32 %v191_v11, %v2893_v55 }
  0xc2   :  { %v2967_v19 = vpack.c.bf16 %v248_v6, %v219_v2 }
  0xc3   :  { %v2969_v20 = vpack.c.bf16 %v192_v15, %v163_v8 }
  0xc4   :  { %3846 = vst [vmem:[#allocation40_spill] sm:$0xff] %v2967_v19 }
  0xc5   :  { %3847 = vst [vmem:[#allocation41_spill] sm:$0xff] %v2969_v20 }
  0xc6   :  { %v220_v24 = vpop.f32.mrf.mxu2 }
  0xc7   :  { %v221_v27 = vadd.f32 %v220_v24, %v2919_v26  ;;  %v249_v28 = vpop.f32.mrf.mxu3 }
  0xc8   :  { %v165_v31 = vpop.f32.mrf.mxu0  ;;  %v250_v32 = vadd.f32 %v249_v28, %v2923_v30  ;;  %v194_v45 = vpop.f32.mrf.mxu1 }
  0xc9   :  { %v166_v43 = vadd.f32 %v165_v31, %v2890_v54  ;;  %v195_v46 = vadd.f32 %v194_v45, %v2893_v55 }
  0xca   :  { %v2975_v50 = vpack.c.bf16 %v250_v32, %v221_v27  ;;  %v2988_v27 = vperm.slane %v2880_v40, 4  ;;  %v2991_v32 = vperm.slane %v2880_v40, 5 }
  0xcb   :  { %v2977_v0 = vpack.c.bf16 %v195_v46, %v166_v43 }
  0xcc   :  { %3848 = vst [vmem:[#allocation42_spill] sm:$0xff] %v2975_v50  ;;  %v2372_v50 = vld [vmem:[#allocation7 + $0xf8] sm:$0xf0] }
  0xcd   :  { %3849 = vst [vmem:[#allocation43_spill] sm:$0xff] %v2977_v0 }
  0xce   :  { %v223_v2 = vpop.f32.mrf.mxu2 }
  0xcf   :  { %v224_v3 = vadd.f32 %v223_v2, %v2919_v26  ;;  %v252_v4 = vpop.f32.mrf.mxu3 }
  0xd0   :  { %v167_v6 = vpop.f32.mrf.mxu0  ;;  %v253_v8 = vadd.f32 %v252_v4, %v2923_v30  ;;  %v196_v15 = vpop.f32.mrf.mxu1 }
  0xd1   :  { %v168_v11 = vadd.f32 %v167_v6, %v2890_v54  ;;  %v197_v24 = vadd.f32 %v196_v15, %v2893_v55  ;;  %v3005_v15 = vperm.slane %v2880_v40, 7 }
  0xd2   :  { %v2983_v28 = vpack.c.bf16 %v253_v8, %v224_v3 }
  0xd3   :  { %v2985_v31 = vpack.c.bf16 %v197_v24, %v168_v11  ;;  %v3002_v11 = vperm.slane %v2880_v40, 6 }
  0xd4   :  { %3850 = vst [vmem:[#allocation44_spill] sm:$0xff] %v2983_v28 }
  0xd5   :  { %3851 = vst [vmem:[#allocation45_spill] sm:$0xff] %v2985_v31 }
  0xd6   :  { %v225_v43 = vpop.f32.mrf.mxu2 }
  0xd7   :  { %v226_v45 = vadd.f32 %v225_v43, %v2919_v26  ;;  %v254_v46 = vpop.f32.mrf.mxu3 }
  0xd8   :  { %v266_v2 = vpop.f32.mrf.mxu0  ;;  %v255_v54 = vadd.f32 %v254_v46, %v2923_v30  ;;  %v295_v55 = vpop.f32.mrf.mxu1 }
  0xd9   :  { %v267_v4 = vadd.f32 %v266_v2, %v2988_v27  ;;  %v296_v3 = vadd.f32 %v295_v55, %v2991_v32 }
  0xda   :  { %v2997_v6 = vpack.c.bf16 %v255_v54, %v226_v45 }
  0xdb   :  { %v2999_v8 = vpack.c.bf16 %v296_v3, %v267_v4 }
  0xdc   :  { %3852 = vst [vmem:[#allocation46_spill] sm:$0xff] %v2997_v6 }
  0xdd   :  { %3853 = vst [vmem:[#allocation47_spill] sm:$0xff] %v2999_v8 }
  0xde   :  { %v324_v26 = vpop.f32.mrf.mxu2 }
  0xdf   :  { %v325_v24 = vadd.f32 %v324_v26, %v3002_v11  ;;  %v353_v43 = vpop.f32.mrf.mxu3 }
  0xe0   :  { %v268_v30 = vpop.f32.mrf.mxu0  ;;  %v354_v46 = vadd.f32 %v353_v43, %v3005_v15  ;;  %v297_v55 = vpop.f32.mrf.mxu1 }
  0xe1   :  { %v269_v2 = vadd.f32 %v268_v30, %v2988_v27  ;;  %v298_v45 = vadd.f32 %v297_v55, %v2991_v32 }
  0xe2   :  { %v3011_v54 = vpack.c.bf16 %v354_v46, %v325_v24 }
  0xe3   :  { %v3013_v4 = vpack.c.bf16 %v298_v45, %v269_v2 }
  0xe4   :  { %3854 = vst [vmem:[#allocation48_spill] sm:$0xff] %v3011_v54 }
  0xe5   :  { %3855 = vst [vmem:[#allocation49_spill] sm:$0xff] %v3013_v4 }
  0xe6   :  { %v326_v3 = vpop.f32.mrf.mxu2 }
  0xe7   :  { %v327_v40 = vadd.f32 %v326_v3, %v3002_v11  ;;  %v355_v8 = vpop.f32.mrf.mxu3 }
  0xe8   :  { %v271_v6 = vpop.f32.mrf.mxu0  ;;  %v356_v26 = vadd.f32 %v355_v8, %v3005_v15  ;;  %v300_v28 = vpop.f32.mrf.mxu1 }
  0xe9   :  { %v272_v31 = vadd.f32 %v271_v6, %v2988_v27  ;;  %v301_v43 = vadd.f32 %v300_v28, %v2991_v32  ;;  %v2362_v28 = vld [vmem:[#allocation7 + $0xe0] sm:$0xf] }
  0xea   :  { %v3019_v30 = vpack.c.bf16 %v356_v26, %v327_v40  ;;  %v2451_v40 = vld [vmem:[#allocation7 + $0xec] sm:$0xf0] }
  0xeb   :  { %v3021_v0 = vpack.c.bf16 %v301_v43, %v272_v31  ;;  %v2449_v31 = vld [vmem:[#allocation7 + $0xe4] sm:$0xf]  ;;  %v3031_v26 = vor.u32 %v2451_v40, %v2362_v28  ;;  %v2364_v43 = vld [vmem:[#allocation7 + $0xf0] sm:$0xf0]  ;;  %v2447_v28 = vld [vmem:[#allocation7 + $0xcc] sm:$0xf0] }
  0xec   :  { %3856 = vst [vmem:[#allocation50_spill] sm:$0xff] %v3019_v30  ;;  %v2452_v30 = vld [vmem:[#allocation7 + $0xf4] sm:$0xf0]  ;;  %v2445_v40 = vld [vmem:[#allocation7 + $0xc4] sm:$0xf] }
  0xed   :  { %3857 = vst [vmem:[#allocation51_spill] sm:$0xff] %v3021_v0  ;;  %v3033_v0 = vor.u32 %v2449_v31, %v2364_v43  ;;  %937 = vmatpush.bf16.msrb.mxu0 %v3031_v26 }
  0xee   :  { %v329_v24 = vpop.f32.mrf.mxu2 }
  0xef   :  { %v330_v46 = vadd.f32 %v329_v24, %v3002_v11  ;;  %v358_v2 = vpop.f32.mrf.mxu3  ;;  %v2370_v24 = vld [vmem:[#allocation7 + $0xe8] sm:$0xf]  ;;  %950 = vmatpush.bf16.msrb.mxu1 %v3033_v0 }
  0xf0   :  { %v273_v55 = vpop.f32.mrf.mxu0  ;;  %v359_v45 = vadd.f32 %v358_v2, %v3005_v15  ;;  %v302_v54 = vpop.f32.mrf.mxu1  ;;  %v3035_v2 = vor.u32 %v2452_v30, %v2370_v24  ;;  %v2348_v24 = vld [vmem:[#allocation7 + $0xd0] sm:$0xf0] }
  0xf1   :  { %v274_v3 = vadd.f32 %v273_v55, %v2988_v27  ;;  %v303_v8 = vadd.f32 %v302_v54, %v2991_v32  ;;  %v2450_v55 = vld [vmem:[#allocation7 + $0xec] sm:$0xf] }
  0xf2   :  { %v3027_v6 = vpack.c.bf16 %v359_v45, %v330_v46  ;;  %v3038_v54 = vor.u32 %v2450_v55, %v2372_v50  ;;  %963 = vmatpush.bf16.msrb.mxu2 %v3035_v2  ;;  %v2448_v55 = vld [vmem:[#allocation7 + $0xd4] sm:$0xf0] }
  0xf3   :  { %v3029_v4 = vpack.c.bf16 %v303_v8, %v274_v3  ;;  %v2346_v8 = vld [vmem:[#allocation7 + $0xc0] sm:$0xf] }
  0xf4   :  { %3858 = vst [vmem:[#allocation52_spill] sm:$0xff] %v3027_v6  ;;  %976 = vmatpush.bf16.msrb.mxu3 %v3038_v54  ;;  %v3046_v50 = vor.u32 %v2447_v28, %v2346_v8  ;;  %v2330_v8 = vld [vmem:[#allocation7 + $0xa0] sm:$0xf]  ;;  %v2443_v28 = vld [vmem:[#allocation7 + $0xac] sm:$0xf0] }
  0xf5   :  { %3859 = vst [vmem:[#allocation53_spill] sm:$0xff] %v3029_v4  ;;  %v3049_v4 = vor.u32 %v2445_v40, %v2348_v24  ;;  %v2441_v40 = vld [vmem:[#allocation7 + $0xa4] sm:$0xf]  ;;  %v2332_v24 = vld [vmem:[#allocation7 + $0xb0] sm:$0xf0] }
  0xf6   :  { %v331_v20 = vpop.f32.mrf.mxu2  ;;  %938 = vmatpush.bf16.msrb.mxu0 %v3046_v50 }
  0xf7   :  { %v332_v46 = vadd.f32 %v331_v20, %v3002_v11  ;;  %v360_v45 = vpop.f32.mrf.mxu3  ;;  %v2354_v20 = vld [vmem:[#allocation7 + $0xc8] sm:$0xf]  ;;  %951 = vmatpush.bf16.msrb.mxu1 %v3049_v4 }
  0xf8   :  { %v276_v3 = vpop.f32.mrf.mxu0  ;;  %v361_v30 = vadd.f32 %v360_v45, %v3005_v15  ;;  %v305_v43 = vpop.f32.mrf.mxu1  ;;  %v3051_v19 = vor.u32 %v2448_v55, %v2354_v20  ;;  %v3056_v45 = vor.u32 %v2446_v59, %v2356_v49  ;;  %v3065_v20 = vor.u32 %v2441_v40, %v2332_v24  ;;  %v2442_v59 = vld [vmem:[#allocation7 + $0xac] sm:$0xf]  ;;  %v2437_v40 = vld [vmem:[#allocation7 + $0x84] sm:$0xf] }
  0xf9   :  { %v277_v31 = vadd.f32 %v276_v3, %v2988_v27  ;;  %v306_v6 = vadd.f32 %v305_v43, %v2991_v32  ;;  %v3063_v43 = vor.u32 %v2443_v28, %v2330_v8  ;;  %v2314_v8 = vld [vmem:[#allocation7 + $0x80] sm:$0xf]  ;;  %v2439_v28 = vld [vmem:[#allocation7 + $0x8c] sm:$0xf0] }
  0xfa   :  { %3860 = vst [vmem:[#allocation54_spill] sm:$0xff] %v3051_v19  ;;  %v3053_v14 = vpack.c.bf16 %v361_v30, %v332_v46  ;;  %964 = vmatpush.bf16.msrb.mxu2 %v3051_v19  ;;  %977 = vmatpush.bf16.msrb.mxu3 %v3056_v45  ;;  %v2338_v46 = vld [vmem:[#allocation7 + $0xa8] sm:$0xf]  ;;  %v2444_v30 = vld [vmem:[#allocation7 + $0xb4] sm:$0xf0] }
  0xfb   :  { %3862 = vst [vmem:[#allocation56_spill] sm:$0xff] %v3056_v45  ;;  %v3058_v3 = vpack.c.bf16 %v306_v6, %v277_v31  ;;  %v3067_v49 = vor.u32 %v2444_v30, %v2338_v46  ;;  %v2340_v6 = vld [vmem:[#allocation7 + $0xb8] sm:$0xf0]  ;;  %939 = vmatpush.bf16.msrb.mxu0 %v3063_v43  ;;  %952 = vmatpush.bf16.msrb.mxu1 %v3065_v20 }
  0xfc   :  { %3861 = vst [vmem:[#allocation55_spill] sm:$0xff] %v3053_v14  ;;  %v3070_v55 = vor.u32 %v2442_v59, %v2340_v6  ;;  %v3078_v59 = vor.u32 %v2439_v28, %v2314_v8  ;;  %v2316_v6 = vld [vmem:[#allocation7 + $0x90] sm:$0xf0]  ;;  %v2298_v8 = vld [vmem:[#allocation7 + $0x60] sm:$0xf] }
  0xfd   :  { %3863 = vst [vmem:[#allocation57_spill] sm:$0xff] %v3058_v3  ;;  %v3081_v36 = vor.u32 %v2437_v40, %v2316_v6  ;;  %v2435_v28 = vld [vmem:[#allocation7 + $0x6c] sm:$0xf0]  ;;  %v2433_v40 = vld [vmem:[#allocation7 + $0x64] sm:$0xf] }
  0xfe   :  { %3864 = vst [vmem:[#allocation58_spill] sm:$0xff] %v3063_v43  ;;  %v334_v31 = vpop.f32.mrf.mxu2  ;;  %965 = vmatpush.bf16.msrb.mxu2 %v3067_v49  ;;  %978 = vmatpush.bf16.msrb.mxu3 %v3070_v55  ;;  %v2324_v43 = vld [vmem:[#allocation7 + $0x98] sm:$0xf0] }
  0xff   :  { %3865 = vst [vmem:[#allocation59_spill] sm:$0xff] %v3065_v20  ;;  %v335_v14 = vadd.f32 %v334_v31, %v3002_v11  ;;  %v363_v3 = vpop.f32.mrf.mxu3  ;;  %v2322_v31 = vld [vmem:[#allocation7 + $0x88] sm:$0xf]  ;;  %v2438_v20 = vld [vmem:[#allocation7 + $0x8c] sm:$0xf]  ;;  %940 = vmatpush.bf16.msrb.mxu0 %v3078_v59  ;;  %953 = vmatpush.bf16.msrb.mxu1 %v3081_v36 }
 0x100   :  { %3866 = vst [vmem:[#allocation60_spill] sm:$0xff] %v3067_v49  ;;  %v278_v12 = vpop.f32.mrf.mxu0  ;;  %v364_v24 = vadd.f32 %v363_v3, %v3005_v15  ;;  %v307_v30 = vpop.f32.mrf.mxu1  ;;  %v3083_v49 = vor.u32 %v2440_v39, %v2322_v31  ;;  %v3095_v39 = vor.u32 %v2435_v28, %v2298_v8  ;;  %v2282_v8 = vld [vmem:[#allocation7 + $0x40] sm:$0xf]  ;;  %v2431_v28 = vld [vmem:[#allocation7 + $0x4c] sm:$0xf0] }
 0x101   :  { %3867 = vst [vmem:[#allocation61_spill] sm:$0xff] %v3070_v55  ;;  %v279_v46 = vadd.f32 %v278_v12, %v2988_v27  ;;  %v308_v51 = vadd.f32 %v307_v30, %v2991_v32  ;;  %v3088_v12 = vor.u32 %v2438_v20, %v2324_v43  ;;  %v2300_v30 = vld [vmem:[#allocation7 + $0x70] sm:$0xf0]  ;;  %v2308_v20 = vld [vmem:[#allocation7 + $0x78] sm:$0xf0] }
 0x102   :  { %3868 = vst [vmem:[#allocation62_spill] sm:$0xff] %v3078_v59  ;;  %v3085_v45 = vpack.c.bf16 %v364_v24, %v335_v14  ;;  %966 = vmatpush.bf16.msrb.mxu2 %v3083_v49  ;;  %v2306_v14 = vld [vmem:[#allocation7 + $0x68] sm:$0xf]  ;;  %v2436_v24 = vld [vmem:[#allocation7 + $0x74] sm:$0xf0]  ;;  %v3097_v6 = vor.u32 %v2433_v40, %v2300_v30 }
 0x103   :  { %3869 = vst [vmem:[#allocation63_spill] sm:$0xff] %v3081_v36  ;;  %v3090_v3 = vpack.c.bf16 %v308_v51, %v279_v46  ;;  %979 = vmatpush.bf16.msrb.mxu3 %v3088_v12  ;;  %v3099_v43 = vor.u32 %v2436_v24, %v2306_v14  ;;  %v2434_v51 = vld [vmem:[#allocation7 + $0x6c] sm:$0xf]  ;;  %941 = vmatpush.bf16.msrb.mxu0 %v3095_v39  ;;  %v2429_v40 = vld [vmem:[#allocation7 + $0x44] sm:$0xf] }
 0x104   :  { %3870 = vst [vmem:[#allocation64_spill] sm:$0xff] %v3083_v49  ;;  %v3102_v31 = vor.u32 %v2434_v51, %v2308_v20  ;;  %954 = vmatpush.bf16.msrb.mxu1 %v3097_v6  ;;  %v3110_v51 = vor.u32 %v2431_v28, %v2282_v8  ;;  %v2284_v20 = vld [vmem:[#allocation7 + $0x50] sm:$0xf0]  ;;  %v2430_v36 = vld [vmem:[#allocation7 + $0x4c] sm:$0xf] }
 0x105   :  { %3871 = vst [vmem:[#allocation65_spill] sm:$0xff] %v3085_v45  ;;  %v2292_v59 = vld [vmem:[#allocation7 + $0x58] sm:$0xf0]  ;;  %v2266_v55 = vld [vmem:[#allocation7 + $0x20] sm:$0xf] }
 0x106   :  { %3872 = vst [vmem:[#allocation66_spill] sm:$0xff] %v3088_v12  ;;  %v336_v46 = vpop.f32.mrf.mxu2  ;;  %967 = vmatpush.bf16.msrb.mxu2 %v3099_v43  ;;  %v2427_v8 = vld [vmem:[#allocation7 + $0x2c] sm:$0xf0]  ;;  %v2425_v28 = vld [vmem:[#allocation7 + $0x24] sm:$0xf] }
 0x107   :  { %3873 = vst [vmem:[#allocation67_spill] sm:$0xff] %v3090_v3  ;;  %v337_v45 = vadd.f32 %v336_v46, %v3002_v11  ;;  %v365_v3 = vpop.f32.mrf.mxu3  ;;  %980 = vmatpush.bf16.msrb.mxu3 %v3102_v31  ;;  %v2290_v46 = vld [vmem:[#allocation7 + $0x48] sm:$0xf]  ;;  %942 = vmatpush.bf16.msrb.mxu0 %v3110_v51 }
 0x108   :  { %3874 = vst [vmem:[#allocation68_spill] sm:$0xff] %v3095_v39  ;;  %v281_v12 = vpop.f32.mrf.mxu0  ;;  %v366_v30 = vadd.f32 %v365_v3, %v3005_v15  ;;  %v310_v24 = vpop.f32.mrf.mxu1  ;;  %v2432_v39 = vld [vmem:[#allocation7 + $0x54] sm:$0xf0] }
 0x109   :  { %3875 = vst [vmem:[#allocation69_spill] sm:$0xff] %v3097_v6  ;;  %v282_v14 = vadd.f32 %v281_v12, %v2988_v27  ;;  %v311_v49 = vadd.f32 %v310_v24, %v2991_v32  ;;  %v3113_v6 = vor.u32 %v2429_v40, %v2284_v20  ;;  %v3120_v12 = vor.u32 %v2430_v36, %v2292_v59  ;;  %v2274_v24 = vld [vmem:[#allocation7 + $0x28] sm:$0xf]  ;;  %v2276_v59 = vld [vmem:[#allocation7 + $0x38] sm:$0xf0] }
 0x10a   :  { %3876 = vst [vmem:[#allocation70_spill] sm:$0xff] %v3099_v43  ;;  %v3115_v43 = vor.u32 %v2432_v39, %v2290_v46  ;;  %v3117_v3 = vpack.c.bf16 %v366_v30, %v337_v45  ;;  %v3126_v39 = vor.u32 %v2427_v8, %v2266_v55  ;;  %v2428_v45 = vld [vmem:[#allocation7 + $0x34] sm:$0xf0]  ;;  %v2426_v30 = vld [vmem:[#allocation7 + $0x2c] sm:$0xf] }
 0x10b   :  { %3877 = vst [vmem:[#allocation71_spill] sm:$0xff] %v3102_v31  ;;  %v2268_v31 = vld [vmem:[#allocation7 + $0x30] sm:$0xf0]  ;;  %v3122_v19 = vpack.c.bf16 %v311_v49, %v282_v14  ;;  %955 = vmatpush.bf16.msrb.mxu1 %v3113_v6  ;;  %981 = vmatpush.bf16.msrb.mxu3 %v3120_v12  ;;  %v3131_v36 = vor.u32 %v2428_v45, %v2274_v24  ;;  %v2250_v20 = vld [vmem:[#allocation7] sm:$0xf] }
 0x10c   :  { %3878 = vst [vmem:[#allocation72_spill] sm:$0xff] %v3110_v51  ;;  %968 = vmatpush.bf16.msrb.mxu2 %v3115_v43  ;;  %v3128_v40 = vor.u32 %v2425_v28, %v2268_v31  ;;  %v2423_v46 = vld [vmem:[#allocation7 + $0xc] sm:$0xf0]  ;;  %v3133_v49 = vor.u32 %v2426_v30, %v2276_v59  ;;  %v2421_v14 = vld [vmem:[#allocation7 + $0x4] sm:$0xf]  ;;  %943 = vmatpush.bf16.msrb.mxu0 %v3126_v39 }
 0x10d   :  { %3879 = vst [vmem:[#allocation73_spill] sm:$0xff] %v3113_v6  ;;  %v3136_v55 = vor.u32 %v2423_v46, %v2250_v20  ;;  %v2424_v31 = vld [vmem:[#allocation7 + $0x14] sm:$0xf0]  ;;  %v2422_v8 = vld [vmem:[#allocation7 + $0xc] sm:$0xf] }
 0x10e   :  { %3880 = vst [vmem:[#allocation74_spill] sm:$0xff] %v3115_v43  ;;  %v339_v43 = vpop.f32.mrf.mxu2  ;;  %v2260_v28 = vld [vmem:[#allocation7 + $0x18] sm:$0xf0] }
 0x10f   :  { %3881 = vst [vmem:[#allocation75_spill] sm:$0xff] %v3117_v3  ;;  %v2252_v3 = vld [vmem:[#allocation7 + $0x10] sm:$0xf0]  ;;  %v368_v24 = vpop.f32.mrf.mxu3  ;;  %956 = vmatpush.bf16.msrb.mxu1 %v3128_v40  ;;  %982 = vmatpush.bf16.msrb.mxu3 %v3133_v49 }
 0x110   :  { %3882 = vst [vmem:[#allocation76_spill] sm:$0xff] %v3120_v12  ;;  %v340_v12 = vadd.f32 %v339_v43, %v3002_v11  ;;  %v283_v45 = vpop.f32.mrf.mxu0  ;;  %969 = vmatpush.bf16.msrb.mxu2 %v3131_v36  ;;  %v3141_v30 = vor.u32 %v2421_v14, %v2252_v3  ;;  %v369_v6 = vadd.f32 %v368_v24, %v3005_v15  ;;  %v312_v46 = vpop.f32.mrf.mxu1 }
 0x111   :  { %3883 = vst [vmem:[#allocation77_spill] sm:$0xff] %v3122_v19  ;;  %v2258_v19 = vld [vmem:[#allocation7 + $0x8] sm:$0xf]  ;;  %v284_v20 = vadd.f32 %v283_v45, %v2988_v27  ;;  %v313_v43 = vadd.f32 %v312_v46, %v2991_v32  ;;  %944 = vmatpush.bf16.msrb.mxu0 %v3136_v55 }
 0x112   :  { %3884 = vst [vmem:[#allocation78_spill] sm:$0xff] %v3126_v39  ;;  %v3143_v59 = vor.u32 %v2424_v31, %v2258_v19  ;;  %v3148_v39 = vor.u32 %v2422_v8, %v2260_v28  ;;  %v3151_v51 = vpack.c.bf16 %v369_v6, %v340_v12 }
 0x113   :  { %3885 = vst [vmem:[#allocation79_spill] sm:$0xff] %v3131_v36  ;;  %v403_v36 = vpack.c.bf16 %v313_v43, %v284_v20  ;;  %957 = vmatpush.bf16.msrb.mxu1 %v3141_v30 }
 0x114   :  { %970 = vmatpush.bf16.msrb.mxu2 %v3143_v59  ;;  %983 = vmatpush.bf16.msrb.mxu3 %v3148_v39 }
 0x115   :  { %1060 = vmatpush.bf16.msra.mxu0 %v2803_v33  ;;  %v515_v19 = vunpack.c.l.bf16 %v403_v36  ;;  %v516_v27 = vunpack.c.h.bf16 %v403_v36 }
 0x116   :  { %v341_v32 = vpop.f32.mrf.mxu2 }
 0x117   :  { %1073 = vmatpush.bf16.msra.mxu1 %v2806_v37  ;;  %v537_v6 = vmul.f32 0.5, %v515_v19  ;;  %v538_v3 = vmul.f32 0.5, %v516_v27  ;;  %v342_v12 = vadd.f32 %v341_v32, %v3002_v11  ;;  %v370_v14 = vpop.f32.mrf.mxu3 }
 0x118   :  { %1086 = vmatpush.bf16.msra.mxu2 %v2808_v38  ;;  %1099 = vmatpush.bf16.msra.mxu3 %v2811_v41  ;;  %v371_v31 = vadd.f32 %v370_v14, %v3005_v15 }
 0x119   :  { %1061 = vmatpush.bf16.msra.mxu0 %v2816_v44  ;;  %2468 = vtanh.f32 %v537_v6 }
 0x11a   :  { %2470 = vtanh.f32 %v538_v3  ;;  %v404_v36 = vpack.c.bf16 %v371_v31, %v342_v12 }
 0x11b   :  { %1074 = vmatpush.bf16.msra.mxu1 %v2818_v48 }
 0x11c   :  { %1087 = vmatpush.bf16.msra.mxu2 %v2821_v52  ;;  %1100 = vmatpush.bf16.msra.mxu3 %v2823_v53  ;;  %v517_v8 = vunpack.c.l.bf16 %v404_v36  ;;  %v518_v28 = vunpack.c.h.bf16 %v404_v36 }
 0x11d   :  { %1062 = vmatpush.bf16.msra.mxu0 %v2828_v57 }
 0x11e   :  { %v539_v11 = vmul.f32 0.5, %v517_v8  ;;  %2472 = vtanh.f32 %v518_v28  ;;  %v994_v28 = vunpack.c.l.bf16 %v2931_v60 }
 0x11f   :  { %1075 = vmatpush.bf16.msra.mxu1 %v2830_v61  ;;  %v2469_v15 = vpop.eup %2468 }
 0x120   :  { %1088 = vmatpush.bf16.msra.mxu2 %v2832_v62  ;;  %1101 = vmatpush.bf16.msra.mxu3 %v2835_v1  ;;  %v2471_v24 = vpop.eup %2470  ;;  %v543_v45 = vmul.f32 0.5, %v2469_v15  ;;  %2474 = vtanh.f32 %v539_v11  ;;  %v995_v11 = vunpack.c.h.bf16 %v2931_v60  ;;  %v3890_v60 = vld [vmem:[#allocation33_spill] sm:$0xff] }
 0x121   :  { %1063 = vmatpush.bf16.msra.mxu0 %v2840_v5  ;;  %v544_v20 = vmul.f32 0.5, %v2471_v24 }
 0x122   :  { %v546_v46 = vadd.f32 0.5, %v543_v45 }
 0x123   :  { %1076 = vmatpush.bf16.msra.mxu1 %v2842_v9  ;;  %v547_v43 = vadd.f32 0.5, %v544_v20 }
 0x124   :  { %1089 = vmatpush.bf16.msra.mxu2 %v2844_v10  ;;  %1102 = vmatpush.bf16.msra.mxu3 %v2847_v13  ;;  %v2473_v19 = vpop.eup %2472 }
 0x125   :  { %1064 = vmatpush.bf16.msra.mxu0 %v2856_v17  ;;  %v550_v27 = vmul.f32 0.0, %v547_v43  ;;  %v551_v32 = vmul.f32 %v2473_v19, %v546_v46  ;;  %v3886_v46 = vld [vmem:[#allocation54_spill] sm:$0xff]  ;;  %v3887_v43 = vld [vmem:[#allocation56_spill] sm:$0xff] }
 0x126   :  { %v2475_v6 = vpop.eup %2474 }
 0x127   :  { %1077 = vmatpush.bf16.msra.mxu1 %v2861_v21  ;;  %v3179_v3 = vadd.f32 %v551_v32, %v550_v27  ;;  %v545_v12 = vmul.f32 0.5, %v2475_v6  ;;  %v3888_v32 = vld [vmem:[#allocation58_spill] sm:$0xff]  ;;  %v3889_v6 = vld [vmem:[#allocation59_spill] sm:$0xff] }
 0x128   :  { %1090 = vmatpush.bf16.msra.mxu2 %v2863_v22  ;;  %1103 = vmatpush.bf16.msra.mxu3 %v2867_v25 }
 0x129   :  { %1065 = vmatpush.bf16.msra.mxu0 %v2870_v29  ;;  %2476 = vtanh.f32 %v3179_v3  ;;  %v548_v14 = vadd.f32 0.5, %v545_v12  ;;  %v996_v12 = vunpack.c.l.bf16 %v3890_v60 }
 0x12b   :  { %1078 = vmatpush.bf16.msra.mxu1 %v2873_v34 }
 0x12c   :  { %1091 = vmatpush.bf16.msra.mxu2 %v2875_v35  ;;  %1104 = vmatpush.bf16.msra.mxu3 %v2884_v42 }
 0x12d   :  { %1066 = vmatpush.bf16.msra.mxu0 %v2887_v47 }
 0x12f   :  { %1079 = vmatpush.bf16.msra.mxu1 %v2896_v56  ;;  %v2477_v31 = vpop.eup %2476 }
 0x130   :  { %1092 = vmatpush.bf16.msra.mxu2 %v2898_v58  ;;  %1105 = vmatpush.bf16.msra.mxu3 %v2902_v63  ;;  %v554_v36 = vmul.f32 %v2477_v31, %v548_v14  ;;  %v997_v14 = vunpack.c.h.bf16 %v3890_v60  ;;  %v3891_v31 = vld [vmem:[#allocation60_spill] sm:$0xff] }
 0x131   :  { %1067 = vmatpush.bf16.msra.mxu0 %v2905_v7 }
 0x132   :  { %2119 = vst [vmem:[%s3702_s5 + $0x78] sm:$0xff] %v554_v36  ;;  %v776_v8 = vpack.c.bf16 %v554_v36, %v554_v36  ;;  %v3892_v36 = vld [vmem:[#allocation61_spill] sm:$0xff] }
 0x133   :  { %1080 = vmatpush.bf16.msra.mxu1 %v2910_v16 }
 0x134   :  { %1093 = vmatpush.bf16.msra.mxu2 %v2912_v18  ;;  %1106 = vmatpush.bf16.msra.mxu3 %v2916_v23 }
 0x135   :  { %945 = vmatmul.bf16.vlgmr.msrb.gmra.mxu0 %v776_v8  ;;  %958 = vmatmul.bf16.vlgmr.msrb.gmra.mxu1 %v776_v8 }
 0x136   :  { %971 = vmatmul.bf16.vlgmr.msrb.gmra.mxu2 %v776_v8  ;;  %984 = vmatmul.bf16.vlgmr.msrb.gmra.mxu3 %v776_v8 }
 0x137   :  { %1113 = vmatpush.bf16.msrb.mxu0 %v3031_v26  ;;  %1126 = vmatpush.bf16.msrb.mxu1 %v3033_v0 }
 0x138   :  { %1139 = vmatpush.bf16.msrb.mxu2 %v3035_v2  ;;  %1152 = vmatpush.bf16.msrb.mxu3 %v3038_v54 }
 0x139   :  { %v733_v15 = vpop.f32.mrf.mxu0  ;;  %v746_v24 = vpop.f32.mrf.mxu1 }
 0x13a   :  { %v1007_v45 = vadd.f32 %v994_v28, %v733_v15  ;;  %v1008_v20 = vadd.f32 %v995_v11, %v746_v24 }
 0x13b   :  { %1114 = vmatpush.bf16.msrb.mxu0 %v3046_v50  ;;  %1127 = vmatpush.bf16.msrb.mxu1 %v3049_v4 }
 0x13c   :  { %1140 = vmatpush.bf16.msrb.mxu2 %v3886_v46  ;;  %1153 = vmatpush.bf16.msrb.mxu3 %v3887_v43  ;;  %v1015_v19 = vmul.f32 0.5, %v1007_v45  ;;  %v1016_v27 = vmul.f32 0.5, %v1008_v20  ;;  %v3893_v20 = vld [vmem:[#allocation62_spill] sm:$0xff]  ;;  %v3897_v46 = vld [vmem:[#allocation68_spill] sm:$0xff] }
 0x13e   :  { %2478 = vtanh.f32 %v1015_v19  ;;  %v3894_v19 = vld [vmem:[#allocation63_spill] sm:$0xff] }
 0x13f   :  { %1115 = vmatpush.bf16.msrb.mxu0 %v3888_v32  ;;  %1128 = vmatpush.bf16.msrb.mxu1 %v3889_v6  ;;  %2480 = vtanh.f32 %v1016_v27  ;;  %v3895_v27 = vld [vmem:[#allocation64_spill] sm:$0xff]  ;;  %v3896_v32 = vld [vmem:[#allocation66_spill] sm:$0xff] }
 0x140   :  { %1141 = vmatpush.bf16.msrb.mxu2 %v3891_v31  ;;  %1154 = vmatpush.bf16.msrb.mxu3 %v3892_v36  ;;  %v759_v8 = vpop.f32.mrf.mxu2  ;;  %v772_v28 = vpop.f32.mrf.mxu3 }
 0x141   :  { %v1009_v11 = vadd.f32 %v996_v12, %v759_v8  ;;  %v1010_v15 = vadd.f32 %v997_v14, %v772_v28  ;;  %v735_v24 = vpop.f32.mrf.mxu0  ;;  %v748_v45 = vpop.f32.mrf.mxu1  ;;  %v3898_v12 = vld [vmem:[#allocation69_spill] sm:$0xff]  ;;  %v3899_v8 = vld [vmem:[#allocation70_spill] sm:$0xff]  ;;  %v3900_v28 = vld [vmem:[#allocation71_spill] sm:$0xff] }
 0x143   :  { %1116 = vmatpush.bf16.msrb.mxu0 %v3893_v20  ;;  %1129 = vmatpush.bf16.msrb.mxu1 %v3894_v19  ;;  %v1017_v6 = vmul.f32 0.5, %v1009_v11  ;;  %2482 = vtanh.f32 %v1010_v15  ;;  %v3902_v20 = vld [vmem:[#allocation72_spill] sm:$0xff] }
 0x144   :  { %1142 = vmatpush.bf16.msrb.mxu2 %v3895_v27  ;;  %1155 = vmatpush.bf16.msrb.mxu3 %v3896_v32  ;;  %v2479_v60 = vpop.eup %2478  ;;  %v3901_v27 = vld [vmem:[#allocation35_spill] sm:$0xff] }
 0x145   :  { %v2481_v31 = vpop.eup %2480  ;;  %v1021_v43 = vmul.f32 0.5, %v2479_v60  ;;  %2484 = vtanh.f32 %v1017_v6  ;;  %v3904_v6 = vld [vmem:[#allocation74_spill] sm:$0xff]  ;;  %v3905_v60 = vld [vmem:[#allocation76_spill] sm:$0xff] }
 0x146   :  { %v1022_v36 = vmul.f32 0.5, %v2481_v31  ;;  %v3903_v31 = vld [vmem:[#allocation73_spill] sm:$0xff] }
 0x147   :  { %1117 = vmatpush.bf16.msrb.mxu0 %v3897_v46  ;;  %1130 = vmatpush.bf16.msrb.mxu1 %v3898_v12  ;;  %v1024_v14 = vadd.f32 0.5, %v1021_v43 }
 0x148   :  { %1143 = vmatpush.bf16.msrb.mxu2 %v3899_v8  ;;  %1156 = vmatpush.bf16.msrb.mxu3 %v3900_v28  ;;  %v1025_v11 = vadd.f32 0.5, %v1022_v36  ;;  %v761_v15 = vpop.f32.mrf.mxu2  ;;  %v774_v24 = vpop.f32.mrf.mxu3  ;;  %v3906_v36 = vld [vmem:[#allocation78_spill] sm:$0xff] }
 0x149   :  { %v2483_v45 = vpop.eup %2482  ;;  %v3908_v24 = vld [vmem:[#allocation77_spill] sm:$0xff] }
 0x14a   :  { %v1028_v32 = vmul.f32 %v1025_v11, %v3901_v27  ;;  %v1029_v19 = vmul.f32 %v2483_v45, %v1024_v14  ;;  %v3907_v27 = vld [vmem:[#allocation79_spill] sm:$0xff]  ;;  %v1003_v45 = vunpack.c.l.bf16 %v3908_v24 }
 0x14b   :  { %1118 = vmatpush.bf16.msrb.mxu0 %v3902_v20  ;;  %1131 = vmatpush.bf16.msrb.mxu1 %v3903_v31  ;;  %v2485_v43 = vpop.eup %2484 }
 0x14c   :  { %1144 = vmatpush.bf16.msrb.mxu2 %v3904_v6  ;;  %1157 = vmatpush.bf16.msrb.mxu3 %v3905_v60  ;;  %v3226_v12 = vadd.f32 %v1029_v19, %v1028_v32  ;;  %v1023_v15 = vmul.f32 0.5, %v2485_v43  ;;  %v1004_v43 = vunpack.c.h.bf16 %v3908_v24 }
 0x14e   :  { %2486 = vtanh.f32 %v3226_v12  ;;  %v1026_v14 = vadd.f32 0.5, %v1023_v15 }
 0x14f   :  { %1119 = vmatpush.bf16.msrb.mxu0 %v3906_v36  ;;  %1132 = vmatpush.bf16.msrb.mxu1 %v3128_v40 }
 0x150   :  { %1145 = vmatpush.bf16.msrb.mxu2 %v3907_v27  ;;  %1158 = vmatpush.bf16.msrb.mxu3 %v3133_v49 }
 0x153   :  { %1120 = vmatpush.bf16.msrb.mxu0 %v3136_v55  ;;  %1133 = vmatpush.bf16.msrb.mxu1 %v3141_v30 }
 0x154   :  { %1146 = vmatpush.bf16.msrb.mxu2 %v3143_v59  ;;  %1159 = vmatpush.bf16.msrb.mxu3 %v3148_v39  ;;  %v2487_v32 = vpop.eup %2486 }
 0x155   :  { %v1032_v19 = vmul.f32 %v2487_v32, %v1026_v14 }
 0x157   :  { %2376 = vst [vmem:[%s3702_s5 + $0x10] sm:$0xff] %v1032_v19  ;;  %v1059_v11 = vpack.c.bf16 %v1032_v19, %v1032_v19 }
 0x159   :  { %1068 = vmatmul.bf16.vlgmr.msra.gmra.mxu0 %v1059_v11  ;;  %1081 = vmatmul.bf16.vlgmr.msra.gmra.mxu1 %v1059_v11 }
 0x15a   :  { %1094 = vmatmul.bf16.vlgmr.msra.gmra.mxu2 %v1059_v11  ;;  %1107 = vmatmul.bf16.vlgmr.msra.gmra.mxu3 %v1059_v11 }
 0x15b   :  { %1236 = vmatpush.bf16.msra.mxu0 %v2803_v33  ;;  %1249 = vmatpush.bf16.msra.mxu1 %v2806_v37 }
 0x15c   :  { %1262 = vmatpush.bf16.msra.mxu2 %v2808_v38  ;;  %1275 = vmatpush.bf16.msra.mxu3 %v2811_v41 }
 0x15f   :  { %1237 = vmatpush.bf16.msra.mxu0 %v2816_v44  ;;  %1250 = vmatpush.bf16.msra.mxu1 %v2818_v48 }
 0x160   :  { %1263 = vmatpush.bf16.msra.mxu2 %v2821_v52  ;;  %1276 = vmatpush.bf16.msra.mxu3 %v2823_v53 }
 0x163   :  { %1238 = vmatpush.bf16.msra.mxu0 %v2828_v57  ;;  %1251 = vmatpush.bf16.msra.mxu1 %v2830_v61 }
 0x164   :  { %1264 = vmatpush.bf16.msra.mxu2 %v2832_v62  ;;  %1277 = vmatpush.bf16.msra.mxu3 %v2835_v1 }
 0x167   :  { %1239 = vmatpush.bf16.msra.mxu0 %v2840_v5  ;;  %1252 = vmatpush.bf16.msra.mxu1 %v2842_v9 }
 0x168   :  { %1265 = vmatpush.bf16.msra.mxu2 %v2844_v10  ;;  %1278 = vmatpush.bf16.msra.mxu3 %v2847_v13 }
 0x16b   :  { %1240 = vmatpush.bf16.msra.mxu0 %v2856_v17  ;;  %1253 = vmatpush.bf16.msra.mxu1 %v2861_v21 }
 0x16c   :  { %1266 = vmatpush.bf16.msra.mxu2 %v2863_v22  ;;  %1279 = vmatpush.bf16.msra.mxu3 %v2867_v25 }
 0x16f   :  { %1241 = vmatpush.bf16.msra.mxu0 %v2870_v29  ;;  %1254 = vmatpush.bf16.msra.mxu1 %v2873_v34 }
 0x170   :  { %1267 = vmatpush.bf16.msra.mxu2 %v2875_v35  ;;  %1280 = vmatpush.bf16.msra.mxu3 %v2884_v42 }
 0x173   :  { %1242 = vmatpush.bf16.msra.mxu0 %v2887_v47  ;;  %1255 = vmatpush.bf16.msra.mxu1 %v2896_v56 }
 0x174   :  { %1268 = vmatpush.bf16.msra.mxu2 %v2898_v58  ;;  %1281 = vmatpush.bf16.msra.mxu3 %v2902_v63 }
 0x177   :  { %1243 = vmatpush.bf16.msra.mxu0 %v2905_v7  ;;  %1256 = vmatpush.bf16.msra.mxu1 %v2910_v16  ;;  %v1005_v7 = vunpack.c.l.bf16 %v3151_v51  ;;  %v1006_v16 = vunpack.c.h.bf16 %v3151_v51 }
 0x178   :  { %1269 = vmatpush.bf16.msra.mxu2 %v2912_v18  ;;  %1282 = vmatpush.bf16.msra.mxu3 %v2916_v23 }
 0x1b2   :  { %v946_v15 = vpop.f32.mrf.mxu0  ;;  %v959_v14 = vpop.f32.mrf.mxu1 }
 0x1b3   :  { %v1011_v32 = vadd.f32 %v1003_v45, %v946_v15  ;;  %v1012_v19 = vadd.f32 %v1004_v43, %v959_v14 }
 0x1b5   :  { %v1033_v11 = vmul.f32 0.5, %v1011_v32  ;;  %v1034_v58 = vmul.f32 0.5, %v1012_v19 }
 0x1b7   :  { %2488 = vtanh.f32 %v1033_v11 }
 0x1b8   :  { %2490 = vtanh.f32 %v1034_v58 }
 0x1b9   :  { %v972_v63 = vpop.f32.mrf.mxu2  ;;  %v985_v18 = vpop.f32.mrf.mxu3 }
 0x1ba   :  { %v1013_v56 = vadd.f32 %v1005_v7, %v972_v63  ;;  %v1014_v23 = vadd.f32 %v1006_v16, %v985_v18  ;;  %v948_v47 = vpop.f32.mrf.mxu0  ;;  %v961_v42 = vpop.f32.mrf.mxu1 }
 0x1bc   :  { %v1035_v35 = vmul.f32 0.5, %v1013_v56  ;;  %2492 = vtanh.f32 %v1014_v23 }
 0x1bd   :  { %v2489_v24 = vpop.eup %2488 }
 0x1be   :  { %v2491_v34 = vpop.eup %2490  ;;  %v1039_v45 = vmul.f32 0.5, %v2489_v24  ;;  %2494 = vtanh.f32 %v1035_v35 }
 0x1bf   :  { %v1040_v43 = vmul.f32 0.5, %v2491_v34 }
 0x1c0   :  { %v1042_v15 = vadd.f32 0.5, %v1039_v45  ;;  %v3910_v45 = vld [vmem:[#allocation54_spill] sm:$0xff] }
 0x1c1   :  { %v1043_v14 = vadd.f32 0.5, %v1040_v43  ;;  %v974_v58 = vpop.f32.mrf.mxu2  ;;  %v987_v32 = vpop.f32.mrf.mxu3  ;;  %v3911_v43 = vld [vmem:[#allocation56_spill] sm:$0xff] }
 0x1c2   :  { %v2493_v19 = vpop.eup %2492  ;;  %v3912_v58 = vld [vmem:[#allocation58_spill] sm:$0xff]  ;;  %v3913_v32 = vld [vmem:[#allocation59_spill] sm:$0xff] }
 0x1c3   :  { %v1046_v51 = vmul.f32 %v1043_v14, %v3179_v3  ;;  %v1047_v11 = vmul.f32 %v2493_v19, %v1042_v15  ;;  %v3914_v19 = vld [vmem:[#allocation36_spill] sm:$0xff] }
 0x1c4   :  { %v2495_v29 = vpop.eup %2494 }
 0x1c5   :  { %v3277_v63 = vadd.f32 %v1047_v11, %v1046_v51  ;;  %v1041_v42 = vmul.f32 0.5, %v2495_v29  ;;  %v3909_v29 = vld [vmem:[#allocation34_spill] sm:$0xff]  ;;  %v1172_v51 = vunpack.c.l.bf16 %v3914_v19  ;;  %v1173_v11 = vunpack.c.h.bf16 %v3914_v19 }
 0x1c6   :  { %v1170_v35 = vunpack.c.l.bf16 %v3909_v29  ;;  %v1171_v16 = vunpack.c.h.bf16 %v3909_v29 }
 0x1c7   :  { %2496 = vtanh.f32 %v3277_v63  ;;  %v1044_v47 = vadd.f32 0.5, %v1041_v42  ;;  %v3915_v42 = vld [vmem:[#allocation60_spill] sm:$0xff] }
 0x1cd   :  { %v2497_v56 = vpop.eup %2496 }
 0x1ce   :  { %v1050_v7 = vmul.f32 %v2497_v56, %v1044_v47  ;;  %v3916_v47 = vld [vmem:[#allocation61_spill] sm:$0xff] }
 0x1d0   :  { %2377 = vst [vmem:[%s3702_s5 + $0x68] sm:$0xff] %v1050_v7  ;;  %v1112_v34 = vpack.c.bf16 %v1050_v7, %v1050_v7 }
 0x1d2   :  { %1121 = vmatmul.bf16.vlgmr.msrb.gmra.mxu0 %v1112_v34  ;;  %1134 = vmatmul.bf16.vlgmr.msrb.gmra.mxu1 %v1112_v34 }
 0x1d3   :  { %1147 = vmatmul.bf16.vlgmr.msrb.gmra.mxu2 %v1112_v34  ;;  %1160 = vmatmul.bf16.vlgmr.msrb.gmra.mxu3 %v1112_v34 }
 0x1d4   :  { %1289 = vmatpush.bf16.msrb.mxu0 %v3031_v26  ;;  %1302 = vmatpush.bf16.msrb.mxu1 %v3033_v0 }
 0x1d5   :  { %1315 = vmatpush.bf16.msrb.mxu2 %v3035_v2  ;;  %1328 = vmatpush.bf16.msrb.mxu3 %v3038_v54 }
 0x1d6   :  { %v1069_v18 = vpop.f32.mrf.mxu0  ;;  %v1082_v23 = vpop.f32.mrf.mxu1 }
 0x1d7   :  { %v1183_v3 = vadd.f32 %v1170_v35, %v1069_v18  ;;  %v1184_v24 = vadd.f32 %v1171_v16, %v1082_v23  ;;  %v3917_v18 = vld [vmem:[#allocation62_spill] sm:$0xff]  ;;  %v3918_v23 = vld [vmem:[#allocation63_spill] sm:$0xff] }
 0x1d8   :  { %1290 = vmatpush.bf16.msrb.mxu0 %v3046_v50  ;;  %1303 = vmatpush.bf16.msrb.mxu1 %v3049_v4 }
 0x1d9   :  { %1316 = vmatpush.bf16.msrb.mxu2 %v3910_v45  ;;  %1329 = vmatpush.bf16.msrb.mxu3 %v3911_v43  ;;  %v1191_v15 = vmul.f32 0.5, %v1183_v3  ;;  %v1192_v14 = vmul.f32 0.5, %v1184_v24  ;;  %v3919_v24 = vld [vmem:[#allocation64_spill] sm:$0xff] }
 0x1db   :  { %2498 = vtanh.f32 %v1191_v15  ;;  %v3920_v15 = vld [vmem:[#allocation66_spill] sm:$0xff] }
 0x1dc   :  { %1291 = vmatpush.bf16.msrb.mxu0 %v3912_v58  ;;  %1304 = vmatpush.bf16.msrb.mxu1 %v3913_v32  ;;  %2500 = vtanh.f32 %v1192_v14 }
 0x1dd   :  { %1317 = vmatpush.bf16.msrb.mxu2 %v3915_v42  ;;  %1330 = vmatpush.bf16.msrb.mxu3 %v3916_v47  ;;  %v1095_v56 = vpop.f32.mrf.mxu2  ;;  %v1108_v7 = vpop.f32.mrf.mxu3 }
 0x1de   :  { %v1185_v34 = vadd.f32 %v1172_v51, %v1095_v56  ;;  %v1186_v29 = vadd.f32 %v1173_v11, %v1108_v7  ;;  %v1071_v35 = vpop.f32.mrf.mxu0  ;;  %v1084_v16 = vpop.f32.mrf.mxu1  ;;  %v3921_v51 = vld [vmem:[#allocation69_spill] sm:$0xff] }
 0x1e0   :  { %1292 = vmatpush.bf16.msrb.mxu0 %v3917_v18  ;;  %1305 = vmatpush.bf16.msrb.mxu1 %v3918_v23  ;;  %v1193_v3 = vmul.f32 0.5, %v1185_v34  ;;  %2502 = vtanh.f32 %v1186_v29 }
 0x1e1   :  { %1318 = vmatpush.bf16.msrb.mxu2 %v3919_v24  ;;  %1331 = vmatpush.bf16.msrb.mxu3 %v3920_v15  ;;  %v2499_v14 = vpop.eup %2498 }
 0x1e2   :  { %v2501_v19 = vpop.eup %2500  ;;  %v1197_v42 = vmul.f32 0.5, %v2499_v14  ;;  %2504 = vtanh.f32 %v1193_v3 }
 0x1e3   :  { %v1198_v47 = vmul.f32 0.5, %v2501_v19 }
 0x1e4   :  { %1293 = vmatpush.bf16.msrb.mxu0 %v3897_v46  ;;  %1306 = vmatpush.bf16.msrb.mxu1 %v3921_v51  ;;  %v1200_v11 = vadd.f32 0.5, %v1197_v42 }
 0x1e5   :  { %1319 = vmatpush.bf16.msrb.mxu2 %v3899_v8  ;;  %1332 = vmatpush.bf16.msrb.mxu3 %v3900_v28  ;;  %v1201_v56 = vadd.f32 0.5, %v1198_v47  ;;  %v1097_v7 = vpop.f32.mrf.mxu2  ;;  %v1110_v34 = vpop.f32.mrf.mxu3 }
 0x1e6   :  { %v2503_v29 = vpop.eup %2502  ;;  %v3923_v7 = vld [vmem:[#allocation22_spill] sm:$0xff]  ;;  %v3924_v34 = vld [vmem:[#allocation23_spill] sm:$0xff] }
 0x1e7   :  { %v1204_v35 = vmul.f32 %v1201_v56, %v3226_v12  ;;  %v1205_v16 = vmul.f32 %v2503_v29, %v1200_v11  ;;  %v3922_v56 = vld [vmem:[#allocation21_spill] sm:$0xff]  ;;  %v3925_v29 = vld [vmem:[#allocation24_spill] sm:$0xff] }
 0x1e8   :  { %1294 = vmatpush.bf16.msrb.mxu0 %v3902_v20  ;;  %1307 = vmatpush.bf16.msrb.mxu1 %v3903_v31  ;;  %v2505_v42 = vpop.eup %2504 }
 0x1e9   :  { %1320 = vmatpush.bf16.msrb.mxu2 %v3904_v6  ;;  %1333 = vmatpush.bf16.msrb.mxu3 %v3905_v60  ;;  %v3312_v3 = vadd.f32 %v1205_v16, %v1204_v35  ;;  %v1199_v47 = vmul.f32 0.5, %v2505_v42  ;;  %v3926_v35 = vld [vmem:[#allocation25_spill] sm:$0xff]  ;;  %v3927_v16 = vld [vmem:[#allocation26_spill] sm:$0xff]  ;;  %v3928_v42 = vld [vmem:[#allocation27_spill] sm:$0xff] }
 0x1eb   :  { %2506 = vtanh.f32 %v3312_v3  ;;  %v1202_v12 = vadd.f32 0.5, %v1199_v47  ;;  %v3929_v47 = vld [vmem:[#allocation28_spill] sm:$0xff] }
 0x1ec   :  { %1295 = vmatpush.bf16.msrb.mxu0 %v3906_v36  ;;  %1308 = vmatpush.bf16.msrb.mxu1 %v3128_v40 }
 0x1ed   :  { %1321 = vmatpush.bf16.msrb.mxu2 %v3907_v27  ;;  %1334 = vmatpush.bf16.msrb.mxu3 %v3133_v49 }
 0x1f0   :  { %1296 = vmatpush.bf16.msrb.mxu0 %v3136_v55  ;;  %1309 = vmatpush.bf16.msrb.mxu1 %v3141_v30 }
 0x1f1   :  { %1322 = vmatpush.bf16.msrb.mxu2 %v3143_v59  ;;  %1335 = vmatpush.bf16.msrb.mxu3 %v3148_v39  ;;  %v2507_v14 = vpop.eup %2506 }
 0x1f2   :  { %v1208_v19 = vmul.f32 %v2507_v14, %v1202_v12  ;;  %v3930_v12 = vld [vmem:[#allocation29_spill] sm:$0xff]  ;;  %v3931_v14 = vld [vmem:[#allocation30_spill] sm:$0xff] }
 0x1f4   :  { %2378 = vst [vmem:[%s3702_s5 + $0x20] sm:$0xff] %v1208_v19  ;;  %v1235_v11 = vpack.c.bf16 %v1208_v19, %v1208_v19  ;;  %v3932_v19 = vld [vmem:[#allocation31_spill] sm:$0xff] }
 0x1f6   :  { %1244 = vmatmul.bf16.vlgmr.msra.gmra.mxu0 %v1235_v11  ;;  %1257 = vmatmul.bf16.vlgmr.msra.gmra.mxu1 %v1235_v11 }
 0x1f7   :  { %1270 = vmatmul.bf16.vlgmr.msra.gmra.mxu2 %v1235_v11  ;;  %1283 = vmatmul.bf16.vlgmr.msra.gmra.mxu3 %v1235_v11  ;;  %v3933_v11 = vld [vmem:[#allocation32_spill] sm:$0xff] }
 0x1f8   :  { %1412 = vmatpush.bf16.msra.mxu0 %v2803_v33  ;;  %1425 = vmatpush.bf16.msra.mxu1 %v2806_v37 }
 0x1f9   :  { %1438 = vmatpush.bf16.msra.mxu2 %v2808_v38  ;;  %1451 = vmatpush.bf16.msra.mxu3 %v2811_v41 }
 0x1fc   :  { %1413 = vmatpush.bf16.msra.mxu0 %v2816_v44  ;;  %1426 = vmatpush.bf16.msra.mxu1 %v2818_v48 }
 0x1fd   :  { %1439 = vmatpush.bf16.msra.mxu2 %v2821_v52  ;;  %1452 = vmatpush.bf16.msra.mxu3 %v2823_v53 }
 0x200   :  { %1414 = vmatpush.bf16.msra.mxu0 %v2828_v57  ;;  %1427 = vmatpush.bf16.msra.mxu1 %v2830_v61 }
 0x201   :  { %1440 = vmatpush.bf16.msra.mxu2 %v2832_v62  ;;  %1453 = vmatpush.bf16.msra.mxu3 %v2835_v1 }
 0x204   :  { %1415 = vmatpush.bf16.msra.mxu0 %v2840_v5  ;;  %1428 = vmatpush.bf16.msra.mxu1 %v2842_v9 }
 0x205   :  { %1441 = vmatpush.bf16.msra.mxu2 %v2844_v10  ;;  %1454 = vmatpush.bf16.msra.mxu3 %v2847_v13 }
 0x208   :  { %1416 = vmatpush.bf16.msra.mxu0 %v2856_v17  ;;  %1429 = vmatpush.bf16.msra.mxu1 %v2861_v21 }
 0x209   :  { %1442 = vmatpush.bf16.msra.mxu2 %v2863_v22  ;;  %1455 = vmatpush.bf16.msra.mxu3 %v2867_v25 }
 0x20c   :  { %1417 = vmatpush.bf16.msra.mxu0 %v3922_v56  ;;  %1430 = vmatpush.bf16.msra.mxu1 %v3923_v7  ;;  %v3934_v7 = vld [vmem:[#allocation67_spill] sm:$0xff] }
 0x20d   :  { %1443 = vmatpush.bf16.msra.mxu2 %v3924_v34  ;;  %1456 = vmatpush.bf16.msra.mxu3 %v3925_v29  ;;  %v1179_v34 = vunpack.c.l.bf16 %v3934_v7  ;;  %v1180_v29 = vunpack.c.h.bf16 %v3934_v7 }
 0x210   :  { %1418 = vmatpush.bf16.msra.mxu0 %v3926_v35  ;;  %1431 = vmatpush.bf16.msra.mxu1 %v3927_v16 }
 0x211   :  { %1444 = vmatpush.bf16.msra.mxu2 %v3928_v42  ;;  %1457 = vmatpush.bf16.msra.mxu3 %v3929_v47  ;;  %v3935_v47 = vld [vmem:[#allocation75_spill] sm:$0xff] }
 0x214   :  { %1419 = vmatpush.bf16.msra.mxu0 %v3930_v12  ;;  %1432 = vmatpush.bf16.msra.mxu1 %v3931_v14  ;;  %v1181_v12 = vunpack.c.l.bf16 %v3935_v47  ;;  %v1182_v14 = vunpack.c.h.bf16 %v3935_v47 }
 0x215   :  { %1445 = vmatpush.bf16.msra.mxu2 %v3932_v19  ;;  %1458 = vmatpush.bf16.msra.mxu3 %v3933_v11 }
 0x24f   :  { %v1122_v56 = vpop.f32.mrf.mxu0  ;;  %v1135_v35 = vpop.f32.mrf.mxu1 }
 0x250   :  { %v1187_v25 = vadd.f32 %v1179_v34, %v1122_v56  ;;  %v1188_v16 = vadd.f32 %v1180_v29, %v1135_v35 }
 0x252   :  { %v1209_v22 = vmul.f32 0.5, %v1187_v25  ;;  %v1210_v42 = vmul.f32 0.5, %v1188_v16 }
 0x254   :  { %2508 = vtanh.f32 %v1209_v22 }
 0x255   :  { %2510 = vtanh.f32 %v1210_v42 }
 0x256   :  { %v1148_v21 = vpop.f32.mrf.mxu2  ;;  %v1161_v19 = vpop.f32.mrf.mxu3 }
 0x257   :  { %v1189_v17 = vadd.f32 %v1181_v12, %v1148_v21  ;;  %v1190_v11 = vadd.f32 %v1182_v14, %v1161_v19  ;;  %v1124_v13 = vpop.f32.mrf.mxu0  ;;  %v1137_v10 = vpop.f32.mrf.mxu1 }
 0x259   :  { %v1211_v9 = vmul.f32 0.5, %v1189_v17  ;;  %2512 = vtanh.f32 %v1190_v11 }
 0x25a   :  { %v2509_v7 = vpop.eup %2508 }
 0x25b   :  { %v2511_v5 = vpop.eup %2510  ;;  %v1215_v56 = vmul.f32 0.5, %v2509_v7  ;;  %2514 = vtanh.f32 %v1211_v9 }
 0x25c   :  { %v1216_v34 = vmul.f32 0.5, %v2511_v5 }
 0x25d   :  { %v1218_v25 = vadd.f32 0.5, %v1215_v56 }
 0x25e   :  { %v1219_v22 = vadd.f32 0.5, %v1216_v34  ;;  %v1150_v29 = vpop.f32.mrf.mxu2  ;;  %v1163_v35 = vpop.f32.mrf.mxu3 }
 0x25f   :  { %v2513_v16 = vpop.eup %2512  ;;  %v3938_v35 = vld [vmem:[#allocation60_spill] sm:$0xff] }
 0x260   :  { %v1222_v42 = vmul.f32 %v1219_v22, %v3277_v63  ;;  %v1223_v47 = vmul.f32 %v2513_v16, %v1218_v25  ;;  %v3937_v25 = vld [vmem:[#allocation38_spill] sm:$0xff]  ;;  %v3939_v16 = vld [vmem:[#allocation61_spill] sm:$0xff] }
 0x261   :  { %v2515_v1 = vpop.eup %2514  ;;  %v1348_v22 = vunpack.c.l.bf16 %v3937_v25  ;;  %v1349_v29 = vunpack.c.h.bf16 %v3937_v25 }
 0x262   :  { %v3363_v21 = vadd.f32 %v1223_v47, %v1222_v42  ;;  %v1217_v10 = vmul.f32 0.5, %v2515_v1  ;;  %v3936_v1 = vld [vmem:[#allocation37_spill] sm:$0xff] }
 0x263   :  { %v1346_v9 = vunpack.c.l.bf16 %v3936_v1  ;;  %v1347_v63 = vunpack.c.h.bf16 %v3936_v1 }
 0x264   :  { %2516 = vtanh.f32 %v3363_v21  ;;  %v1220_v13 = vadd.f32 0.5, %v1217_v10 }
 0x26a   :  { %v2517_v17 = vpop.eup %2516 }
 0x26b   :  { %v1226_v12 = vmul.f32 %v2517_v17, %v1220_v13 }
 0x26d   :  { %2379 = vst [vmem:[%s3702_s5 + $0x58] sm:$0xff] %v1226_v12  ;;  %v1288_v5 = vpack.c.bf16 %v1226_v12, %v1226_v12 }
 0x26f   :  { %1297 = vmatmul.bf16.vlgmr.msrb.gmra.mxu0 %v1288_v5  ;;  %1310 = vmatmul.bf16.vlgmr.msrb.gmra.mxu1 %v1288_v5 }
 0x270   :  { %1323 = vmatmul.bf16.vlgmr.msrb.gmra.mxu2 %v1288_v5  ;;  %1336 = vmatmul.bf16.vlgmr.msrb.gmra.mxu3 %v1288_v5 }
 0x271   :  { %1465 = vmatpush.bf16.msrb.mxu0 %v3031_v26  ;;  %1478 = vmatpush.bf16.msrb.mxu1 %v3033_v0 }
 0x272   :  { %1491 = vmatpush.bf16.msrb.mxu2 %v3035_v2  ;;  %1504 = vmatpush.bf16.msrb.mxu3 %v3038_v54 }
 0x273   :  { %v1245_v14 = vpop.f32.mrf.mxu0  ;;  %v1258_v19 = vpop.f32.mrf.mxu1 }
 0x274   :  { %v1359_v11 = vadd.f32 %v1346_v9, %v1245_v14  ;;  %v1360_v7 = vadd.f32 %v1347_v63, %v1258_v19 }
 0x275   :  { %1466 = vmatpush.bf16.msrb.mxu0 %v3046_v50  ;;  %1479 = vmatpush.bf16.msrb.mxu1 %v3049_v4 }
 0x276   :  { %1492 = vmatpush.bf16.msrb.mxu2 %v3910_v45  ;;  %1505 = vmatpush.bf16.msrb.mxu3 %v3911_v43  ;;  %v1367_v56 = vmul.f32 0.5, %v1359_v11  ;;  %v1368_v34 = vmul.f32 0.5, %v1360_v7 }
 0x278   :  { %2518 = vtanh.f32 %v1367_v56 }
 0x279   :  { %1467 = vmatpush.bf16.msrb.mxu0 %v3912_v58  ;;  %1480 = vmatpush.bf16.msrb.mxu1 %v3913_v32  ;;  %2520 = vtanh.f32 %v1368_v34 }
 0x27a   :  { %1493 = vmatpush.bf16.msrb.mxu2 %v3938_v35  ;;  %1506 = vmatpush.bf16.msrb.mxu3 %v3939_v16  ;;  %v1271_v42 = vpop.f32.mrf.mxu2  ;;  %v1284_v47 = vpop.f32.mrf.mxu3 }
 0x27b   :  { %v1361_v10 = vadd.f32 %v1348_v22, %v1271_v42  ;;  %v1362_v13 = vadd.f32 %v1349_v29, %v1284_v47  ;;  %v1247_v17 = vpop.f32.mrf.mxu0  ;;  %v1260_v12 = vpop.f32.mrf.mxu1 }
 0x27c   :  { %v3940_v12 = vld [vmem:[#allocation12_spill] sm:$0xff] }
 0x27d   :  { %1468 = vmatpush.bf16.msrb.mxu0 %v3917_v18  ;;  %1481 = vmatpush.bf16.msrb.mxu1 %v3918_v23  ;;  %v1369_v5 = vmul.f32 0.5, %v1361_v10  ;;  %2522 = vtanh.f32 %v1362_v13 }
 0x27e   :  { %1494 = vmatpush.bf16.msrb.mxu2 %v3919_v24  ;;  %1507 = vmatpush.bf16.msrb.mxu3 %v3920_v15  ;;  %v2519_v1 = vpop.eup %2518 }
 0x27f   :  { %v2521_v9 = vpop.eup %2520  ;;  %v1373_v63 = vmul.f32 0.5, %v2519_v1  ;;  %2524 = vtanh.f32 %v1369_v5  ;;  %v3941_v5 = vld [vmem:[#allocation13_spill] sm:$0xff]  ;;  %v3942_v1 = vld [vmem:[#allocation14_spill] sm:$0xff] }
 0x280   :  { %v1374_v14 = vmul.f32 0.5, %v2521_v9  ;;  %v3943_v9 = vld [vmem:[#allocation15_spill] sm:$0xff] }
 0x281   :  { %1469 = vmatpush.bf16.msrb.mxu0 %v3897_v46  ;;  %1482 = vmatpush.bf16.msrb.mxu1 %v3921_v51  ;;  %v1376_v19 = vadd.f32 0.5, %v1373_v63  ;;  %v3944_v63 = vld [vmem:[#allocation16_spill] sm:$0xff] }
 0x282   :  { %1495 = vmatpush.bf16.msrb.mxu2 %v3899_v8  ;;  %1508 = vmatpush.bf16.msrb.mxu3 %v3900_v28  ;;  %v1377_v11 = vadd.f32 0.5, %v1374_v14  ;;  %v1273_v7 = vpop.f32.mrf.mxu2  ;;  %v1286_v56 = vpop.f32.mrf.mxu3  ;;  %v3945_v14 = vld [vmem:[#allocation17_spill] sm:$0xff] }
 0x283   :  { %v2523_v34 = vpop.eup %2522  ;;  %v3948_v7 = vld [vmem:[#allocation20_spill] sm:$0xff]  ;;  %v3949_v56 = vld [vmem:[#allocation21_spill] sm:$0xff] }
 0x284   :  { %v1380_v25 = vmul.f32 %v1377_v11, %v3312_v3  ;;  %v1381_v22 = vmul.f32 %v2523_v34, %v1376_v19  ;;  %v3946_v19 = vld [vmem:[#allocation18_spill] sm:$0xff]  ;;  %v3947_v11 = vld [vmem:[#allocation19_spill] sm:$0xff] }
 0x285   :  { %1470 = vmatpush.bf16.msrb.mxu0 %v3902_v20  ;;  %1483 = vmatpush.bf16.msrb.mxu1 %v3903_v31  ;;  %v2525_v29 = vpop.eup %2524  ;;  %v3950_v34 = vld [vmem:[#allocation22_spill] sm:$0xff] }
 0x286   :  { %1496 = vmatpush.bf16.msrb.mxu2 %v3904_v6  ;;  %1509 = vmatpush.bf16.msrb.mxu3 %v3905_v60  ;;  %v3398_v42 = vadd.f32 %v1381_v22, %v1380_v25  ;;  %v1375_v47 = vmul.f32 0.5, %v2525_v29  ;;  %v3951_v25 = vld [vmem:[#allocation23_spill] sm:$0xff]  ;;  %v3952_v22 = vld [vmem:[#allocation24_spill] sm:$0xff]  ;;  %v3953_v29 = vld [vmem:[#allocation25_spill] sm:$0xff] }
 0x288   :  { %2526 = vtanh.f32 %v3398_v42  ;;  %v1378_v3 = vadd.f32 0.5, %v1375_v47  ;;  %v3954_v47 = vld [vmem:[#allocation26_spill] sm:$0xff] }
 0x289   :  { %1471 = vmatpush.bf16.msrb.mxu0 %v3906_v36  ;;  %1484 = vmatpush.bf16.msrb.mxu1 %v3128_v40 }
 0x28a   :  { %1497 = vmatpush.bf16.msrb.mxu2 %v3907_v27  ;;  %1510 = vmatpush.bf16.msrb.mxu3 %v3133_v49 }
 0x28d   :  { %1472 = vmatpush.bf16.msrb.mxu0 %v3136_v55  ;;  %1485 = vmatpush.bf16.msrb.mxu1 %v3141_v30 }
 0x28e   :  { %1498 = vmatpush.bf16.msrb.mxu2 %v3143_v59  ;;  %1511 = vmatpush.bf16.msrb.mxu3 %v3148_v39  ;;  %v2527_v10 = vpop.eup %2526 }
 0x28f   :  { %v1384_v13 = vmul.f32 %v2527_v10, %v1378_v3  ;;  %v3955_v3 = vld [vmem:[#allocation27_spill] sm:$0xff]  ;;  %v3956_v10 = vld [vmem:[#allocation28_spill] sm:$0xff] }
 0x291   :  { %2380 = vst [vmem:[%s3702_s5 + $0x30] sm:$0xff] %v1384_v13  ;;  %v1411_v17 = vpack.c.bf16 %v1384_v13, %v1384_v13  ;;  %v3957_v13 = vld [vmem:[#allocation29_spill] sm:$0xff] }
 0x293   :  { %1420 = vmatmul.bf16.vlgmr.msra.gmra.mxu0 %v1411_v17  ;;  %1433 = vmatmul.bf16.vlgmr.msra.gmra.mxu1 %v1411_v17 }
 0x294   :  { %1446 = vmatmul.bf16.vlgmr.msra.gmra.mxu2 %v1411_v17  ;;  %1459 = vmatmul.bf16.vlgmr.msra.gmra.mxu3 %v1411_v17  ;;  %v3958_v17 = vld [vmem:[#allocation30_spill] sm:$0xff] }
 0x295   :  { %1576 = vmatpush.bf16.msra.mxu0 %v2803_v33  ;;  %1589 = vmatpush.bf16.msra.mxu1 %v2806_v37 }
 0x296   :  { %1602 = vmatpush.bf16.msra.mxu2 %v2808_v38  ;;  %1615 = vmatpush.bf16.msra.mxu3 %v2811_v41 }
 0x299   :  { %1577 = vmatpush.bf16.msra.mxu0 %v2816_v44  ;;  %1590 = vmatpush.bf16.msra.mxu1 %v2818_v48 }
 0x29a   :  { %1603 = vmatpush.bf16.msra.mxu2 %v2821_v52  ;;  %1616 = vmatpush.bf16.msra.mxu3 %v2823_v53 }
 0x29d   :  { %1578 = vmatpush.bf16.msra.mxu0 %v2828_v57  ;;  %1591 = vmatpush.bf16.msra.mxu1 %v2830_v61 }
 0x29e   :  { %1604 = vmatpush.bf16.msra.mxu2 %v2832_v62  ;;  %1617 = vmatpush.bf16.msra.mxu3 %v3940_v12 }
 0x2a1   :  { %1579 = vmatpush.bf16.msra.mxu0 %v3941_v5  ;;  %1592 = vmatpush.bf16.msra.mxu1 %v3942_v1 }
 0x2a2   :  { %1605 = vmatpush.bf16.msra.mxu2 %v3943_v9  ;;  %1618 = vmatpush.bf16.msra.mxu3 %v3944_v63 }
 0x2a5   :  { %1580 = vmatpush.bf16.msra.mxu0 %v3945_v14  ;;  %1593 = vmatpush.bf16.msra.mxu1 %v3946_v19 }
 0x2a6   :  { %1606 = vmatpush.bf16.msra.mxu2 %v3947_v11  ;;  %1619 = vmatpush.bf16.msra.mxu3 %v3948_v7  ;;  %v3959_v7 = vld [vmem:[#allocation31_spill] sm:$0xff] }
 0x2a9   :  { %1581 = vmatpush.bf16.msra.mxu0 %v3949_v56  ;;  %1594 = vmatpush.bf16.msra.mxu1 %v3950_v34  ;;  %v3960_v56 = vld [vmem:[#allocation32_spill] sm:$0xff]  ;;  %v3961_v34 = vld [vmem:[#allocation57_spill] sm:$0xff] }
 0x2aa   :  { %1607 = vmatpush.bf16.msra.mxu2 %v3951_v25  ;;  %1620 = vmatpush.bf16.msra.mxu3 %v3952_v22  ;;  %v1355_v25 = vunpack.c.l.bf16 %v3961_v34  ;;  %v1356_v22 = vunpack.c.h.bf16 %v3961_v34 }
 0x2ad   :  { %1582 = vmatpush.bf16.msra.mxu0 %v3953_v29  ;;  %1595 = vmatpush.bf16.msra.mxu1 %v3954_v47 }
 0x2ae   :  { %1608 = vmatpush.bf16.msra.mxu2 %v3955_v3  ;;  %1621 = vmatpush.bf16.msra.mxu3 %v3956_v10  ;;  %v3962_v10 = vld [vmem:[#allocation65_spill] sm:$0xff] }
 0x2b1   :  { %1583 = vmatpush.bf16.msra.mxu0 %v3957_v13  ;;  %1596 = vmatpush.bf16.msra.mxu1 %v3958_v17  ;;  %v1357_v13 = vunpack.c.l.bf16 %v3962_v10  ;;  %v1358_v17 = vunpack.c.h.bf16 %v3962_v10 }
 0x2b2   :  { %1609 = vmatpush.bf16.msra.mxu2 %v3959_v7  ;;  %1622 = vmatpush.bf16.msra.mxu3 %v3960_v56 }
 0x2ec   :  { %v1298_v11 = vpop.f32.mrf.mxu0  ;;  %v1311_v29 = vpop.f32.mrf.mxu1 }
 0x2ed   :  { %v1363_v19 = vadd.f32 %v1355_v25, %v1298_v11  ;;  %v1364_v47 = vadd.f32 %v1356_v22, %v1311_v29 }
 0x2ef   :  { %v1385_v14 = vmul.f32 0.5, %v1363_v19  ;;  %v1386_v3 = vmul.f32 0.5, %v1364_v47 }
 0x2f1   :  { %2528 = vtanh.f32 %v1385_v14 }
 0x2f2   :  { %2530 = vtanh.f32 %v1386_v3 }
 0x2f3   :  { %v1324_v63 = vpop.f32.mrf.mxu2  ;;  %v1337_v7 = vpop.f32.mrf.mxu3 }
 0x2f4   :  { %v1365_v9 = vadd.f32 %v1357_v13, %v1324_v63  ;;  %v1366_v56 = vadd.f32 %v1358_v17, %v1337_v7  ;;  %v1300_v1 = vpop.f32.mrf.mxu0  ;;  %v1313_v5 = vpop.f32.mrf.mxu1 }
 0x2f6   :  { %v1387_v12 = vmul.f32 0.5, %v1365_v9  ;;  %2532 = vtanh.f32 %v1366_v56 }
 0x2f7   :  { %v2529_v34 = vpop.eup %2528 }
 0x2f8   :  { %v2531_v62 = vpop.eup %2530  ;;  %v1391_v11 = vmul.f32 0.5, %v2529_v34  ;;  %2534 = vtanh.f32 %v1387_v12 }
 0x2f9   :  { %v1392_v25 = vmul.f32 0.5, %v2531_v62 }
 0x2fa   :  { %v1394_v19 = vadd.f32 0.5, %v1391_v11 }
 0x2fb   :  { %v1395_v14 = vadd.f32 0.5, %v1392_v25  ;;  %v1326_v22 = vpop.f32.mrf.mxu2  ;;  %v1339_v29 = vpop.f32.mrf.mxu3 }
 0x2fc   :  { %v2533_v47 = vpop.eup %2532 }
 0x2fd   :  { %v1398_v3 = vmul.f32 %v1395_v14, %v3363_v21  ;;  %v1399_v10 = vmul.f32 %v2533_v47, %v1394_v19  ;;  %v3964_v19 = vld [vmem:[#allocation40_spill] sm:$0xff] }
 0x2fe   :  { %v2535_v61 = vpop.eup %2534  ;;  %v1521_v14 = vunpack.c.l.bf16 %v3964_v19  ;;  %v1522_v22 = vunpack.c.h.bf16 %v3964_v19 }
 0x2ff   :  { %v3449_v63 = vadd.f32 %v1399_v10, %v1398_v3  ;;  %v1393_v5 = vmul.f32 0.5, %v2535_v61  ;;  %v3963_v61 = vld [vmem:[#allocation39_spill] sm:$0xff] }
 0x300   :  { %v1519_v21 = vunpack.c.l.bf16 %v3963_v61  ;;  %v1520_v12 = vunpack.c.h.bf16 %v3963_v61 }
 0x301   :  { %2536 = vtanh.f32 %v3449_v63  ;;  %v1396_v1 = vadd.f32 0.5, %v1393_v5 }
 0x307   :  { %v2537_v9 = vpop.eup %2536 }
 0x308   :  { %v1402_v7 = vmul.f32 %v2537_v9, %v1396_v1 }
 0x30a   :  { %2381 = vst [vmem:[%s3702_s5 + $0x48] sm:$0xff] %v1402_v7  ;;  %v1464_v62 = vpack.c.bf16 %v1402_v7, %v1402_v7 }
 0x30c   :  { %1473 = vmatmul.bf16.vlgmr.msrb.gmra.mxu0 %v1464_v62  ;;  %1486 = vmatmul.bf16.vlgmr.msrb.gmra.mxu1 %v1464_v62 }
 0x30d   :  { %1499 = vmatmul.bf16.vlgmr.msrb.gmra.mxu2 %v1464_v62  ;;  %1512 = vmatmul.bf16.vlgmr.msrb.gmra.mxu3 %v1464_v62 }
 0x30e   :  { %1629 = vmatpush.bf16.msrb.mxu0 %v3031_v26  ;;  %1642 = vmatpush.bf16.msrb.mxu1 %v3033_v0 }
 0x30f   :  { %1655 = vmatpush.bf16.msrb.mxu2 %v3035_v2  ;;  %1668 = vmatpush.bf16.msrb.mxu3 %v3038_v54 }
 0x310   :  { %v1421_v56 = vpop.f32.mrf.mxu0  ;;  %v1434_v13 = vpop.f32.mrf.mxu1 }
 0x311   :  { %v1529_v17 = vadd.f32 %v1519_v21, %v1421_v56  ;;  %v1530_v34 = vadd.f32 %v1520_v12, %v1434_v13 }
 0x312   :  { %1630 = vmatpush.bf16.msrb.mxu0 %v3046_v50  ;;  %1643 = vmatpush.bf16.msrb.mxu1 %v3049_v4 }
 0x313   :  { %1656 = vmatpush.bf16.msrb.mxu2 %v3910_v45  ;;  %1669 = vmatpush.bf16.msrb.mxu3 %v3911_v43  ;;  %v1537_v11 = vmul.f32 0.5, %v1529_v17  ;;  %v1538_v25 = vmul.f32 0.5, %v1530_v34 }
 0x315   :  { %2538 = vtanh.f32 %v1537_v11 }
 0x316   :  { %1631 = vmatpush.bf16.msrb.mxu0 %v3912_v58  ;;  %1644 = vmatpush.bf16.msrb.mxu1 %v3913_v32  ;;  %2540 = vtanh.f32 %v1538_v25 }
 0x317   :  { %1657 = vmatpush.bf16.msrb.mxu2 %v3938_v35  ;;  %1670 = vmatpush.bf16.msrb.mxu3 %v3939_v16  ;;  %v1447_v29 = vpop.f32.mrf.mxu2  ;;  %v1460_v47 = vpop.f32.mrf.mxu3 }
 0x318   :  { %v1531_v3 = vadd.f32 %v1521_v14, %v1447_v29  ;;  %v1532_v10 = vadd.f32 %v1522_v22, %v1460_v47  ;;  %v1423_v5 = vpop.f32.mrf.mxu0  ;;  %v1436_v1 = vpop.f32.mrf.mxu1 }
 0x319   :  { %v3966_v5 = vld [vmem:[#allocation11_spill] sm:$0xff]  ;;  %v3967_v1 = vld [vmem:[#allocation12_spill] sm:$0xff] }
 0x31a   :  { %1632 = vmatpush.bf16.msrb.mxu0 %v3917_v18  ;;  %1645 = vmatpush.bf16.msrb.mxu1 %v3918_v23  ;;  %v1539_v9 = vmul.f32 0.5, %v1531_v3  ;;  %2542 = vtanh.f32 %v1532_v10  ;;  %v3965_v10 = vld [vmem:[#allocation10_spill] sm:$0xff] }
 0x31b   :  { %1658 = vmatpush.bf16.msrb.mxu2 %v3919_v24  ;;  %1671 = vmatpush.bf16.msrb.mxu3 %v3920_v15  ;;  %v2539_v7 = vpop.eup %2538 }
 0x31c   :  { %v2541_v62 = vpop.eup %2540  ;;  %v1543_v61 = vmul.f32 0.5, %v2539_v7  ;;  %2544 = vtanh.f32 %v1539_v9  ;;  %v3968_v9 = vld [vmem:[#allocation13_spill] sm:$0xff]  ;;  %v3969_v7 = vld [vmem:[#allocation14_spill] sm:$0xff] }
 0x31d   :  { %v1544_v21 = vmul.f32 0.5, %v2541_v62  ;;  %v3970_v62 = vld [vmem:[#allocation15_spill] sm:$0xff] }
 0x31e   :  { %1633 = vmatpush.bf16.msrb.mxu0 %v3897_v46  ;;  %1646 = vmatpush.bf16.msrb.mxu1 %v3921_v51  ;;  %v1546_v12 = vadd.f32 0.5, %v1543_v61  ;;  %v3971_v61 = vld [vmem:[#allocation16_spill] sm:$0xff] }
 0x31f   :  { %1659 = vmatpush.bf16.msrb.mxu2 %v3899_v8  ;;  %1672 = vmatpush.bf16.msrb.mxu3 %v3900_v28  ;;  %v1547_v56 = vadd.f32 0.5, %v1544_v21  ;;  %v1449_v13 = vpop.f32.mrf.mxu2  ;;  %v1462_v17 = vpop.f32.mrf.mxu3  ;;  %v3972_v21 = vld [vmem:[#allocation17_spill] sm:$0xff] }
 0x320   :  { %v2543_v34 = vpop.eup %2542  ;;  %v3975_v13 = vld [vmem:[#allocation20_spill] sm:$0xff]  ;;  %v3976_v17 = vld [vmem:[#allocation21_spill] sm:$0xff] }
 0x321   :  { %v1550_v11 = vmul.f32 %v1547_v56, %v3398_v42  ;;  %v1551_v25 = vmul.f32 %v2543_v34, %v1546_v12  ;;  %v3973_v12 = vld [vmem:[#allocation18_spill] sm:$0xff]  ;;  %v3974_v56 = vld [vmem:[#allocation19_spill] sm:$0xff] }
 0x322   :  { %1634 = vmatpush.bf16.msrb.mxu0 %v3902_v20  ;;  %1647 = vmatpush.bf16.msrb.mxu1 %v3903_v31  ;;  %v2545_v19 = vpop.eup %2544  ;;  %v3977_v34 = vld [vmem:[#allocation22_spill] sm:$0xff] }
 0x323   :  { %1660 = vmatpush.bf16.msrb.mxu2 %v3904_v6  ;;  %1673 = vmatpush.bf16.msrb.mxu3 %v3905_v60  ;;  %v3484_v14 = vadd.f32 %v1551_v25, %v1550_v11  ;;  %v1545_v22 = vmul.f32 0.5, %v2545_v19  ;;  %v3978_v11 = vld [vmem:[#allocation23_spill] sm:$0xff]  ;;  %v3979_v25 = vld [vmem:[#allocation24_spill] sm:$0xff]  ;;  %v3980_v19 = vld [vmem:[#allocation25_spill] sm:$0xff] }
 0x325   :  { %2546 = vtanh.f32 %v3484_v14  ;;  %v1548_v42 = vadd.f32 0.5, %v1545_v22  ;;  %v3981_v22 = vld [vmem:[#allocation26_spill] sm:$0xff] }
 0x326   :  { %1635 = vmatpush.bf16.msrb.mxu0 %v3906_v36  ;;  %1648 = vmatpush.bf16.msrb.mxu1 %v3128_v40 }
 0x327   :  { %1661 = vmatpush.bf16.msrb.mxu2 %v3907_v27  ;;  %1674 = vmatpush.bf16.msrb.mxu3 %v3133_v49 }
 0x32a   :  { %1636 = vmatpush.bf16.msrb.mxu0 %v3136_v55  ;;  %1649 = vmatpush.bf16.msrb.mxu1 %v3141_v30 }
 0x32b   :  { %1662 = vmatpush.bf16.msrb.mxu2 %v3143_v59  ;;  %1675 = vmatpush.bf16.msrb.mxu3 %v3148_v39  ;;  %v2547_v29 = vpop.eup %2546 }
 0x32c   :  { %v1554_v47 = vmul.f32 %v2547_v29, %v1548_v42  ;;  %v3982_v42 = vld [vmem:[#allocation27_spill] sm:$0xff]  ;;  %v3983_v29 = vld [vmem:[#allocation28_spill] sm:$0xff] }
 0x32e   :  { %2382 = vst [vmem:[%s3702_s5 + $0x40] sm:$0xff] %v1554_v47  ;;  %v1575_v3 = vpack.c.bf16 %v1554_v47, %v1554_v47  ;;  %v3984_v47 = vld [vmem:[#allocation29_spill] sm:$0xff] }
 0x330   :  { %1584 = vmatmul.bf16.vlgmr.msra.gmra.mxu0 %v1575_v3  ;;  %1597 = vmatmul.bf16.vlgmr.msra.gmra.mxu1 %v1575_v3 }
 0x331   :  { %1610 = vmatmul.bf16.vlgmr.msra.gmra.mxu2 %v1575_v3  ;;  %1623 = vmatmul.bf16.vlgmr.msra.gmra.mxu3 %v1575_v3  ;;  %v3985_v3 = vld [vmem:[#allocation30_spill] sm:$0xff] }
 0x332   :  { %1740 = vmatpush.bf16.msra.mxu0 %v2803_v33  ;;  %1753 = vmatpush.bf16.msra.mxu1 %v2806_v37 }
 0x333   :  { %1766 = vmatpush.bf16.msra.mxu2 %v2808_v38  ;;  %1779 = vmatpush.bf16.msra.mxu3 %v2811_v41 }
 0x336   :  { %1741 = vmatpush.bf16.msra.mxu0 %v2816_v44  ;;  %1754 = vmatpush.bf16.msra.mxu1 %v2818_v48 }
 0x337   :  { %1767 = vmatpush.bf16.msra.mxu2 %v2821_v52  ;;  %1780 = vmatpush.bf16.msra.mxu3 %v2823_v53 }
 0x33a   :  { %1742 = vmatpush.bf16.msra.mxu0 %v2828_v57  ;;  %1755 = vmatpush.bf16.msra.mxu1 %v3965_v10 }
 0x33b   :  { %1768 = vmatpush.bf16.msra.mxu2 %v3966_v5  ;;  %1781 = vmatpush.bf16.msra.mxu3 %v3967_v1 }
 0x33e   :  { %1743 = vmatpush.bf16.msra.mxu0 %v3968_v9  ;;  %1756 = vmatpush.bf16.msra.mxu1 %v3969_v7 }
 0x33f   :  { %1769 = vmatpush.bf16.msra.mxu2 %v3970_v62  ;;  %1782 = vmatpush.bf16.msra.mxu3 %v3971_v61 }
 0x342   :  { %1744 = vmatpush.bf16.msra.mxu0 %v3972_v21  ;;  %1757 = vmatpush.bf16.msra.mxu1 %v3973_v12 }
 0x343   :  { %1770 = vmatpush.bf16.msra.mxu2 %v3974_v56  ;;  %1783 = vmatpush.bf16.msra.mxu3 %v3975_v13  ;;  %v3986_v13 = vld [vmem:[#allocation31_spill] sm:$0xff] }
 0x346   :  { %1745 = vmatpush.bf16.msra.mxu0 %v3976_v17  ;;  %1758 = vmatpush.bf16.msra.mxu1 %v3977_v34  ;;  %v3987_v17 = vld [vmem:[#allocation32_spill] sm:$0xff]  ;;  %v3988_v34 = vld [vmem:[#allocation53_spill] sm:$0xff] }
 0x347   :  { %1771 = vmatpush.bf16.msra.mxu2 %v3978_v11  ;;  %1784 = vmatpush.bf16.msra.mxu3 %v3979_v25  ;;  %v1525_v11 = vunpack.c.l.bf16 %v3988_v34  ;;  %v1526_v25 = vunpack.c.h.bf16 %v3988_v34 }
 0x34a   :  { %1746 = vmatpush.bf16.msra.mxu0 %v3980_v19  ;;  %1759 = vmatpush.bf16.msra.mxu1 %v3981_v22 }
 0x34b   :  { %1772 = vmatpush.bf16.msra.mxu2 %v3982_v42  ;;  %1785 = vmatpush.bf16.msra.mxu3 %v3983_v29  ;;  %v3989_v29 = vld [vmem:[#allocation55_spill] sm:$0xff] }
 0x34e   :  { %1747 = vmatpush.bf16.msra.mxu0 %v3984_v47  ;;  %1760 = vmatpush.bf16.msra.mxu1 %v3985_v3  ;;  %v1527_v47 = vunpack.c.l.bf16 %v3989_v29  ;;  %v1528_v3 = vunpack.c.h.bf16 %v3989_v29 }
 0x34f   :  { %1773 = vmatpush.bf16.msra.mxu2 %v3986_v13  ;;  %1786 = vmatpush.bf16.msra.mxu3 %v3987_v17 }
 0x389   :  { %v1474_v56 = vpop.f32.mrf.mxu0  ;;  %v1487_v19 = vpop.f32.mrf.mxu1 }
 0x38a   :  { %v1533_v12 = vadd.f32 %v1525_v11, %v1474_v56  ;;  %v1534_v22 = vadd.f32 %v1526_v25, %v1487_v19 }
 0x38c   :  { %v1555_v21 = vmul.f32 0.5, %v1533_v12  ;;  %v1556_v42 = vmul.f32 0.5, %v1534_v22 }
 0x38e   :  { %2548 = vtanh.f32 %v1555_v21 }
 0x38f   :  { %2550 = vtanh.f32 %v1556_v42 }
 0x390   :  { %v1500_v61 = vpop.f32.mrf.mxu2  ;;  %v1513_v13 = vpop.f32.mrf.mxu3 }
 0x391   :  { %v1535_v62 = vadd.f32 %v1527_v47, %v1500_v61  ;;  %v1536_v17 = vadd.f32 %v1528_v3, %v1513_v13  ;;  %v1476_v7 = vpop.f32.mrf.mxu0  ;;  %v1489_v9 = vpop.f32.mrf.mxu1 }
 0x393   :  { %v1557_v1 = vmul.f32 0.5, %v1535_v62  ;;  %2552 = vtanh.f32 %v1536_v17 }
 0x394   :  { %v2549_v34 = vpop.eup %2548 }
 0x395   :  { %v2551_v5 = vpop.eup %2550  ;;  %v1561_v56 = vmul.f32 0.5, %v2549_v34  ;;  %2554 = vtanh.f32 %v1557_v1 }
 0x396   :  { %v1562_v11 = vmul.f32 0.5, %v2551_v5 }
 0x397   :  { %v1564_v12 = vadd.f32 0.5, %v1561_v56 }
 0x398   :  { %v1565_v21 = vadd.f32 0.5, %v1562_v11  ;;  %v1502_v25 = vpop.f32.mrf.mxu2  ;;  %v1515_v19 = vpop.f32.mrf.mxu3 }
 0x399   :  { %v2553_v22 = vpop.eup %2552 }
 0x39a   :  { %v1568_v42 = vmul.f32 %v1565_v21, %v3449_v63  ;;  %v1569_v29 = vmul.f32 %v2553_v22, %v1564_v12  ;;  %v3990_v63 = vld [vmem:[#allocation41_spill] sm:$0xff]  ;;  %v3991_v12 = vld [vmem:[#allocation42_spill] sm:$0xff] }
 0x39b   :  { %v2555_v10 = vpop.eup %2554  ;;  %v1684_v1 = vunpack.c.h.bf16 %v3990_v63  ;;  %v1685_v21 = vunpack.c.l.bf16 %v3991_v12  ;;  %v1686_v25 = vunpack.c.h.bf16 %v3991_v12 }
 0x39c   :  { %v3535_v61 = vadd.f32 %v1569_v29, %v1568_v42  ;;  %v1563_v9 = vmul.f32 0.5, %v2555_v10  ;;  %v1683_v10 = vunpack.c.l.bf16 %v3990_v63 }
 0x39e   :  { %2556 = vtanh.f32 %v3535_v61  ;;  %v1566_v7 = vadd.f32 0.5, %v1563_v9 }
 0x3a4   :  { %v2557_v62 = vpop.eup %2556 }
 0x3a5   :  { %v1572_v13 = vmul.f32 %v2557_v62, %v1566_v7 }
 0x3a7   :  { %2383 = vst [vmem:[%s3702_s5 + $0x38] sm:$0xff] %v1572_v13  ;;  %v1628_v5 = vpack.c.bf16 %v1572_v13, %v1572_v13 }
 0x3a9   :  { %1637 = vmatmul.bf16.vlgmr.msrb.gmra.mxu0 %v1628_v5  ;;  %1650 = vmatmul.bf16.vlgmr.msrb.gmra.mxu1 %v1628_v5 }
 0x3aa   :  { %1663 = vmatmul.bf16.vlgmr.msrb.gmra.mxu2 %v1628_v5  ;;  %1676 = vmatmul.bf16.vlgmr.msrb.gmra.mxu3 %v1628_v5 }
 0x3ab   :  { %1793 = vmatpush.bf16.msrb.mxu0 %v3031_v26  ;;  %1806 = vmatpush.bf16.msrb.mxu1 %v3033_v0 }
 0x3ac   :  { %1819 = vmatpush.bf16.msrb.mxu2 %v3035_v2  ;;  %1832 = vmatpush.bf16.msrb.mxu3 %v3038_v54 }
 0x3ad   :  { %v1585_v17 = vpop.f32.mrf.mxu0  ;;  %v1598_v47 = vpop.f32.mrf.mxu1 }
 0x3ae   :  { %v1693_v3 = vadd.f32 %v1683_v10, %v1585_v17  ;;  %v1694_v34 = vadd.f32 %v1684_v1, %v1598_v47 }
 0x3af   :  { %1794 = vmatpush.bf16.msrb.mxu0 %v3046_v50  ;;  %1807 = vmatpush.bf16.msrb.mxu1 %v3049_v4 }
 0x3b0   :  { %1820 = vmatpush.bf16.msrb.mxu2 %v3910_v45  ;;  %1833 = vmatpush.bf16.msrb.mxu3 %v3911_v43  ;;  %v1701_v56 = vmul.f32 0.5, %v1693_v3  ;;  %v1702_v11 = vmul.f32 0.5, %v1694_v34 }
 0x3b2   :  { %2558 = vtanh.f32 %v1701_v56 }
 0x3b3   :  { %1795 = vmatpush.bf16.msrb.mxu0 %v3912_v58  ;;  %1808 = vmatpush.bf16.msrb.mxu1 %v3913_v32  ;;  %2560 = vtanh.f32 %v1702_v11 }
 0x3b4   :  { %1821 = vmatpush.bf16.msrb.mxu2 %v3938_v35  ;;  %1834 = vmatpush.bf16.msrb.mxu3 %v3939_v16  ;;  %v1611_v19 = vpop.f32.mrf.mxu2  ;;  %v1624_v22 = vpop.f32.mrf.mxu3 }
 0x3b5   :  { %v1695_v42 = vadd.f32 %v1685_v21, %v1611_v19  ;;  %v1696_v29 = vadd.f32 %v1686_v25, %v1624_v22  ;;  %v1587_v9 = vpop.f32.mrf.mxu0  ;;  %v1600_v7 = vpop.f32.mrf.mxu1 }
 0x3b6   :  { %v3993_v9 = vld [vmem:[#allocation11_spill] sm:$0xff]  ;;  %v4003_v7 = vld [vmem:[#allocation21_spill] sm:$0xff] }
 0x3b7   :  { %1796 = vmatpush.bf16.msrb.mxu0 %v3917_v18  ;;  %1809 = vmatpush.bf16.msrb.mxu1 %v3918_v23  ;;  %v1703_v62 = vmul.f32 0.5, %v1695_v42  ;;  %2562 = vtanh.f32 %v1696_v29  ;;  %v3992_v29 = vld [vmem:[#allocation10_spill] sm:$0xff] }
 0x3b8   :  { %1822 = vmatpush.bf16.msrb.mxu2 %v3919_v24  ;;  %1835 = vmatpush.bf16.msrb.mxu3 %v3920_v15  ;;  %v2559_v13 = vpop.eup %2558 }
 0x3b9   :  { %v2561_v5 = vpop.eup %2560  ;;  %v1707_v63 = vmul.f32 0.5, %v2559_v13  ;;  %2564 = vtanh.f32 %v1703_v62  ;;  %v4004_v62 = vld [vmem:[#allocation22_spill] sm:$0xff]  ;;  %v4005_v13 = vld [vmem:[#allocation23_spill] sm:$0xff] }
 0x3ba   :  { %v1708_v10 = vmul.f32 0.5, %v2561_v5  ;;  %v4006_v5 = vld [vmem:[#allocation24_spill] sm:$0xff] }
 0x3bb   :  { %1797 = vmatpush.bf16.msrb.mxu0 %v3897_v46  ;;  %1810 = vmatpush.bf16.msrb.mxu1 %v3921_v51  ;;  %v1710_v1 = vadd.f32 0.5, %v1707_v63  ;;  %v4007_v63 = vld [vmem:[#allocation25_spill] sm:$0xff] }
 0x3bc   :  { %1823 = vmatpush.bf16.msrb.mxu2 %v3899_v8  ;;  %1836 = vmatpush.bf16.msrb.mxu3 %v3900_v28  ;;  %v1711_v17 = vadd.f32 0.5, %v1708_v10  ;;  %v1613_v47 = vpop.f32.mrf.mxu2  ;;  %v1626_v3 = vpop.f32.mrf.mxu3  ;;  %v4008_v10 = vld [vmem:[#allocation26_spill] sm:$0xff] }
 0x3bd   :  { %v2563_v34 = vpop.eup %2562  ;;  %v4011_v47 = vld [vmem:[#allocation29_spill] sm:$0xff]  ;;  %v4012_v3 = vld [vmem:[#allocation30_spill] sm:$0xff] }
 0x3be   :  { %v1714_v56 = vmul.f32 %v1711_v17, %v3484_v14  ;;  %v1715_v11 = vmul.f32 %v2563_v34, %v1710_v1  ;;  %v4009_v1 = vld [vmem:[#allocation27_spill] sm:$0xff]  ;;  %v4010_v17 = vld [vmem:[#allocation28_spill] sm:$0xff] }
 0x3bf   :  { %1798 = vmatpush.bf16.msrb.mxu0 %v3902_v20  ;;  %1811 = vmatpush.bf16.msrb.mxu1 %v3903_v31  ;;  %v2565_v12 = vpop.eup %2564  ;;  %v4013_v34 = vld [vmem:[#allocation31_spill] sm:$0xff] }
 0x3c0   :  { %1824 = vmatpush.bf16.msrb.mxu2 %v3904_v6  ;;  %1837 = vmatpush.bf16.msrb.mxu3 %v3905_v60  ;;  %v3570_v21 = vadd.f32 %v1715_v11, %v1714_v56  ;;  %v1709_v25 = vmul.f32 0.5, %v2565_v12  ;;  %v4014_v56 = vld [vmem:[#allocation32_spill] sm:$0xff]  ;;  %v4015_v11 = vld [vmem:[#allocation51_spill] sm:$0xff] }
 0x3c1   :  { %v1689_v12 = vunpack.c.l.bf16 %v4015_v11 }
 0x3c2   :  { %2566 = vtanh.f32 %v3570_v21  ;;  %v1712_v14 = vadd.f32 0.5, %v1709_v25  ;;  %v1690_v25 = vunpack.c.h.bf16 %v4015_v11 }
 0x3c3   :  { %1799 = vmatpush.bf16.msrb.mxu0 %v3906_v36  ;;  %1812 = vmatpush.bf16.msrb.mxu1 %v3128_v40 }
 0x3c4   :  { %1825 = vmatpush.bf16.msrb.mxu2 %v3907_v27  ;;  %1838 = vmatpush.bf16.msrb.mxu3 %v3133_v49 }
 0x3c7   :  { %1800 = vmatpush.bf16.msrb.mxu0 %v3136_v55  ;;  %1813 = vmatpush.bf16.msrb.mxu1 %v3141_v30 }
 0x3c8   :  { %1826 = vmatpush.bf16.msrb.mxu2 %v3143_v59  ;;  %1839 = vmatpush.bf16.msrb.mxu3 %v3148_v39  ;;  %v2567_v19 = vpop.eup %2566 }
 0x3c9   :  { %v1718_v22 = vmul.f32 %v2567_v19, %v1712_v14 }
 0x3cb   :  { %2384 = vst [vmem:[%s3702_s5 + $0x50] sm:$0xff] %v1718_v22  ;;  %v1739_v42 = vpack.c.bf16 %v1718_v22, %v1718_v22 }
 0x3cd   :  { %1748 = vmatmul.bf16.vlgmr.msra.gmra.mxu0 %v1739_v42  ;;  %1761 = vmatmul.bf16.vlgmr.msra.gmra.mxu1 %v1739_v42 }
 0x3ce   :  { %1774 = vmatmul.bf16.vlgmr.msra.gmra.mxu2 %v1739_v42  ;;  %1787 = vmatmul.bf16.vlgmr.msra.gmra.mxu3 %v1739_v42 }
 0x3cf   :  { %1904 = vmatpush.bf16.msra.mxu0 %v2803_v33  ;;  %1917 = vmatpush.bf16.msra.mxu1 %v2806_v37  ;;  %v3994_v33 = vld [vmem:[#allocation12_spill] sm:$0xff]  ;;  %v3995_v37 = vld [vmem:[#allocation13_spill] sm:$0xff] }
 0x3d0   :  { %1930 = vmatpush.bf16.msra.mxu2 %v2808_v38  ;;  %1943 = vmatpush.bf16.msra.mxu3 %v2811_v41  ;;  %v3996_v38 = vld [vmem:[#allocation14_spill] sm:$0xff]  ;;  %v3997_v41 = vld [vmem:[#allocation15_spill] sm:$0xff] }
 0x3d3   :  { %1905 = vmatpush.bf16.msra.mxu0 %v2816_v44  ;;  %1918 = vmatpush.bf16.msra.mxu1 %v2818_v48  ;;  %v3998_v44 = vld [vmem:[#allocation16_spill] sm:$0xff]  ;;  %v3999_v48 = vld [vmem:[#allocation17_spill] sm:$0xff] }
 0x3d4   :  { %1931 = vmatpush.bf16.msra.mxu2 %v2821_v52  ;;  %1944 = vmatpush.bf16.msra.mxu3 %v2823_v53  ;;  %v4000_v52 = vld [vmem:[#allocation18_spill] sm:$0xff]  ;;  %v4001_v53 = vld [vmem:[#allocation19_spill] sm:$0xff] }
 0x3d7   :  { %1906 = vmatpush.bf16.msra.mxu0 %v2828_v57  ;;  %1919 = vmatpush.bf16.msra.mxu1 %v3992_v29  ;;  %v4002_v57 = vld [vmem:[#allocation20_spill] sm:$0xff] }
 0x3d8   :  { %1932 = vmatpush.bf16.msra.mxu2 %v3993_v9  ;;  %1945 = vmatpush.bf16.msra.mxu3 %v3994_v33  ;;  %v4016_v33 = vld [vmem:[#allocation52_spill] sm:$0xff] }
 0x3db   :  { %1907 = vmatpush.bf16.msra.mxu0 %v3995_v37  ;;  %1920 = vmatpush.bf16.msra.mxu1 %v3996_v38  ;;  %v1691_v37 = vunpack.c.l.bf16 %v4016_v33  ;;  %v1692_v38 = vunpack.c.h.bf16 %v4016_v33 }
 0x3dc   :  { %1933 = vmatpush.bf16.msra.mxu2 %v3997_v41  ;;  %1946 = vmatpush.bf16.msra.mxu3 %v3998_v44 }
 0x3df   :  { %1908 = vmatpush.bf16.msra.mxu0 %v3999_v48  ;;  %1921 = vmatpush.bf16.msra.mxu1 %v4000_v52 }
 0x3e0   :  { %1934 = vmatpush.bf16.msra.mxu2 %v4001_v53  ;;  %1947 = vmatpush.bf16.msra.mxu3 %v4002_v57 }
 0x3e3   :  { %1909 = vmatpush.bf16.msra.mxu0 %v4003_v7  ;;  %1922 = vmatpush.bf16.msra.mxu1 %v4004_v62 }
 0x3e4   :  { %1935 = vmatpush.bf16.msra.mxu2 %v4005_v13  ;;  %1948 = vmatpush.bf16.msra.mxu3 %v4006_v5 }
 0x3e7   :  { %1910 = vmatpush.bf16.msra.mxu0 %v4007_v63  ;;  %1923 = vmatpush.bf16.msra.mxu1 %v4008_v10 }
 0x3e8   :  { %1936 = vmatpush.bf16.msra.mxu2 %v4009_v1  ;;  %1949 = vmatpush.bf16.msra.mxu3 %v4010_v17 }
 0x3eb   :  { %1911 = vmatpush.bf16.msra.mxu0 %v4011_v47  ;;  %1924 = vmatpush.bf16.msra.mxu1 %v4012_v3 }
 0x3ec   :  { %1937 = vmatpush.bf16.msra.mxu2 %v4013_v34  ;;  %1950 = vmatpush.bf16.msra.mxu3 %v4014_v56 }
 0x426   :  { %v1638_v14 = vpop.f32.mrf.mxu0  ;;  %v1651_v19 = vpop.f32.mrf.mxu1 }
 0x427   :  { %v1697_v22 = vadd.f32 %v1689_v12, %v1638_v14  ;;  %v1698_v42 = vadd.f32 %v1690_v25, %v1651_v19 }
 0x429   :  { %v1719_v29 = vmul.f32 0.5, %v1697_v22  ;;  %v1720_v9 = vmul.f32 0.5, %v1698_v42 }
 0x42b   :  { %2568 = vtanh.f32 %v1719_v29 }
 0x42c   :  { %2570 = vtanh.f32 %v1720_v9 }
 0x42d   :  { %v1664_v41 = vpop.f32.mrf.mxu2  ;;  %v1677_v44 = vpop.f32.mrf.mxu3 }
 0x42e   :  { %v1699_v48 = vadd.f32 %v1691_v37, %v1664_v41  ;;  %v1700_v52 = vadd.f32 %v1692_v38, %v1677_v44  ;;  %v1640_v53 = vpop.f32.mrf.mxu0  ;;  %v1653_v57 = vpop.f32.mrf.mxu1 }
 0x430   :  { %v1721_v7 = vmul.f32 0.5, %v1699_v48  ;;  %2572 = vtanh.f32 %v1700_v52 }
 0x431   :  { %v2569_v62 = vpop.eup %2568 }
 0x432   :  { %v2571_v13 = vpop.eup %2570  ;;  %v1725_v5 = vmul.f32 0.5, %v2569_v62  ;;  %2574 = vtanh.f32 %v1721_v7 }
 0x433   :  { %v1726_v63 = vmul.f32 0.5, %v2571_v13 }
 0x434   :  { %v1728_v10 = vadd.f32 0.5, %v1725_v5 }
 0x435   :  { %v1729_v1 = vadd.f32 0.5, %v1726_v63  ;;  %v1666_v17 = vpop.f32.mrf.mxu2  ;;  %v1679_v47 = vpop.f32.mrf.mxu3 }
 0x436   :  { %v2573_v3 = vpop.eup %2572 }
 0x437   :  { %v1732_v34 = vmul.f32 %v1729_v1, %v3535_v61  ;;  %v1733_v56 = vmul.f32 %v2573_v3, %v1728_v10  ;;  %v4017_v61 = vld [vmem:[#allocation43_spill] sm:$0xff] }
 0x438   :  { %v2575_v11 = vpop.eup %2574  ;;  %v1847_v29 = vunpack.c.l.bf16 %v4017_v61  ;;  %v1848_v9 = vunpack.c.h.bf16 %v4017_v61 }
 0x439   :  { %v3621_v12 = vadd.f32 %v1733_v56, %v1732_v34  ;;  %v1727_v25 = vmul.f32 0.5, %v2575_v11 }
 0x43b   :  { %2576 = vtanh.f32 %v3621_v12  ;;  %v1730_v14 = vadd.f32 0.5, %v1727_v25 }
 0x441   :  { %v2577_v19 = vpop.eup %2576 }
 0x442   :  { %v1736_v22 = vmul.f32 %v2577_v19, %v1730_v14 }
 0x444   :  { %2385 = vst [vmem:[%s3702_s5 + $0x28] sm:$0xff] %v1736_v22  ;;  %v1792_v42 = vpack.c.bf16 %v1736_v22, %v1736_v22 }
 0x446   :  { %1801 = vmatmul.bf16.vlgmr.msrb.gmra.mxu0 %v1792_v42  ;;  %1814 = vmatmul.bf16.vlgmr.msrb.gmra.mxu1 %v1792_v42 }
 0x447   :  { %1827 = vmatmul.bf16.vlgmr.msrb.gmra.mxu2 %v1792_v42  ;;  %1840 = vmatmul.bf16.vlgmr.msrb.gmra.mxu3 %v1792_v42 }
 0x448   :  { %1957 = vmatpush.bf16.msrb.mxu0 %v3031_v26  ;;  %1970 = vmatpush.bf16.msrb.mxu1 %v3033_v0 }
 0x449   :  { %1983 = vmatpush.bf16.msrb.mxu2 %v3035_v2  ;;  %1996 = vmatpush.bf16.msrb.mxu3 %v3038_v54  ;;  %v4018_v2 = vld [vmem:[#allocation44_spill] sm:$0xff] }
 0x44a   :  { %v1749_v33 = vpop.f32.mrf.mxu0  ;;  %v1762_v37 = vpop.f32.mrf.mxu1  ;;  %v1849_v54 = vunpack.c.l.bf16 %v4018_v2  ;;  %v1850_v44 = vunpack.c.h.bf16 %v4018_v2 }
 0x44b   :  { %v1857_v38 = vadd.f32 %v1847_v29, %v1749_v33  ;;  %v1858_v41 = vadd.f32 %v1848_v9, %v1762_v37 }
 0x44c   :  { %1958 = vmatpush.bf16.msrb.mxu0 %v3046_v50  ;;  %1971 = vmatpush.bf16.msrb.mxu1 %v3049_v4 }
 0x44d   :  { %1984 = vmatpush.bf16.msrb.mxu2 %v3910_v45  ;;  %1997 = vmatpush.bf16.msrb.mxu3 %v3911_v43  ;;  %v1865_v0 = vmul.f32 0.5, %v1857_v38  ;;  %v1866_v26 = vmul.f32 0.5, %v1858_v41 }
 0x44f   :  { %2578 = vtanh.f32 %v1865_v0 }
 0x450   :  { %1959 = vmatpush.bf16.msrb.mxu0 %v3912_v58  ;;  %1972 = vmatpush.bf16.msrb.mxu1 %v3913_v32  ;;  %2580 = vtanh.f32 %v1866_v26 }
 0x451   :  { %1985 = vmatpush.bf16.msrb.mxu2 %v3938_v35  ;;  %1998 = vmatpush.bf16.msrb.mxu3 %v3939_v16  ;;  %v1775_v4 = vpop.f32.mrf.mxu2  ;;  %v1788_v50 = vpop.f32.mrf.mxu3 }
 0x452   :  { %v1859_v45 = vadd.f32 %v1849_v54, %v1775_v4  ;;  %v1860_v43 = vadd.f32 %v1850_v44, %v1788_v50  ;;  %v1751_v48 = vpop.f32.mrf.mxu0  ;;  %v1764_v52 = vpop.f32.mrf.mxu1 }
 0x454   :  { %1960 = vmatpush.bf16.msrb.mxu0 %v3917_v18  ;;  %1973 = vmatpush.bf16.msrb.mxu1 %v3918_v23  ;;  %v1867_v58 = vmul.f32 0.5, %v1859_v45  ;;  %2582 = vtanh.f32 %v1860_v43 }
 0x455   :  { %1986 = vmatpush.bf16.msrb.mxu2 %v3919_v24  ;;  %1999 = vmatpush.bf16.msrb.mxu3 %v3920_v15  ;;  %v2579_v32 = vpop.eup %2578 }
 0x456   :  { %v2581_v35 = vpop.eup %2580  ;;  %v1871_v53 = vmul.f32 0.5, %v2579_v32  ;;  %2584 = vtanh.f32 %v1867_v58  ;;  %v4022_v32 = vld [vmem:[#allocation46_spill] sm:$0xff] }
 0x457   :  { %v1872_v16 = vmul.f32 0.5, %v2581_v35  ;;  %v2013_v35 = vunpack.c.l.bf16 %v4022_v32 }
 0x458   :  { %1961 = vmatpush.bf16.msrb.mxu0 %v3897_v46  ;;  %1974 = vmatpush.bf16.msrb.mxu1 %v3921_v51  ;;  %v1874_v57 = vadd.f32 0.5, %v1871_v53  ;;  %v2014_v53 = vunpack.c.h.bf16 %v4022_v32 }
 0x459   :  { %1987 = vmatpush.bf16.msrb.mxu2 %v3899_v8  ;;  %2000 = vmatpush.bf16.msrb.mxu3 %v3900_v28  ;;  %v1875_v18 = vadd.f32 0.5, %v1872_v16  ;;  %v1777_v23 = vpop.f32.mrf.mxu2  ;;  %v1790_v7 = vpop.f32.mrf.mxu3 }
 0x45a   :  { %v2583_v24 = vpop.eup %2582 }
 0x45b   :  { %v1878_v15 = vmul.f32 %v1875_v18, %v3570_v21  ;;  %v1879_v62 = vmul.f32 %v2583_v24, %v1874_v57  ;;  %v4020_v21 = vld [vmem:[#allocation50_spill] sm:$0xff] }
 0x45c   :  { %1962 = vmatpush.bf16.msrb.mxu0 %v3902_v20  ;;  %1975 = vmatpush.bf16.msrb.mxu1 %v3903_v31  ;;  %v2585_v46 = vpop.eup %2584  ;;  %v1855_v13 = vunpack.c.l.bf16 %v4020_v21  ;;  %v1856_v5 = vunpack.c.h.bf16 %v4020_v21 }
 0x45d   :  { %1988 = vmatpush.bf16.msrb.mxu2 %v3904_v6  ;;  %2001 = vmatpush.bf16.msrb.mxu3 %v3905_v60  ;;  %v3656_v51 = vadd.f32 %v1879_v62, %v1878_v15  ;;  %v1873_v8 = vmul.f32 0.5, %v2585_v46 }
 0x45f   :  { %2586 = vtanh.f32 %v3656_v51  ;;  %v1876_v20 = vadd.f32 0.5, %v1873_v8 }
 0x460   :  { %1963 = vmatpush.bf16.msrb.mxu0 %v3906_v36  ;;  %1976 = vmatpush.bf16.msrb.mxu1 %v3128_v40 }
 0x461   :  { %1989 = vmatpush.bf16.msrb.mxu2 %v3907_v27  ;;  %2002 = vmatpush.bf16.msrb.mxu3 %v3133_v49  ;;  %v4019_v49 = vld [vmem:[#allocation49_spill] sm:$0xff] }
 0x464   :  { %1964 = vmatpush.bf16.msrb.mxu0 %v3136_v55  ;;  %1977 = vmatpush.bf16.msrb.mxu1 %v3141_v30  ;;  %v1853_v55 = vunpack.c.l.bf16 %v4019_v49  ;;  %v1854_v30 = vunpack.c.h.bf16 %v4019_v49 }
 0x465   :  { %1990 = vmatpush.bf16.msrb.mxu2 %v3143_v59  ;;  %2003 = vmatpush.bf16.msrb.mxu3 %v3148_v39  ;;  %v2587_v28 = vpop.eup %2586 }
 0x466   :  { %v1882_v31 = vmul.f32 %v2587_v28, %v1876_v20 }
 0x468   :  { %2386 = vst [vmem:[%s3702_s5 + $0x60] sm:$0xff] %v1882_v31  ;;  %v1903_v40 = vpack.c.bf16 %v1882_v31, %v1882_v31 }
 0x46a   :  { %1912 = vmatmul.bf16.vlgmr.msra.gmra.mxu0 %v1903_v40  ;;  %1925 = vmatmul.bf16.vlgmr.msra.gmra.mxu1 %v1903_v40 }
 0x46b   :  { %1938 = vmatmul.bf16.vlgmr.msra.gmra.mxu2 %v1903_v40  ;;  %1951 = vmatmul.bf16.vlgmr.msra.gmra.mxu3 %v1903_v40 }
 0x4c3   :  { %v1802_v6 = vpop.f32.mrf.mxu0  ;;  %v1815_v60 = vpop.f32.mrf.mxu1 }
 0x4c4   :  { %v1861_v59 = vadd.f32 %v1853_v55, %v1802_v6  ;;  %v1862_v36 = vadd.f32 %v1854_v30, %v1815_v60 }
 0x4c6   :  { %v1883_v39 = vmul.f32 0.5, %v1861_v59  ;;  %v1884_v27 = vmul.f32 0.5, %v1862_v36 }
 0x4c8   :  { %2588 = vtanh.f32 %v1883_v39 }
 0x4c9   :  { %2590 = vtanh.f32 %v1884_v27 }
 0x4ca   :  { %v1828_v63 = vpop.f32.mrf.mxu2  ;;  %v1841_v10 = vpop.f32.mrf.mxu3 }
 0x4cb   :  { %v1863_v1 = vadd.f32 %v1855_v13, %v1828_v63  ;;  %v1864_v17 = vadd.f32 %v1856_v5, %v1841_v10  ;;  %v1804_v47 = vpop.f32.mrf.mxu0  ;;  %v1817_v3 = vpop.f32.mrf.mxu1  ;;  %v4023_v13 = vld [vmem:[#allocation47_spill] sm:$0xff] }
 0x4cc   :  { %v2017_v5 = vunpack.c.l.bf16 %v4023_v13  ;;  %v2018_v63 = vunpack.c.h.bf16 %v4023_v13 }
 0x4cd   :  { %v1885_v34 = vmul.f32 0.5, %v1863_v1  ;;  %2592 = vtanh.f32 %v1864_v17 }
 0x4ce   :  { %v2589_v56 = vpop.eup %2588 }
 0x4cf   :  { %v2591_v11 = vpop.eup %2590  ;;  %v1889_v25 = vmul.f32 0.5, %v2589_v56  ;;  %2594 = vtanh.f32 %v1885_v34  ;;  %v4024_v34 = vld [vmem:[#allocation48_spill] sm:$0xff] }
 0x4d0   :  { %v1890_v14 = vmul.f32 0.5, %v2591_v11  ;;  %v2019_v56 = vunpack.c.l.bf16 %v4024_v34  ;;  %v2020_v11 = vunpack.c.h.bf16 %v4024_v34 }
 0x4d1   :  { %v1892_v19 = vadd.f32 0.5, %v1889_v25 }
 0x4d2   :  { %v1893_v22 = vadd.f32 0.5, %v1890_v14  ;;  %v1830_v42 = vpop.f32.mrf.mxu2  ;;  %v1843_v61 = vpop.f32.mrf.mxu3 }
 0x4d3   :  { %v2593_v29 = vpop.eup %2592 }
 0x4d4   :  { %v1896_v9 = vmul.f32 %v1893_v22, %v3621_v12  ;;  %v1897_v33 = vmul.f32 %v2593_v29, %v1892_v19  ;;  %v4021_v12 = vld [vmem:[#allocation45_spill] sm:$0xff] }
 0x4d5   :  { %v2595_v37 = vpop.eup %2594  ;;  %v2011_v44 = vunpack.c.l.bf16 %v4021_v12  ;;  %v2012_v4 = vunpack.c.h.bf16 %v4021_v12 }
 0x4d6   :  { %v3675_v38 = vadd.f32 %v1897_v33, %v1896_v9  ;;  %v1891_v41 = vmul.f32 0.5, %v2595_v37 }
 0x4d8   :  { %2596 = vtanh.f32 %v3675_v38  ;;  %v1894_v0 = vadd.f32 0.5, %v1891_v41 }
 0x4de   :  { %v2597_v26 = vpop.eup %2596 }
 0x4df   :  { %v1900_v2 = vmul.f32 %v2597_v26, %v1894_v0 }
 0x4e1   :  { %2387 = vst [vmem:[%s3702_s5 + $0x18] sm:$0xff] %v1900_v2  ;;  %v1956_v54 = vpack.c.bf16 %v1900_v2, %v1900_v2 }
 0x4e3   :  { %1965 = vmatmul.bf16.vlgmr.msrb.gmra.mxu0 %v1956_v54  ;;  %1978 = vmatmul.bf16.vlgmr.msrb.gmra.mxu1 %v1956_v54 }
 0x4e4   :  { %1991 = vmatmul.bf16.vlgmr.msrb.gmra.mxu2 %v1956_v54  ;;  %2004 = vmatmul.bf16.vlgmr.msrb.gmra.mxu3 %v1956_v54 }
 0x4e7   :  { %v1913_v50 = vpop.f32.mrf.mxu0  ;;  %v1926_v45 = vpop.f32.mrf.mxu1 }
 0x4e8   :  { %v2021_v43 = vadd.f32 %v2011_v44, %v1913_v50  ;;  %v2022_v48 = vadd.f32 %v2012_v4, %v1926_v45 }
 0x4ea   :  { %v2029_v52 = vmul.f32 0.5, %v2021_v43  ;;  %v2030_v58 = vmul.f32 0.5, %v2022_v48 }
 0x4ec   :  { %2598 = vtanh.f32 %v2029_v52 }
 0x4ed   :  { %2600 = vtanh.f32 %v2030_v58 }
 0x4ee   :  { %v1939_v16 = vpop.f32.mrf.mxu2  ;;  %v1952_v57 = vpop.f32.mrf.mxu3 }
 0x4ef   :  { %v2023_v18 = vadd.f32 %v2013_v35, %v1939_v16  ;;  %v2024_v23 = vadd.f32 %v2014_v53, %v1952_v57  ;;  %v1915_v7 = vpop.f32.mrf.mxu0  ;;  %v1928_v24 = vpop.f32.mrf.mxu1 }
 0x4f1   :  { %v2031_v15 = vmul.f32 0.5, %v2023_v18  ;;  %2602 = vtanh.f32 %v2024_v23 }
 0x4f2   :  { %v2599_v62 = vpop.eup %2598 }
 0x4f3   :  { %v2601_v46 = vpop.eup %2600  ;;  %v2035_v8 = vmul.f32 0.5, %v2599_v62  ;;  %2604 = vtanh.f32 %v2031_v15 }
 0x4f4   :  { %v2036_v20 = vmul.f32 0.5, %v2601_v46 }
 0x4f5   :  { %v2038_v28 = vadd.f32 0.5, %v2035_v8 }
 0x4f6   :  { %v2039_v31 = vadd.f32 0.5, %v2036_v20  ;;  %v1941_v40 = vpop.f32.mrf.mxu2  ;;  %v1954_v49 = vpop.f32.mrf.mxu3 }
 0x4f7   :  { %v2603_v55 = vpop.eup %2602 }
 0x4f8   :  { %v2042_v30 = vmul.f32 %v2039_v31, %v3656_v51  ;;  %v2043_v6 = vmul.f32 %v2603_v55, %v2038_v28 }
 0x4f9   :  { %v2605_v60 = vpop.eup %2604 }
 0x4fa   :  { %v2044_v59 = vadd.f32 %v2043_v6, %v2042_v30  ;;  %v2037_v36 = vmul.f32 0.5, %v2605_v60 }
 0x4fc   :  { %2606 = vtanh.f32 %v2044_v59  ;;  %v2040_v39 = vadd.f32 0.5, %v2037_v36 }
 0x502   :  { %v2607_v27 = vpop.eup %2606 }
 0x503   :  { %v2046_v21 = vmul.f32 %v2607_v27, %v2040_v39 }
 0x505   :  { %2388 = vst [vmem:[%s3702_s5 + $0x70] sm:$0xff] %v2046_v21 }
 0x560   :  { %v1966_v10 = vpop.f32.mrf.mxu0  ;;  %v1979_v1 = vpop.f32.mrf.mxu1 }
 0x561   :  { %v2025_v17 = vadd.f32 %v2017_v5, %v1966_v10  ;;  %v2026_v51 = vadd.f32 %v2018_v63, %v1979_v1 }
 0x563   :  { %v2047_v47 = vmul.f32 0.5, %v2025_v17  ;;  %v2048_v3 = vmul.f32 0.5, %v2026_v51 }
 0x565   :  { %2608 = vtanh.f32 %v2047_v47 }
 0x566   :  { %2610 = vtanh.f32 %v2048_v3 }
 0x567   :  { %v1992_v25 = vpop.f32.mrf.mxu2  ;;  %v2005_v14 = vpop.f32.mrf.mxu3 }
 0x568   :  { %v2027_v19 = vadd.f32 %v2019_v56, %v1992_v25  ;;  %v2028_v22 = vadd.f32 %v2020_v11, %v2005_v14  ;;  %v1968_v42 = vpop.f32.mrf.mxu0  ;;  %v1981_v61 = vpop.f32.mrf.mxu1 }
 0x56a   :  { %v2049_v29 = vmul.f32 0.5, %v2027_v19  ;;  %2612 = vtanh.f32 %v2028_v22 }
 0x56b   :  { %v2609_v9 = vpop.eup %2608 }
 0x56c   :  { %v2611_v33 = vpop.eup %2610  ;;  %v2053_v37 = vmul.f32 0.5, %v2609_v9  ;;  %2614 = vtanh.f32 %v2049_v29 }
 0x56d   :  { %v2054_v41 = vmul.f32 0.5, %v2611_v33 }
 0x56e   :  { %v2056_v0 = vadd.f32 0.5, %v2053_v37 }
 0x56f   :  { %v2057_v26 = vadd.f32 0.5, %v2054_v41  ;;  %v1994_v2 = vpop.f32.mrf.mxu2  ;;  %v2007_v54 = vpop.f32.mrf.mxu3 }
 0x570   :  { %v2613_v12 = vpop.eup %2612 }
 0x571   :  { %v2060_v44 = vmul.f32 %v2057_v26, %v3675_v38  ;;  %v2061_v4 = vmul.f32 %v2613_v12, %v2056_v0 }
 0x572   :  { %v2615_v50 = vpop.eup %2614 }
 0x573   :  { %v2062_v45 = vadd.f32 %v2061_v4, %v2060_v44  ;;  %v2055_v43 = vmul.f32 0.5, %v2615_v50 }
 0x575   :  { %2616 = vtanh.f32 %v2062_v45  ;;  %v2058_v48 = vadd.f32 0.5, %v2055_v43 }
 0x57b   :  { %v2617_v52 = vpop.eup %2616 }
 0x57c   :  { %v2064_v58 = vmul.f32 %v2617_v52, %v2058_v48 }
 0x57e   :  { %2066 = vst [vmem:[%s3702_s5 + $0x8] sm:$0xff] %v2064_v58 }
 0x57f   :  { %2071 = vsyncpa [#allocation4], 1 }
 0x580   :  { %2072 = vsyncpa [#allocation6], 1 }

// kernel: lstm_temporal_classification.3
= control target key start
LH: loop header
LB: loop body
LE: loop exit
PB: predicated region body
PF: predicated region fallthrough
CT: control target
= control target key end

     0   :  { %12 = vsyncpa [#allocation5], 0  ;;  %s6076_s0 = inlined_call_operand.vmem [shape: f32[64,256], index: 0, kind: input, shape index: {}]   ;;  %s6077_s1 = inlined_call_operand.hbm [shape: bf16[256,1024], index: 1, kind: input, shape index: {}]   ;;  %s6078_s2 = inlined_call_operand.hbm [shape: bf16[128,512], index: 2, kind: input, shape index: {}]   ;;  %s6079_s3 = inlined_call_operand.hbm [shape: bf16[128,512], index: 3, kind: input, shape index: {}]   ;;  %s6080_s4 = inlined_call_operand.hbm [shape: f32[1,1024], index: 4, kind: input, shape index: {}]   ;;  %s6081_s5 = inlined_call_operand.vmem [shape: bf16[256,128], index: 5, kind: input, shape index: {}]   ;;  %s6082_s6 = inlined_call_operand.vmem [shape: f32[1,128], index: 6, kind: input, shape index: {}]   ;;  %s6083_s7 = inlined_call_operand.vmem [shape: f32[64,128], index: 7, kind: output, shape index: {}]  }
   0x1   :  { %13 = vsyncpa [#allocation7], 0  ;;  %s34_s26 = sshll.u32 %s6078_s2, 4  ;;  %s35_s26 = int_to_ptr.hbm [resolvable:$true] %s34_s26 }
   0x2   :  { %14 = vsyncpa [#allocation10], 0  ;;  %s4749_s27 = smov [#allocation6]   ;;  %s21_s8 = sshll.u32 %s6077_s1, 4  ;;  %s22_s8 = int_to_ptr.hbm [resolvable:$true] %s21_s8 }
   0x3   :  { %s36_s28 = sshll.u32 %s4749_s27, 4  ;;  %s4750_s9 = smov 256   ;;  %s37_s28 = int_to_ptr.vmem [resolvable:$true] %s36_s28 }
   0x4   :  { %s4751_s10 = smov 16   ;;  %s4752_s11 = smov [#allocation4]  }
   0x5   :  { %42 = dma.hbm_to_vmem [thread:$0]  %s35_s26, 4096, %s37_s28, [#allocation7], %s4750_s9, %s4750_s9, %s4751_s10  }
   0x6   :  { %s23_s12 = sshll.u32 %s4752_s11, 4  ;;  %s4753_s13 = smov 512   ;;  %s24_s12 = int_to_ptr.vmem [resolvable:$true] %s23_s12 }
   0x7   :  { %s4754_s14 = smov 32   ;;  %s47_s16 = sshll.u32 %s6079_s3, 4  ;;  %s48_s16 = int_to_ptr.hbm [resolvable:$true] %s47_s16 }
   0x8   :  { %29 = dma.hbm_to_vmem [thread:$0]  %s22_s8, 16384, %s24_s12, [#allocation5], %s4753_s13, %s4753_s13, %s4754_s14  }
   0x9   :  { %s4755_s17 = smov [#allocation8]   ;;  %s61_s20 = sshll.u32 %s6080_s4, 4  ;;  %s62_s20 = int_to_ptr.hbm [resolvable:$true] %s61_s20 }
   0xa   :  { %s49_s18 = sshll.u32 %s4755_s17, 4  ;;  %s4756_s21 = smov [#allocation9]   ;;  %s50_s18 = int_to_ptr.vmem [resolvable:$true] %s49_s18 }
   0xb   :  { %55 = dma.hbm_to_vmem [thread:$0]  %s48_s16, 4096, %s50_s18, [#allocation7], %s4750_s9, %s4750_s9, %s4751_s10  }
   0xc   :  { %s63_s22 = sshll.u32 %s4756_s21, 4  ;;  %s64_s22 = int_to_ptr.vmem [resolvable:$true] %s63_s22 }
   0xd   :  { %66 = dma.hbm_to_vmem [thread:$0]  %s62_s20, 128, %s64_s22, [#allocation10]  }
   0xe   :  { %4743 = dma.done.wait [#allocation5], 16384  }
   0xf   :  { %4744 = vsyncadd [#allocation5], 4294950912 }
  0x10   :  { %4745 = dma.done.wait [#allocation7], 8192  }
  0x11   :  { %4746 = vsyncadd [#allocation7], 4294959104 }
  0x12   :  { %4747 = dma.done.wait [#allocation10], 128  }
  0x13   :  { %4748 = vsyncadd [#allocation10], 4294967168  ;;  %v3615_v0 = vld [vmem:[#allocation4 + $0x1c0] sm:$0xf]  ;;  %v4277_v46 = vld [vmem:[#allocation4 + $0x1c4] sm:$0xf] }
  0x14   :  { %v4281_v1 = vld [vmem:[#allocation4 + $0x1dc] sm:$0xf0]  ;;  %v3617_v47 = vld [vmem:[#allocation4 + $0x1e0] sm:$0xf0]  ;;  %v97_v52 = vld [vmem:[%s6076_s0 + $0x50] sm:$0xff] }
  0x15   :  { %v3871_v2 = vld [vmem:[#allocation4 + $0x3c0] sm:$0xf]  ;;  %v3616_v3 = vor.u32 %v4281_v1, %v3615_v0  ;;  %v4341_v48 = vld [vmem:[#allocation4 + $0x3c4] sm:$0xf]  ;;  %v96_v54 = vld [vmem:[%s6076_s0 + $0x48] sm:$0xff]  ;;  %v3620_v56 = vor.u32 %v4277_v46, %v3617_v47 }
  0x16   :  { %v4345_v4 = vld [vmem:[#allocation4 + $0x3dc] sm:$0xf0]  ;;  %v3873_v49 = vld [vmem:[#allocation4 + $0x3e0] sm:$0xf0]  ;;  %v98_v55 = vld [vmem:[%s6076_s0 + $0x58] sm:$0xff] }
  0x17   :  { %v3583_v5 = vld [vmem:[#allocation4 + $0x180] sm:$0xf]  ;;  %v3872_v7 = vor.u32 %v4345_v4, %v3871_v2  ;;  %4429 = vmatpush.bf16.msra.mxu2 %v3616_v3  ;;  %897 = vmatpush.bf16.msra.mxu0 %v3616_v3  ;;  %v4269_v57 = vld [vmem:[#allocation4 + $0x184] sm:$0xf]  ;;  %v3876_v58 = vor.u32 %v4341_v48, %v3873_v49  ;;  %v89_v61 = vld [vmem:[%s6076_s0 + $0x10] sm:$0xff]  ;;  %v4829_v1 = vpack.c.bf16 %v98_v55, %v96_v54 }
  0x18   :  { %v4273_v6 = vld [vmem:[#allocation4 + $0x19c] sm:$0xf0]  ;;  %v3585_v59 = vld [vmem:[#allocation4 + $0x1a0] sm:$0xf0]  ;;  %v88_v4 = vld [vmem:[%s6076_s0 + $0x8] sm:$0xff] }
  0x19   :  { %v3839_v8 = vld [vmem:[#allocation4 + $0x380] sm:$0xf]  ;;  %v3584_v10 = vor.u32 %v4273_v6, %v3583_v5  ;;  %4437 = vmatpush.bf16.msra.mxu3 %v3872_v7  ;;  %926 = vmatpush.bf16.msra.mxu1 %v3872_v7  ;;  %v4333_v63 = vld [vmem:[#allocation4 + $0x384] sm:$0xf]  ;;  %v3588_v2 = vor.u32 %v4269_v57, %v3585_v59  ;;  %v90_v5 = vld [vmem:[%s6076_s0 + $0x18] sm:$0xff] }
  0x1a   :  { %v4337_v9 = vld [vmem:[#allocation4 + $0x39c] sm:$0xf0]  ;;  %v3841_v0 = vld [vmem:[#allocation4 + $0x3a0] sm:$0xf0]  ;;  %v3527_v49 = vld [vmem:[#allocation4 + $0x108] sm:$0xf] }
  0x1b   :  { %v3840_v11 = vor.u32 %v4337_v9, %v3839_v8  ;;  %v3551_v12 = vld [vmem:[#allocation4 + $0x140] sm:$0xf]  ;;  %4430 = vmatpush.bf16.msra.mxu2 %v3584_v10  ;;  %898 = vmatpush.bf16.msra.mxu0 %v3584_v10  ;;  %v3844_v6 = vor.u32 %v4333_v63, %v3841_v0  ;;  %v4261_v7 = vld [vmem:[#allocation4 + $0x144] sm:$0xf]  ;;  %v93_v55 = vld [vmem:[%s6076_s0 + $0x30] sm:$0xff] }
  0x1c   :  { %v4265_v13 = vld [vmem:[#allocation4 + $0x15c] sm:$0xf0]  ;;  %v3553_v8 = vld [vmem:[#allocation4 + $0x160] sm:$0xf0] }
  0x1d   :  { %v3807_v14 = vld [vmem:[#allocation4 + $0x340] sm:$0xf]  ;;  %v3552_v16 = vor.u32 %v4265_v13, %v3551_v12  ;;  %4438 = vmatpush.bf16.msra.mxu3 %v3840_v11  ;;  %927 = vmatpush.bf16.msra.mxu1 %v3840_v11  ;;  %v4325_v9 = vld [vmem:[#allocation4 + $0x344] sm:$0xf]  ;;  %v4840_v11 = vpack.c.bf16 %v90_v5, %v88_v4  ;;  %v94_v4 = vld [vmem:[%s6076_s0 + $0x38] sm:$0xff] }
  0x1e   :  { %v4329_v15 = vld [vmem:[#allocation4 + $0x35c] sm:$0xf0]  ;;  %v3809_v10 = vld [vmem:[#allocation4 + $0x360] sm:$0xf0] }
  0x1f   :  { %v3808_v17 = vor.u32 %v4329_v15, %v3807_v14  ;;  %v3519_v18 = vld [vmem:[#allocation4 + $0x100] sm:$0xf]  ;;  %4431 = vmatpush.bf16.msra.mxu2 %v3552_v16  ;;  %899 = vmatpush.bf16.msra.mxu0 %v3552_v16  ;;  %v4253_v12 = vld [vmem:[#allocation4 + $0x104] sm:$0xf]  ;;  %v3556_v14 = vor.u32 %v4261_v7, %v3553_v8 }
  0x20   :  { %v4257_v19 = vld [vmem:[#allocation4 + $0x11c] sm:$0xf0]  ;;  %v3521_v13 = vld [vmem:[#allocation4 + $0x120] sm:$0xf0] }
  0x21   :  { %v3775_v20 = vld [vmem:[#allocation4 + $0x300] sm:$0xf]  ;;  %v3520_v22 = vor.u32 %v4257_v19, %v3519_v18  ;;  %4439 = vmatpush.bf16.msra.mxu3 %v3808_v17  ;;  %928 = vmatpush.bf16.msra.mxu1 %v3808_v17  ;;  %v4317_v15 = vld [vmem:[#allocation4 + $0x304] sm:$0xf]  ;;  %v3623_v17 = vld [vmem:[#allocation4 + $0x1c8] sm:$0xf]  ;;  %v3812_v19 = vor.u32 %v4325_v9, %v3809_v10 }
  0x22   :  { %v4321_v21 = vld [vmem:[#allocation4 + $0x31c] sm:$0xf0]  ;;  %v3777_v16 = vld [vmem:[#allocation4 + $0x320] sm:$0xf0]  ;;  %v4282_v18 = vld [vmem:[#allocation4 + $0x1e4] sm:$0xf0] }
  0x23   :  { %v3776_v23 = vor.u32 %v4321_v21, %v3775_v20  ;;  %v3487_v24 = vld [vmem:[#allocation4 + $0xc0] sm:$0xf]  ;;  %4432 = vmatpush.bf16.msra.mxu2 %v3520_v22  ;;  %900 = vmatpush.bf16.msra.mxu0 %v3520_v22  ;;  %v3624_v20 = vor.u32 %v4282_v18, %v3623_v17  ;;  %v3879_v21 = vld [vmem:[#allocation4 + $0x3c8] sm:$0xf]  ;;  %v4301_v57 = vld [vmem:[#allocation4 + $0x284] sm:$0xf] }
  0x24   :  { %v4249_v25 = vld [vmem:[#allocation4 + $0xdc] sm:$0xf0]  ;;  %v4346_v22 = vld [vmem:[#allocation4 + $0x3e4] sm:$0xf0]  ;;  %v3425_v7 = vld [vmem:[#allocation4 + $0x60] sm:$0xf0] }
  0x25   :  { %v3743_v26 = vld [vmem:[#allocation4 + $0x2c0] sm:$0xf]  ;;  %v3488_v28 = vor.u32 %v4249_v25, %v3487_v24  ;;  %4440 = vmatpush.bf16.msra.mxu3 %v3776_v23  ;;  %929 = vmatpush.bf16.msra.mxu1 %v3776_v23  ;;  %v3591_v23 = vld [vmem:[#allocation4 + $0x188] sm:$0xf]  ;;  %v3880_v24 = vor.u32 %v4346_v22, %v3879_v21  ;;  %v4293_v8 = vld [vmem:[#allocation4 + $0x244] sm:$0xf] }
  0x26   :  { %v4313_v27 = vld [vmem:[#allocation4 + $0x2dc] sm:$0xf0]  ;;  %v4274_v25 = vld [vmem:[#allocation4 + $0x1a4] sm:$0xf0]  ;;  %v3681_v9 = vld [vmem:[#allocation4 + $0x260] sm:$0xf0] }
  0x27   :  { %v3744_v29 = vor.u32 %v4313_v27, %v3743_v26  ;;  %v3455_v30 = vld [vmem:[#allocation4 + $0x80] sm:$0xf]  ;;  %4433 = vmatpush.bf16.msra.mxu2 %v3488_v28  ;;  %901 = vmatpush.bf16.msra.mxu0 %v3488_v28  ;;  %v3847_v26 = vld [vmem:[#allocation4 + $0x388] sm:$0xf]  ;;  %v3592_v28 = vor.u32 %v4274_v25, %v3591_v23  ;;  %v4221_v10 = vld [vmem:[#allocation4 + $0x4] sm:$0xf]  ;;  %v3684_v21 = vor.u32 %v4293_v8, %v3681_v9 }
  0x28   :  { %v4241_v31 = vld [vmem:[#allocation4 + $0x9c] sm:$0xf0]  ;;  %v4338_v27 = vld [vmem:[#allocation4 + $0x3a4] sm:$0xf0]  ;;  %v4278_v17 = vld [vmem:[#allocation4 + $0x1cc] sm:$0xf] }
  0x29   :  { %v3711_v32 = vld [vmem:[#allocation4 + $0x280] sm:$0xf]  ;;  %v3456_v34 = vor.u32 %v4241_v31, %v3455_v30  ;;  %4441 = vmatpush.bf16.msra.mxu3 %v3744_v29  ;;  %930 = vmatpush.bf16.msra.mxu1 %v3744_v29  ;;  %v3524_v29 = vor.u32 %v4253_v12, %v3521_v13  ;;  %v4245_v30 = vld [vmem:[#allocation4 + $0xc4] sm:$0xf]  ;;  %v3848_v31 = vor.u32 %v4338_v27, %v3847_v26  ;;  %v3625_v18 = vld [vmem:[#allocation4 + $0x1e8] sm:$0xf0] }
  0x2a   :  { %v4305_v33 = vld [vmem:[#allocation4 + $0x29c] sm:$0xf0]  ;;  %v3393_v12 = vld [vmem:[#allocation4 + $0x20] sm:$0xf0]  ;;  %v3751_v23 = vld [vmem:[#allocation4 + $0x2c8] sm:$0xf] }
  0x2b   :  { %v3712_v35 = vor.u32 %v4305_v33, %v3711_v32  ;;  %v3423_v36 = vld [vmem:[#allocation4 + $0x40] sm:$0xf]  ;;  %4434 = vmatpush.bf16.msra.mxu2 %v3456_v34  ;;  %902 = vmatpush.bf16.msra.mxu0 %v3456_v34  ;;  %v3559_v32 = vld [vmem:[#allocation4 + $0x148] sm:$0xf]  ;;  %v3780_v34 = vor.u32 %v4317_v15, %v3777_v16  ;;  %v4285_v15 = vld [vmem:[#allocation4 + $0x204] sm:$0xf] }
  0x2c   :  { %v4233_v37 = vld [vmem:[#allocation4 + $0x5c] sm:$0xf0]  ;;  %v4266_v33 = vld [vmem:[#allocation4 + $0x164] sm:$0xf0]  ;;  %v3649_v16 = vld [vmem:[#allocation4 + $0x220] sm:$0xf0] }
  0x2d   :  { %v3679_v38 = vld [vmem:[#allocation4 + $0x240] sm:$0xf]  ;;  %v3424_v40 = vor.u32 %v4233_v37, %v3423_v36  ;;  %4442 = vmatpush.bf16.msra.mxu3 %v3712_v35  ;;  %931 = vmatpush.bf16.msra.mxu1 %v3712_v35  ;;  %v101_v36 = vld [vmem:[%s6076_s0 + $0x70] sm:$0xff]  ;;  %v3489_v37 = vld [vmem:[#allocation4 + $0xe0] sm:$0xf0]  ;;  %v3560_v46 = vor.u32 %v4266_v33, %v3559_v32  ;;  %v3396_v33 = vor.u32 %v4221_v10, %v3393_v12 }
  0x2e   :  { %v4297_v39 = vld [vmem:[#allocation4 + $0x25c] sm:$0xf0]  ;;  %v3492_v47 = vor.u32 %v4245_v30, %v3489_v37  ;;  %v3463_v25 = vld [vmem:[#allocation4 + $0x88] sm:$0xf]  ;;  %v4342_v30 = vld [vmem:[#allocation4 + $0x3cc] sm:$0xf]  ;;  %v3652_v37 = vor.u32 %v4285_v15, %v3649_v16 }
  0x2f   :  { %v3680_v41 = vor.u32 %v4297_v39, %v3679_v38  ;;  %v3391_v42 = vld [vmem:[#allocation4] sm:$0xf]  ;;  %4435 = vmatpush.bf16.msra.mxu2 %v3424_v40  ;;  %903 = vmatpush.bf16.msra.mxu0 %v3424_v40  ;;  %v3815_v38 = vld [vmem:[#allocation4 + $0x348] sm:$0xf]  ;;  %v4246_v10 = vld [vmem:[#allocation4 + $0xcc] sm:$0xf] }
  0x30   :  { %v4225_v43 = vld [vmem:[#allocation4 + $0x1c] sm:$0xf0]  ;;  %v4330_v39 = vld [vmem:[#allocation4 + $0x364] sm:$0xf0]  ;;  %v3497_v12 = vld [vmem:[#allocation4 + $0xe8] sm:$0xf0] }
  0x31   :  { %v3647_v44 = vld [vmem:[#allocation4 + $0x200] sm:$0xf]  ;;  %v3392_v50 = vor.u32 %v4225_v43, %v3391_v42  ;;  %4443 = vmatpush.bf16.msra.mxu3 %v3680_v41  ;;  %932 = vmatpush.bf16.msra.mxu1 %v3680_v41  ;;  %v100_v40 = vld [vmem:[%s6076_s0 + $0x68] sm:$0xff]  ;;  %v4309_v41 = vld [vmem:[#allocation4 + $0x2c4] sm:$0xf]  ;;  %v3816_v48 = vor.u32 %v4330_v39, %v3815_v38  ;;  %v3628_v38 = vor.u32 %v4278_v17, %v3625_v18 }
  0x32   :  { %v4289_v45 = vld [vmem:[#allocation4 + $0x21c] sm:$0xf0]  ;;  %v3745_v42 = vld [vmem:[#allocation4 + $0x2e0] sm:$0xf0]  ;;  %v102_v43 = vld [vmem:[%s6076_s0 + $0x78] sm:$0xff]  ;;  %v3500_v16 = vor.u32 %v4246_v10, %v3497_v12 }
  0x33   :  { %v95_v51 = vld [vmem:[%s6076_s0 + $0x40] sm:$0xff]  ;;  %v3648_v53 = vor.u32 %v4289_v45, %v3647_v44  ;;  %4436 = vmatpush.bf16.msra.mxu2 %v3392_v50  ;;  %904 = vmatpush.bf16.msra.mxu0 %v3392_v50  ;;  %v4258_v50 = vld [vmem:[#allocation4 + $0x124] sm:$0xf0]  ;;  %v4865_v59 = vpack.c.bf16 %v102_v43, %v100_v40  ;;  %v3593_v43 = vld [vmem:[#allocation4 + $0x1a8] sm:$0xf0] }
  0x34   :  { %v87_v60 = vld [vmem:[%s6076_s0] sm:$0xff]  ;;  %v4827_v62 = vpack.c.bf16 %v97_v52, %v95_v51  ;;  %v3783_v51 = vld [vmem:[#allocation4 + $0x308] sm:$0xf]  ;;  %v3748_v52 = vor.u32 %v4309_v41, %v3745_v42  ;;  %v4270_v42 = vld [vmem:[#allocation4 + $0x18c] sm:$0xf] }
  0x35   :  { %4444 = vmatpush.bf16.msra.mxu3 %v3648_v53  ;;  %v4831_v3 = vpack.c.bf16 %v89_v61, %v87_v60  ;;  %933 = vmatpush.bf16.msra.mxu1 %v3648_v53  ;;  %v99_v35 = vld [vmem:[%s6076_s0 + $0x60] sm:$0xff]  ;;  %v4322_v53 = vld [vmem:[#allocation4 + $0x324] sm:$0xf0]  ;;  %v3528_v60 = vor.u32 %v4258_v50, %v3527_v49  ;;  %v3596_v50 = vor.u32 %v4270_v42, %v3593_v43  ;;  %v3753_v15 = vld [vmem:[#allocation4 + $0x2e8] sm:$0xf0] }
  0x36   :  { %915 = vmatmul.bf16.vlgmr.msra.gmra.mxu2 %v4827_v62  ;;  %v4237_v44 = vld [vmem:[#allocation4 + $0x84] sm:$0xf]  ;;  %v3784_v63 = vor.u32 %v4322_v53, %v3783_v51  ;;  %v4242_v27 = vld [vmem:[#allocation4 + $0xa4] sm:$0xf0]  ;;  %v4238_v18 = vld [vmem:[#allocation4 + $0x8c] sm:$0xf] }
  0x37   :  { %955 = vmatpush.bf16.msrb.mxu2 %v3620_v56  ;;  %905 = vmatmul.bf16.vlgmr.msra.gmra.mxu0 %v4831_v3  ;;  %v3457_v45 = vld [vmem:[#allocation4 + $0xa0] sm:$0xf0]  ;;  %v4863_v56 = vpack.c.bf16 %v101_v36, %v99_v35  ;;  %v3464_v32 = vor.u32 %v4242_v27, %v3463_v25  ;;  %v3431_v35 = vld [vmem:[#allocation4 + $0x48] sm:$0xf]  ;;  %v3433_v25 = vld [vmem:[#allocation4 + $0x68] sm:$0xf0] }
  0x38   :  { %944 = vmatmul.bf16.vlgmr.msra.gmra.mxu3 %v4829_v1  ;;  %934 = vmatmul.bf16.vlgmr.msra.gmra.mxu1 %v4840_v11  ;;  %v91_v54 = vld [vmem:[%s6076_s0 + $0x20] sm:$0xff]  ;;  %v3460_v61 = vor.u32 %v4237_v44, %v3457_v45  ;;  %v4234_v36 = vld [vmem:[#allocation4 + $0x64] sm:$0xf0]  ;;  %v4334_v44 = vld [vmem:[#allocation4 + $0x38c] sm:$0xf] }
  0x39   :  { %984 = vmatpush.bf16.msrb.mxu3 %v3876_v58  ;;  %1013 = vmatpush.bf16.msrb.mxu0 %v3624_v20  ;;  %v3713_v58 = vld [vmem:[#allocation4 + $0x2a0] sm:$0xf0]  ;;  %v4867_v0 = vpack.c.bf16 %v93_v55, %v91_v54  ;;  %v4250_v20 = vld [vmem:[#allocation4 + $0xe4] sm:$0xf0]  ;;  %v3849_v45 = vld [vmem:[#allocation4 + $0x3a8] sm:$0xf0] }
  0x3a   :  { %1042 = vmatpush.bf16.msrb.mxu1 %v3880_v24  ;;  %v3716_v5 = vor.u32 %v4301_v57, %v3713_v58  ;;  %v4314_v24 = vld [vmem:[#allocation4 + $0x2e4] sm:$0xf0]  ;;  %v3852_v53 = vor.u32 %v4334_v44, %v3849_v45  ;;  %v4262_v54 = vld [vmem:[#allocation4 + $0x14c] sm:$0xf]  ;;  %v4283_v42 = vld [vmem:[#allocation4 + $0x1ec] sm:$0xf0] }
  0x3b   :  { %956 = vmatpush.bf16.msrb.mxu2 %v3588_v2  ;;  %v92_v2 = vld [vmem:[%s6076_s0 + $0x28] sm:$0xff]  ;;  %v3752_v26 = vor.u32 %v4314_v24, %v3751_v23  ;;  %v3887_v45 = vld [vmem:[#allocation4 + $0x3d0] sm:$0xf] }
  0x3c   :  { %v4878_v13 = vpack.c.bf16 %v94_v4, %v92_v2  ;;  %v3687_v39 = vld [vmem:[#allocation4 + $0x248] sm:$0xf]  ;;  %v3561_v55 = vld [vmem:[#allocation4 + $0x168] sm:$0xf0]  ;;  %v3791_v10 = vld [vmem:[#allocation4 + $0x310] sm:$0xf] }
  0x3d   :  { %985 = vmatpush.bf16.msrb.mxu3 %v3844_v6  ;;  %1014 = vmatpush.bf16.msrb.mxu0 %v3592_v28  ;;  %v4229_v6 = vld [vmem:[#allocation4 + $0x44] sm:$0xf]  ;;  %v3719_v28 = vld [vmem:[#allocation4 + $0x288] sm:$0xf]  ;;  %v4326_v57 = vld [vmem:[#allocation4 + $0x34c] sm:$0xf] }
  0x3e   :  { %1043 = vmatpush.bf16.msrb.mxu1 %v3848_v31  ;;  %v3881_v31 = vld [vmem:[#allocation4 + $0x3e8] sm:$0xf0]  ;;  %v4298_v40 = vld [vmem:[#allocation4 + $0x264] sm:$0xf0]  ;;  %v4323_v12 = vld [vmem:[#allocation4 + $0x32c] sm:$0xf0] }
  0x3f   :  { %957 = vmatpush.bf16.msrb.mxu2 %v3556_v14  ;;  %v3428_v14 = vor.u32 %v4229_v6, %v3425_v7  ;;  %v3884_v41 = vor.u32 %v4342_v30, %v3881_v31  ;;  %v4226_v49 = vld [vmem:[#allocation4 + $0x24] sm:$0xf0]  ;;  %v3817_v58 = vld [vmem:[#allocation4 + $0x368] sm:$0xf0] }
  0x40   :  { %v3655_v51 = vld [vmem:[#allocation4 + $0x208] sm:$0xf]  ;;  %v3820_v2 = vor.u32 %v4326_v57, %v3817_v58  ;;  %v4254_v4 = vld [vmem:[#allocation4 + $0x10c] sm:$0xf] }
  0x41   :  { %986 = vmatpush.bf16.msrb.mxu3 %v3812_v19  ;;  %1015 = vmatpush.bf16.msrb.mxu0 %v3560_v46  ;;  %v3495_v19 = vld [vmem:[#allocation4 + $0xc8] sm:$0xf]  ;;  %v3432_v46 = vor.u32 %v4234_v36, %v3431_v35  ;;  %v4318_v6 = vld [vmem:[#allocation4 + $0x30c] sm:$0xf]  ;;  %v4279_v36 = vld [vmem:[#allocation4 + $0x1d4] sm:$0xf] }
  0x42   :  { %1044 = vmatpush.bf16.msrb.mxu1 %v3816_v48  ;;  %v3496_v22 = vor.u32 %v4250_v20, %v3495_v19  ;;  %v3399_v48 = vld [vmem:[#allocation4 + $0x8] sm:$0xf]  ;;  %v3785_v7 = vld [vmem:[#allocation4 + $0x328] sm:$0xf0] }
  0x43   :  { %958 = vmatpush.bf16.msrb.mxu2 %v3524_v29  ;;  %v4306_v29 = vld [vmem:[#allocation4 + $0x2a4] sm:$0xf0]  ;;  %v3788_v9 = vor.u32 %v4318_v6, %v3785_v7  ;;  %v3465_v19 = vld [vmem:[#allocation4 + $0xa8] sm:$0xf0] }
  0x44   :  { %v4302_v20 = vld [vmem:[#allocation4 + $0x28c] sm:$0xf] }
  0x45   :  { %987 = vmatpush.bf16.msrb.mxu3 %v3780_v34  ;;  %1016 = vmatpush.bf16.msrb.mxu0 %v3528_v60  ;;  %v3720_v34 = vor.u32 %v4306_v29, %v3719_v28  ;;  %v3400_v60 = vor.u32 %v4226_v49, %v3399_v48  ;;  %v4230_v24 = vld [vmem:[#allocation4 + $0x4c] sm:$0xf]  ;;  %v4275_v49 = vld [vmem:[#allocation4 + $0x1ac] sm:$0xf0] }
  0x46   :  { %920 = vmatmul.bf16.gmra.mxu2 %v4863_v56  ;;  %1045 = vmatpush.bf16.msrb.mxu1 %v3784_v63  ;;  %v3564_v63 = vor.u32 %v4262_v54, %v3561_v55  ;;  %v3436_v27 = vor.u32 %v4230_v24, %v3433_v25  ;;  %v3689_v28 = vld [vmem:[#allocation4 + $0x268] sm:$0xf0]  ;;  %v4335_v54 = vld [vmem:[#allocation4 + $0x394] sm:$0xf]  ;;  %v3759_v25 = vld [vmem:[#allocation4 + $0x2d0] sm:$0xf] }
  0x47   :  { %959 = vmatpush.bf16.msrb.mxu2 %v3492_v47  ;;  %910 = vmatmul.bf16.gmra.mxu0 %v4867_v0  ;;  %v3688_v47 = vor.u32 %v4298_v40, %v3687_v39  ;;  %v4222_v29 = vld [vmem:[#allocation4 + $0xc] sm:$0xf]  ;;  %v3889_v40 = vld [vmem:[#allocation4 + $0x3f0] sm:$0xf0] }
  0x48   :  { %949 = vmatmul.bf16.gmra.mxu3 %v4865_v59  ;;  %939 = vmatmul.bf16.gmra.mxu1 %v4878_v13  ;;  %v3401_v30 = vld [vmem:[#allocation4 + $0x28] sm:$0xf0] }
  0x49   :  { %988 = vmatpush.bf16.msrb.mxu3 %v3748_v52  ;;  %1017 = vmatpush.bf16.msrb.mxu0 %v3496_v22  ;;  %v4290_v52 = vld [vmem:[#allocation4 + $0x224] sm:$0xf0]  ;;  %v3468_v22 = vor.u32 %v4238_v18, %v3465_v19  ;;  %v4327_v18 = vld [vmem:[#allocation4 + $0x354] sm:$0xf] }
  0x4a   :  { %1046 = vmatpush.bf16.msrb.mxu1 %v3752_v26  ;;  %v4294_v26 = vld [vmem:[#allocation4 + $0x24c] sm:$0xf] }
  0x4b   :  { %960 = vmatpush.bf16.msrb.mxu2 %v3460_v61  ;;  %v3656_v61 = vor.u32 %v4290_v52, %v3655_v51  ;;  %v3692_v31 = vor.u32 %v4294_v26, %v3689_v28  ;;  %v4339_v51 = vld [vmem:[#allocation4 + $0x3ac] sm:$0xf0]  ;;  %v4271_v52 = vld [vmem:[#allocation4 + $0x194] sm:$0xf] }
  0x4c   :  { %v4315_v26 = vld [vmem:[#allocation4 + $0x2ec] sm:$0xf0] }
  0x4d   :  { %989 = vmatpush.bf16.msrb.mxu3 %v3716_v5  ;;  %1018 = vmatpush.bf16.msrb.mxu0 %v3464_v32  ;;  %v3529_v5 = vld [vmem:[#allocation4 + $0x128] sm:$0xf0]  ;;  %v3760_v28 = vor.u32 %v4315_v26, %v3759_v25  ;;  %v3641_v25 = vld [vmem:[#allocation4 + $0x1f8] sm:$0xf0] }
  0x4e   :  { %1047 = vmatpush.bf16.msrb.mxu1 %v3720_v34  ;;  %v3532_v8 = vor.u32 %v4254_v4, %v3529_v5  ;;  %v4286_v32 = vld [vmem:[#allocation4 + $0x20c] sm:$0xf]  ;;  %v3404_v34 = vor.u32 %v4222_v29, %v3401_v30  ;;  %v3823_v4 = vld [vmem:[#allocation4 + $0x350] sm:$0xf]  ;;  %v4344_v26 = vld [vmem:[#allocation4 + $0x3dc] sm:$0xf] }
  0x4f   :  { %961 = vmatpush.bf16.msrb.mxu2 %v3428_v14  ;;  %v4310_v14 = vld [vmem:[#allocation4 + $0x2cc] sm:$0xf]  ;;  %v4331_v5 = vld [vmem:[#allocation4 + $0x36c] sm:$0xf0] }
  0x50   :  { %v3756_v17 = vor.u32 %v4310_v14, %v3753_v15  ;;  %v3824_v7 = vor.u32 %v4331_v5, %v3823_v4  ;;  %v3792_v15 = vor.u32 %v4323_v12, %v3791_v10  ;;  %v4243_v29 = vld [vmem:[#allocation4 + $0xac] sm:$0xf0]  ;;  %v3729_v4 = vld [vmem:[#allocation4 + $0x2b0] sm:$0xf0] }
  0x51   :  { %990 = vmatpush.bf16.msrb.mxu3 %v3684_v21  ;;  %1019 = vmatpush.bf16.msrb.mxu0 %v3432_v46  ;;  %v3721_v21 = vld [vmem:[#allocation4 + $0x2a8] sm:$0xf0]  ;;  %v4347_v46 = vld [vmem:[#allocation4 + $0x3ec] sm:$0xf0]  ;;  %v3697_v10 = vld [vmem:[#allocation4 + $0x270] sm:$0xf0] }
  0x52   :  { %1048 = vmatpush.bf16.msrb.mxu1 %v3688_v47  ;;  %v3724_v23 = vor.u32 %v4302_v20, %v3721_v21  ;;  %v3599_v47 = vld [vmem:[#allocation4 + $0x190] sm:$0xf]  ;;  %v3888_v48 = vor.u32 %v4347_v46, %v3887_v45  ;;  %v3825_v20 = vld [vmem:[#allocation4 + $0x370] sm:$0xf0] }
  0x53   :  { %962 = vmatpush.bf16.msrb.mxu2 %v3396_v33  ;;  %v3657_v33 = vld [vmem:[#allocation4 + $0x228] sm:$0xf0]  ;;  %v3600_v55 = vor.u32 %v4275_v49, %v3599_v47  ;;  %v3503_v21 = vld [vmem:[#allocation4 + $0xd0] sm:$0xf] }
  0x54   :  { %v3660_v35 = vor.u32 %v4286_v32, %v3657_v33  ;;  %v3727_v30 = vld [vmem:[#allocation4 + $0x290] sm:$0xf]  ;;  %v4255_v32 = vld [vmem:[#allocation4 + $0x114] sm:$0xf] }
  0x55   :  { %991 = vmatpush.bf16.msrb.mxu3 %v3652_v37  ;;  %1020 = vmatpush.bf16.msrb.mxu0 %v3400_v60  ;;  %v3633_v37 = vld [vmem:[#allocation4 + $0x1f0] sm:$0xf0]  ;;  %v3407_v46 = vld [vmem:[#allocation4 + $0x10] sm:$0xf] }
  0x56   :  { %963 = vmatmul.bf16.vlgmr.msrb.gmra.mxu2 %v4831_v3  ;;  %1049 = vmatpush.bf16.msrb.mxu1 %v3656_v61  ;;  %v3636_v39 = vor.u32 %v4279_v36, %v3633_v37  ;;  %v3857_v60 = vld [vmem:[#allocation4 + $0x3b0] sm:$0xf0]  ;;  %v3567_v61 = vld [vmem:[#allocation4 + $0x150] sm:$0xf] }
  0x57   :  { %1071 = vmatpush.bf16.msra.mxu2 %v3628_v38  ;;  %v4343_v38 = vld [vmem:[#allocation4 + $0x3d4] sm:$0xf]  ;;  %v4227_v47 = vld [vmem:[#allocation4 + $0x2c] sm:$0xf0] }
  0x58   :  { %992 = vmatmul.bf16.vlgmr.msrb.gmra.mxu3 %v4840_v11  ;;  %1021 = vmatmul.bf16.vlgmr.msrb.gmra.mxu0 %v4831_v3  ;;  %v3892_v43 = vor.u32 %v4343_v38, %v3889_v40  ;;  %v3537_v33 = vld [vmem:[#allocation4 + $0x130] sm:$0xf0]  ;;  %v4291_v49 = vld [vmem:[#allocation4 + $0x22c] sm:$0xf0] }
  0x59   :  { %1100 = vmatpush.bf16.msra.mxu3 %v3884_v41  ;;  %1050 = vmatmul.bf16.vlgmr.msrb.gmra.mxu1 %v4840_v11  ;;  %v3631_v41 = vld [vmem:[#allocation4 + $0x1d0] sm:$0xf]  ;;  %v3540_v37 = vor.u32 %v4255_v32, %v3537_v33  ;;  %v3793_v38 = vld [vmem:[#allocation4 + $0x330] sm:$0xf0]  ;;  %v4284_v32 = vld [vmem:[#allocation4 + $0x1f4] sm:$0xf0] }
  0x5a   :  { %v3632_v44 = vor.u32 %v4283_v42, %v3631_v41  ;;  %1158 = vmatpush.bf16.msra.mxu1 %v3888_v48  ;;  %v4235_v41 = vld [vmem:[#allocation4 + $0x6c] sm:$0xf0]  ;;  %v3895_v33 = vld [vmem:[#allocation4 + $0x3d8] sm:$0xf] }
  0x5b   :  { %1072 = vmatpush.bf16.msra.mxu2 %v3596_v50  ;;  %v3855_v50 = vld [vmem:[#allocation4 + $0x390] sm:$0xf] }
  0x5c   :  { %1129 = vmatpush.bf16.msra.mxu0 %v3632_v44  ;;  %v3856_v57 = vor.u32 %v4339_v51, %v3855_v50  ;;  %v3695_v42 = vld [vmem:[#allocation4 + $0x250] sm:$0xf]  ;;  %v3408_v50 = vor.u32 %v4227_v47, %v3407_v46 }
  0x5d   :  { %1101 = vmatpush.bf16.msra.mxu3 %v3852_v53  ;;  %v3601_v53 = vld [vmem:[#allocation4 + $0x1b0] sm:$0xf0]  ;;  %v3663_v48 = vld [vmem:[#allocation4 + $0x210] sm:$0xf] }
  0x5e   :  { %v3604_v58 = vor.u32 %v4271_v52, %v3601_v53  ;;  %1159 = vmatpush.bf16.msra.mxu1 %v3856_v57  ;;  %v3664_v51 = vor.u32 %v4291_v49, %v3663_v48  ;;  %v4247_v52 = vld [vmem:[#allocation4 + $0xd4] sm:$0xf]  ;;  %v3575_v48 = vld [vmem:[#allocation4 + $0x158] sm:$0xf] }
  0x5f   :  { %1073 = vmatpush.bf16.msra.mxu2 %v3564_v63  ;;  %v3860_v63 = vor.u32 %v4335_v54, %v3857_v60  ;;  %v3505_v53 = vld [vmem:[#allocation4 + $0xf0] sm:$0xf0]  ;;  %v4268_v49 = vld [vmem:[#allocation4 + $0x174] sm:$0xf0] }
  0x60   :  { %1130 = vmatpush.bf16.msra.mxu0 %v3600_v55  ;;  %v4311_v54 = vld [vmem:[#allocation4 + $0x2d4] sm:$0xf]  ;;  %v3508_v55 = vor.u32 %v4247_v52, %v3505_v53  ;;  %v4332_v52 = vld [vmem:[#allocation4 + $0x374] sm:$0xf0] }
  0x61   :  { %1102 = vmatpush.bf16.msra.mxu3 %v3820_v2  ;;  %v4267_v2 = vld [vmem:[#allocation4 + $0x16c] sm:$0xf0]  ;;  %v3761_v57 = vld [vmem:[#allocation4 + $0x2f0] sm:$0xf0] }
  0x62   :  { %v3568_v6 = vor.u32 %v4267_v2, %v3567_v61  ;;  %1160 = vmatpush.bf16.msra.mxu1 %v3824_v7  ;;  %v4239_v60 = vld [vmem:[#allocation4 + $0x94] sm:$0xf] }
  0x63   :  { %1074 = vmatpush.bf16.msra.mxu2 %v3532_v8  ;;  %v3535_v8 = vld [vmem:[#allocation4 + $0x110] sm:$0xf]  ;;  %v3473_v61 = vld [vmem:[#allocation4 + $0xb0] sm:$0xf0] }
  0x64   :  { %1131 = vmatpush.bf16.msra.mxu0 %v3568_v6  ;;  %v3476_v2 = vor.u32 %v4239_v60, %v3473_v61  ;;  %v4231_v6 = vld [vmem:[#allocation4 + $0x54] sm:$0xf]  ;;  %v3543_v60 = vld [vmem:[#allocation4 + $0x118] sm:$0xf] }
  0x65   :  { %1103 = vmatpush.bf16.msra.mxu3 %v3788_v9  ;;  %v4259_v9 = vld [vmem:[#allocation4 + $0x12c] sm:$0xf0]  ;;  %v3441_v7 = vld [vmem:[#allocation4 + $0x70] sm:$0xf0]  ;;  %v4260_v61 = vld [vmem:[#allocation4 + $0x134] sm:$0xf0] }
  0x66   :  { %968 = vmatmul.bf16.gmra.mxu2 %v4867_v0  ;;  %v3536_v14 = vor.u32 %v4259_v9, %v3535_v8  ;;  %1161 = vmatpush.bf16.msra.mxu1 %v3792_v15  ;;  %v4295_v8 = vld [vmem:[#allocation4 + $0x254] sm:$0xf]  ;;  %v3444_v9 = vor.u32 %v4231_v6, %v3441_v7 }
  0x67   :  { %1075 = vmatpush.bf16.msra.mxu2 %v3500_v16  ;;  %v4263_v16 = vld [vmem:[#allocation4 + $0x154] sm:$0xf]  ;;  %v3700_v12 = vor.u32 %v4295_v8, %v3697_v10  ;;  %v3511_v10 = vld [vmem:[#allocation4 + $0xd8] sm:$0xf] }
  0x68   :  { %997 = vmatmul.bf16.gmra.mxu3 %v4878_v13  ;;  %1026 = vmatmul.bf16.gmra.mxu0 %v4867_v0  ;;  %v3409_v15 = vld [vmem:[#allocation4 + $0x30] sm:$0xf0] }
  0x69   :  { %1104 = vmatpush.bf16.msra.mxu3 %v3756_v17  ;;  %1055 = vmatmul.bf16.gmra.mxu1 %v4878_v13  ;;  %v3569_v17 = vld [vmem:[#allocation4 + $0x170] sm:$0xf0] }
  0x6a   :  { %1132 = vmatpush.bf16.msra.mxu0 %v3536_v14  ;;  %v3572_v19 = vor.u32 %v4263_v16, %v3569_v17  ;;  %1162 = vmatpush.bf16.msra.mxu1 %v3760_v28  ;;  %v4223_v14 = vld [vmem:[#allocation4 + $0x14] sm:$0xf]  ;;  %v3897_v28 = vld [vmem:[#allocation4 + $0x3f8] sm:$0xf0] }
  0x6b   :  { %1076 = vmatpush.bf16.msra.mxu2 %v3468_v22  ;;  %v4251_v22 = vld [vmem:[#allocation4 + $0xec] sm:$0xf0]  ;;  %v4287_v16 = vld [vmem:[#allocation4 + $0x214] sm:$0xf]  ;;  %v3412_v17 = vor.u32 %v4223_v14, %v3409_v15  ;;  %v3767_v14 = vld [vmem:[#allocation4 + $0x2d8] sm:$0xf] }
  0x6c   :  { %v3504_v24 = vor.u32 %v4251_v22, %v3503_v21 }
  0x6d   :  { %1105 = vmatpush.bf16.msra.mxu3 %v3724_v23  ;;  %v3828_v23 = vor.u32 %v4327_v18, %v3825_v20  ;;  %v3665_v18 = vld [vmem:[#allocation4 + $0x230] sm:$0xf0]  ;;  %v4905_v20 = vld [vmem:[#allocation9] sm:$0xff] }
  0x6e   :  { %1133 = vmatpush.bf16.msra.mxu0 %v3504_v24  ;;  %v4280_v24 = vld [vmem:[#allocation4 + $0x1dc] sm:$0xf] }
  0x6f   :  { %1077 = vmatpush.bf16.msra.mxu2 %v3436_v27  ;;  %v3471_v27 = vld [vmem:[#allocation4 + $0x90] sm:$0xf] }
  0x71   :  { %1106 = vmatpush.bf16.msra.mxu3 %v3692_v31  ;;  %v4307_v31 = vld [vmem:[#allocation4 + $0x2ac] sm:$0xf0] }
  0x72   :  { %v3728_v36 = vor.u32 %v4307_v31, %v3727_v30  ;;  %v3900_v31 = vor.u32 %v4344_v26, %v3897_v28  ;;  %v3479_v26 = vld [vmem:[#allocation4 + $0x98] sm:$0xf] }
  0x73   :  { %1078 = vmatpush.bf16.msra.mxu2 %v3404_v34  ;;  %v4319_v34 = vld [vmem:[#allocation4 + $0x314] sm:$0xf]  ;;  %v3735_v28 = vld [vmem:[#allocation4 + $0x298] sm:$0xf] }
  0x74   :  { %v3796_v40 = vor.u32 %v4319_v34, %v3793_v38  ;;  %1163 = vmatpush.bf16.msra.mxu1 %v3728_v36  ;;  %v4348_v34 = vld [vmem:[#allocation4 + $0x3f4] sm:$0xf0] }
  0x75   :  { %1107 = vmatpush.bf16.msra.mxu3 %v3660_v35  ;;  %v3472_v35 = vor.u32 %v4243_v29, %v3471_v27  ;;  %v3644_v27 = vor.u32 %v4280_v24, %v3641_v25  ;;  %v3639_v29 = vld [vmem:[#allocation4 + $0x1d8] sm:$0xf]  ;;  %v3896_v38 = vor.u32 %v4348_v34, %v3895_v33 }
  0x76   :  { %973 = vmatmul.bf16.gmra.mxu2 %v4827_v62 }
  0x77   :  { %1187 = vmatpush.bf16.msrb.mxu2 %v3636_v39  ;;  %v3439_v39 = vld [vmem:[#allocation4 + $0x50] sm:$0xf]  ;;  %1134 = vmatpush.bf16.msra.mxu0 %v3472_v35 }
  0x78   :  { %1002 = vmatmul.bf16.gmra.mxu3 %v4829_v1  ;;  %1031 = vmatmul.bf16.gmra.mxu0 %v4827_v62  ;;  %v3440_v44 = vor.u32 %v4235_v41, %v3439_v39  ;;  %v3607_v39 = vld [vmem:[#allocation4 + $0x198] sm:$0xf] }
  0x79   :  { %1060 = vmatmul.bf16.gmra.mxu1 %v4829_v1  ;;  %1216 = vmatpush.bf16.msrb.mxu3 %v3892_v43  ;;  %v4299_v43 = vld [vmem:[#allocation4 + $0x26c] sm:$0xf0]  ;;  %v3863_v41 = vld [vmem:[#allocation4 + $0x398] sm:$0xf] }
  0x7a   :  { %v3696_v45 = vor.u32 %v4299_v43, %v3695_v42 }
  0x7b   :  { %1188 = vmatpush.bf16.msrb.mxu2 %v3604_v58  ;;  %1135 = vmatpush.bf16.msra.mxu0 %v3440_v44  ;;  %v3764_v58 = vor.u32 %v4311_v54, %v3761_v57  ;;  %v4340_v44 = vld [vmem:[#allocation4 + $0x3b4] sm:$0xf0] }
  0x7c   :  { %1164 = vmatpush.bf16.msra.mxu1 %v3696_v45  ;;  %v3864_v45 = vor.u32 %v4340_v44, %v3863_v41 }
  0x7d   :  { %1217 = vmatpush.bf16.msrb.mxu3 %v3860_v63  ;;  %v4303_v63 = vld [vmem:[#allocation4 + $0x294] sm:$0xf] }
  0x7e   :  { %v3732_v5 = vor.u32 %v4303_v63, %v3729_v4  ;;  %v3799_v63 = vld [vmem:[#allocation4 + $0x318] sm:$0xf]  ;;  %v3544_v4 = vor.u32 %v4260_v61, %v3543_v60  ;;  %v3545_v60 = vld [vmem:[#allocation4 + $0x138] sm:$0xf0] }
  0x7f   :  { %1189 = vmatpush.bf16.msrb.mxu2 %v3572_v19  ;;  %1136 = vmatpush.bf16.msra.mxu0 %v3408_v50  ;;  %v3668_v19 = vor.u32 %v4287_v16, %v3665_v18  ;;  %v3831_v50 = vld [vmem:[#allocation4 + $0x358] sm:$0xf]  ;;  %v4320_v61 = vld [vmem:[#allocation4 + $0x31c] sm:$0xf] }
  0x80   :  { %1165 = vmatpush.bf16.msra.mxu1 %v3664_v51  ;;  %v3576_v51 = vor.u32 %v4268_v49, %v3575_v48  ;;  %v3832_v54 = vor.u32 %v4332_v52, %v3831_v50  ;;  %v4316_v16 = vld [vmem:[#allocation4 + $0x2f4] sm:$0xf0]  ;;  %v3577_v48 = vld [vmem:[#allocation4 + $0x178] sm:$0xf0] }
  0x81   :  { %1218 = vmatpush.bf16.msrb.mxu3 %v3828_v23  ;;  %v4913_v23 = vperm.slane %v4905_v20, 0  ;;  %v3768_v18 = vor.u32 %v4316_v16, %v3767_v14  ;;  %v4328_v52 = vld [vmem:[#allocation4 + $0x35c] sm:$0xf]  ;;  %v3671_v14 = vld [vmem:[#allocation4 + $0x218] sm:$0xf] }
  0x83   :  { %1190 = vmatpush.bf16.msrb.mxu2 %v3540_v37  ;;  %v3640_v37 = vor.u32 %v4284_v32, %v3639_v29 }
  0x84   :  { %1274 = vmatpush.bf16.msrb.mxu1 %v3896_v38  ;;  %v4272_v38 = vld [vmem:[#allocation4 + $0x19c] sm:$0xf] }
  0x85   :  { %1219 = vmatpush.bf16.msrb.mxu3 %v3796_v40  ;;  %v4276_v40 = vld [vmem:[#allocation4 + $0x1b4] sm:$0xf0]  ;;  %1245 = vmatpush.bf16.msrb.mxu0 %v3640_v37 }
  0x86   :  { %978 = vmatmul.bf16.gmra.mxu2 %v4863_v56  ;;  %v3608_v43 = vor.u32 %v4276_v40, %v3607_v39  ;;  %v4236_v37 = vld [vmem:[#allocation4 + $0x74] sm:$0xf0]  ;;  %v3609_v39 = vld [vmem:[#allocation4 + $0x1b8] sm:$0xf0] }
  0x87   :  { %1191 = vmatpush.bf16.msrb.mxu2 %v3508_v55  ;;  %v4336_v40 = vld [vmem:[#allocation4 + $0x39c] sm:$0xf] }
  0x88   :  { %1007 = vmatmul.bf16.gmra.mxu3 %v4865_v59  ;;  %1036 = vmatmul.bf16.gmra.mxu0 %v4863_v56 }
  0x89   :  { %1065 = vmatmul.bf16.gmra.mxu1 %v4865_v59  ;;  %1220 = vmatpush.bf16.msrb.mxu3 %v3764_v58 }
  0x8a   :  { %1246 = vmatpush.bf16.msrb.mxu0 %v3608_v43  ;;  %1275 = vmatpush.bf16.msrb.mxu1 %v3864_v45  ;;  %v3612_v45 = vor.u32 %v4272_v38, %v3609_v39 }
  0x8b   :  { %1192 = vmatpush.bf16.msrb.mxu2 %v3476_v2 }
  0x8d   :  { %1221 = vmatpush.bf16.msrb.mxu3 %v3732_v5  ;;  %v4324_v5 = vld [vmem:[#allocation4 + $0x334] sm:$0xf0] }
  0x8e   :  { %1247 = vmatpush.bf16.msrb.mxu0 %v3576_v51  ;;  %1276 = vmatpush.bf16.msrb.mxu1 %v3832_v54  ;;  %v3800_v7 = vor.u32 %v4324_v5, %v3799_v63  ;;  %v4300_v5 = vld [vmem:[#allocation4 + $0x274] sm:$0xf0] }
  0x8f   :  { %1193 = vmatpush.bf16.msrb.mxu2 %v3444_v9 }
  0x91   :  { %1222 = vmatpush.bf16.msrb.mxu3 %v3700_v12  ;;  %v4252_v12 = vld [vmem:[#allocation4 + $0xf4] sm:$0xf0] }
  0x92   :  { %1248 = vmatpush.bf16.msrb.mxu0 %v3544_v4  ;;  %v3512_v15 = vor.u32 %v4252_v12, %v3511_v10  ;;  %1277 = vmatpush.bf16.msrb.mxu1 %v3800_v7  ;;  %v3415_v7 = vld [vmem:[#allocation4 + $0x18] sm:$0xf] }
  0x93   :  { %1194 = vmatpush.bf16.msrb.mxu2 %v3412_v17 }
  0x95   :  { %1223 = vmatpush.bf16.msrb.mxu3 %v3668_v19 }
  0x96   :  { %1079 = vmatmul.bf16.vlgmr.msra.gmra.mxu2 %v4831_v3  ;;  %1249 = vmatpush.bf16.msrb.mxu0 %v3512_v15  ;;  %v4292_v15 = vld [vmem:[#allocation4 + $0x234] sm:$0xf0] }
  0x97   :  { %1303 = vmatpush.bf16.msra.mxu2 %v3644_v27  ;;  %v4244_v27 = vld [vmem:[#allocation4 + $0xb4] sm:$0xf0]  ;;  %1278 = vmatpush.bf16.msrb.mxu1 %v3768_v18 }
  0x98   :  { %1108 = vmatmul.bf16.vlgmr.msra.gmra.mxu3 %v4840_v11  ;;  %1137 = vmatmul.bf16.vlgmr.msra.gmra.mxu0 %v4831_v3 }
  0x99   :  { %1166 = vmatmul.bf16.vlgmr.msra.gmra.mxu1 %v4840_v11  ;;  %1332 = vmatpush.bf16.msra.mxu3 %v3900_v31  ;;  %v4308_v31 = vld [vmem:[#allocation4 + $0x2b4] sm:$0xf0] }
  0x9a   :  { %v3736_v33 = vor.u32 %v4308_v31, %v3735_v28  ;;  %v4312_v28 = vld [vmem:[#allocation4 + $0x2dc] sm:$0xf] }
  0x9b   :  { %1304 = vmatpush.bf16.msra.mxu2 %v3612_v45 }
  0x9c   :  { %1279 = vmatpush.bf16.msrb.mxu1 %v3736_v33 }
  0xa6   :  { %1084 = vmatmul.bf16.gmra.mxu2 %v4867_v0 }
  0xa8   :  { %1113 = vmatmul.bf16.gmra.mxu3 %v4878_v13  ;;  %1142 = vmatmul.bf16.gmra.mxu0 %v4867_v0 }
  0xa9   :  { %1171 = vmatmul.bf16.gmra.mxu1 %v4878_v13 }
  0xb4   :  { %v4907_v21 = vpop.f32.mrf.mxu0 }
  0xb5   :  { %v4909_v22 = vpop.f32.mrf.mxu1 }
  0xb6   :  { %1089 = vmatmul.bf16.gmra.mxu2 %v4827_v62 }
  0xb8   :  { %1118 = vmatmul.bf16.gmra.mxu3 %v4829_v1  ;;  %1147 = vmatmul.bf16.gmra.mxu0 %v4827_v62 }
  0xb9   :  { %v916_v30 = vpop.f32.mrf.mxu2  ;;  %1176 = vmatmul.bf16.gmra.mxu1 %v4829_v1 }
  0xba   :  { %v917_v35 = vadd.f32 %v916_v30, %v4913_v23  ;;  %v3480_v30 = vor.u32 %v4244_v27, %v3479_v26  ;;  %v3513_v26 = vld [vmem:[#allocation4 + $0xf8] sm:$0xf0] }
  0xbb   :  { %v945_v36 = vpop.f32.mrf.mxu3 }
  0xbc   :  { %v4919_v42 = vadd.f32 %v945_v36, %v917_v35  ;;  %v908_v46 = vpop.f32.mrf.mxu0  ;;  %v3447_v36 = vld [vmem:[#allocation4 + $0x58] sm:$0xf]  ;;  %1250 = vmatpush.bf16.msrb.mxu0 %v3480_v30  ;;  %v3769_v30 = vld [vmem:[#allocation4 + $0x2f8] sm:$0xf0] }
  0xbd   :  { %v937_v47 = vpop.f32.mrf.mxu1  ;;  %v909_v58 = vadd.f32 %v908_v46, %v4913_v23  ;;  %v3448_v43 = vor.u32 %v4236_v37, %v3447_v36  ;;  %v3865_v46 = vld [vmem:[#allocation4 + $0x3b8] sm:$0xf0] }
  0xbe   :  { %v3868_v51 = vor.u32 %v4336_v40, %v3865_v46  ;;  %v3481_v36 = vld [vmem:[#allocation4 + $0xb8] sm:$0xf0] }
  0xbf   :  { %v4925_v6 = vadd.f32 %v937_v47, %v909_v58  ;;  %v4264_v47 = vld [vmem:[#allocation4 + $0x15c] sm:$0xf] }
  0xc0   :  { %v4256_v58 = vld [vmem:[#allocation4 + $0x11c] sm:$0xf]  ;;  %1333 = vmatpush.bf16.msra.mxu3 %v3868_v51  ;;  %1251 = vmatpush.bf16.msrb.mxu0 %v3448_v43 }
  0xc1   :  { %v918_v53 = vpop.f32.mrf.mxu2  ;;  %v3548_v16 = vor.u32 %v4256_v58, %v3545_v60  ;;  %v4304_v37 = vld [vmem:[#allocation4 + $0x29c] sm:$0xf] }
  0xc2   :  { %v919_v55 = vadd.f32 %v918_v53, %v4913_v23  ;;  %v3833_v53 = vld [vmem:[#allocation4 + $0x378] sm:$0xf0] }
  0xc3   :  { %v947_v57 = vpop.f32.mrf.mxu3  ;;  %v3836_v4 = vor.u32 %v4328_v52, %v3833_v53  ;;  %v3737_v40 = vld [vmem:[#allocation4 + $0x2b8] sm:$0xf0] }
  0xc4   :  { %v4923_v2 = vadd.f32 %v947_v57, %v919_v55  ;;  %v911_v8 = vpop.f32.mrf.mxu0  ;;  %v3703_v55 = vld [vmem:[#allocation4 + $0x258] sm:$0xf]  ;;  %v3580_v57 = vor.u32 %v4264_v47, %v3577_v48  ;;  %v4232_v52 = vld [vmem:[#allocation4 + $0x5c] sm:$0xf] }
  0xc5   :  { %v940_v9 = vpop.f32.mrf.mxu1  ;;  %v912_v25 = vadd.f32 %v911_v8, %v4913_v23  ;;  %v4228_v8 = vld [vmem:[#allocation4 + $0x34] sm:$0xf0]  ;;  %v3704_v10 = vor.u32 %v4300_v5, %v3703_v55  ;;  %1334 = vmatpush.bf16.msra.mxu3 %v3836_v4  ;;  %v3449_v53 = vld [vmem:[#allocation4 + $0x78] sm:$0xf0] }
  0xc6   :  { %1094 = vmatmul.bf16.gmra.mxu2 %v4863_v56  ;;  %v3416_v12 = vor.u32 %v4228_v8, %v3415_v7  ;;  %v4296_v55 = vld [vmem:[#allocation4 + $0x25c] sm:$0xf]  ;;  %v3452_v60 = vor.u32 %v4232_v52, %v3449_v53  ;;  %v3999_v53 = vld [vmem:[#allocation6 + $0xc0] sm:$0xf] }
  0xc7   :  { %v4935_v32 = vadd.f32 %v940_v9, %v912_v25  ;;  %v3801_v9 = vld [vmem:[#allocation4 + $0x338] sm:$0xf0]  ;;  %1305 = vmatpush.bf16.msra.mxu2 %v3580_v57  ;;  %1280 = vmatpush.bf16.msrb.mxu1 %v3704_v10 }
  0xc8   :  { %1123 = vmatmul.bf16.gmra.mxu3 %v4865_v59  ;;  %1152 = vmatmul.bf16.gmra.mxu0 %v4863_v56  ;;  %v3804_v18 = vor.u32 %v4320_v61, %v3801_v9  ;;  %v4248_v25 = vld [vmem:[#allocation4 + $0xdc] sm:$0xf] }
  0xc9   :  { %v921_v17 = vpop.f32.mrf.mxu2  ;;  %1181 = vmatmul.bf16.gmra.mxu1 %v4865_v59  ;;  %1252 = vmatpush.bf16.msrb.mxu0 %v3416_v12  ;;  %v3516_v33 = vor.u32 %v4248_v25, %v3513_v26  ;;  %v3705_v61 = vld [vmem:[#allocation4 + $0x278] sm:$0xf0] }
  0xca   :  { %v922_v19 = vadd.f32 %v921_v17, %v4913_v23  ;;  %1335 = vmatpush.bf16.msra.mxu3 %v3804_v18  ;;  %v3708_v5 = vor.u32 %v4296_v55, %v3705_v61  ;;  %v4224_v12 = vld [vmem:[#allocation4 + $0x1c] sm:$0xf]  ;;  %v4375_v55 = vld [vmem:[#allocation6 + $0xcc] sm:$0xf0]  ;;  %v4001_v61 = vld [vmem:[#allocation6 + $0xd0] sm:$0xf0] }
  0xcb   :  { %v950_v24 = vpop.f32.mrf.mxu3  ;;  %1306 = vmatpush.bf16.msra.mxu2 %v3548_v16  ;;  %v4288_v18 = vld [vmem:[#allocation4 + $0x21c] sm:$0xf] }
  0xcc   :  { %v4933_v29 = vadd.f32 %v950_v24, %v922_v19  ;;  %v913_v34 = vpop.f32.mrf.mxu0  ;;  %v3672_v24 = vor.u32 %v4292_v15, %v3671_v14  ;;  %v3417_v14 = vld [vmem:[#allocation4 + $0x38] sm:$0xf0] }
  0xcd   :  { %v942_v35 = vpop.f32.mrf.mxu1  ;;  %v914_v41 = vadd.f32 %v913_v34, %v4913_v23  ;;  %v3772_v34 = vor.u32 %v4312_v28, %v3769_v30  ;;  %v3420_v16 = vor.u32 %v4224_v12, %v3417_v14  ;;  %v4369_v12 = vld [vmem:[#allocation6 + $0xa4] sm:$0xf] }
  0xce   :  { %1281 = vmatpush.bf16.msrb.mxu1 %v3672_v24  ;;  %v3673_v24 = vld [vmem:[#allocation4 + $0x238] sm:$0xf0] }
  0xcf   :  { %v4939_v54 = vadd.f32 %v942_v35, %v914_v41  ;;  %v4240_v35 = vld [vmem:[#allocation4 + $0x9c] sm:$0xf]  ;;  %1307 = vmatpush.bf16.msra.mxu2 %v3516_v33  ;;  %v4958_v41 = vperm.slane %v4905_v20, 1  ;;  %1336 = vmatpush.bf16.msra.mxu3 %v3772_v34  ;;  %v3676_v26 = vor.u32 %v4288_v18, %v3673_v24  ;;  %v3985_v18 = vld [vmem:[#allocation6 + $0xb0] sm:$0xf0] }
  0xd0   :  { %v3484_v39 = vor.u32 %v4240_v35, %v3481_v36  ;;  %v4015_v36 = vld [vmem:[#allocation6 + $0xe0] sm:$0xf] }
  0xd1   :  { %v923_v44 = vpop.f32.mrf.mxu2 }
  0xd2   :  { %v924_v49 = vadd.f32 %v923_v44, %v4913_v23  ;;  %v3740_v44 = vor.u32 %v4304_v37, %v3737_v40  ;;  %v4379_v37 = vld [vmem:[#allocation6 + $0xec] sm:$0xf0] }
  0xd3   :  { %v952_v50 = vpop.f32.mrf.mxu3  ;;  %1308 = vmatpush.bf16.msra.mxu2 %v3484_v39 }
  0xd4   :  { %v4941_v63 = vadd.f32 %v952_v50, %v924_v49  ;;  %1337 = vmatpush.bf16.msra.mxu3 %v3740_v44  ;;  %v4968_v50 = vperm.slane %v4905_v20, 2  ;;  %v4991_v44 = vor.u32 %v4379_v37, %v4015_v36  ;;  %v4365_v36 = vld [vmem:[#allocation6 + $0x84] sm:$0xf] }
  0xd5   :  { %v4945_v17 = vpop.f32.mrf.mxu0 }
  0xd6   :  { %1195 = vmatmul.bf16.vlgmr.msrb.gmra.mxu2 %v4831_v3  ;;  %v4947_v19 = vpop.f32.mrf.mxu1  ;;  %1712 = vmatpush.bf16.msra.mxu0 %v4991_v44 }
  0xd7   :  { %1309 = vmatpush.bf16.msra.mxu2 %v3452_v60  ;;  %v5000_v60 = vor.u32 %v4375_v55, %v3999_v53 }
  0xd8   :  { %1224 = vmatmul.bf16.vlgmr.msrb.gmra.mxu3 %v4840_v11  ;;  %1253 = vmatmul.bf16.vlgmr.msrb.gmra.mxu0 %v4831_v3 }
  0xd9   :  { %v4949_v27 = vpop.f32.mrf.mxu2  ;;  %1282 = vmatmul.bf16.vlgmr.msrb.gmra.mxu1 %v4840_v11  ;;  %1338 = vmatpush.bf16.msra.mxu3 %v3708_v5 }
  0xda   :  { %1713 = vmatpush.bf16.msra.mxu0 %v5000_v60 }
  0xdb   :  { %v4951_v31 = vpop.f32.mrf.mxu3  ;;  %1310 = vmatpush.bf16.msra.mxu2 %v3420_v16 }
  0xdd   :  { %v4955_v38 = vpop.f32.mrf.mxu0  ;;  %1339 = vmatpush.bf16.msra.mxu3 %v3676_v26  ;;  %v5017_v26 = vor.u32 %v4369_v12, %v3985_v18  ;;  %v4357_v12 = vld [vmem:[#allocation6 + $0x44] sm:$0xf] }
  0xde   :  { %v4960_v43 = vpop.f32.mrf.mxu1 }
  0xdf   :  { %6217 = vst [vmem:[#allocation17_spill] sm:$0xff] %v5017_v26 }
  0xe1   :  { %v966_v45 = vpop.f32.mrf.mxu2 }
  0xe2   :  { %v967_v46 = vadd.f32 %v966_v45, %v4958_v41  ;;  %v4377_v45 = vld [vmem:[#allocation6 + $0xe4] sm:$0xf] }
  0xe3   :  { %v995_v47 = vpop.f32.mrf.mxu3 }
  0xe4   :  { %v996_v48 = vadd.f32 %v995_v47, %v967_v46  ;;  %v4017_v46 = vld [vmem:[#allocation6 + $0xf0] sm:$0xf0] }
  0xe5   :  { %v1027_v51 = vpop.f32.mrf.mxu0 }
  0xe6   :  { %v4964_v49 = vpack.c.bf16 %v996_v48, %v4925_v6  ;;  %1200 = vmatmul.bf16.gmra.mxu2 %v4867_v0  ;;  %v1028_v57 = vadd.f32 %v1027_v51, %v4968_v50  ;;  %v1056_v58 = vpop.f32.mrf.mxu1  ;;  %v4993_v48 = vor.u32 %v4377_v45, %v4017_v46 }
  0xe8   :  { %1229 = vmatmul.bf16.gmra.mxu3 %v4878_v13  ;;  %v4973_v8 = vadd.f32 %v1056_v58, %v1028_v57  ;;  %1258 = vmatmul.bf16.gmra.mxu0 %v4867_v0  ;;  %v4373_v57 = vld [vmem:[#allocation6 + $0xc4] sm:$0xf] }
  0xe9   :  { %v969_v4 = vpop.f32.mrf.mxu2  ;;  %1287 = vmatmul.bf16.gmra.mxu1 %v4878_v13 }
  0xea   :  { %v970_v6 = vadd.f32 %v969_v4, %v4958_v41  ;;  %1725 = vmatpush.bf16.msra.mxu1 %v4993_v48  ;;  %v5003_v4 = vor.u32 %v4373_v57, %v4001_v61 }
  0xeb   :  { %v998_v7 = vpop.f32.mrf.mxu3 }
  0xec   :  { %v999_v9 = vadd.f32 %v998_v7, %v970_v6  ;;  %v3983_v7 = vld [vmem:[#allocation6 + $0xa0] sm:$0xf] }
  0xed   :  { %v4980_v15 = vpop.f32.mrf.mxu0 }
  0xee   :  { %v4977_v10 = vpack.c.bf16 %v999_v9, %v4935_v32  ;;  %v4982_v25 = vpop.f32.mrf.mxu1  ;;  %v4371_v9 = vld [vmem:[#allocation6 + $0xac] sm:$0xf0]  ;;  %1726 = vmatpush.bf16.msra.mxu1 %v5003_v4 }
  0xef   :  { %v5015_v16 = vor.u32 %v4371_v9, %v3983_v7  ;;  %v3935_v7 = vld [vmem:[#allocation6 + $0x40] sm:$0xf]  ;;  %v4359_v9 = vld [vmem:[#allocation6 + $0x4c] sm:$0xf0] }
  0xf0   :  { %6214 = vst [vmem:[#allocation14_spill] sm:$0xff] %v4977_v10 }
  0xf1   :  { %v971_v28 = vpop.f32.mrf.mxu2  ;;  %1714 = vmatpush.bf16.msra.mxu0 %v5015_v16 }
  0xf2   :  { %v972_v30 = vadd.f32 %v971_v28, %v4958_v41  ;;  %v965_v28 = vadd.f32 %v4949_v27, %v4958_v41  ;;  %1727 = vmatpush.bf16.msra.mxu1 %v5017_v26 }
  0xf3   :  { %v1000_v33 = vpop.f32.mrf.mxu3 }
  0xf4   :  { %v1001_v32 = vadd.f32 %v1000_v33, %v972_v30 }
  0xf5   :  { %v1032_v35 = vpop.f32.mrf.mxu0 }
  0xf6   :  { %v4986_v34 = vpack.c.bf16 %v1001_v32, %v4939_v54  ;;  %1205 = vmatmul.bf16.gmra.mxu2 %v4827_v62  ;;  %v1033_v39 = vadd.f32 %v1032_v35, %v4968_v50  ;;  %v1061_v40 = vpop.f32.mrf.mxu1  ;;  %v3967_v32 = vld [vmem:[#allocation6 + $0x80] sm:$0xf]  ;;  %v4367_v35 = vld [vmem:[#allocation6 + $0x8c] sm:$0xf0] }
  0xf8   :  { %6215 = vst [vmem:[#allocation15_spill] sm:$0xff] %v4986_v34  ;;  %1234 = vmatmul.bf16.gmra.mxu3 %v4829_v1  ;;  %v4996_v52 = vadd.f32 %v1061_v40, %v1033_v39  ;;  %1263 = vmatmul.bf16.gmra.mxu0 %v4827_v62  ;;  %v5026_v39 = vor.u32 %v4367_v35, %v3967_v32  ;;  %v3969_v40 = vld [vmem:[#allocation6 + $0x90] sm:$0xf0]  ;;  %v3919_v35 = vld [vmem:[#allocation6 + $0x20] sm:$0xf] }
  0xf9   :  { %v974_v47 = vpop.f32.mrf.mxu2  ;;  %1292 = vmatmul.bf16.gmra.mxu1 %v4829_v1  ;;  %v5028_v45 = vor.u32 %v4365_v36, %v3969_v40  ;;  %v4355_v36 = vld [vmem:[#allocation6 + $0x2c] sm:$0xf0] }
  0xfa   :  { %v975_v54 = vadd.f32 %v974_v47, %v4958_v41  ;;  %6218 = vst [vmem:[#allocation18_spill] sm:$0xff] %v5026_v39  ;;  %1715 = vmatpush.bf16.msra.mxu0 %v5026_v39  ;;  %v3951_v47 = vld [vmem:[#allocation6 + $0x60] sm:$0xf] }
  0xfb   :  { %v1003_v51 = vpop.f32.mrf.mxu3  ;;  %6219 = vst [vmem:[#allocation19_spill] sm:$0xff] %v5028_v45  ;;  %1728 = vmatpush.bf16.msra.mxu1 %v5028_v45 }
  0xfc   :  { %v1004_v58 = vadd.f32 %v1003_v51, %v975_v54  ;;  %v4363_v54 = vld [vmem:[#allocation6 + $0x6c] sm:$0xf0]  ;;  %v4361_v51 = vld [vmem:[#allocation6 + $0x64] sm:$0xf] }
  0xfd   :  { %v5010_v6 = vpop.f32.mrf.mxu0  ;;  %v5039_v55 = vor.u32 %v4363_v54, %v3951_v47 }
  0xfe   :  { %v5006_v5 = vpack.c.bf16 %v1004_v58, %v4919_v42  ;;  %v5012_v14 = vpop.f32.mrf.mxu1  ;;  %v907_v42 = vadd.f32 %v4907_v21, %v4913_v23  ;;  %v994_v23 = vadd.f32 %v4951_v31, %v965_v28 }
  0xff   :  { %6221 = vst [vmem:[#allocation21_spill] sm:$0xff] %v5039_v55  ;;  %1716 = vmatpush.bf16.msra.mxu0 %v5039_v55 }
 0x100   :  { %6216 = vst [vmem:[#allocation16_spill] sm:$0xff] %v5006_v5  ;;  %v936_v21 = vadd.f32 %v4909_v22, %v907_v42  ;;  %v3953_v22 = vld [vmem:[#allocation6 + $0x70] sm:$0xf0] }
 0x101   :  { %v976_v24 = vpop.f32.mrf.mxu2  ;;  %v5041_v57 = vor.u32 %v4361_v51, %v3953_v22  ;;  %v3937_v42 = vld [vmem:[#allocation6 + $0x50] sm:$0xf0] }
 0x102   :  { %v977_v30 = vadd.f32 %v976_v24, %v4958_v41  ;;  %v5046_v24 = vor.u32 %v4359_v9, %v3935_v7  ;;  %v5049_v28 = vor.u32 %v4357_v12, %v3937_v42  ;;  %v4349_v7 = vld [vmem:[#allocation6 + $0x4] sm:$0xf]  ;;  %v1023_v42 = vadd.f32 %v4945_v17, %v4968_v50 }
 0x103   :  { %v1005_v33 = vpop.f32.mrf.mxu3  ;;  %6222 = vst [vmem:[#allocation22_spill] sm:$0xff] %v5041_v57  ;;  %1729 = vmatpush.bf16.msra.mxu1 %v5041_v57  ;;  %v5084_v17 = vperm.slane %v4905_v20, 4 }
 0x104   :  { %v1006_v37 = vadd.f32 %v1005_v33, %v977_v30  ;;  %6223 = vst [vmem:[#allocation23_spill] sm:$0xff] %v5046_v24  ;;  %1717 = vmatpush.bf16.msra.mxu0 %v5046_v24 }
 0x105   :  { %v1037_v46 = vpop.f32.mrf.mxu0  ;;  %6224 = vst [vmem:[#allocation24_spill] sm:$0xff] %v5049_v28 }
 0x106   :  { %v5033_v27 = vpack.c.bf16 %v1006_v37, %v4923_v2  ;;  %1210 = vmatmul.bf16.gmra.mxu2 %v4863_v56  ;;  %v1066_v53 = vpop.f32.mrf.mxu1  ;;  %v1361_v2 = vpack.c.bf16 %v994_v23, %v936_v21  ;;  %v4353_v37 = vld [vmem:[#allocation6 + $0x24] sm:$0xf]  ;;  %v5061_v21 = vor.u32 %v4355_v36, %v3919_v35  ;;  %v3921_v23 = vld [vmem:[#allocation6 + $0x30] sm:$0xf0] }
 0x107   :  { %1730 = vmatpush.bf16.msra.mxu1 %v5049_v28  ;;  %v5063_v54 = vor.u32 %v4353_v37, %v3921_v23  ;;  %v5079_v23 = vperm.slane %v4905_v20, 3 }
 0x108   :  { %6220 = vst [vmem:[#allocation20_spill] sm:$0xff] %v5033_v27  ;;  %1239 = vmatmul.bf16.gmra.mxu3 %v4865_v59  ;;  %1268 = vmatmul.bf16.gmra.mxu0 %v4863_v56  ;;  %v1495_v30 = vunpack.c.h.bf16 %v1361_v2 }
 0x109   :  { %v979_v31 = vpop.f32.mrf.mxu2  ;;  %1297 = vmatmul.bf16.gmra.mxu1 %v4865_v59  ;;  %6226 = vst [vmem:[#allocation26_spill] sm:$0xff] %v5061_v21  ;;  %1718 = vmatpush.bf16.msra.mxu0 %v5061_v21 }
 0x10a   :  { %v980_v58 = vadd.f32 %v979_v31, %v4958_v41  ;;  %6227 = vst [vmem:[#allocation27_spill] sm:$0xff] %v5063_v54  ;;  %v1508_v51 = vmul.f32 0.5, %v1495_v30  ;;  %v4380_v30 = vld [vmem:[#allocation6 + $0xf4] sm:$0xf0] }
 0x10b   :  { %v1008_v61 = vpop.f32.mrf.mxu3  ;;  %1731 = vmatpush.bf16.msra.mxu1 %v5063_v54 }
 0x10c   :  { %v1009_v18 = vadd.f32 %v1008_v61, %v980_v58  ;;  %v3903_v58 = vld [vmem:[#allocation6] sm:$0xf]  ;;  %v4351_v61 = vld [vmem:[#allocation6 + $0xc] sm:$0xf0]  ;;  %4454 = vtanh.f32 %v1508_v51 }
 0x10d   :  { %v5056_v32 = vpop.f32.mrf.mxu0  ;;  %v5068_v12 = vor.u32 %v4351_v61, %v3903_v58  ;;  %v4376_v61 = vld [vmem:[#allocation6 + $0xd4] sm:$0xf0] }
 0x10e   :  { %v5052_v33 = vpack.c.bf16 %v1009_v18, %v4933_v29  ;;  %v5058_v40 = vpop.f32.mrf.mxu1  ;;  %v1494_v29 = vunpack.c.l.bf16 %v1361_v2  ;;  %v3905_v18 = vld [vmem:[#allocation6 + $0x10] sm:$0xf0]  ;;  %v4023_v2 = vld [vmem:[#allocation6 + $0xe8] sm:$0xf] }
 0x10f   :  { %6228 = vst [vmem:[#allocation28_spill] sm:$0xff] %v5068_v12  ;;  %v5072_v35 = vor.u32 %v4349_v7, %v3905_v18  ;;  %1719 = vmatpush.bf16.msra.mxu0 %v5068_v12  ;;  %v4374_v7 = vld [vmem:[#allocation6 + $0xcc] sm:$0xf] }
 0x110   :  { %6225 = vst [vmem:[#allocation25_spill] sm:$0xff] %v5052_v33  ;;  %v1507_v36 = vmul.f32 0.5, %v1494_v29  ;;  %v5087_v29 = vor.u32 %v4380_v30, %v4023_v2  ;;  %v4009_v30 = vld [vmem:[#allocation6 + $0xd8] sm:$0xf0]  ;;  %v4370_v33 = vld [vmem:[#allocation6 + $0xac] sm:$0xf] }
 0x111   :  { %v981_v47 = vpop.f32.mrf.mxu2  ;;  %6229 = vst [vmem:[#allocation29_spill] sm:$0xff] %v5072_v35  ;;  %1732 = vmatpush.bf16.msra.mxu1 %v5072_v35  ;;  %v4362_v12 = vld [vmem:[#allocation6 + $0x6c] sm:$0xf] }
 0x112   :  { %v982_v22 = vadd.f32 %v981_v47, %v4958_v41  ;;  %v4378_v41 = vld [vmem:[#allocation6 + $0xec] sm:$0xf]  ;;  %v1038_v47 = vadd.f32 %v1037_v46, %v4968_v50  ;;  %1738 = vmatpush.bf16.msrb.mxu2 %v5087_v29  ;;  %4456 = vtanh.f32 %v1507_v36  ;;  %v4372_v36 = vld [vmem:[#allocation6 + $0xb4] sm:$0xf0] }
 0x113   :  { %v1010_v31 = vpop.f32.mrf.mxu3 }
 0x114   :  { %v1011_v9 = vadd.f32 %v1010_v31, %v982_v22  ;;  %v4025_v22 = vld [vmem:[#allocation6 + $0xf8] sm:$0xf0]  ;;  %v5091_v31 = vadd.f32 %v1066_v53, %v1038_v47  ;;  %v5103_v47 = vor.u32 %v4374_v7, %v4009_v30 }
 0x116   :  { %v5075_v37 = vpack.c.bf16 %v1011_v9, %v4941_v63  ;;  %1311 = vmatmul.bf16.vlgmr.msra.gmra.mxu2 %v4831_v3  ;;  %v5089_v63 = vor.u32 %v4378_v41, %v4025_v22  ;;  %v1138_v3 = vpop.f32.mrf.mxu0  ;;  %v1167_v58 = vpop.f32.mrf.mxu1  ;;  %v1052_v9 = vadd.f32 %v4947_v19, %v1023_v42 }
 0x117   :  { %v1139_v51 = vadd.f32 %v1138_v3, %v5084_v17  ;;  %v4455_v3 = vpop.eup %4454 }
 0x118   :  { %6230 = vst [vmem:[#allocation30_spill] sm:$0xff] %v5075_v37  ;;  %1340 = vmatmul.bf16.vlgmr.msra.gmra.mxu3 %v4840_v11  ;;  %v4007_v11 = vld [vmem:[#allocation6 + $0xc8] sm:$0xf] }
 0x119   :  { %v1080_v46 = vpop.f32.mrf.mxu2  ;;  %1751 = vmatpush.bf16.msrb.mxu3 %v5089_v63  ;;  %v5099_v2 = vor.u32 %v4376_v61, %v4007_v11  ;;  %v5101_v41 = vadd.f32 %v1167_v58, %v1139_v51  ;;  %v3991_v37 = vld [vmem:[#allocation6 + $0xa8] sm:$0xf]  ;;  %v4457_v61 = vpop.eup %4456  ;;  %v1514_v58 = vmul.f32 0.5, %v4455_v3  ;;  %v1025_v51 = vadd.f32 %v4955_v38, %v4968_v50 }
 0x11a   :  { %v1081_v53 = vadd.f32 %v1080_v46, %v5079_v23  ;;  %v5107_v42 = vor.u32 %v4372_v36, %v3991_v37  ;;  %v3993_v46 = vld [vmem:[#allocation6 + $0xb8] sm:$0xf0]  ;;  %v3975_v37 = vld [vmem:[#allocation6 + $0x88] sm:$0xf] }
 0x11b   :  { %v1109_v18 = vpop.f32.mrf.mxu3  ;;  %1739 = vmatpush.bf16.msrb.mxu2 %v5099_v2  ;;  %v5109_v11 = vor.u32 %v4370_v33, %v3993_v46  ;;  %v4366_v33 = vld [vmem:[#allocation6 + $0x8c] sm:$0xf]  ;;  %v1513_v46 = vmul.f32 0.5, %v4457_v61  ;;  %v1517_v34 = vadd.f32 0.5, %v1514_v58  ;;  %v1054_v10 = vadd.f32 %v4960_v43, %v1025_v51  ;;  %v3961_v61 = vld [vmem:[#allocation6 + $0x78] sm:$0xf0] }
 0x11c   :  { %v1110_v22 = vadd.f32 %v1109_v18, %v1081_v53  ;;  %6231 = vst [vmem:[#allocation31_spill] sm:$0xff] %v5107_v42  ;;  %v5133_v43 = vor.u32 %v4362_v12, %v3961_v61 }
 0x11d   :  { %1752 = vmatpush.bf16.msrb.mxu3 %v5103_v47  ;;  %6232 = vst [vmem:[#allocation32_spill] sm:$0xff] %v5109_v11  ;;  %v1520_v51 = vmul.f32 0.0, %v1517_v34 }
 0x11e   :  { %v1362_v19 = vpack.c.bf16 %v1110_v22, %v1052_v9  ;;  %v5113_v18 = vpop.f32.mrf.mxu0  ;;  %v5115_v30 = vpop.f32.mrf.mxu1  ;;  %v4368_v9 = vld [vmem:[#allocation6 + $0x94] sm:$0xf0]  ;;  %6236 = vst [vmem:[#allocation36_spill] sm:$0xff] %v5133_v43 }
 0x11f   :  { %1740 = vmatpush.bf16.msrb.mxu2 %v5107_v42  ;;  %v5120_v38 = vor.u32 %v4368_v9, %v3975_v37  ;;  %v1516_v9 = vadd.f32 0.5, %v1513_v46 }
 0x120   :  { %v1496_v7 = vunpack.c.l.bf16 %v1362_v19  ;;  %v1497_v53 = vunpack.c.h.bf16 %v1362_v19  ;;  %v3977_v19 = vld [vmem:[#allocation6 + $0x98] sm:$0xf0] }
 0x121   :  { %v1082_v27 = vpop.f32.mrf.mxu2  ;;  %1753 = vmatpush.bf16.msrb.mxu3 %v5109_v11  ;;  %6233 = vst [vmem:[#allocation33_spill] sm:$0xff] %v5120_v38  ;;  %v5122_v5 = vor.u32 %v4366_v33, %v3977_v19 }
 0x122   :  { %v1509_v22 = vmul.f32 0.5, %v1496_v7  ;;  %4458 = vtanh.f32 %v1497_v53  ;;  %v1083_v3 = vadd.f32 %v1082_v27, %v5079_v23  ;;  %v3959_v7 = vld [vmem:[#allocation6 + $0x68] sm:$0xf]  ;;  %v4364_v53 = vld [vmem:[#allocation6 + $0x74] sm:$0xf0] }
 0x123   :  { %v1111_v36 = vpop.f32.mrf.mxu3  ;;  %6234 = vst [vmem:[#allocation34_spill] sm:$0xff] %v5122_v5  ;;  %1741 = vmatpush.bf16.msrb.mxu2 %v5120_v38  ;;  %v5130_v37 = vor.u32 %v4364_v53, %v3959_v7  ;;  %v3945_v7 = vld [vmem:[#allocation6 + $0x58] sm:$0xf0] }
 0x124   :  { %v1112_v35 = vadd.f32 %v1111_v36, %v1083_v3  ;;  %4460 = vtanh.f32 %v1509_v22 }
 0x125   :  { %1754 = vmatpush.bf16.msrb.mxu3 %v5122_v5  ;;  %6235 = vst [vmem:[#allocation35_spill] sm:$0xff] %v5130_v37 }
 0x126   :  { %v5127_v27 = vpack.c.bf16 %v1112_v35, %v1054_v10  ;;  %1316 = vmatmul.bf16.gmra.mxu2 %v4867_v0  ;;  %v1143_v33 = vpop.f32.mrf.mxu0  ;;  %v1172_v22 = vpop.f32.mrf.mxu1  ;;  %v3943_v0 = vld [vmem:[#allocation6 + $0x48] sm:$0xf]  ;;  %v4360_v10 = vld [vmem:[#allocation6 + $0x54] sm:$0xf0]  ;;  %v4358_v35 = vld [vmem:[#allocation6 + $0x4c] sm:$0xf] }
 0x127   :  { %v1144_v19 = vadd.f32 %v1143_v33, %v5084_v17  ;;  %1742 = vmatpush.bf16.msrb.mxu2 %v5130_v37  ;;  %v5139_v12 = vor.u32 %v4360_v10, %v3943_v0  ;;  %v3927_v33 = vld [vmem:[#allocation6 + $0x28] sm:$0xf] }
 0x128   :  { %1345 = vmatmul.bf16.gmra.mxu3 %v4878_v13  ;;  %v4459_v58 = vpop.eup %4458 }
 0x129   :  { %v1521_v3 = vmul.f32 %v4459_v58, %v1516_v9  ;;  %v1085_v36 = vpop.f32.mrf.mxu2  ;;  %1755 = vmatpush.bf16.msrb.mxu3 %v5133_v43  ;;  %6237 = vst [vmem:[#allocation37_spill] sm:$0xff] %v5139_v12  ;;  %v5143_v61 = vadd.f32 %v1172_v22, %v1144_v19  ;;  %v5145_v9 = vor.u32 %v4358_v35, %v3945_v7  ;;  %v3929_v22 = vld [vmem:[#allocation6 + $0x38] sm:$0xf0]  ;;  %v4352_v7 = vld [vmem:[#allocation6 + $0x14] sm:$0xf0] }
 0x12a   :  { %v1086_v46 = vadd.f32 %v1085_v36, %v5079_v23  ;;  %v4461_v34 = vpop.eup %4460  ;;  %v4356_v36 = vld [vmem:[#allocation6 + $0x34] sm:$0xf0]  ;;  %v1030_v19 = vadd.f32 %v4980_v15, %v4968_v50 }
 0x12b   :  { %v1114_v13 = vpop.f32.mrf.mxu3  ;;  %v5141_v53 = vadd.f32 %v1521_v3, %v1520_v51  ;;  %6239 = vst [vmem:[#allocation39_spill] sm:$0xff] %v5145_v9  ;;  %1743 = vmatpush.bf16.msrb.mxu2 %v5139_v12  ;;  %v1515_v54 = vmul.f32 0.5, %v4461_v34  ;;  %v5153_v10 = vor.u32 %v4356_v36, %v3927_v33  ;;  %v4354_v51 = vld [vmem:[#allocation6 + $0x2c] sm:$0xf] }
 0x12c   :  { %v1115_v58 = vadd.f32 %v1114_v13, %v1086_v46  ;;  %v5155_v3 = vor.u32 %v4354_v51, %v3929_v22  ;;  %v4350_v34 = vld [vmem:[#allocation6 + $0xc] sm:$0xf]  ;;  %v3913_v22 = vld [vmem:[#allocation6 + $0x18] sm:$0xf0] }
 0x12d   :  { %6238 = vst [vmem:[#allocation38_spill] sm:$0xff] %v5141_v53  ;;  %4462 = vtanh.f32 %v5141_v53  ;;  %1756 = vmatpush.bf16.msrb.mxu3 %v5145_v9  ;;  %v1059_v53 = vadd.f32 %v4982_v25, %v1030_v19 }
 0x12e   :  { %v5151_v0 = vpack.c.bf16 %v1115_v58, %v4973_v8  ;;  %6241 = vst [vmem:[#allocation41_spill] sm:$0xff] %v5153_v10  ;;  %v5159_v35 = vpop.f32.mrf.mxu0  ;;  %v5161_v46 = vpop.f32.mrf.mxu1  ;;  %v3911_v8 = vld [vmem:[#allocation6 + $0x8] sm:$0xf]  ;;  %v1518_v58 = vadd.f32 0.5, %v1515_v54 }
 0x12f   :  { %6242 = vst [vmem:[#allocation42_spill] sm:$0xff] %v5155_v3  ;;  %1744 = vmatpush.bf16.msrb.mxu2 %v5153_v10  ;;  %v5166_v51 = vor.u32 %v4352_v7, %v3911_v8 }
 0x130   :  { %6240 = vst [vmem:[#allocation40_spill] sm:$0xff] %v5151_v0  ;;  %v5168_v0 = vor.u32 %v4350_v34, %v3913_v22 }
 0x131   :  { %v1087_v13 = vpop.f32.mrf.mxu2  ;;  %1757 = vmatpush.bf16.msrb.mxu3 %v5155_v3  ;;  %6243 = vst [vmem:[#allocation43_spill] sm:$0xff] %v5166_v51 }
 0x132   :  { %v1088_v33 = vadd.f32 %v1087_v13, %v5079_v23  ;;  %6244 = vst [vmem:[#allocation44_spill] sm:$0xff] %v5168_v0 }
 0x133   :  { %v1116_v36 = vpop.f32.mrf.mxu3  ;;  %v4463_v15 = vpop.eup %4462  ;;  %1745 = vmatpush.bf16.msrb.mxu2 %v5166_v51 }
 0x134   :  { %v5171_v21 = vmul.f32 %v4463_v15, %v1518_v58  ;;  %v1117_v10 = vadd.f32 %v1116_v36, %v1088_v33 }
 0x135   :  { %1758 = vmatpush.bf16.msrb.mxu3 %v5168_v0 }
 0x136   :  { %6245 = vst [vmem:[#allocation45_spill] sm:$0xff] %v5171_v21  ;;  %v1551_v54 = vpack.c.bf16 %v5171_v21, %v5171_v21  ;;  %v5177_v13 = vpack.c.bf16 %v1117_v10, %v1059_v53  ;;  %1321 = vmatmul.bf16.gmra.mxu2 %v4827_v62  ;;  %v1148_v8 = vpop.f32.mrf.mxu0  ;;  %v1177_v25 = vpop.f32.mrf.mxu1  ;;  %v1035_v62 = vadd.f32 %v5010_v6, %v4968_v50 }
 0x137   :  { %v1149_v7 = vadd.f32 %v1148_v8, %v5084_v17 }
 0x138   :  { %6246 = vst [vmem:[#allocation46_spill] sm:$0xff] %v5177_v13  ;;  %1350 = vmatmul.bf16.gmra.mxu3 %v4829_v1  ;;  %1720 = vmatmul.bf16.vlgmr.msra.gmra.mxu0 %v1551_v54  ;;  %v4151_v13 = vld [vmem:[#allocation8 + $0xe8] sm:$0xf] }
 0x139   :  { %1733 = vmatmul.bf16.vlgmr.msra.gmra.mxu1 %v1551_v54  ;;  %v1090_v19 = vpop.f32.mrf.mxu2  ;;  %v5183_v33 = vadd.f32 %v1177_v25, %v1149_v7 }
 0x13a   :  { %v1091_v34 = vadd.f32 %v1090_v19, %v5079_v23  ;;  %v1064_v19 = vadd.f32 %v5012_v14, %v1035_v62 }
 0x13b   :  { %v1119_v58 = vpop.f32.mrf.mxu3 }
 0x13c   :  { %v1120_v36 = vadd.f32 %v1119_v58, %v1091_v34 }
 0x13e   :  { %v5186_v53 = vpack.c.bf16 %v1120_v36, %v4996_v52  ;;  %v5190_v1 = vpop.f32.mrf.mxu0  ;;  %v5192_v10 = vpop.f32.mrf.mxu1 }
 0x140   :  { %6247 = vst [vmem:[#allocation47_spill] sm:$0xff] %v5186_v53 }
 0x141   :  { %v1092_v22 = vpop.f32.mrf.mxu2 }
 0x142   :  { %v1093_v15 = vadd.f32 %v1092_v22, %v5079_v23 }
 0x143   :  { %v1121_v8 = vpop.f32.mrf.mxu3 }
 0x144   :  { %v1122_v21 = vadd.f32 %v1121_v8, %v1093_v15 }
 0x146   :  { %v5196_v25 = vpack.c.bf16 %v1122_v21, %v1064_v19  ;;  %1326 = vmatmul.bf16.gmra.mxu2 %v4863_v56  ;;  %v1153_v52 = vpop.f32.mrf.mxu0  ;;  %v1182_v7 = vpop.f32.mrf.mxu1  ;;  %v1040_v21 = vadd.f32 %v5056_v32, %v4968_v50  ;;  %v5221_v50 = vperm.slane %v4905_v20, 6 }
 0x147   :  { %v1154_v34 = vadd.f32 %v1153_v52, %v5084_v17 }
 0x148   :  { %6248 = vst [vmem:[#allocation48_spill] sm:$0xff] %v5196_v25  ;;  %1355 = vmatmul.bf16.gmra.mxu3 %v4865_v59  ;;  %v1069_v19 = vadd.f32 %v5058_v40, %v1040_v21 }
 0x149   :  { %v1095_v6 = vpop.f32.mrf.mxu2  ;;  %v5202_v53 = vadd.f32 %v1182_v7, %v1154_v34 }
 0x14a   :  { %v1096_v58 = vadd.f32 %v1095_v6, %v5079_v23 }
 0x14b   :  { %v1124_v36 = vpop.f32.mrf.mxu3 }
 0x14c   :  { %v1125_v22 = vadd.f32 %v1124_v36, %v1096_v58 }
 0x14e   :  { %v5205_v14 = vpack.c.bf16 %v1125_v22, %v5091_v31  ;;  %v5209_v56 = vpop.f32.mrf.mxu0  ;;  %v5212_v8 = vpop.f32.mrf.mxu1  ;;  %v5218_v31 = vperm.slane %v4905_v20, 5 }
 0x150   :  { %6249 = vst [vmem:[#allocation49_spill] sm:$0xff] %v5205_v14 }
 0x151   :  { %v1097_v59 = vpop.f32.mrf.mxu2 }
 0x152   :  { %v1098_v62 = vadd.f32 %v1097_v59, %v5079_v23 }
 0x153   :  { %v1126_v15 = vpop.f32.mrf.mxu3 }
 0x154   :  { %v1127_v52 = vadd.f32 %v1126_v15, %v1098_v62 }
 0x156   :  { %v5215_v7 = vpack.c.bf16 %v1127_v52, %v1069_v19  ;;  %1746 = vmatmul.bf16.vlgmr.msrb.gmra.mxu2 %v1551_v54  ;;  %v1254_v34 = vpop.f32.mrf.mxu0  ;;  %v1283_v40 = vpop.f32.mrf.mxu1 }
 0x157   :  { %v1255_v58 = vadd.f32 %v1254_v34, %v5221_v50 }
 0x158   :  { %6250 = vst [vmem:[#allocation50_spill] sm:$0xff] %v5215_v7  ;;  %1759 = vmatmul.bf16.vlgmr.msrb.gmra.mxu3 %v1551_v54  ;;  %v1141_v54 = vadd.f32 %v5113_v18, %v5084_v17 }
 0x159   :  { %v1196_v32 = vpop.f32.mrf.mxu2  ;;  %v5225_v22 = vadd.f32 %v1283_v40, %v1255_v58 }
 0x15a   :  { %v1197_v6 = vadd.f32 %v1196_v32, %v5218_v31  ;;  %v1170_v19 = vadd.f32 %v5115_v30, %v1141_v54  ;;  %v1146_v30 = vadd.f32 %v5159_v35, %v5084_v17 }
 0x15b   :  { %v1225_v23 = vpop.f32.mrf.mxu3 }
 0x15c   :  { %v1226_v36 = vadd.f32 %v1225_v23, %v1197_v6 }
 0x15e   :  { %v5228_v21 = vpack.c.bf16 %v1226_v36, %v5101_v41  ;;  %v1256_v15 = vpop.f32.mrf.mxu0  ;;  %v5234_v32 = vpop.f32.mrf.mxu1 }
 0x160   :  { %6251 = vst [vmem:[#allocation51_spill] sm:$0xff] %v5228_v21 }
 0x161   :  { %v1198_v59 = vpop.f32.mrf.mxu2 }
 0x162   :  { %v1199_v20 = vadd.f32 %v1198_v59, %v5218_v31 }
 0x163   :  { %v1227_v62 = vpop.f32.mrf.mxu3 }
 0x164   :  { %v1228_v52 = vadd.f32 %v1227_v62, %v1199_v20 }
 0x166   :  { %v5236_v6 = vpack.c.bf16 %v1228_v52, %v1170_v19  ;;  %v1259_v58 = vpop.f32.mrf.mxu0  ;;  %v1288_v40 = vpop.f32.mrf.mxu1  ;;  %v1175_v52 = vadd.f32 %v5161_v46, %v1146_v30 }
 0x167   :  { %v1260_v36 = vadd.f32 %v1259_v58, %v5221_v50 }
 0x168   :  { %6252 = vst [vmem:[#allocation52_spill] sm:$0xff] %v5236_v6 }
 0x169   :  { %v1201_v23 = vpop.f32.mrf.mxu2  ;;  %v5240_v21 = vadd.f32 %v1288_v40, %v1260_v36 }
 0x16a   :  { %v1202_v34 = vadd.f32 %v1201_v23, %v5218_v31 }
 0x16b   :  { %v1230_v41 = vpop.f32.mrf.mxu3 }
 0x16c   :  { %v1231_v18 = vadd.f32 %v1230_v41, %v1202_v34 }
 0x16e   :  { %v5243_v59 = vpack.c.bf16 %v1231_v18, %v5143_v61  ;;  %v5248_v19 = vpop.f32.mrf.mxu0  ;;  %v5251_v58 = vpop.f32.mrf.mxu1 }
 0x170   :  { %6253 = vst [vmem:[#allocation53_spill] sm:$0xff] %v5243_v59 }
 0x171   :  { %v1203_v54 = vpop.f32.mrf.mxu2 }
 0x172   :  { %v1204_v20 = vadd.f32 %v1203_v54, %v5218_v31  ;;  %v1151_v54 = vadd.f32 %v5190_v1, %v5084_v17 }
 0x173   :  { %v1232_v62 = vpop.f32.mrf.mxu3 }
 0x174   :  { %v1233_v23 = vadd.f32 %v1232_v62, %v1204_v20  ;;  %v1180_v62 = vadd.f32 %v5192_v10, %v1151_v54 }
 0x176   :  { %v5253_v34 = vpack.c.bf16 %v1233_v23, %v1175_v52  ;;  %v1264_v18 = vpop.f32.mrf.mxu0  ;;  %v1293_v35 = vpop.f32.mrf.mxu1 }
 0x178   :  { %6254 = vst [vmem:[#allocation54_spill] sm:$0xff] %v5253_v34 }
 0x179   :  { %v1206_v41 = vpop.f32.mrf.mxu2 }
 0x17a   :  { %v1207_v61 = vadd.f32 %v1206_v41, %v5218_v31 }
 0x17b   :  { %v1235_v36 = vpop.f32.mrf.mxu3 }
 0x17c   :  { %v1236_v40 = vadd.f32 %v1235_v36, %v1207_v61  ;;  %v1265_v61 = vadd.f32 %v1264_v18, %v5221_v50  ;;  %v4646_v18 = vld [vmem:[#allocation9] sm:$0xff] }
 0x17e   :  { %v5257_v7 = vpack.c.bf16 %v1236_v40, %v5183_v33  ;;  %v5262_v20 = vpop.f32.mrf.mxu0  ;;  %v5265_v23 = vpop.f32.mrf.mxu1  ;;  %v5271_v1 = vadd.f32 %v1293_v35, %v1265_v61 }
 0x180   :  { %6255 = vst [vmem:[#allocation55_spill] sm:$0xff] %v5257_v7 }
 0x181   :  { %v1208_v6 = vpop.f32.mrf.mxu2 }
 0x182   :  { %v1209_v46 = vadd.f32 %v1208_v6, %v5218_v31 }
 0x183   :  { %v1237_v30 = vpop.f32.mrf.mxu3 }
 0x184   :  { %v1238_v52 = vadd.f32 %v1237_v30, %v1209_v46  ;;  %v5283_v30 = vperm.slane %v4646_v18, 7  ;;  %v4145_v18 = vld [vmem:[#allocation8 + $0xf0] sm:$0xf0] }
 0x186   :  { %v5267_v41 = vpack.c.bf16 %v1238_v52, %v1180_v62  ;;  %v1269_v14 = vpop.f32.mrf.mxu0  ;;  %v1298_v25 = vpop.f32.mrf.mxu1 }
 0x187   :  { %v1270_v6 = vadd.f32 %v1269_v14, %v5221_v50 }
 0x188   :  { %6256 = vst [vmem:[#allocation56_spill] sm:$0xff] %v5267_v41 }
 0x189   :  { %v1211_v33 = vpop.f32.mrf.mxu2  ;;  %v5274_v34 = vadd.f32 %v1298_v25, %v1270_v6  ;;  %v1257_v25 = vadd.f32 %v1256_v15, %v5221_v50  ;;  %v4409_v6 = vld [vmem:[#allocation8 + $0xe4] sm:$0xf] }
 0x18a   :  { %v1212_v36 = vadd.f32 %v1211_v33, %v5218_v31 }
 0x18b   :  { %v1240_v40 = vpop.f32.mrf.mxu3 }
 0x18c   :  { %v1241_v59 = vadd.f32 %v1240_v40, %v1212_v36  ;;  %v4143_v36 = vld [vmem:[#allocation8 + $0xe0] sm:$0xf]  ;;  %v4411_v40 = vld [vmem:[#allocation8 + $0xec] sm:$0xf0] }
 0x18d   :  { %v5291_v7 = vor.u32 %v4411_v40, %v4143_v36  ;;  %v4127_v40 = vld [vmem:[#allocation8 + $0xc0] sm:$0xf] }
 0x18e   :  { %v5277_v10 = vpack.c.bf16 %v1241_v59, %v5202_v53 }
 0x18f   :  { %6259 = vst [vmem:[#allocation59_spill] sm:$0xff] %v5291_v7  ;;  %1925 = vmatpush.bf16.msrb.mxu0 %v5291_v7 }
 0x190   :  { %6257 = vst [vmem:[#allocation57_spill] sm:$0xff] %v5277_v10  ;;  %v4401_v10 = vld [vmem:[#allocation8 + $0xa4] sm:$0xf] }
 0x191   :  { %v5279_v54 = vpop.f32.mrf.mxu2 }
 0x193   :  { %v5281_v46 = vpop.f32.mrf.mxu3 }
 0x199   :  { %v1312_v62 = vpop.f32.mrf.mxu2 }
 0x19a   :  { %v1313_v35 = vadd.f32 %v1312_v62, %v5283_v30  ;;  %v1286_v62 = vadd.f32 %v5234_v32, %v1257_v25  ;;  %v4405_v25 = vld [vmem:[#allocation8 + $0xc4] sm:$0xf] }
 0x19b   :  { %v1341_v52 = vpop.f32.mrf.mxu3 }
 0x19c   :  { %v1342_v61 = vadd.f32 %v1341_v52, %v1313_v35  ;;  %v5294_v35 = vor.u32 %v4409_v6, %v4145_v18  ;;  %v4410_v52 = vld [vmem:[#allocation8 + $0xec] sm:$0xf]  ;;  %v4408_v6 = vld [vmem:[#allocation8 + $0xd4] sm:$0xf0] }
 0x19e   :  { %v5287_v14 = vpack.c.bf16 %v1342_v61, %v5225_v22  ;;  %6260 = vst [vmem:[#allocation60_spill] sm:$0xff] %v5294_v35  ;;  %v4412_v22 = vld [vmem:[#allocation8 + $0xf4] sm:$0xf0]  ;;  %v4153_v61 = vld [vmem:[#allocation8 + $0xf8] sm:$0xf0]  ;;  %1938 = vmatpush.bf16.msrb.mxu1 %v5294_v35 }
 0x19f   :  { %v5297_v15 = vor.u32 %v4412_v22, %v4151_v13  ;;  %v5302_v36 = vor.u32 %v4410_v52, %v4153_v61  ;;  %v4137_v22 = vld [vmem:[#allocation8 + $0xd8] sm:$0xf0] }
 0x1a0   :  { %6258 = vst [vmem:[#allocation58_spill] sm:$0xff] %v5287_v14  ;;  %v4407_v14 = vld [vmem:[#allocation8 + $0xcc] sm:$0xf0] }
 0x1a1   :  { %v1314_v33 = vpop.f32.mrf.mxu2  ;;  %6261 = vst [vmem:[#allocation61_spill] sm:$0xff] %v5297_v15  ;;  %1951 = vmatpush.bf16.msra.mxu2 %v5297_v15  ;;  %v5305_v32 = vor.u32 %v4407_v14, %v4127_v40  ;;  %1964 = vmatpush.bf16.msra.mxu3 %v5302_v36  ;;  %v4111_v40 = vld [vmem:[#allocation8 + $0xa0] sm:$0xf]  ;;  %v4121_v15 = vld [vmem:[#allocation8 + $0xb8] sm:$0xf0] }
 0x1a2   :  { %v1315_v53 = vadd.f32 %v1314_v33, %v5283_v30  ;;  %6263 = vst [vmem:[#allocation63_spill] sm:$0xff] %v5302_v36  ;;  %v4404_v36 = vld [vmem:[#allocation8 + $0xb4] sm:$0xf0] }
 0x1a3   :  { %v1343_v59 = vpop.f32.mrf.mxu3  ;;  %6264 = vst [vmem:[#allocation64_spill] sm:$0xff] %v5305_v32  ;;  %1926 = vmatpush.bf16.msrb.mxu0 %v5305_v32 }
 0x1a4   :  { %v1344_v41 = vadd.f32 %v1343_v59, %v1315_v53  ;;  %v4129_v53 = vld [vmem:[#allocation8 + $0xd0] sm:$0xf0]  ;;  %v4135_v59 = vld [vmem:[#allocation8 + $0xc8] sm:$0xf] }
 0x1a5   :  { %v5308_v13 = vor.u32 %v4405_v25, %v4129_v53  ;;  %v5317_v25 = vpop.f32.mrf.mxu0  ;;  %v5319_v53 = vpop.f32.mrf.mxu1 }
 0x1a6   :  { %v5299_v33 = vpack.c.bf16 %v1344_v41, %v1286_v62  ;;  %v4406_v41 = vld [vmem:[#allocation8 + $0xcc] sm:$0xf]  ;;  %v5311_v62 = vor.u32 %v4408_v6, %v4135_v59  ;;  %v4113_v59 = vld [vmem:[#allocation8 + $0xb0] sm:$0xf0]  ;;  %v4119_v6 = vld [vmem:[#allocation8 + $0xa8] sm:$0xf] }
 0x1a7   :  { %6265 = vst [vmem:[#allocation65_spill] sm:$0xff] %v5308_v13  ;;  %1939 = vmatpush.bf16.msrb.mxu1 %v5308_v13  ;;  %v5315_v14 = vor.u32 %v4406_v41, %v4137_v22  ;;  %v5325_v13 = vor.u32 %v4401_v10, %v4113_v59  ;;  %v5327_v41 = vor.u32 %v4404_v36, %v4119_v6  ;;  %v4402_v22 = vld [vmem:[#allocation8 + $0xac] sm:$0xf]  ;;  %v4097_v36 = vld [vmem:[#allocation8 + $0x90] sm:$0xf0] }
 0x1a8   :  { %6262 = vst [vmem:[#allocation62_spill] sm:$0xff] %v5299_v33  ;;  %v4403_v33 = vld [vmem:[#allocation8 + $0xac] sm:$0xf0]  ;;  %1952 = vmatpush.bf16.msra.mxu2 %v5311_v62  ;;  %v5330_v35 = vor.u32 %v4402_v22, %v4121_v15  ;;  %v4400_v59 = vld [vmem:[#allocation8 + $0x94] sm:$0xf0]  ;;  %v1262_v6 = vadd.f32 %v5248_v19, %v5221_v50 }
 0x1a9   :  { %v1317_v18 = vpop.f32.mrf.mxu2  ;;  %6266 = vst [vmem:[#allocation66_spill] sm:$0xff] %v5311_v62  ;;  %v5322_v32 = vor.u32 %v4403_v33, %v4111_v40  ;;  %1965 = vmatpush.bf16.msra.mxu3 %v5315_v14  ;;  %v4095_v33 = vld [vmem:[#allocation8 + $0x80] sm:$0xf]  ;;  %v4399_v40 = vld [vmem:[#allocation8 + $0x8c] sm:$0xf0] }
 0x1aa   :  { %v1318_v52 = vadd.f32 %v1317_v18, %v5283_v30  ;;  %6267 = vst [vmem:[#allocation67_spill] sm:$0xff] %v5315_v14  ;;  %v5337_v10 = vor.u32 %v4399_v40, %v4095_v33  ;;  %v4105_v22 = vld [vmem:[#allocation8 + $0x98] sm:$0xf0]  ;;  %v4395_v19 = vld [vmem:[#allocation8 + $0x6c] sm:$0xf0] }
 0x1ab   :  { %v1346_v61 = vpop.f32.mrf.mxu3  ;;  %6268 = vst [vmem:[#allocation68_spill] sm:$0xff] %v5322_v32  ;;  %1927 = vmatpush.bf16.msrb.mxu0 %v5322_v32  ;;  %1940 = vmatpush.bf16.msrb.mxu1 %v5325_v13  ;;  %v4393_v32 = vld [vmem:[#allocation8 + $0x64] sm:$0xf] }
 0x1ac   :  { %v1347_v18 = vadd.f32 %v1346_v61, %v1318_v52  ;;  %6269 = vst [vmem:[#allocation69_spill] sm:$0xff] %v5325_v13  ;;  %v4397_v52 = vld [vmem:[#allocation8 + $0x84] sm:$0xf]  ;;  %1953 = vmatpush.bf16.msra.mxu2 %v5327_v41  ;;  %v4103_v61 = vld [vmem:[#allocation8 + $0x88] sm:$0xf] }
 0x1ad   :  { %6270 = vst [vmem:[#allocation70_spill] sm:$0xff] %v5327_v41  ;;  %1966 = vmatpush.bf16.msra.mxu3 %v5330_v35  ;;  %v5342_v15 = vor.u32 %v4397_v52, %v4097_v36  ;;  %v4079_v13 = vld [vmem:[#allocation8 + $0x60] sm:$0xf]  ;;  %v4081_v36 = vld [vmem:[#allocation8 + $0x70] sm:$0xf0] }
 0x1ae   :  { %6271 = vst [vmem:[#allocation71_spill] sm:$0xff] %v5330_v35  ;;  %v5333_v62 = vpack.c.bf16 %v1347_v18, %v5240_v21  ;;  %v5344_v21 = vor.u32 %v4400_v59, %v4103_v61  ;;  %v4398_v18 = vld [vmem:[#allocation8 + $0x8c] sm:$0xf]  ;;  %v5352_v52 = vor.u32 %v4395_v19, %v4079_v13  ;;  %v4087_v61 = vld [vmem:[#allocation8 + $0x68] sm:$0xf]  ;;  %v1291_v35 = vadd.f32 %v5251_v58, %v1262_v6 }
 0x1af   :  { %6273 = vst [vmem:[#allocation73_spill] sm:$0xff] %v5337_v10  ;;  %1928 = vmatpush.bf16.msrb.mxu0 %v5337_v10  ;;  %v5347_v41 = vor.u32 %v4398_v18, %v4105_v22  ;;  %1941 = vmatpush.bf16.msrb.mxu1 %v5342_v15  ;;  %v4396_v59 = vld [vmem:[#allocation8 + $0x74] sm:$0xf0]  ;;  %v5356_v18 = vor.u32 %v4393_v32, %v4081_v36  ;;  %v4394_v22 = vld [vmem:[#allocation8 + $0x6c] sm:$0xf] }
 0x1b0   :  { %6272 = vst [vmem:[#allocation72_spill] sm:$0xff] %v5333_v62  ;;  %1954 = vmatpush.bf16.msra.mxu2 %v5344_v21  ;;  %v4063_v58 = vld [vmem:[#allocation8 + $0x40] sm:$0xf]  ;;  %v4391_v6 = vld [vmem:[#allocation8 + $0x4c] sm:$0xf0] }
 0x1b1   :  { %6274 = vst [vmem:[#allocation74_spill] sm:$0xff] %v5342_v15  ;;  %v1319_v62 = vpop.f32.mrf.mxu2  ;;  %1967 = vmatpush.bf16.msra.mxu3 %v5347_v41  ;;  %v4089_v15 = vld [vmem:[#allocation8 + $0x78] sm:$0xf0]  ;;  %v4389_v32 = vld [vmem:[#allocation8 + $0x44] sm:$0xf] }
 0x1b2   :  { %6275 = vst [vmem:[#allocation75_spill] sm:$0xff] %v5344_v21  ;;  %v1320_v33 = vadd.f32 %v1319_v62, %v5283_v30  ;;  %v5358_v62 = vor.u32 %v4396_v59, %v4087_v61  ;;  %v5365_v13 = vor.u32 %v4394_v22, %v4089_v15  ;;  %v4071_v36 = vld [vmem:[#allocation8 + $0x48] sm:$0xf]  ;;  %v4392_v61 = vld [vmem:[#allocation8 + $0x54] sm:$0xf0] }
 0x1b3   :  { %6276 = vst [vmem:[#allocation76_spill] sm:$0xff] %v5347_v41  ;;  %v1348_v40 = vpop.f32.mrf.mxu3  ;;  %1929 = vmatpush.bf16.msrb.mxu0 %v5352_v52  ;;  %1942 = vmatpush.bf16.msrb.mxu1 %v5356_v18  ;;  %v5376_v15 = vor.u32 %v4392_v61, %v4071_v36  ;;  %v4055_v36 = vld [vmem:[#allocation8 + $0x28] sm:$0xf]  ;;  %v4388_v61 = vld [vmem:[#allocation8 + $0x34] sm:$0xf0] }
 0x1b4   :  { %6277 = vst [vmem:[#allocation77_spill] sm:$0xff] %v5352_v52  ;;  %v1349_v10 = vadd.f32 %v1348_v40, %v1320_v33  ;;  %1955 = vmatpush.bf16.msra.mxu2 %v5358_v62  ;;  %v5371_v33 = vor.u32 %v4391_v6, %v4063_v58  ;;  %v4065_v40 = vld [vmem:[#allocation8 + $0x50] sm:$0xf0]  ;;  %v4047_v6 = vld [vmem:[#allocation8 + $0x20] sm:$0xf] }
 0x1b5   :  { %6278 = vst [vmem:[#allocation78_spill] sm:$0xff] %v5356_v18  ;;  %v5360_v14 = vpop.f32.mrf.mxu0  ;;  %1968 = vmatpush.bf16.msra.mxu3 %v5365_v13  ;;  %v5374_v59 = vor.u32 %v4389_v32, %v4065_v40  ;;  %v4387_v18 = vld [vmem:[#allocation8 + $0x2c] sm:$0xf0]  ;;  %v4385_v52 = vld [vmem:[#allocation8 + $0x24] sm:$0xf] }
 0x1b6   :  { %6279 = vst [vmem:[#allocation79_spill] sm:$0xff] %v5358_v62  ;;  %v5362_v7 = vpop.f32.mrf.mxu1  ;;  %v5367_v19 = vpack.c.bf16 %v1349_v10, %v1291_v35  ;;  %v4390_v35 = vld [vmem:[#allocation8 + $0x4c] sm:$0xf]  ;;  %v4073_v10 = vld [vmem:[#allocation8 + $0x58] sm:$0xf0]  ;;  %v5384_v32 = vor.u32 %v4387_v18, %v4047_v6  ;;  %v1156_v6 = vadd.f32 %v5209_v56, %v5084_v17  ;;  %v1267_v17 = vadd.f32 %v5262_v20, %v5221_v50 }
 0x1b7   :  { %6280 = vst [vmem:[#allocation80_spill] sm:$0xff] %v5365_v13  ;;  %1930 = vmatpush.bf16.msrb.mxu0 %v5371_v33  ;;  %1943 = vmatpush.bf16.msrb.mxu1 %v5374_v59  ;;  %v4049_v40 = vld [vmem:[#allocation8 + $0x30] sm:$0xf0]  ;;  %v4057_v13 = vld [vmem:[#allocation8 + $0x38] sm:$0xf0] }
 0x1b8   :  { %6281 = vst [vmem:[#allocation81_spill] sm:$0xff] %v5367_v19  ;;  %v5379_v19 = vor.u32 %v4390_v35, %v4073_v10  ;;  %1956 = vmatpush.bf16.msra.mxu2 %v5376_v15  ;;  %v5389_v10 = vor.u32 %v4385_v52, %v4049_v40  ;;  %v4383_v52 = vld [vmem:[#allocation8 + $0xc] sm:$0xf0]  ;;  %v4384_v40 = vld [vmem:[#allocation8 + $0x14] sm:$0xf0] }
 0x1b9   :  { %6282 = vst [vmem:[#allocation82_spill] sm:$0xff] %v5371_v33  ;;  %v1322_v22 = vpop.f32.mrf.mxu2  ;;  %v1214_v33 = vadd.f32 %v5279_v54, %v5218_v31  ;;  %v4031_v54 = vld [vmem:[#allocation8] sm:$0xf] }
 0x1ba   :  { %6283 = vst [vmem:[#allocation83_spill] sm:$0xff] %v5374_v59  ;;  %v1323_v62 = vadd.f32 %v1322_v22, %v5283_v30  ;;  %1969 = vmatpush.bf16.msra.mxu3 %v5379_v19  ;;  %v5391_v22 = vor.u32 %v4388_v61, %v4055_v36  ;;  %v4386_v59 = vld [vmem:[#allocation8 + $0x2c] sm:$0xf]  ;;  %v4041_v36 = vld [vmem:[#allocation8 + $0x18] sm:$0xf0] }
 0x1bb   :  { %v1351_v58 = vpop.f32.mrf.mxu3  ;;  %1931 = vmatpush.bf16.msrb.mxu0 %v5384_v32  ;;  %v5394_v18 = vor.u32 %v4386_v59, %v4057_v13  ;;  %1944 = vmatpush.bf16.msrb.mxu1 %v5389_v10  ;;  %v1243_v13 = vadd.f32 %v5281_v46, %v1214_v33  ;;  %v4382_v59 = vld [vmem:[#allocation8 + $0xc] sm:$0xf] }
 0x1bc   :  { %v1352_v35 = vadd.f32 %v1351_v58, %v1323_v62  ;;  %v4381_v62 = vld [vmem:[#allocation8 + $0x4] sm:$0xf]  ;;  %1957 = vmatpush.bf16.msra.mxu2 %v5391_v22  ;;  %v5403_v58 = vor.u32 %v4383_v52, %v4031_v54  ;;  %v1185_v54 = vadd.f32 %v5212_v8, %v1156_v6  ;;  %v1296_v52 = vadd.f32 %v5265_v23, %v1267_v17 }
 0x1bd   :  { %v1723_v41 = vpop.f32.mrf.mxu0  ;;  %v1982_v17 = vunpack.c.l.bf16 %v4964_v49 }
 0x1be   :  { %v1736_v21 = vpop.f32.mrf.mxu1  ;;  %v5399_v31 = vpack.c.bf16 %v1352_v35, %v5271_v1  ;;  %v4033_v41 = vld [vmem:[#allocation8 + $0x10] sm:$0xf0]  ;;  %1970 = vmatpush.bf16.msra.mxu3 %v5394_v18  ;;  %v5414_v35 = vor.u32 %v4382_v59, %v4041_v36  ;;  %v1391_v20 = vpack.c.bf16 %v1243_v13, %v1185_v54 }
 0x1bf   :  { %v4039_v21 = vld [vmem:[#allocation8 + $0x8] sm:$0xf]  ;;  %v5409_v56 = vor.u32 %v4381_v62, %v4033_v41  ;;  %1932 = vmatpush.bf16.msrb.mxu0 %v5403_v58  ;;  %v1983_v41 = vunpack.c.h.bf16 %v4964_v49  ;;  %v1995_v54 = vadd.f32 %v1982_v17, %v5360_v14  ;;  %v1272_v49 = vadd.f32 %v5317_v25, %v5221_v50 }
 0x1c0   :  { %6284 = vst [vmem:[#allocation84_spill] sm:$0xff] %v5399_v31  ;;  %v5411_v1 = vor.u32 %v4384_v40, %v4039_v21  ;;  %v1504_v6 = vunpack.c.h.bf16 %v1391_v20  ;;  %v1503_v23 = vunpack.c.l.bf16 %v1391_v20 }
 0x1c1   :  { %v1324_v61 = vpop.f32.mrf.mxu2  ;;  %1945 = vmatpush.bf16.msrb.mxu1 %v5409_v56  ;;  %v1996_v59 = vadd.f32 %v1983_v41, %v5362_v7  ;;  %v2003_v7 = vmul.f32 0.5, %v1995_v54 }
 0x1c2   :  { %v1325_v46 = vadd.f32 %v1324_v61, %v5283_v30  ;;  %1958 = vmatpush.bf16.msra.mxu2 %v5411_v1  ;;  %1971 = vmatpush.bf16.msra.mxu3 %v5414_v35  ;;  %v1526_v36 = vmul.f32 0.5, %v1504_v6 }
 0x1c3   :  { %v1353_v33 = vpop.f32.mrf.mxu3  ;;  %2048 = vmatpush.bf16.msra.mxu0 %v4991_v44  ;;  %v2004_v20 = vmul.f32 0.5, %v1996_v59 }
 0x1c4   :  { %v1354_v62 = vadd.f32 %v1353_v33, %v1325_v46  ;;  %v1525_v46 = vmul.f32 0.5, %v1503_v23  ;;  %4464 = vtanh.f32 %v1526_v36  ;;  %v6286_v36 = vld [vmem:[#allocation26_spill] sm:$0xff] }
 0x1c5   :  { %2061 = vmatpush.bf16.msra.mxu1 %v4993_v48 }
 0x1c6   :  { %2074 = vmatpush.bf16.msrb.mxu2 %v5087_v29  ;;  %2087 = vmatpush.bf16.msrb.mxu3 %v5089_v63  ;;  %v5426_v8 = vpack.c.bf16 %v1354_v62, %v1296_v52  ;;  %4466 = vtanh.f32 %v1525_v46  ;;  %v1301_v62 = vadd.f32 %v5319_v53, %v1272_v49 }
 0x1c7   :  { %2049 = vmatpush.bf16.msra.mxu0 %v5000_v60  ;;  %4468 = vtanh.f32 %v2004_v20  ;;  %v6287_v20 = vld [vmem:[#allocation27_spill] sm:$0xff] }
 0x1c8   :  { %6285 = vst [vmem:[#allocation85_spill] sm:$0xff] %v5426_v8  ;;  %4470 = vtanh.f32 %v2003_v7  ;;  %v6288_v7 = vld [vmem:[#allocation41_spill] sm:$0xff] }
 0x1c9   :  { %2062 = vmatpush.bf16.msra.mxu1 %v5003_v4  ;;  %v1327_v21 = vpop.f32.mrf.mxu2 }
 0x1ca   :  { %2075 = vmatpush.bf16.msrb.mxu2 %v5099_v2  ;;  %2088 = vmatpush.bf16.msrb.mxu3 %v5103_v47  ;;  %v1328_v40 = vadd.f32 %v1327_v21, %v5283_v30  ;;  %v4465_v50 = vpop.eup %4464 }
 0x1cb   :  { %v1356_v13 = vpop.f32.mrf.mxu3  ;;  %2050 = vmatpush.bf16.msra.mxu0 %v5015_v16 }
 0x1cc   :  { %v1357_v61 = vadd.f32 %v1356_v13, %v1328_v40  ;;  %v1532_v40 = vmul.f32 0.5, %v4465_v50  ;;  %v1985_v13 = vunpack.c.h.bf16 %v5127_v27 }
 0x1cd   :  { %2063 = vmatpush.bf16.msra.mxu1 %v5017_v26 }
 0x1ce   :  { %2076 = vmatpush.bf16.msrb.mxu2 %v5107_v42  ;;  %2089 = vmatpush.bf16.msrb.mxu3 %v5109_v11  ;;  %v5442_v33 = vpack.c.bf16 %v1357_v61, %v5274_v34 }
 0x1cf   :  { %2051 = vmatpush.bf16.msra.mxu0 %v5026_v39 }
 0x1d1   :  { %2064 = vmatpush.bf16.msra.mxu1 %v5028_v45  ;;  %v1329_v52 = vpop.f32.mrf.mxu2 }
 0x1d2   :  { %2077 = vmatpush.bf16.msrb.mxu2 %v5120_v38  ;;  %2090 = vmatpush.bf16.msrb.mxu3 %v5122_v5  ;;  %v1330_v14 = vadd.f32 %v1329_v52, %v5283_v30  ;;  %v4467_v30 = vpop.eup %4466  ;;  %v1535_v52 = vadd.f32 0.5, %v1532_v40 }
 0x1d3   :  { %v1358_v34 = vpop.f32.mrf.mxu3  ;;  %2052 = vmatpush.bf16.msra.mxu0 %v5039_v55  ;;  %v4469_v23 = vpop.eup %4468  ;;  %v1531_v54 = vmul.f32 0.5, %v4467_v30 }
 0x1d4   :  { %v1359_v6 = vadd.f32 %v1358_v34, %v1330_v14  ;;  %v4471_v61 = vpop.eup %4470  ;;  %v2010_v49 = vmul.f32 0.5, %v4469_v23  ;;  %v6289_v34 = vld [vmem:[#allocation28_spill] sm:$0xff]  ;;  %v1538_v30 = vmul.f32 0.0, %v1535_v52 }
 0x1d5   :  { %2065 = vmatpush.bf16.msra.mxu1 %v5041_v57  ;;  %v2009_v14 = vmul.f32 0.5, %v4471_v61 }
 0x1d6   :  { %2078 = vmatpush.bf16.msrb.mxu2 %v5130_v37  ;;  %2091 = vmatpush.bf16.msrb.mxu3 %v5133_v43  ;;  %v1392_v25 = vpack.c.bf16 %v1359_v6, %v1301_v62  ;;  %v1534_v62 = vadd.f32 0.5, %v1531_v54  ;;  %v6290_v6 = vld [vmem:[#allocation29_spill] sm:$0xff] }
 0x1d7   :  { %2053 = vmatpush.bf16.msra.mxu0 %v5046_v24 }
 0x1d8   :  { %v1505_v41 = vunpack.c.l.bf16 %v1392_v25  ;;  %v1506_v21 = vunpack.c.h.bf16 %v1392_v25  ;;  %v2013_v25 = vadd.f32 0.5, %v2010_v49 }
 0x1d9   :  { %2066 = vmatpush.bf16.msra.mxu1 %v5049_v28  ;;  %v1747_v53 = vpop.f32.mrf.mxu2 }
 0x1da   :  { %2079 = vmatpush.bf16.msrb.mxu2 %v5139_v12  ;;  %2092 = vmatpush.bf16.msrb.mxu3 %v5145_v9  ;;  %v1527_v17 = vmul.f32 0.5, %v1505_v41  ;;  %4472 = vtanh.f32 %v1506_v21  ;;  %v1984_v21 = vunpack.c.l.bf16 %v5127_v27 }
 0x1db   :  { %v1760_v59 = vpop.f32.mrf.mxu3  ;;  %2054 = vmatpush.bf16.msra.mxu0 %v6286_v36 }
 0x1dc   :  { %v1998_v46 = vadd.f32 %v1985_v13, %v1760_v59  ;;  %4474 = vtanh.f32 %v1527_v17  ;;  %v2012_v13 = vadd.f32 0.5, %v2009_v14  ;;  %v1997_v54 = vadd.f32 %v1984_v21, %v1747_v53  ;;  %v6297_v21 = vld [vmem:[#allocation64_spill] sm:$0xff] }
 0x1dd   :  { %2067 = vmatpush.bf16.msra.mxu1 %v6287_v20 }
 0x1de   :  { %2080 = vmatpush.bf16.msrb.mxu2 %v6288_v7  ;;  %4476 = vtanh.f32 %v1998_v46  ;;  %2093 = vmatpush.bf16.msrb.mxu3 %v5155_v3  ;;  %v6291_v46 = vld [vmem:[#allocation38_spill] sm:$0xff] }
 0x1df   :  { %2055 = vmatpush.bf16.msra.mxu0 %v6289_v34  ;;  %v2016_v31 = vmul.f32 %v2013_v25, %v6291_v46  ;;  %v6293_v25 = vld [vmem:[#allocation59_spill] sm:$0xff] }
 0x1e0   :  { %v4473_v50 = vpop.eup %4472 }
 0x1e1   :  { %2068 = vmatpush.bf16.msra.mxu1 %v6290_v6  ;;  %v1539_v41 = vmul.f32 %v4473_v50, %v1534_v62  ;;  %v1749_v23 = vpop.f32.mrf.mxu2  ;;  %v2005_v62 = vmul.f32 0.5, %v1997_v54 }
 0x1e2   :  { %2081 = vmatpush.bf16.msrb.mxu2 %v5166_v51  ;;  %2094 = vmatpush.bf16.msrb.mxu3 %v5168_v0  ;;  %v4475_v40 = vpop.eup %4474 }
 0x1e3   :  { %v1762_v17 = vpop.f32.mrf.mxu3  ;;  %v5470_v61 = vadd.f32 %v1539_v41, %v1538_v30  ;;  %v1533_v49 = vmul.f32 0.5, %v4475_v40  ;;  %v6296_v30 = vld [vmem:[#allocation63_spill] sm:$0xff]  ;;  %v6298_v40 = vld [vmem:[#allocation65_spill] sm:$0xff] }
 0x1e4   :  { %v4477_v59 = vpop.eup %4476  ;;  %v6299_v17 = vld [vmem:[#allocation66_spill] sm:$0xff] }
 0x1e5   :  { %v2017_v8 = vmul.f32 %v4477_v59, %v2012_v13  ;;  %4478 = vtanh.f32 %v5470_v61  ;;  %v1536_v27 = vadd.f32 0.5, %v1533_v49  ;;  %v6300_v59 = vld [vmem:[#allocation67_spill] sm:$0xff]  ;;  %v6302_v49 = vld [vmem:[#allocation68_spill] sm:$0xff] }
 0x1e6   :  { %4480 = vtanh.f32 %v2005_v62  ;;  %v6303_v62 = vld [vmem:[#allocation69_spill] sm:$0xff] }
 0x1e7   :  { %v5474_v52 = vadd.f32 %v2017_v8, %v2016_v31  ;;  %v6294_v31 = vld [vmem:[#allocation60_spill] sm:$0xff]  ;;  %v6295_v8 = vld [vmem:[#allocation61_spill] sm:$0xff] }
 0x1e9   :  { %4482 = vtanh.f32 %v5474_v52 }
 0x1eb   :  { %v4479_v50 = vpop.eup %4478 }
 0x1ec   :  { %v5476_v23 = vmul.f32 %v4479_v50, %v1536_v27  ;;  %v4481_v53 = vpop.eup %4480  ;;  %v6304_v27 = vld [vmem:[#allocation70_spill] sm:$0xff]  ;;  %v6305_v50 = vld [vmem:[#allocation71_spill] sm:$0xff] }
 0x1ed   :  { %v2011_v41 = vmul.f32 0.5, %v4481_v53  ;;  %v6306_v53 = vld [vmem:[#allocation73_spill] sm:$0xff] }
 0x1ee   :  { %6292 = vst [vmem:[#allocation38_spill] sm:$0xff] %v5476_v23  ;;  %v1764_v14 = vpack.c.bf16 %v5476_v23, %v5476_v23  ;;  %v6307_v23 = vld [vmem:[#allocation74_spill] sm:$0xff] }
 0x1ef   :  { %v4483_v13 = vpop.eup %4482  ;;  %v2014_v54 = vadd.f32 0.5, %v2011_v41  ;;  %v6309_v41 = vld [vmem:[#allocation76_spill] sm:$0xff] }
 0x1f0   :  { %1933 = vmatmul.bf16.vlgmr.msrb.gmra.mxu0 %v1764_v14  ;;  %1946 = vmatmul.bf16.vlgmr.msrb.gmra.mxu1 %v1764_v14 }
 0x1f1   :  { %1959 = vmatmul.bf16.vlgmr.msra.gmra.mxu2 %v1764_v14  ;;  %1972 = vmatmul.bf16.vlgmr.msra.gmra.mxu3 %v1764_v14  ;;  %v5489_v46 = vmul.f32 %v4483_v13, %v2014_v54  ;;  %v6310_v13 = vld [vmem:[#allocation77_spill] sm:$0xff]  ;;  %v6311_v54 = vld [vmem:[#allocation78_spill] sm:$0xff] }
 0x1f2   :  { %2101 = vmatpush.bf16.msrb.mxu0 %v6293_v25  ;;  %2114 = vmatpush.bf16.msrb.mxu1 %v6294_v31 }
 0x1f3   :  { %2127 = vmatpush.bf16.msra.mxu2 %v6295_v8  ;;  %2140 = vmatpush.bf16.msra.mxu3 %v6296_v30  ;;  %6301 = vst [vmem:[#allocation59_spill] sm:$0xff] %v5489_v46  ;;  %v2047_v14 = vpack.c.bf16 %v5489_v46, %v5489_v46  ;;  %v6314_v46 = vld [vmem:[#allocation82_spill] sm:$0xff] }
 0x1f6   :  { %2102 = vmatpush.bf16.msrb.mxu0 %v6297_v21  ;;  %2115 = vmatpush.bf16.msrb.mxu1 %v6298_v40 }
 0x1f7   :  { %2128 = vmatpush.bf16.msra.mxu2 %v6299_v17  ;;  %2141 = vmatpush.bf16.msra.mxu3 %v6300_v59  ;;  %v6308_v17 = vld [vmem:[#allocation75_spill] sm:$0xff] }
 0x1fa   :  { %2103 = vmatpush.bf16.msrb.mxu0 %v6302_v49  ;;  %2116 = vmatpush.bf16.msrb.mxu1 %v6303_v62 }
 0x1fb   :  { %2129 = vmatpush.bf16.msra.mxu2 %v6304_v27  ;;  %2142 = vmatpush.bf16.msra.mxu3 %v6305_v50  ;;  %v6312_v50 = vld [vmem:[#allocation79_spill] sm:$0xff]  ;;  %v6313_v27 = vld [vmem:[#allocation80_spill] sm:$0xff] }
 0x1fe   :  { %2104 = vmatpush.bf16.msrb.mxu0 %v6306_v53  ;;  %2117 = vmatpush.bf16.msrb.mxu1 %v6307_v23  ;;  %v6315_v53 = vld [vmem:[#allocation83_spill] sm:$0xff] }
 0x1ff   :  { %2130 = vmatpush.bf16.msra.mxu2 %v6308_v17  ;;  %2143 = vmatpush.bf16.msra.mxu3 %v6309_v41 }
 0x200   :  { %2056 = vmatmul.bf16.vlgmr.msra.gmra.mxu0 %v2047_v14  ;;  %2069 = vmatmul.bf16.vlgmr.msra.gmra.mxu1 %v2047_v14 }
 0x201   :  { %2082 = vmatmul.bf16.vlgmr.msrb.gmra.mxu2 %v2047_v14  ;;  %2095 = vmatmul.bf16.vlgmr.msrb.gmra.mxu3 %v2047_v14  ;;  %v6316_v14 = vld [vmem:[#allocation57_spill] sm:$0xff] }
 0x202   :  { %2105 = vmatpush.bf16.msrb.mxu0 %v6310_v13  ;;  %2118 = vmatpush.bf16.msrb.mxu1 %v6311_v54 }
 0x203   :  { %2131 = vmatpush.bf16.msra.mxu2 %v6312_v50  ;;  %2144 = vmatpush.bf16.msra.mxu3 %v6313_v27 }
 0x206   :  { %2106 = vmatpush.bf16.msrb.mxu0 %v6314_v46  ;;  %2119 = vmatpush.bf16.msrb.mxu1 %v6315_v53 }
 0x207   :  { %2132 = vmatpush.bf16.msra.mxu2 %v5376_v15  ;;  %2145 = vmatpush.bf16.msra.mxu3 %v5379_v19 }
 0x20a   :  { %2107 = vmatpush.bf16.msrb.mxu0 %v5384_v32  ;;  %2120 = vmatpush.bf16.msrb.mxu1 %v5389_v10 }
 0x20b   :  { %2133 = vmatpush.bf16.msra.mxu2 %v5391_v22  ;;  %2146 = vmatpush.bf16.msra.mxu3 %v5394_v18 }
 0x20e   :  { %2108 = vmatpush.bf16.msrb.mxu0 %v5403_v58  ;;  %2121 = vmatpush.bf16.msrb.mxu1 %v5409_v56 }
 0x20f   :  { %2134 = vmatpush.bf16.msra.mxu2 %v5411_v1  ;;  %2147 = vmatpush.bf16.msra.mxu3 %v5414_v35 }
 0x212   :  { %2224 = vmatpush.bf16.msra.mxu0 %v4991_v44  ;;  %2237 = vmatpush.bf16.msra.mxu1 %v4993_v48 }
 0x213   :  { %2250 = vmatpush.bf16.msrb.mxu2 %v5087_v29  ;;  %2263 = vmatpush.bf16.msrb.mxu3 %v5089_v63 }
 0x216   :  { %2225 = vmatpush.bf16.msra.mxu0 %v5000_v60  ;;  %2238 = vmatpush.bf16.msra.mxu1 %v5003_v4 }
 0x217   :  { %2251 = vmatpush.bf16.msrb.mxu2 %v5099_v2  ;;  %2264 = vmatpush.bf16.msrb.mxu3 %v5103_v47 }
 0x21a   :  { %2226 = vmatpush.bf16.msra.mxu0 %v5015_v16  ;;  %2239 = vmatpush.bf16.msra.mxu1 %v5017_v26 }
 0x21b   :  { %2252 = vmatpush.bf16.msrb.mxu2 %v5107_v42  ;;  %2265 = vmatpush.bf16.msrb.mxu3 %v5109_v11 }
 0x21e   :  { %2227 = vmatpush.bf16.msra.mxu0 %v5026_v39  ;;  %2240 = vmatpush.bf16.msra.mxu1 %v5028_v45 }
 0x21f   :  { %2253 = vmatpush.bf16.msrb.mxu2 %v5120_v38  ;;  %2266 = vmatpush.bf16.msrb.mxu3 %v5122_v5 }
 0x222   :  { %2228 = vmatpush.bf16.msra.mxu0 %v5039_v55  ;;  %2241 = vmatpush.bf16.msra.mxu1 %v5041_v57 }
 0x223   :  { %2254 = vmatpush.bf16.msrb.mxu2 %v5130_v37  ;;  %2267 = vmatpush.bf16.msrb.mxu3 %v5133_v43 }
 0x226   :  { %2229 = vmatpush.bf16.msra.mxu0 %v5046_v24  ;;  %2242 = vmatpush.bf16.msra.mxu1 %v5049_v28 }
 0x227   :  { %2255 = vmatpush.bf16.msrb.mxu2 %v5139_v12  ;;  %2268 = vmatpush.bf16.msrb.mxu3 %v5145_v9  ;;  %v1991_v12 = vunpack.c.l.bf16 %v6316_v14  ;;  %v1992_v9 = vunpack.c.h.bf16 %v6316_v14 }
 0x22a   :  { %2230 = vmatpush.bf16.msra.mxu0 %v6286_v36  ;;  %2243 = vmatpush.bf16.msra.mxu1 %v6287_v20 }
 0x22b   :  { %2256 = vmatpush.bf16.msrb.mxu2 %v6288_v7  ;;  %2269 = vmatpush.bf16.msrb.mxu3 %v5155_v3 }
 0x22e   :  { %2231 = vmatpush.bf16.msra.mxu0 %v6289_v34  ;;  %2244 = vmatpush.bf16.msra.mxu1 %v6290_v6  ;;  %v1993_v34 = vunpack.c.l.bf16 %v5442_v33  ;;  %v1994_v6 = vunpack.c.h.bf16 %v5442_v33 }
 0x22f   :  { %2257 = vmatpush.bf16.msrb.mxu2 %v5166_v51  ;;  %2270 = vmatpush.bf16.msrb.mxu3 %v5168_v0 }
 0x26d   :  { %v1934_v28 = vpop.f32.mrf.mxu0  ;;  %v1947_v36 = vpop.f32.mrf.mxu1 }
 0x26e   :  { %v1999_v24 = vadd.f32 %v1991_v12, %v1934_v28  ;;  %v2000_v20 = vadd.f32 %v1992_v9, %v1947_v36 }
 0x270   :  { %v2021_v43 = vmul.f32 0.5, %v1999_v24  ;;  %v2022_v7 = vmul.f32 0.5, %v2000_v20  ;;  %v6317_v20 = vld [vmem:[#allocation14_spill] sm:$0xff] }
 0x271   :  { %v2159_v33 = vunpack.c.h.bf16 %v6317_v20 }
 0x272   :  { %4484 = vtanh.f32 %v2021_v43 }
 0x273   :  { %4486 = vtanh.f32 %v2022_v7  ;;  %v2158_v7 = vunpack.c.l.bf16 %v6317_v20 }
 0x274   :  { %v1960_v3 = vpop.f32.mrf.mxu2  ;;  %v1973_v51 = vpop.f32.mrf.mxu3 }
 0x275   :  { %v2001_v37 = vadd.f32 %v1993_v34, %v1960_v3  ;;  %v2002_v0 = vadd.f32 %v1994_v6, %v1973_v51  ;;  %v1936_v57 = vpop.f32.mrf.mxu0  ;;  %v1949_v55 = vpop.f32.mrf.mxu1 }
 0x277   :  { %v2023_v5 = vmul.f32 0.5, %v2001_v37  ;;  %4488 = vtanh.f32 %v2002_v0 }
 0x278   :  { %v4485_v14 = vpop.eup %4484 }
 0x279   :  { %v4487_v38 = vpop.eup %4486  ;;  %v2027_v28 = vmul.f32 0.5, %v4485_v14  ;;  %4490 = vtanh.f32 %v2023_v5 }
 0x27a   :  { %v2028_v12 = vmul.f32 0.5, %v4487_v38 }
 0x27b   :  { %v2030_v24 = vadd.f32 0.5, %v2027_v28  ;;  %v6318_v28 = vld [vmem:[#allocation40_spill] sm:$0xff] }
 0x27c   :  { %v2031_v43 = vadd.f32 0.5, %v2028_v12  ;;  %v1962_v9 = vpop.f32.mrf.mxu2  ;;  %v1975_v36 = vpop.f32.mrf.mxu3  ;;  %v2160_v12 = vunpack.c.l.bf16 %v6318_v28 }
 0x27d   :  { %v4489_v45 = vpop.eup %4488  ;;  %v2057_v3 = vpop.f32.mrf.mxu0  ;;  %v2161_v9 = vunpack.c.h.bf16 %v6318_v28 }
 0x27e   :  { %v2070_v51 = vpop.f32.mrf.mxu1  ;;  %v2034_v55 = vmul.f32 %v2031_v43, %v5470_v61  ;;  %v2035_v57 = vmul.f32 %v4489_v45, %v2030_v24  ;;  %v2171_v37 = vadd.f32 %v2158_v7, %v2057_v3 }
 0x27f   :  { %v2172_v0 = vadd.f32 %v2159_v33, %v2070_v51  ;;  %v4491_v34 = vpop.eup %4490 }
 0x280   :  { %v5556_v6 = vadd.f32 %v2035_v57, %v2034_v55  ;;  %v2179_v5 = vmul.f32 0.5, %v2171_v37  ;;  %v2029_v14 = vmul.f32 0.5, %v4491_v34 }
 0x281   :  { %v2180_v38 = vmul.f32 0.5, %v2172_v0 }
 0x282   :  { %4492 = vtanh.f32 %v5556_v6  ;;  %v2032_v7 = vadd.f32 0.5, %v2029_v14 }
 0x283   :  { %4494 = vtanh.f32 %v2179_v5 }
 0x284   :  { %4496 = vtanh.f32 %v2180_v38  ;;  %v2083_v36 = vpop.f32.mrf.mxu2  ;;  %v2096_v20 = vpop.f32.mrf.mxu3 }
 0x285   :  { %v2173_v61 = vadd.f32 %v2160_v12, %v2083_v36  ;;  %v2174_v45 = vadd.f32 %v2161_v9, %v2096_v20  ;;  %v2059_v24 = vpop.f32.mrf.mxu0 }
 0x286   :  { %v2072_v43 = vpop.f32.mrf.mxu1  ;;  %v6320_v24 = vld [vmem:[#allocation66_spill] sm:$0xff] }
 0x287   :  { %v2181_v33 = vmul.f32 0.5, %v2173_v61  ;;  %4498 = vtanh.f32 %v2174_v45  ;;  %v6321_v43 = vld [vmem:[#allocation70_spill] sm:$0xff] }
 0x288   :  { %v4493_v3 = vpop.eup %4492 }
 0x289   :  { %v4495_v51 = vpop.eup %4494  ;;  %v5561_v55 = vmul.f32 %v4493_v3, %v2032_v7  ;;  %4500 = vtanh.f32 %v2181_v33  ;;  %v6322_v7 = vld [vmem:[#allocation71_spill] sm:$0xff] }
 0x28a   :  { %v4497_v57 = vpop.eup %4496  ;;  %v2185_v37 = vmul.f32 0.5, %v4495_v51  ;;  %v6324_v51 = vld [vmem:[#allocation73_spill] sm:$0xff] }
 0x28b   :  { %6319 = vst [vmem:[#allocation60_spill] sm:$0xff] %v5561_v55  ;;  %v2186_v0 = vmul.f32 0.5, %v4497_v57  ;;  %v2100_v34 = vpack.c.bf16 %v5561_v55, %v5561_v55  ;;  %v6340_v55 = vld [vmem:[#allocation28_spill] sm:$0xff] }
 0x28c   :  { %v2188_v5 = vadd.f32 0.5, %v2185_v37  ;;  %v2085_v38 = vpop.f32.mrf.mxu2  ;;  %v2098_v28 = vpop.f32.mrf.mxu3  ;;  %v6325_v37 = vld [vmem:[#allocation19_spill] sm:$0xff] }
 0x28d   :  { %v4499_v12 = vpop.eup %4498  ;;  %v2189_v9 = vadd.f32 0.5, %v2186_v0  ;;  %2109 = vmatmul.bf16.vlgmr.msrb.gmra.mxu0 %v2100_v34  ;;  %2122 = vmatmul.bf16.vlgmr.msrb.gmra.mxu1 %v2100_v34  ;;  %v6326_v0 = vld [vmem:[#allocation33_spill] sm:$0xff]  ;;  %v6329_v38 = vld [vmem:[#allocation22_spill] sm:$0xff]  ;;  %v6330_v28 = vld [vmem:[#allocation35_spill] sm:$0xff] }
 0x28e   :  { %v2193_v14 = vmul.f32 %v4499_v12, %v2188_v5  ;;  %2135 = vmatmul.bf16.vlgmr.msra.gmra.mxu2 %v2100_v34  ;;  %2148 = vmatmul.bf16.vlgmr.msra.gmra.mxu3 %v2100_v34  ;;  %v6327_v34 = vld [vmem:[#allocation34_spill] sm:$0xff]  ;;  %v6328_v5 = vld [vmem:[#allocation21_spill] sm:$0xff]  ;;  %v6331_v12 = vld [vmem:[#allocation36_spill] sm:$0xff] }
 0x28f   :  { %v2192_v36 = vmul.f32 %v2189_v9, %v5474_v52  ;;  %2277 = vmatpush.bf16.msrb.mxu0 %v6293_v25  ;;  %2290 = vmatpush.bf16.msrb.mxu1 %v6294_v31  ;;  %v4501_v20 = vpop.eup %4500  ;;  %v6332_v9 = vld [vmem:[#allocation23_spill] sm:$0xff] }
 0x290   :  { %2303 = vmatpush.bf16.msra.mxu2 %v6295_v8  ;;  %2316 = vmatpush.bf16.msra.mxu3 %v6296_v30  ;;  %v2187_v45 = vmul.f32 0.5, %v4501_v20  ;;  %v6335_v20 = vld [vmem:[#allocation39_spill] sm:$0xff] }
 0x291   :  { %v5570_v61 = vadd.f32 %v2193_v14, %v2192_v36  ;;  %v6333_v14 = vld [vmem:[#allocation24_spill] sm:$0xff]  ;;  %v6334_v36 = vld [vmem:[#allocation37_spill] sm:$0xff] }
 0x292   :  { %v2190_v52 = vadd.f32 0.5, %v2187_v45  ;;  %v6336_v45 = vld [vmem:[#allocation26_spill] sm:$0xff] }
 0x293   :  { %4502 = vtanh.f32 %v5570_v61  ;;  %2278 = vmatpush.bf16.msrb.mxu0 %v6297_v21  ;;  %2291 = vmatpush.bf16.msrb.mxu1 %v6298_v40 }
 0x294   :  { %2304 = vmatpush.bf16.msra.mxu2 %v6320_v24  ;;  %2317 = vmatpush.bf16.msra.mxu3 %v6300_v59 }
 0x297   :  { %2279 = vmatpush.bf16.msrb.mxu0 %v6302_v49  ;;  %2292 = vmatpush.bf16.msrb.mxu1 %v6303_v62 }
 0x298   :  { %2305 = vmatpush.bf16.msra.mxu2 %v6321_v43  ;;  %2318 = vmatpush.bf16.msra.mxu3 %v6322_v7 }
 0x299   :  { %v4503_v33 = vpop.eup %4502 }
 0x29a   :  { %v5581_v3 = vmul.f32 %v4503_v33, %v2190_v52  ;;  %v6337_v52 = vld [vmem:[#allocation27_spill] sm:$0xff]  ;;  %v6338_v33 = vld [vmem:[#allocation41_spill] sm:$0xff] }
 0x29b   :  { %2280 = vmatpush.bf16.msrb.mxu0 %v6324_v51  ;;  %2293 = vmatpush.bf16.msrb.mxu1 %v6307_v23 }
 0x29c   :  { %6323 = vst [vmem:[#allocation61_spill] sm:$0xff] %v5581_v3  ;;  %v2223_v57 = vpack.c.bf16 %v5581_v3, %v5581_v3  ;;  %2306 = vmatpush.bf16.msra.mxu2 %v6308_v17  ;;  %2319 = vmatpush.bf16.msra.mxu3 %v6309_v41  ;;  %v6341_v3 = vld [vmem:[#allocation29_spill] sm:$0xff] }
 0x29e   :  { %2232 = vmatmul.bf16.vlgmr.msra.gmra.mxu0 %v2223_v57  ;;  %2245 = vmatmul.bf16.vlgmr.msra.gmra.mxu1 %v2223_v57 }
 0x29f   :  { %2258 = vmatmul.bf16.vlgmr.msrb.gmra.mxu2 %v2223_v57  ;;  %2271 = vmatmul.bf16.vlgmr.msrb.gmra.mxu3 %v2223_v57  ;;  %v6339_v57 = vld [vmem:[#allocation42_spill] sm:$0xff] }
 0x2a0   :  { %2281 = vmatpush.bf16.msrb.mxu0 %v6310_v13  ;;  %2294 = vmatpush.bf16.msrb.mxu1 %v6311_v54 }
 0x2a1   :  { %2307 = vmatpush.bf16.msra.mxu2 %v6312_v50  ;;  %2320 = vmatpush.bf16.msra.mxu3 %v6313_v27 }
 0x2a4   :  { %2282 = vmatpush.bf16.msrb.mxu0 %v6314_v46  ;;  %2295 = vmatpush.bf16.msrb.mxu1 %v6315_v53 }
 0x2a5   :  { %2308 = vmatpush.bf16.msra.mxu2 %v5376_v15  ;;  %2321 = vmatpush.bf16.msra.mxu3 %v5379_v19 }
 0x2a8   :  { %2283 = vmatpush.bf16.msrb.mxu0 %v5384_v32  ;;  %2296 = vmatpush.bf16.msrb.mxu1 %v5389_v10 }
 0x2a9   :  { %2309 = vmatpush.bf16.msra.mxu2 %v5391_v22  ;;  %2322 = vmatpush.bf16.msra.mxu3 %v5394_v18 }
 0x2ac   :  { %2284 = vmatpush.bf16.msrb.mxu0 %v5403_v58  ;;  %2297 = vmatpush.bf16.msrb.mxu1 %v5409_v56 }
 0x2ad   :  { %2310 = vmatpush.bf16.msra.mxu2 %v5411_v1  ;;  %2323 = vmatpush.bf16.msra.mxu3 %v5414_v35 }
 0x2b0   :  { %2400 = vmatpush.bf16.msra.mxu0 %v4991_v44  ;;  %2413 = vmatpush.bf16.msra.mxu1 %v4993_v48 }
 0x2b1   :  { %2426 = vmatpush.bf16.msrb.mxu2 %v5087_v29  ;;  %2439 = vmatpush.bf16.msrb.mxu3 %v5089_v63 }
 0x2b4   :  { %2401 = vmatpush.bf16.msra.mxu0 %v5000_v60  ;;  %2414 = vmatpush.bf16.msra.mxu1 %v5003_v4 }
 0x2b5   :  { %2427 = vmatpush.bf16.msrb.mxu2 %v5099_v2  ;;  %2440 = vmatpush.bf16.msrb.mxu3 %v5103_v47 }
 0x2b8   :  { %2402 = vmatpush.bf16.msra.mxu0 %v5015_v16  ;;  %2415 = vmatpush.bf16.msra.mxu1 %v5017_v26 }
 0x2b9   :  { %2428 = vmatpush.bf16.msrb.mxu2 %v5107_v42  ;;  %2441 = vmatpush.bf16.msrb.mxu3 %v5109_v11 }
 0x2bc   :  { %2403 = vmatpush.bf16.msra.mxu0 %v5026_v39  ;;  %2416 = vmatpush.bf16.msra.mxu1 %v6325_v37 }
 0x2bd   :  { %2429 = vmatpush.bf16.msrb.mxu2 %v6326_v0  ;;  %2442 = vmatpush.bf16.msrb.mxu3 %v6327_v34 }
 0x2c0   :  { %2404 = vmatpush.bf16.msra.mxu0 %v6328_v5  ;;  %2417 = vmatpush.bf16.msra.mxu1 %v6329_v38 }
 0x2c1   :  { %2430 = vmatpush.bf16.msrb.mxu2 %v6330_v28  ;;  %2443 = vmatpush.bf16.msrb.mxu3 %v6331_v12  ;;  %v6342_v12 = vld [vmem:[#allocation43_spill] sm:$0xff] }
 0x2c4   :  { %2405 = vmatpush.bf16.msra.mxu0 %v6332_v9  ;;  %2418 = vmatpush.bf16.msra.mxu1 %v6333_v14  ;;  %v6343_v9 = vld [vmem:[#allocation44_spill] sm:$0xff] }
 0x2c5   :  { %2431 = vmatpush.bf16.msrb.mxu2 %v6334_v36  ;;  %2444 = vmatpush.bf16.msrb.mxu3 %v6335_v20  ;;  %v6344_v14 = vld [vmem:[#allocation56_spill] sm:$0xff] }
 0x2c6   :  { %v2167_v36 = vunpack.c.l.bf16 %v6344_v14  ;;  %v2168_v20 = vunpack.c.h.bf16 %v6344_v14 }
 0x2c8   :  { %2406 = vmatpush.bf16.msra.mxu0 %v6336_v45  ;;  %2419 = vmatpush.bf16.msra.mxu1 %v6337_v52 }
 0x2c9   :  { %2432 = vmatpush.bf16.msrb.mxu2 %v6338_v33  ;;  %2445 = vmatpush.bf16.msrb.mxu3 %v6339_v57  ;;  %v6345_v57 = vld [vmem:[#allocation85_spill] sm:$0xff] }
 0x2cc   :  { %2407 = vmatpush.bf16.msra.mxu0 %v6340_v55  ;;  %2420 = vmatpush.bf16.msra.mxu1 %v6341_v3  ;;  %v2169_v55 = vunpack.c.l.bf16 %v6345_v57  ;;  %v2170_v3 = vunpack.c.h.bf16 %v6345_v57 }
 0x2cd   :  { %2433 = vmatpush.bf16.msrb.mxu2 %v6342_v12  ;;  %2446 = vmatpush.bf16.msrb.mxu3 %v6343_v9 }
 0x30a   :  { %v2110_v28 = vpop.f32.mrf.mxu0  ;;  %v2123_v45 = vpop.f32.mrf.mxu1 }
 0x30b   :  { %v2175_v38 = vadd.f32 %v2167_v36, %v2110_v28  ;;  %v2176_v52 = vadd.f32 %v2168_v20, %v2123_v45 }
 0x30d   :  { %v2197_v5 = vmul.f32 0.5, %v2175_v38  ;;  %v2198_v33 = vmul.f32 0.5, %v2176_v52 }
 0x30f   :  { %4504 = vtanh.f32 %v2197_v5 }
 0x310   :  { %4506 = vtanh.f32 %v2198_v33  ;;  %v6346_v33 = vld [vmem:[#allocation15_spill] sm:$0xff] }
 0x311   :  { %v2136_v34 = vpop.f32.mrf.mxu2  ;;  %v2149_v12 = vpop.f32.mrf.mxu3  ;;  %v2334_v57 = vunpack.c.l.bf16 %v6346_v33  ;;  %v2335_v26 = vunpack.c.h.bf16 %v6346_v33 }
 0x312   :  { %v2177_v0 = vadd.f32 %v2169_v55, %v2136_v34  ;;  %v2178_v9 = vadd.f32 %v2170_v3, %v2149_v12  ;;  %v2112_v37 = vpop.f32.mrf.mxu0  ;;  %v2125_v39 = vpop.f32.mrf.mxu1 }
 0x314   :  { %v2199_v11 = vmul.f32 0.5, %v2177_v0  ;;  %4508 = vtanh.f32 %v2178_v9 }
 0x315   :  { %v4505_v14 = vpop.eup %4504 }
 0x316   :  { %v4507_v42 = vpop.eup %4506  ;;  %v2203_v28 = vmul.f32 0.5, %v4505_v14  ;;  %4510 = vtanh.f32 %v2199_v11 }
 0x317   :  { %v2204_v36 = vmul.f32 0.5, %v4507_v42 }
 0x318   :  { %v2206_v38 = vadd.f32 0.5, %v2203_v28  ;;  %v6347_v28 = vld [vmem:[#allocation46_spill] sm:$0xff] }
 0x319   :  { %v2207_v5 = vadd.f32 0.5, %v2204_v36  ;;  %v2138_v20 = vpop.f32.mrf.mxu2  ;;  %v2151_v45 = vpop.f32.mrf.mxu3  ;;  %v2336_v36 = vunpack.c.l.bf16 %v6347_v28 }
 0x31a   :  { %v4509_v52 = vpop.eup %4508  ;;  %v2337_v20 = vunpack.c.h.bf16 %v6347_v28 }
 0x31b   :  { %v2210_v55 = vmul.f32 %v2207_v5, %v5556_v6  ;;  %v2211_v3 = vmul.f32 %v4509_v52, %v2206_v38  ;;  %v2233_v39 = vpop.f32.mrf.mxu0  ;;  %v2246_v37 = vpop.f32.mrf.mxu1 }
 0x31c   :  { %v2347_v0 = vadd.f32 %v2334_v57, %v2233_v39  ;;  %v2348_v34 = vadd.f32 %v2335_v26, %v2246_v37  ;;  %v4511_v12 = vpop.eup %4510 }
 0x31d   :  { %v5644_v9 = vadd.f32 %v2211_v3, %v2210_v55  ;;  %v2205_v14 = vmul.f32 0.5, %v4511_v12 }
 0x31e   :  { %v2355_v42 = vmul.f32 0.5, %v2347_v0  ;;  %v2356_v11 = vmul.f32 0.5, %v2348_v34 }
 0x31f   :  { %4512 = vtanh.f32 %v5644_v9  ;;  %v2208_v33 = vadd.f32 0.5, %v2205_v14 }
 0x320   :  { %4514 = vtanh.f32 %v2355_v42 }
 0x321   :  { %4516 = vtanh.f32 %v2356_v11 }
 0x322   :  { %v2259_v6 = vpop.f32.mrf.mxu2  ;;  %v2272_v38 = vpop.f32.mrf.mxu3 }
 0x323   :  { %v2349_v5 = vadd.f32 %v2336_v36, %v2259_v6  ;;  %v2350_v45 = vadd.f32 %v2337_v20, %v2272_v38  ;;  %v2235_v52 = vpop.f32.mrf.mxu0  ;;  %v2248_v26 = vpop.f32.mrf.mxu1 }
 0x325   :  { %v4513_v57 = vpop.eup %4512  ;;  %v2357_v55 = vmul.f32 0.5, %v2349_v5  ;;  %4518 = vtanh.f32 %v2350_v45 }
 0x326   :  { %v4515_v3 = vpop.eup %4514  ;;  %v5649_v39 = vmul.f32 %v4513_v57, %v2208_v33  ;;  %v6350_v57 = vld [vmem:[#allocation17_spill] sm:$0xff] }
 0x327   :  { %v4517_v37 = vpop.eup %4516  ;;  %v2361_v0 = vmul.f32 0.5, %v4515_v3  ;;  %4520 = vtanh.f32 %v2357_v55  ;;  %v6351_v55 = vld [vmem:[#allocation31_spill] sm:$0xff]  ;;  %v6352_v3 = vld [vmem:[#allocation32_spill] sm:$0xff] }
 0x328   :  { %6348 = vst [vmem:[#allocation63_spill] sm:$0xff] %v5649_v39  ;;  %v2362_v34 = vmul.f32 0.5, %v4517_v37  ;;  %v2276_v12 = vpack.c.bf16 %v5649_v39, %v5649_v39  ;;  %v6353_v37 = vld [vmem:[#allocation18_spill] sm:$0xff]  ;;  %v6369_v39 = vld [vmem:[#allocation28_spill] sm:$0xff] }
 0x329   :  { %v2364_v42 = vadd.f32 0.5, %v2361_v0  ;;  %v6354_v0 = vld [vmem:[#allocation19_spill] sm:$0xff] }
 0x32a   :  { %v2365_v11 = vadd.f32 0.5, %v2362_v34  ;;  %v2261_v28 = vpop.f32.mrf.mxu2  ;;  %v2274_v36 = vpop.f32.mrf.mxu3  ;;  %2285 = vmatmul.bf16.vlgmr.msrb.gmra.mxu0 %v2276_v12  ;;  %2298 = vmatmul.bf16.vlgmr.msrb.gmra.mxu1 %v2276_v12  ;;  %v6355_v34 = vld [vmem:[#allocation33_spill] sm:$0xff] }
 0x32b   :  { %v4519_v14 = vpop.eup %4518  ;;  %2311 = vmatmul.bf16.vlgmr.msra.gmra.mxu2 %v2276_v12  ;;  %2324 = vmatmul.bf16.vlgmr.msra.gmra.mxu3 %v2276_v12  ;;  %v6356_v12 = vld [vmem:[#allocation34_spill] sm:$0xff]  ;;  %v6359_v28 = vld [vmem:[#allocation35_spill] sm:$0xff]  ;;  %v6360_v36 = vld [vmem:[#allocation36_spill] sm:$0xff] }
 0x32c   :  { %v2368_v20 = vmul.f32 %v2365_v11, %v5570_v61  ;;  %v2369_v6 = vmul.f32 %v4519_v14, %v2364_v42  ;;  %2453 = vmatpush.bf16.msrb.mxu0 %v6293_v25  ;;  %2466 = vmatpush.bf16.msrb.mxu1 %v6294_v31  ;;  %v6357_v42 = vld [vmem:[#allocation21_spill] sm:$0xff]  ;;  %v6358_v11 = vld [vmem:[#allocation22_spill] sm:$0xff]  ;;  %v6361_v14 = vld [vmem:[#allocation23_spill] sm:$0xff] }
 0x32d   :  { %2479 = vmatpush.bf16.msra.mxu2 %v6295_v8  ;;  %2492 = vmatpush.bf16.msra.mxu3 %v6296_v30  ;;  %v4521_v38 = vpop.eup %4520 }
 0x32e   :  { %v5658_v5 = vadd.f32 %v2369_v6, %v2368_v20  ;;  %v2363_v45 = vmul.f32 0.5, %v4521_v38  ;;  %v6362_v20 = vld [vmem:[#allocation24_spill] sm:$0xff]  ;;  %v6363_v6 = vld [vmem:[#allocation37_spill] sm:$0xff]  ;;  %v6364_v38 = vld [vmem:[#allocation39_spill] sm:$0xff] }
 0x330   :  { %4522 = vtanh.f32 %v5658_v5  ;;  %2454 = vmatpush.bf16.msrb.mxu0 %v6297_v21  ;;  %2467 = vmatpush.bf16.msrb.mxu1 %v6298_v40  ;;  %v2366_v61 = vadd.f32 0.5, %v2363_v45  ;;  %v6365_v45 = vld [vmem:[#allocation26_spill] sm:$0xff] }
 0x331   :  { %2480 = vmatpush.bf16.msra.mxu2 %v6320_v24  ;;  %2493 = vmatpush.bf16.msra.mxu3 %v6300_v59 }
 0x334   :  { %2455 = vmatpush.bf16.msrb.mxu0 %v6302_v49  ;;  %2468 = vmatpush.bf16.msrb.mxu1 %v6303_v62 }
 0x335   :  { %2481 = vmatpush.bf16.msra.mxu2 %v6321_v43  ;;  %2494 = vmatpush.bf16.msra.mxu3 %v6322_v7 }
 0x336   :  { %v4523_v52 = vpop.eup %4522 }
 0x337   :  { %v5669_v26 = vmul.f32 %v4523_v52, %v2366_v61  ;;  %v6366_v61 = vld [vmem:[#allocation27_spill] sm:$0xff]  ;;  %v6367_v52 = vld [vmem:[#allocation41_spill] sm:$0xff] }
 0x338   :  { %2456 = vmatpush.bf16.msrb.mxu0 %v6324_v51  ;;  %2469 = vmatpush.bf16.msrb.mxu1 %v6307_v23 }
 0x339   :  { %6349 = vst [vmem:[#allocation64_spill] sm:$0xff] %v5669_v26  ;;  %v2399_v33 = vpack.c.bf16 %v5669_v26, %v5669_v26  ;;  %2482 = vmatpush.bf16.msra.mxu2 %v6308_v17  ;;  %2495 = vmatpush.bf16.msra.mxu3 %v6309_v41  ;;  %v6370_v26 = vld [vmem:[#allocation29_spill] sm:$0xff] }
 0x33b   :  { %2408 = vmatmul.bf16.vlgmr.msra.gmra.mxu0 %v2399_v33  ;;  %2421 = vmatmul.bf16.vlgmr.msra.gmra.mxu1 %v2399_v33 }
 0x33c   :  { %2434 = vmatmul.bf16.vlgmr.msrb.gmra.mxu2 %v2399_v33  ;;  %2447 = vmatmul.bf16.vlgmr.msrb.gmra.mxu3 %v2399_v33  ;;  %v6368_v33 = vld [vmem:[#allocation42_spill] sm:$0xff] }
 0x33d   :  { %2457 = vmatpush.bf16.msrb.mxu0 %v6310_v13  ;;  %2470 = vmatpush.bf16.msrb.mxu1 %v6311_v54 }
 0x33e   :  { %2483 = vmatpush.bf16.msra.mxu2 %v6312_v50  ;;  %2496 = vmatpush.bf16.msra.mxu3 %v6313_v27 }
 0x341   :  { %2458 = vmatpush.bf16.msrb.mxu0 %v6314_v46  ;;  %2471 = vmatpush.bf16.msrb.mxu1 %v6315_v53 }
 0x342   :  { %2484 = vmatpush.bf16.msra.mxu2 %v5376_v15  ;;  %2497 = vmatpush.bf16.msra.mxu3 %v5379_v19 }
 0x345   :  { %2459 = vmatpush.bf16.msrb.mxu0 %v5384_v32  ;;  %2472 = vmatpush.bf16.msrb.mxu1 %v5389_v10 }
 0x346   :  { %2485 = vmatpush.bf16.msra.mxu2 %v5391_v22  ;;  %2498 = vmatpush.bf16.msra.mxu3 %v5394_v18 }
 0x349   :  { %2460 = vmatpush.bf16.msrb.mxu0 %v5403_v58  ;;  %2473 = vmatpush.bf16.msrb.mxu1 %v5409_v56 }
 0x34a   :  { %2486 = vmatpush.bf16.msra.mxu2 %v5411_v1  ;;  %2499 = vmatpush.bf16.msra.mxu3 %v5414_v35 }
 0x34d   :  { %2564 = vmatpush.bf16.msra.mxu0 %v4991_v44  ;;  %2577 = vmatpush.bf16.msra.mxu1 %v4993_v48 }
 0x34e   :  { %2590 = vmatpush.bf16.msrb.mxu2 %v5087_v29  ;;  %2603 = vmatpush.bf16.msrb.mxu3 %v5089_v63 }
 0x351   :  { %2565 = vmatpush.bf16.msra.mxu0 %v5000_v60  ;;  %2578 = vmatpush.bf16.msra.mxu1 %v5003_v4 }
 0x352   :  { %2591 = vmatpush.bf16.msrb.mxu2 %v5099_v2  ;;  %2604 = vmatpush.bf16.msrb.mxu3 %v5103_v47 }
 0x355   :  { %2566 = vmatpush.bf16.msra.mxu0 %v5015_v16  ;;  %2579 = vmatpush.bf16.msra.mxu1 %v6350_v57 }
 0x356   :  { %2592 = vmatpush.bf16.msrb.mxu2 %v6351_v55  ;;  %2605 = vmatpush.bf16.msrb.mxu3 %v6352_v3 }
 0x359   :  { %2567 = vmatpush.bf16.msra.mxu0 %v6353_v37  ;;  %2580 = vmatpush.bf16.msra.mxu1 %v6354_v0 }
 0x35a   :  { %2593 = vmatpush.bf16.msrb.mxu2 %v6355_v34  ;;  %2606 = vmatpush.bf16.msrb.mxu3 %v6356_v12 }
 0x35d   :  { %2568 = vmatpush.bf16.msra.mxu0 %v6357_v42  ;;  %2581 = vmatpush.bf16.msra.mxu1 %v6358_v11 }
 0x35e   :  { %2594 = vmatpush.bf16.msrb.mxu2 %v6359_v28  ;;  %2607 = vmatpush.bf16.msrb.mxu3 %v6360_v36  ;;  %v6371_v36 = vld [vmem:[#allocation43_spill] sm:$0xff] }
 0x361   :  { %2569 = vmatpush.bf16.msra.mxu0 %v6361_v14  ;;  %2582 = vmatpush.bf16.msra.mxu1 %v6362_v20  ;;  %v6372_v14 = vld [vmem:[#allocation44_spill] sm:$0xff]  ;;  %v6373_v20 = vld [vmem:[#allocation55_spill] sm:$0xff] }
 0x362   :  { %2595 = vmatpush.bf16.msrb.mxu2 %v6363_v6  ;;  %2608 = vmatpush.bf16.msrb.mxu3 %v6364_v38  ;;  %v2343_v6 = vunpack.c.l.bf16 %v6373_v20  ;;  %v2344_v38 = vunpack.c.h.bf16 %v6373_v20 }
 0x365   :  { %2570 = vmatpush.bf16.msra.mxu0 %v6365_v45  ;;  %2583 = vmatpush.bf16.msra.mxu1 %v6366_v61 }
 0x366   :  { %2596 = vmatpush.bf16.msrb.mxu2 %v6367_v52  ;;  %2609 = vmatpush.bf16.msrb.mxu3 %v6368_v33  ;;  %v6374_v33 = vld [vmem:[#allocation84_spill] sm:$0xff] }
 0x369   :  { %2571 = vmatpush.bf16.msra.mxu0 %v6369_v39  ;;  %2584 = vmatpush.bf16.msra.mxu1 %v6370_v26  ;;  %v2345_v39 = vunpack.c.l.bf16 %v6374_v33  ;;  %v2346_v26 = vunpack.c.h.bf16 %v6374_v33 }
 0x36a   :  { %2597 = vmatpush.bf16.msrb.mxu2 %v6371_v36  ;;  %2610 = vmatpush.bf16.msrb.mxu3 %v6372_v14 }
 0x3a7   :  { %v2286_v28 = vpop.f32.mrf.mxu0  ;;  %v2299_v45 = vpop.f32.mrf.mxu1 }
 0x3a8   :  { %v2351_v11 = vadd.f32 %v2343_v6, %v2286_v28  ;;  %v2352_v61 = vadd.f32 %v2344_v38, %v2299_v45 }
 0x3aa   :  { %v2373_v42 = vmul.f32 0.5, %v2351_v11  ;;  %v2374_v52 = vmul.f32 0.5, %v2352_v61 }
 0x3ac   :  { %4524 = vtanh.f32 %v2373_v42 }
 0x3ad   :  { %4526 = vtanh.f32 %v2374_v52  ;;  %v6375_v52 = vld [vmem:[#allocation16_spill] sm:$0xff] }
 0x3ae   :  { %v2312_v12 = vpop.f32.mrf.mxu2  ;;  %v2325_v36 = vpop.f32.mrf.mxu3  ;;  %v2507_v33 = vunpack.c.l.bf16 %v6375_v52  ;;  %v2508_v57 = vunpack.c.h.bf16 %v6375_v52 }
 0x3af   :  { %v2353_v34 = vadd.f32 %v2345_v39, %v2312_v12  ;;  %v2354_v14 = vadd.f32 %v2346_v26, %v2325_v36  ;;  %v2288_v0 = vpop.f32.mrf.mxu0  ;;  %v2301_v37 = vpop.f32.mrf.mxu1 }
 0x3b1   :  { %v2375_v3 = vmul.f32 0.5, %v2353_v34  ;;  %4528 = vtanh.f32 %v2354_v14 }
 0x3b2   :  { %v4525_v20 = vpop.eup %4524 }
 0x3b3   :  { %v4527_v55 = vpop.eup %4526  ;;  %v2379_v28 = vmul.f32 0.5, %v4525_v20  ;;  %4530 = vtanh.f32 %v2375_v3 }
 0x3b4   :  { %v2380_v6 = vmul.f32 0.5, %v4527_v55 }
 0x3b5   :  { %v2382_v11 = vadd.f32 0.5, %v2379_v28  ;;  %v6376_v28 = vld [vmem:[#allocation47_spill] sm:$0xff] }
 0x3b6   :  { %v2383_v42 = vadd.f32 0.5, %v2380_v6  ;;  %v2314_v38 = vpop.f32.mrf.mxu2  ;;  %v2327_v45 = vpop.f32.mrf.mxu3  ;;  %v2509_v6 = vunpack.c.l.bf16 %v6376_v28 }
 0x3b7   :  { %v4529_v61 = vpop.eup %4528  ;;  %v2510_v38 = vunpack.c.h.bf16 %v6376_v28 }
 0x3b8   :  { %v2386_v39 = vmul.f32 %v2383_v42, %v5644_v9  ;;  %v2387_v26 = vmul.f32 %v4529_v61, %v2382_v11  ;;  %v2409_v37 = vpop.f32.mrf.mxu0  ;;  %v2422_v0 = vpop.f32.mrf.mxu1 }
 0x3b9   :  { %v2517_v34 = vadd.f32 %v2507_v33, %v2409_v37  ;;  %v2518_v12 = vadd.f32 %v2508_v57, %v2422_v0  ;;  %v4531_v36 = vpop.eup %4530 }
 0x3ba   :  { %v5732_v14 = vadd.f32 %v2387_v26, %v2386_v39  ;;  %v2381_v20 = vmul.f32 0.5, %v4531_v36 }
 0x3bb   :  { %v2525_v55 = vmul.f32 0.5, %v2517_v34  ;;  %v2526_v3 = vmul.f32 0.5, %v2518_v12 }
 0x3bc   :  { %4532 = vtanh.f32 %v5732_v14  ;;  %v2384_v52 = vadd.f32 0.5, %v2381_v20 }
 0x3bd   :  { %4534 = vtanh.f32 %v2525_v55 }
 0x3be   :  { %4536 = vtanh.f32 %v2526_v3 }
 0x3bf   :  { %v2435_v9 = vpop.f32.mrf.mxu2  ;;  %v2448_v11 = vpop.f32.mrf.mxu3 }
 0x3c0   :  { %v2519_v42 = vadd.f32 %v2509_v6, %v2435_v9  ;;  %v2520_v45 = vadd.f32 %v2510_v38, %v2448_v11  ;;  %v2411_v61 = vpop.f32.mrf.mxu0  ;;  %v2424_v57 = vpop.f32.mrf.mxu1 }
 0x3c2   :  { %v4533_v33 = vpop.eup %4532  ;;  %v2527_v39 = vmul.f32 0.5, %v2519_v42  ;;  %4538 = vtanh.f32 %v2520_v45 }
 0x3c3   :  { %v4535_v26 = vpop.eup %4534  ;;  %v5737_v37 = vmul.f32 %v4533_v33, %v2384_v52  ;;  %v6379_v33 = vld [vmem:[#allocation17_spill] sm:$0xff] }
 0x3c4   :  { %v4537_v0 = vpop.eup %4536  ;;  %v2531_v34 = vmul.f32 0.5, %v4535_v26  ;;  %4540 = vtanh.f32 %v2527_v39  ;;  %v6380_v39 = vld [vmem:[#allocation31_spill] sm:$0xff]  ;;  %v6381_v26 = vld [vmem:[#allocation32_spill] sm:$0xff] }
 0x3c5   :  { %6377 = vst [vmem:[#allocation65_spill] sm:$0xff] %v5737_v37  ;;  %v2532_v12 = vmul.f32 0.5, %v4537_v0  ;;  %v2452_v36 = vpack.c.bf16 %v5737_v37, %v5737_v37  ;;  %v6382_v0 = vld [vmem:[#allocation18_spill] sm:$0xff]  ;;  %v6398_v37 = vld [vmem:[#allocation28_spill] sm:$0xff] }
 0x3c6   :  { %v2534_v55 = vadd.f32 0.5, %v2531_v34  ;;  %v6383_v34 = vld [vmem:[#allocation19_spill] sm:$0xff] }
 0x3c7   :  { %v2535_v3 = vadd.f32 0.5, %v2532_v12  ;;  %v2437_v28 = vpop.f32.mrf.mxu2  ;;  %v2450_v6 = vpop.f32.mrf.mxu3  ;;  %2461 = vmatmul.bf16.vlgmr.msrb.gmra.mxu0 %v2452_v36  ;;  %2474 = vmatmul.bf16.vlgmr.msrb.gmra.mxu1 %v2452_v36  ;;  %v6384_v12 = vld [vmem:[#allocation33_spill] sm:$0xff] }
 0x3c8   :  { %v4539_v20 = vpop.eup %4538  ;;  %2487 = vmatmul.bf16.vlgmr.msra.gmra.mxu2 %v2452_v36  ;;  %2500 = vmatmul.bf16.vlgmr.msra.gmra.mxu3 %v2452_v36  ;;  %v6385_v36 = vld [vmem:[#allocation34_spill] sm:$0xff]  ;;  %v6388_v28 = vld [vmem:[#allocation35_spill] sm:$0xff]  ;;  %v6389_v6 = vld [vmem:[#allocation36_spill] sm:$0xff] }
 0x3c9   :  { %v2538_v38 = vmul.f32 %v2535_v3, %v5658_v5  ;;  %v2539_v9 = vmul.f32 %v4539_v20, %v2534_v55  ;;  %2617 = vmatpush.bf16.msrb.mxu0 %v6293_v25  ;;  %2630 = vmatpush.bf16.msrb.mxu1 %v6294_v31  ;;  %v6386_v55 = vld [vmem:[#allocation21_spill] sm:$0xff]  ;;  %v6387_v3 = vld [vmem:[#allocation22_spill] sm:$0xff]  ;;  %v6390_v20 = vld [vmem:[#allocation23_spill] sm:$0xff] }
 0x3ca   :  { %2643 = vmatpush.bf16.msra.mxu2 %v6295_v8  ;;  %2656 = vmatpush.bf16.msra.mxu3 %v6296_v30  ;;  %v4541_v11 = vpop.eup %4540 }
 0x3cb   :  { %v5746_v42 = vadd.f32 %v2539_v9, %v2538_v38  ;;  %v2533_v45 = vmul.f32 0.5, %v4541_v11  ;;  %v6391_v38 = vld [vmem:[#allocation24_spill] sm:$0xff]  ;;  %v6392_v9 = vld [vmem:[#allocation37_spill] sm:$0xff]  ;;  %v6393_v11 = vld [vmem:[#allocation39_spill] sm:$0xff] }
 0x3cd   :  { %4542 = vtanh.f32 %v5746_v42  ;;  %2618 = vmatpush.bf16.msrb.mxu0 %v6297_v21  ;;  %2631 = vmatpush.bf16.msrb.mxu1 %v6298_v40  ;;  %v2536_v5 = vadd.f32 0.5, %v2533_v45  ;;  %v6394_v45 = vld [vmem:[#allocation26_spill] sm:$0xff] }
 0x3ce   :  { %2644 = vmatpush.bf16.msra.mxu2 %v6320_v24  ;;  %2657 = vmatpush.bf16.msra.mxu3 %v6300_v59 }
 0x3d1   :  { %2619 = vmatpush.bf16.msrb.mxu0 %v6302_v49  ;;  %2632 = vmatpush.bf16.msrb.mxu1 %v6303_v62 }
 0x3d2   :  { %2645 = vmatpush.bf16.msra.mxu2 %v6321_v43  ;;  %2658 = vmatpush.bf16.msra.mxu3 %v6322_v7 }
 0x3d3   :  { %v4543_v61 = vpop.eup %4542 }
 0x3d4   :  { %v5757_v57 = vmul.f32 %v4543_v61, %v2536_v5  ;;  %v6395_v5 = vld [vmem:[#allocation27_spill] sm:$0xff]  ;;  %v6396_v61 = vld [vmem:[#allocation41_spill] sm:$0xff] }
 0x3d5   :  { %2620 = vmatpush.bf16.msrb.mxu0 %v6324_v51  ;;  %2633 = vmatpush.bf16.msrb.mxu1 %v6307_v23 }
 0x3d6   :  { %6378 = vst [vmem:[#allocation67_spill] sm:$0xff] %v5757_v57  ;;  %v2563_v52 = vpack.c.bf16 %v5757_v57, %v5757_v57  ;;  %2646 = vmatpush.bf16.msra.mxu2 %v6308_v17  ;;  %2659 = vmatpush.bf16.msra.mxu3 %v6309_v41  ;;  %v6399_v57 = vld [vmem:[#allocation29_spill] sm:$0xff] }
 0x3d8   :  { %2572 = vmatmul.bf16.vlgmr.msra.gmra.mxu0 %v2563_v52  ;;  %2585 = vmatmul.bf16.vlgmr.msra.gmra.mxu1 %v2563_v52 }
 0x3d9   :  { %2598 = vmatmul.bf16.vlgmr.msrb.gmra.mxu2 %v2563_v52  ;;  %2611 = vmatmul.bf16.vlgmr.msrb.gmra.mxu3 %v2563_v52  ;;  %v6397_v52 = vld [vmem:[#allocation42_spill] sm:$0xff] }
 0x3da   :  { %2621 = vmatpush.bf16.msrb.mxu0 %v6310_v13  ;;  %2634 = vmatpush.bf16.msrb.mxu1 %v6311_v54 }
 0x3db   :  { %2647 = vmatpush.bf16.msra.mxu2 %v6312_v50  ;;  %2660 = vmatpush.bf16.msra.mxu3 %v6313_v27 }
 0x3de   :  { %2622 = vmatpush.bf16.msrb.mxu0 %v6314_v46  ;;  %2635 = vmatpush.bf16.msrb.mxu1 %v6315_v53 }
 0x3df   :  { %2648 = vmatpush.bf16.msra.mxu2 %v5376_v15  ;;  %2661 = vmatpush.bf16.msra.mxu3 %v5379_v19 }
 0x3e2   :  { %2623 = vmatpush.bf16.msrb.mxu0 %v5384_v32  ;;  %2636 = vmatpush.bf16.msrb.mxu1 %v5389_v10 }
 0x3e3   :  { %2649 = vmatpush.bf16.msra.mxu2 %v5391_v22  ;;  %2662 = vmatpush.bf16.msra.mxu3 %v5394_v18 }
 0x3e6   :  { %2624 = vmatpush.bf16.msrb.mxu0 %v5403_v58  ;;  %2637 = vmatpush.bf16.msrb.mxu1 %v5409_v56 }
 0x3e7   :  { %2650 = vmatpush.bf16.msra.mxu2 %v5411_v1  ;;  %2663 = vmatpush.bf16.msra.mxu3 %v5414_v35 }
 0x3ea   :  { %2728 = vmatpush.bf16.msra.mxu0 %v4991_v44  ;;  %2741 = vmatpush.bf16.msra.mxu1 %v4993_v48 }
 0x3eb   :  { %2754 = vmatpush.bf16.msrb.mxu2 %v5087_v29  ;;  %2767 = vmatpush.bf16.msrb.mxu3 %v5089_v63 }
 0x3ee   :  { %2729 = vmatpush.bf16.msra.mxu0 %v5000_v60  ;;  %2742 = vmatpush.bf16.msra.mxu1 %v5003_v4 }
 0x3ef   :  { %2755 = vmatpush.bf16.msrb.mxu2 %v5099_v2  ;;  %2768 = vmatpush.bf16.msrb.mxu3 %v5103_v47 }
 0x3f2   :  { %2730 = vmatpush.bf16.msra.mxu0 %v5015_v16  ;;  %2743 = vmatpush.bf16.msra.mxu1 %v6379_v33 }
 0x3f3   :  { %2756 = vmatpush.bf16.msrb.mxu2 %v6380_v39  ;;  %2769 = vmatpush.bf16.msrb.mxu3 %v6381_v26 }
 0x3f6   :  { %2731 = vmatpush.bf16.msra.mxu0 %v6382_v0  ;;  %2744 = vmatpush.bf16.msra.mxu1 %v6383_v34 }
 0x3f7   :  { %2757 = vmatpush.bf16.msrb.mxu2 %v6384_v12  ;;  %2770 = vmatpush.bf16.msrb.mxu3 %v6385_v36 }
 0x3fa   :  { %2732 = vmatpush.bf16.msra.mxu0 %v6386_v55  ;;  %2745 = vmatpush.bf16.msra.mxu1 %v6387_v3 }
 0x3fb   :  { %2758 = vmatpush.bf16.msrb.mxu2 %v6388_v28  ;;  %2771 = vmatpush.bf16.msrb.mxu3 %v6389_v6  ;;  %v6400_v6 = vld [vmem:[#allocation43_spill] sm:$0xff] }
 0x3fe   :  { %2733 = vmatpush.bf16.msra.mxu0 %v6390_v20  ;;  %2746 = vmatpush.bf16.msra.mxu1 %v6391_v38  ;;  %v6401_v20 = vld [vmem:[#allocation44_spill] sm:$0xff]  ;;  %v6402_v38 = vld [vmem:[#allocation54_spill] sm:$0xff] }
 0x3ff   :  { %2759 = vmatpush.bf16.msrb.mxu2 %v6392_v9  ;;  %2772 = vmatpush.bf16.msrb.mxu3 %v6393_v11  ;;  %v2513_v9 = vunpack.c.l.bf16 %v6402_v38  ;;  %v2514_v11 = vunpack.c.h.bf16 %v6402_v38 }
 0x402   :  { %2734 = vmatpush.bf16.msra.mxu0 %v6394_v45  ;;  %2747 = vmatpush.bf16.msra.mxu1 %v6395_v5 }
 0x403   :  { %2760 = vmatpush.bf16.msrb.mxu2 %v6396_v61  ;;  %2773 = vmatpush.bf16.msrb.mxu3 %v6397_v52  ;;  %v6403_v52 = vld [vmem:[#allocation81_spill] sm:$0xff] }
 0x406   :  { %2735 = vmatpush.bf16.msra.mxu0 %v6398_v37  ;;  %2748 = vmatpush.bf16.msra.mxu1 %v6399_v57  ;;  %v2515_v37 = vunpack.c.l.bf16 %v6403_v52  ;;  %v2516_v57 = vunpack.c.h.bf16 %v6403_v52 }
 0x407   :  { %2761 = vmatpush.bf16.msrb.mxu2 %v6400_v6  ;;  %2774 = vmatpush.bf16.msrb.mxu3 %v6401_v20 }
 0x444   :  { %v2462_v28 = vpop.f32.mrf.mxu0  ;;  %v2475_v45 = vpop.f32.mrf.mxu1 }
 0x445   :  { %v2521_v3 = vadd.f32 %v2513_v9, %v2462_v28  ;;  %v2522_v5 = vadd.f32 %v2514_v11, %v2475_v45 }
 0x447   :  { %v2543_v55 = vmul.f32 0.5, %v2521_v3  ;;  %v2544_v61 = vmul.f32 0.5, %v2522_v5 }
 0x449   :  { %4544 = vtanh.f32 %v2543_v55 }
 0x44a   :  { %4546 = vtanh.f32 %v2544_v61  ;;  %v6404_v61 = vld [vmem:[#allocation20_spill] sm:$0xff] }
 0x44b   :  { %v2488_v36 = vpop.f32.mrf.mxu2  ;;  %v2501_v6 = vpop.f32.mrf.mxu3  ;;  %v2671_v52 = vunpack.c.l.bf16 %v6404_v61  ;;  %v2672_v33 = vunpack.c.h.bf16 %v6404_v61 }
 0x44c   :  { %v2523_v12 = vadd.f32 %v2515_v37, %v2488_v36  ;;  %v2524_v20 = vadd.f32 %v2516_v57, %v2501_v6  ;;  %v2464_v34 = vpop.f32.mrf.mxu0  ;;  %v2477_v0 = vpop.f32.mrf.mxu1 }
 0x44e   :  { %v2545_v26 = vmul.f32 0.5, %v2523_v12  ;;  %4548 = vtanh.f32 %v2524_v20 }
 0x44f   :  { %v4545_v38 = vpop.eup %4544 }
 0x450   :  { %v4547_v39 = vpop.eup %4546  ;;  %v2549_v28 = vmul.f32 0.5, %v4545_v38  ;;  %4550 = vtanh.f32 %v2545_v26 }
 0x451   :  { %v2550_v9 = vmul.f32 0.5, %v4547_v39 }
 0x452   :  { %v2552_v3 = vadd.f32 0.5, %v2549_v28  ;;  %v6405_v28 = vld [vmem:[#allocation48_spill] sm:$0xff] }
 0x453   :  { %v2553_v55 = vadd.f32 0.5, %v2550_v9  ;;  %v2490_v11 = vpop.f32.mrf.mxu2  ;;  %v2503_v45 = vpop.f32.mrf.mxu3  ;;  %v2673_v9 = vunpack.c.l.bf16 %v6405_v28 }
 0x454   :  { %v4549_v5 = vpop.eup %4548  ;;  %v2674_v11 = vunpack.c.h.bf16 %v6405_v28 }
 0x455   :  { %v2556_v37 = vmul.f32 %v2553_v55, %v5732_v14  ;;  %v2557_v57 = vmul.f32 %v4549_v5, %v2552_v3  ;;  %v2573_v0 = vpop.f32.mrf.mxu0  ;;  %v2586_v34 = vpop.f32.mrf.mxu1 }
 0x456   :  { %v2681_v12 = vadd.f32 %v2671_v52, %v2573_v0  ;;  %v2682_v36 = vadd.f32 %v2672_v33, %v2586_v34  ;;  %v4551_v6 = vpop.eup %4550 }
 0x457   :  { %v5820_v20 = vadd.f32 %v2557_v57, %v2556_v37  ;;  %v2551_v38 = vmul.f32 0.5, %v4551_v6 }
 0x458   :  { %v2689_v39 = vmul.f32 0.5, %v2681_v12  ;;  %v2690_v26 = vmul.f32 0.5, %v2682_v36 }
 0x459   :  { %4552 = vtanh.f32 %v5820_v20  ;;  %v2554_v61 = vadd.f32 0.5, %v2551_v38 }
 0x45a   :  { %4554 = vtanh.f32 %v2689_v39 }
 0x45b   :  { %4556 = vtanh.f32 %v2690_v26 }
 0x45c   :  { %v2599_v14 = vpop.f32.mrf.mxu2  ;;  %v2612_v3 = vpop.f32.mrf.mxu3 }
 0x45d   :  { %v2683_v55 = vadd.f32 %v2673_v9, %v2599_v14  ;;  %v2684_v45 = vadd.f32 %v2674_v11, %v2612_v3  ;;  %v2575_v5 = vpop.f32.mrf.mxu0  ;;  %v2588_v33 = vpop.f32.mrf.mxu1 }
 0x45f   :  { %v4553_v52 = vpop.eup %4552  ;;  %v2691_v37 = vmul.f32 0.5, %v2683_v55  ;;  %4558 = vtanh.f32 %v2684_v45 }
 0x460   :  { %v4555_v57 = vpop.eup %4554  ;;  %v5825_v0 = vmul.f32 %v4553_v52, %v2554_v61  ;;  %v6406_v52 = vld [vmem:[#allocation17_spill] sm:$0xff] }
 0x461   :  { %v4557_v34 = vpop.eup %4556  ;;  %v2695_v12 = vmul.f32 0.5, %v4555_v57  ;;  %4560 = vtanh.f32 %v2691_v37  ;;  %v6407_v37 = vld [vmem:[#allocation31_spill] sm:$0xff] }
 0x462   :  { %v2696_v36 = vmul.f32 0.5, %v4557_v34  ;;  %v2616_v6 = vpack.c.bf16 %v5825_v0, %v5825_v0  ;;  %v6417_v57 = vld [vmem:[#allocation23_spill] sm:$0xff]  ;;  %v6418_v34 = vld [vmem:[#allocation24_spill] sm:$0xff] }
 0x463   :  { %v2698_v39 = vadd.f32 0.5, %v2695_v12  ;;  %v6419_v12 = vld [vmem:[#allocation37_spill] sm:$0xff] }
 0x464   :  { %v2699_v26 = vadd.f32 0.5, %v2696_v36  ;;  %v2601_v28 = vpop.f32.mrf.mxu2  ;;  %v2614_v9 = vpop.f32.mrf.mxu3  ;;  %2625 = vmatmul.bf16.vlgmr.msrb.gmra.mxu0 %v2616_v6  ;;  %2638 = vmatmul.bf16.vlgmr.msrb.gmra.mxu1 %v2616_v6  ;;  %v6420_v36 = vld [vmem:[#allocation39_spill] sm:$0xff] }
 0x465   :  { %v4559_v38 = vpop.eup %4558  ;;  %2651 = vmatmul.bf16.vlgmr.msra.gmra.mxu2 %v2616_v6  ;;  %2664 = vmatmul.bf16.vlgmr.msra.gmra.mxu3 %v2616_v6  ;;  %v6421_v6 = vld [vmem:[#allocation26_spill] sm:$0xff]  ;;  %v6425_v9 = vld [vmem:[#allocation28_spill] sm:$0xff] }
 0x466   :  { %v2702_v11 = vmul.f32 %v2699_v26, %v5746_v42  ;;  %v2703_v14 = vmul.f32 %v4559_v38, %v2698_v39  ;;  %2781 = vmatpush.bf16.msrb.mxu0 %v6293_v25  ;;  %2794 = vmatpush.bf16.msrb.mxu1 %v6294_v31  ;;  %v6422_v39 = vld [vmem:[#allocation27_spill] sm:$0xff]  ;;  %v6423_v26 = vld [vmem:[#allocation41_spill] sm:$0xff]  ;;  %v6424_v28 = vld [vmem:[#allocation42_spill] sm:$0xff] }
 0x467   :  { %2807 = vmatpush.bf16.msra.mxu2 %v6295_v8  ;;  %2820 = vmatpush.bf16.msra.mxu3 %v6296_v30  ;;  %v4561_v3 = vpop.eup %4560  ;;  %v6426_v38 = vld [vmem:[#allocation29_spill] sm:$0xff] }
 0x468   :  { %v5834_v55 = vadd.f32 %v2703_v14, %v2702_v11  ;;  %v2697_v45 = vmul.f32 0.5, %v4561_v3  ;;  %v6427_v11 = vld [vmem:[#allocation43_spill] sm:$0xff]  ;;  %v6428_v14 = vld [vmem:[#allocation44_spill] sm:$0xff]  ;;  %v6429_v3 = vld [vmem:[#allocation53_spill] sm:$0xff] }
 0x46a   :  { %4562 = vtanh.f32 %v5834_v55  ;;  %2782 = vmatpush.bf16.msrb.mxu0 %v6297_v21  ;;  %2795 = vmatpush.bf16.msrb.mxu1 %v6298_v40  ;;  %v2700_v42 = vadd.f32 0.5, %v2697_v45  ;;  %v2677_v45 = vunpack.c.l.bf16 %v6429_v3 }
 0x46b   :  { %2808 = vmatpush.bf16.msra.mxu2 %v6320_v24  ;;  %2821 = vmatpush.bf16.msra.mxu3 %v6300_v59 }
 0x46e   :  { %2783 = vmatpush.bf16.msrb.mxu0 %v6302_v49  ;;  %2796 = vmatpush.bf16.msrb.mxu1 %v6303_v62 }
 0x46f   :  { %2809 = vmatpush.bf16.msra.mxu2 %v6321_v43  ;;  %2822 = vmatpush.bf16.msra.mxu3 %v6322_v7 }
 0x470   :  { %v4563_v5 = vpop.eup %4562 }
 0x471   :  { %v5845_v33 = vmul.f32 %v4563_v5, %v2700_v42  ;;  %v2678_v42 = vunpack.c.h.bf16 %v6429_v3  ;;  %v6431_v3 = vld [vmem:[#allocation25_spill] sm:$0xff] }
 0x472   :  { %2784 = vmatpush.bf16.msrb.mxu0 %v6324_v51  ;;  %2797 = vmatpush.bf16.msrb.mxu1 %v6307_v23 }
 0x473   :  { %v2727_v61 = vpack.c.bf16 %v5845_v33, %v5845_v33  ;;  %2810 = vmatpush.bf16.msra.mxu2 %v6308_v17  ;;  %2823 = vmatpush.bf16.msra.mxu3 %v6309_v41 }
 0x475   :  { %2736 = vmatmul.bf16.vlgmr.msra.gmra.mxu0 %v2727_v61  ;;  %2749 = vmatmul.bf16.vlgmr.msra.gmra.mxu1 %v2727_v61 }
 0x476   :  { %2762 = vmatmul.bf16.vlgmr.msrb.gmra.mxu2 %v2727_v61  ;;  %2775 = vmatmul.bf16.vlgmr.msrb.gmra.mxu3 %v2727_v61 }
 0x477   :  { %2785 = vmatpush.bf16.msrb.mxu0 %v6310_v13  ;;  %2798 = vmatpush.bf16.msrb.mxu1 %v6311_v54 }
 0x478   :  { %2811 = vmatpush.bf16.msra.mxu2 %v6312_v50  ;;  %2824 = vmatpush.bf16.msra.mxu3 %v6313_v27 }
 0x47b   :  { %2786 = vmatpush.bf16.msrb.mxu0 %v6314_v46  ;;  %2799 = vmatpush.bf16.msrb.mxu1 %v6315_v53 }
 0x47c   :  { %2812 = vmatpush.bf16.msra.mxu2 %v5376_v15  ;;  %2825 = vmatpush.bf16.msra.mxu3 %v5379_v19 }
 0x47f   :  { %2787 = vmatpush.bf16.msrb.mxu0 %v5384_v32  ;;  %2800 = vmatpush.bf16.msrb.mxu1 %v5389_v10 }
 0x480   :  { %2813 = vmatpush.bf16.msra.mxu2 %v5391_v22  ;;  %2826 = vmatpush.bf16.msra.mxu3 %v5394_v18 }
 0x483   :  { %2788 = vmatpush.bf16.msrb.mxu0 %v5403_v58  ;;  %2801 = vmatpush.bf16.msrb.mxu1 %v5409_v56 }
 0x484   :  { %2814 = vmatpush.bf16.msra.mxu2 %v5411_v1  ;;  %2827 = vmatpush.bf16.msra.mxu3 %v5414_v35 }
 0x487   :  { %2892 = vmatpush.bf16.msra.mxu0 %v4991_v44  ;;  %2905 = vmatpush.bf16.msra.mxu1 %v4993_v48  ;;  %v6408_v44 = vld [vmem:[#allocation32_spill] sm:$0xff]  ;;  %v6409_v48 = vld [vmem:[#allocation18_spill] sm:$0xff] }
 0x488   :  { %2918 = vmatpush.bf16.msrb.mxu2 %v5087_v29  ;;  %2931 = vmatpush.bf16.msrb.mxu3 %v5089_v63  ;;  %v6410_v29 = vld [vmem:[#allocation19_spill] sm:$0xff]  ;;  %v6411_v63 = vld [vmem:[#allocation33_spill] sm:$0xff] }
 0x48b   :  { %2893 = vmatpush.bf16.msra.mxu0 %v5000_v60  ;;  %2906 = vmatpush.bf16.msra.mxu1 %v5003_v4  ;;  %v6412_v60 = vld [vmem:[#allocation34_spill] sm:$0xff]  ;;  %v6413_v4 = vld [vmem:[#allocation21_spill] sm:$0xff] }
 0x48c   :  { %2919 = vmatpush.bf16.msrb.mxu2 %v5099_v2  ;;  %2932 = vmatpush.bf16.msrb.mxu3 %v5103_v47  ;;  %v6414_v2 = vld [vmem:[#allocation22_spill] sm:$0xff]  ;;  %v6415_v47 = vld [vmem:[#allocation35_spill] sm:$0xff] }
 0x48f   :  { %2894 = vmatpush.bf16.msra.mxu0 %v5015_v16  ;;  %2907 = vmatpush.bf16.msra.mxu1 %v6406_v52  ;;  %v6416_v16 = vld [vmem:[#allocation36_spill] sm:$0xff] }
 0x490   :  { %2920 = vmatpush.bf16.msrb.mxu2 %v6407_v37  ;;  %2933 = vmatpush.bf16.msrb.mxu3 %v6408_v44 }
 0x493   :  { %2895 = vmatpush.bf16.msra.mxu0 %v6409_v48  ;;  %2908 = vmatpush.bf16.msra.mxu1 %v6410_v29  ;;  %v6430_v29 = vld [vmem:[#allocation72_spill] sm:$0xff] }
 0x494   :  { %2921 = vmatpush.bf16.msrb.mxu2 %v6411_v63  ;;  %2934 = vmatpush.bf16.msrb.mxu3 %v6412_v60  ;;  %v2679_v63 = vunpack.c.l.bf16 %v6430_v29  ;;  %v2680_v60 = vunpack.c.h.bf16 %v6430_v29 }
 0x497   :  { %2896 = vmatpush.bf16.msra.mxu0 %v6413_v4  ;;  %2909 = vmatpush.bf16.msra.mxu1 %v6414_v2 }
 0x498   :  { %2922 = vmatpush.bf16.msrb.mxu2 %v6415_v47  ;;  %2935 = vmatpush.bf16.msrb.mxu3 %v6416_v16 }
 0x49b   :  { %2897 = vmatpush.bf16.msra.mxu0 %v6417_v57  ;;  %2910 = vmatpush.bf16.msra.mxu1 %v6418_v34 }
 0x49c   :  { %2923 = vmatpush.bf16.msrb.mxu2 %v6419_v12  ;;  %2936 = vmatpush.bf16.msrb.mxu3 %v6420_v36 }
 0x49f   :  { %2898 = vmatpush.bf16.msra.mxu0 %v6421_v6  ;;  %2911 = vmatpush.bf16.msra.mxu1 %v6422_v39 }
 0x4a0   :  { %2924 = vmatpush.bf16.msrb.mxu2 %v6423_v26  ;;  %2937 = vmatpush.bf16.msrb.mxu3 %v6424_v28 }
 0x4a3   :  { %2899 = vmatpush.bf16.msra.mxu0 %v6425_v9  ;;  %2912 = vmatpush.bf16.msra.mxu1 %v6426_v38 }
 0x4a4   :  { %2925 = vmatpush.bf16.msrb.mxu2 %v6427_v11  ;;  %2938 = vmatpush.bf16.msrb.mxu3 %v6428_v14 }
 0x4e1   :  { %v2626_v5 = vpop.f32.mrf.mxu0  ;;  %v2639_v61 = vpop.f32.mrf.mxu1 }
 0x4e2   :  { %v2685_v52 = vadd.f32 %v2677_v45, %v2626_v5  ;;  %v2686_v37 = vadd.f32 %v2678_v42, %v2639_v61  ;;  %v2835_v45 = vunpack.c.l.bf16 %v6431_v3  ;;  %v2836_v42 = vunpack.c.h.bf16 %v6431_v3 }
 0x4e4   :  { %v2707_v44 = vmul.f32 0.5, %v2685_v52  ;;  %v2708_v48 = vmul.f32 0.5, %v2686_v37 }
 0x4e6   :  { %4564 = vtanh.f32 %v2707_v44 }
 0x4e7   :  { %4566 = vtanh.f32 %v2708_v48 }
 0x4e8   :  { %v2652_v4 = vpop.f32.mrf.mxu2  ;;  %v2665_v2 = vpop.f32.mrf.mxu3 }
 0x4e9   :  { %v2687_v47 = vadd.f32 %v2679_v63, %v2652_v4  ;;  %v2688_v16 = vadd.f32 %v2680_v60, %v2665_v2  ;;  %v2628_v57 = vpop.f32.mrf.mxu0  ;;  %v2641_v34 = vpop.f32.mrf.mxu1 }
 0x4eb   :  { %v2709_v12 = vmul.f32 0.5, %v2687_v47  ;;  %4568 = vtanh.f32 %v2688_v16  ;;  %v6432_v47 = vld [vmem:[#allocation49_spill] sm:$0xff] }
 0x4ec   :  { %v4565_v36 = vpop.eup %4564  ;;  %v2837_v16 = vunpack.c.l.bf16 %v6432_v47  ;;  %v2838_v57 = vunpack.c.h.bf16 %v6432_v47 }
 0x4ed   :  { %v4567_v6 = vpop.eup %4566  ;;  %v2713_v39 = vmul.f32 0.5, %v4565_v36  ;;  %4570 = vtanh.f32 %v2709_v12 }
 0x4ee   :  { %v2714_v26 = vmul.f32 0.5, %v4567_v6 }
 0x4ef   :  { %v2716_v28 = vadd.f32 0.5, %v2713_v39 }
 0x4f0   :  { %v2717_v9 = vadd.f32 0.5, %v2714_v26  ;;  %v2654_v38 = vpop.f32.mrf.mxu2  ;;  %v2667_v11 = vpop.f32.mrf.mxu3 }
 0x4f1   :  { %v4569_v14 = vpop.eup %4568 }
 0x4f2   :  { %v2720_v5 = vmul.f32 %v2717_v9, %v5820_v20  ;;  %v2721_v61 = vmul.f32 %v4569_v14, %v2716_v28  ;;  %v2737_v52 = vpop.f32.mrf.mxu0  ;;  %v2750_v37 = vpop.f32.mrf.mxu1 }
 0x4f3   :  { %v2845_v44 = vadd.f32 %v2835_v45, %v2737_v52  ;;  %v2846_v48 = vadd.f32 %v2836_v42, %v2750_v37  ;;  %v4571_v29 = vpop.eup %4570 }
 0x4f4   :  { %v5908_v63 = vadd.f32 %v2721_v61, %v2720_v5  ;;  %v2715_v2 = vmul.f32 0.5, %v4571_v29 }
 0x4f5   :  { %v2853_v60 = vmul.f32 0.5, %v2845_v44  ;;  %v2854_v4 = vmul.f32 0.5, %v2846_v48 }
 0x4f6   :  { %4572 = vtanh.f32 %v5908_v63  ;;  %v2718_v26 = vadd.f32 0.5, %v2715_v2 }
 0x4f7   :  { %4574 = vtanh.f32 %v2853_v60 }
 0x4f8   :  { %4576 = vtanh.f32 %v2854_v4 }
 0x4f9   :  { %v2763_v20 = vpop.f32.mrf.mxu2  ;;  %v2776_v34 = vpop.f32.mrf.mxu3 }
 0x4fa   :  { %v2847_v12 = vadd.f32 %v2837_v16, %v2763_v20  ;;  %v2848_v36 = vadd.f32 %v2838_v57, %v2776_v34  ;;  %v2739_v6 = vpop.f32.mrf.mxu0  ;;  %v2752_v39 = vpop.f32.mrf.mxu1 }
 0x4fb   :  { %v6435_v6 = vld [vmem:[#allocation30_spill] sm:$0xff] }
 0x4fc   :  { %v4573_v28 = vpop.eup %4572  ;;  %v2855_v9 = vmul.f32 0.5, %v2847_v12  ;;  %4578 = vtanh.f32 %v2848_v36  ;;  %v2999_v39 = vunpack.c.l.bf16 %v6435_v6 }
 0x4fd   :  { %v4575_v38 = vpop.eup %4574  ;;  %v5913_v11 = vmul.f32 %v4573_v28, %v2718_v26  ;;  %v3000_v26 = vunpack.c.h.bf16 %v6435_v6  ;;  %v6442_v6 = vld [vmem:[#allocation51_spill] sm:$0xff] }
 0x4fe   :  { %v4577_v14 = vpop.eup %4576  ;;  %v2859_v3 = vmul.f32 0.5, %v4575_v38  ;;  %4580 = vtanh.f32 %v2855_v9 }
 0x4ff   :  { %v2860_v45 = vmul.f32 0.5, %v4577_v14  ;;  %v2780_v42 = vpack.c.bf16 %v5913_v11, %v5913_v11 }
 0x500   :  { %v2862_v5 = vadd.f32 0.5, %v2859_v3 }
 0x501   :  { %v2863_v61 = vadd.f32 0.5, %v2860_v45  ;;  %v2765_v52 = vpop.f32.mrf.mxu2  ;;  %v2778_v37 = vpop.f32.mrf.mxu3  ;;  %2789 = vmatmul.bf16.vlgmr.msrb.gmra.mxu0 %v2780_v42  ;;  %2802 = vmatmul.bf16.vlgmr.msrb.gmra.mxu1 %v2780_v42 }
 0x502   :  { %v4579_v44 = vpop.eup %4578  ;;  %2815 = vmatmul.bf16.vlgmr.msra.gmra.mxu2 %v2780_v42  ;;  %2828 = vmatmul.bf16.vlgmr.msra.gmra.mxu3 %v2780_v42 }
 0x503   :  { %v2866_v48 = vmul.f32 %v2863_v61, %v5834_v55  ;;  %v2867_v29 = vmul.f32 %v4579_v44, %v2862_v5  ;;  %2945 = vmatpush.bf16.msrb.mxu0 %v6293_v25  ;;  %2958 = vmatpush.bf16.msrb.mxu1 %v6294_v31  ;;  %v6436_v44 = vld [vmem:[#allocation50_spill] sm:$0xff] }
 0x504   :  { %2971 = vmatpush.bf16.msra.mxu2 %v6295_v8  ;;  %2984 = vmatpush.bf16.msra.mxu3 %v6296_v30  ;;  %v4581_v60 = vpop.eup %4580 }
 0x505   :  { %v5922_v4 = vadd.f32 %v2867_v29, %v2866_v48  ;;  %v2861_v2 = vmul.f32 0.5, %v4581_v60  ;;  %v3001_v48 = vunpack.c.l.bf16 %v6436_v44  ;;  %v3002_v29 = vunpack.c.h.bf16 %v6436_v44 }
 0x507   :  { %4582 = vtanh.f32 %v5922_v4  ;;  %2946 = vmatpush.bf16.msrb.mxu0 %v6297_v21  ;;  %2959 = vmatpush.bf16.msrb.mxu1 %v6298_v40  ;;  %v2864_v25 = vadd.f32 0.5, %v2861_v2 }
 0x508   :  { %2972 = vmatpush.bf16.msra.mxu2 %v6320_v24  ;;  %2985 = vmatpush.bf16.msra.mxu3 %v6300_v59  ;;  %v4415_v59 = vld [vmem:[%s6081_s5 + $0x10] sm:$0xff] }
 0x50b   :  { %2947 = vmatpush.bf16.msrb.mxu0 %v6302_v49  ;;  %2960 = vmatpush.bf16.msrb.mxu1 %v6303_v62 }
 0x50c   :  { %2973 = vmatpush.bf16.msra.mxu2 %v6321_v43  ;;  %2986 = vmatpush.bf16.msra.mxu3 %v6322_v7  ;;  %v4413_v7 = vld [vmem:[%s6081_s5] sm:$0xff] }
 0x50d   :  { %v4583_v31 = vpop.eup %4582 }
 0x50e   :  { %v5933_v8 = vmul.f32 %v4583_v31, %v2864_v25 }
 0x50f   :  { %2948 = vmatpush.bf16.msrb.mxu0 %v6324_v51  ;;  %2961 = vmatpush.bf16.msrb.mxu1 %v6307_v23 }
 0x510   :  { %v2891_v30 = vpack.c.bf16 %v5933_v8, %v5933_v8  ;;  %2974 = vmatpush.bf16.msra.mxu2 %v6308_v17  ;;  %2987 = vmatpush.bf16.msra.mxu3 %v6309_v41 }
 0x512   :  { %2900 = vmatmul.bf16.vlgmr.msra.gmra.mxu0 %v2891_v30  ;;  %2913 = vmatmul.bf16.vlgmr.msra.gmra.mxu1 %v2891_v30 }
 0x513   :  { %2926 = vmatmul.bf16.vlgmr.msrb.gmra.mxu2 %v2891_v30  ;;  %2939 = vmatmul.bf16.vlgmr.msrb.gmra.mxu3 %v2891_v30 }
 0x514   :  { %2949 = vmatpush.bf16.msrb.mxu0 %v6310_v13  ;;  %2962 = vmatpush.bf16.msrb.mxu1 %v6311_v54 }
 0x515   :  { %2975 = vmatpush.bf16.msra.mxu2 %v6312_v50  ;;  %2988 = vmatpush.bf16.msra.mxu3 %v6313_v27  ;;  %v4414_v27 = vld [vmem:[%s6081_s5 + $0x8] sm:$0xff] }
 0x518   :  { %2950 = vmatpush.bf16.msrb.mxu0 %v6314_v46  ;;  %2963 = vmatpush.bf16.msrb.mxu1 %v6315_v53  ;;  %v6434_v46 = vld [vmem:[#allocation62_spill] sm:$0xff] }
 0x519   :  { %2976 = vmatpush.bf16.msra.mxu2 %v5376_v15  ;;  %2989 = vmatpush.bf16.msra.mxu3 %v5379_v19  ;;  %v4420_v19 = vld [vmem:[%s6081_s5 + $0x38] sm:$0xff]  ;;  %v4419_v15 = vld [vmem:[%s6081_s5 + $0x30] sm:$0xff]  ;;  %v2843_v49 = vunpack.c.l.bf16 %v6434_v46  ;;  %v2844_v62 = vunpack.c.h.bf16 %v6434_v46 }
 0x51c   :  { %2951 = vmatpush.bf16.msrb.mxu0 %v5384_v32  ;;  %2964 = vmatpush.bf16.msrb.mxu1 %v5389_v10  ;;  %v4418_v32 = vld [vmem:[%s6081_s5 + $0x28] sm:$0xff]  ;;  %v4417_v10 = vld [vmem:[%s6081_s5 + $0x20] sm:$0xff] }
 0x51d   :  { %2977 = vmatpush.bf16.msra.mxu2 %v5391_v22  ;;  %2990 = vmatpush.bf16.msra.mxu3 %v5394_v18  ;;  %v6433_v22 = vld [vmem:[#allocation52_spill] sm:$0xff] }
 0x51e   :  { %v2841_v18 = vunpack.c.l.bf16 %v6433_v22 }
 0x520   :  { %2952 = vmatpush.bf16.msrb.mxu0 %v5403_v58  ;;  %2965 = vmatpush.bf16.msrb.mxu1 %v5409_v56  ;;  %v2842_v58 = vunpack.c.h.bf16 %v6433_v22 }
 0x521   :  { %2978 = vmatpush.bf16.msra.mxu2 %v5411_v1  ;;  %2991 = vmatpush.bf16.msra.mxu3 %v5414_v35  ;;  %v4416_v35 = vld [vmem:[%s6081_s5 + $0x18] sm:$0xff] }
 0x524   :  { %3211 = vmatpush.bf16.msra.mxu0 %v4420_v19 }
 0x528   :  { %3212 = vmatpush.bf16.msra.mxu0 %v4419_v15 }
 0x52c   :  { %3213 = vmatpush.bf16.msra.mxu0 %v4418_v32 }
 0x530   :  { %3214 = vmatpush.bf16.msra.mxu0 %v4417_v10 }
 0x534   :  { %3215 = vmatpush.bf16.msra.mxu0 %v4416_v35 }
 0x538   :  { %3216 = vmatpush.bf16.msra.mxu0 %v4415_v59 }
 0x53c   :  { %3217 = vmatpush.bf16.msra.mxu0 %v4414_v27 }
 0x540   :  { %3218 = vmatpush.bf16.msra.mxu0 %v4413_v7  ;;  %v6440_v7 = vld [vmem:[#allocation64_spill] sm:$0xff] }
 0x57e   :  { %v2790_v56 = vpop.f32.mrf.mxu0  ;;  %v2803_v1 = vpop.f32.mrf.mxu1 }
 0x57f   :  { %v2849_v23 = vadd.f32 %v2841_v18, %v2790_v56  ;;  %v2850_v21 = vadd.f32 %v2842_v58, %v2803_v1 }
 0x581   :  { %v2871_v40 = vmul.f32 0.5, %v2849_v23  ;;  %v2872_v17 = vmul.f32 0.5, %v2850_v21 }
 0x583   :  { %4584 = vtanh.f32 %v2871_v40 }
 0x584   :  { %4586 = vtanh.f32 %v2872_v17 }
 0x585   :  { %v2816_v50 = vpop.f32.mrf.mxu2  ;;  %v2829_v53 = vpop.f32.mrf.mxu3 }
 0x586   :  { %v2851_v41 = vadd.f32 %v2843_v49, %v2816_v50  ;;  %v2852_v13 = vadd.f32 %v2844_v62, %v2829_v53  ;;  %v2792_v54 = vpop.f32.mrf.mxu0  ;;  %v2805_v24 = vpop.f32.mrf.mxu1 }
 0x587   :  { %v6438_v54 = vld [vmem:[#allocation59_spill] sm:$0xff] }
 0x588   :  { %v2873_v43 = vmul.f32 0.5, %v2851_v41  ;;  %4588 = vtanh.f32 %v2852_v13  ;;  %v6437_v13 = vld [vmem:[#allocation45_spill] sm:$0xff] }
 0x589   :  { %v4585_v51 = vpop.eup %4584  ;;  %v3071_v24 = vpack.c.bf16 %v6438_v54, %v6437_v13 }
 0x58a   :  { %v4587_v55 = vpop.eup %4586  ;;  %v2877_v47 = vmul.f32 0.5, %v4585_v51  ;;  %4590 = vtanh.f32 %v2873_v43  ;;  %v6439_v43 = vld [vmem:[#allocation61_spill] sm:$0xff] }
 0x58b   :  { %v2878_v16 = vmul.f32 0.5, %v4587_v55  ;;  %v3073_v51 = vpack.c.bf16 %v6440_v7, %v6439_v43  ;;  %v6441_v55 = vld [vmem:[#allocation67_spill] sm:$0xff] }
 0x58c   :  { %v2880_v57 = vadd.f32 0.5, %v2877_v47  ;;  %v3075_v47 = vpack.c.bf16 %v5845_v33, %v6441_v55  ;;  %v4425_v33 = vld [vmem:[%s6081_s5 + $0x60] sm:$0xff] }
 0x58d   :  { %v2881_v20 = vadd.f32 0.5, %v2878_v16  ;;  %v2818_v34 = vpop.f32.mrf.mxu2  ;;  %v2831_v12 = vpop.f32.mrf.mxu3  ;;  %v4428_v16 = vld [vmem:[%s6081_s5 + $0x78] sm:$0xff] }
 0x58e   :  { %v4589_v36 = vpop.eup %4588  ;;  %3240 = vmatpush.bf16.msra.mxu1 %v4428_v16  ;;  %v4423_v34 = vld [vmem:[%s6081_s5 + $0x50] sm:$0xff]  ;;  %v4422_v12 = vld [vmem:[%s6081_s5 + $0x48] sm:$0xff] }
 0x58f   :  { %v2884_v28 = vmul.f32 %v2881_v20, %v5908_v63  ;;  %v2885_v9 = vmul.f32 %v4589_v36, %v2880_v57  ;;  %v2901_v38 = vpop.f32.mrf.mxu0  ;;  %v2914_v14 = vpop.f32.mrf.mxu1  ;;  %v4427_v57 = vld [vmem:[%s6081_s5 + $0x70] sm:$0xff]  ;;  %v4426_v20 = vld [vmem:[%s6081_s5 + $0x68] sm:$0xff]  ;;  %v4421_v36 = vld [vmem:[%s6081_s5 + $0x40] sm:$0xff] }
 0x590   :  { %v3009_v3 = vadd.f32 %v2999_v39, %v2901_v38  ;;  %v3010_v45 = vadd.f32 %v3000_v26, %v2914_v14  ;;  %v4591_v42 = vpop.eup %4590  ;;  %v3005_v39 = vunpack.c.l.bf16 %v6442_v6  ;;  %v3006_v26 = vunpack.c.h.bf16 %v6442_v6 }
 0x591   :  { %v5988_v5 = vadd.f32 %v2885_v9, %v2884_v28  ;;  %v2879_v37 = vmul.f32 0.5, %v4591_v42  ;;  %v6443_v42 = vld [vmem:[#allocation58_spill] sm:$0xff] }
 0x592   :  { %v3017_v61 = vmul.f32 0.5, %v3009_v3  ;;  %v3018_v52 = vmul.f32 0.5, %v3010_v45  ;;  %3241 = vmatpush.bf16.msra.mxu1 %v4427_v57 }
 0x593   :  { %4592 = vtanh.f32 %v5988_v5  ;;  %v2882_v19 = vadd.f32 0.5, %v2879_v37 }
 0x594   :  { %4594 = vtanh.f32 %v3017_v61  ;;  %v3007_v61 = vunpack.c.l.bf16 %v6443_v42 }
 0x595   :  { %4596 = vtanh.f32 %v3018_v52  ;;  %v3008_v52 = vunpack.c.h.bf16 %v6443_v42 }
 0x596   :  { %v2927_v63 = vpop.f32.mrf.mxu2  ;;  %v2940_v60 = vpop.f32.mrf.mxu3  ;;  %3242 = vmatpush.bf16.msra.mxu1 %v4426_v20 }
 0x597   :  { %v3011_v2 = vadd.f32 %v3001_v48, %v2927_v63  ;;  %v3012_v25 = vadd.f32 %v3002_v29, %v2940_v60  ;;  %v2903_v31 = vpop.f32.mrf.mxu0  ;;  %v2916_v30 = vpop.f32.mrf.mxu1 }
 0x599   :  { %v4593_v15 = vpop.eup %4592  ;;  %v3019_v32 = vmul.f32 0.5, %v3011_v2  ;;  %4598 = vtanh.f32 %v3012_v25 }
 0x59a   :  { %v4595_v10 = vpop.eup %4594  ;;  %v5993_v22 = vmul.f32 %v4593_v15, %v2882_v19  ;;  %3243 = vmatpush.bf16.msra.mxu1 %v4425_v33 }
 0x59b   :  { %v4597_v18 = vpop.eup %4596  ;;  %v3023_v58 = vmul.f32 0.5, %v4595_v10  ;;  %4600 = vtanh.f32 %v3019_v32 }
 0x59c   :  { %v3024_v56 = vmul.f32 0.5, %v4597_v18  ;;  %v2944_v1 = vpack.c.bf16 %v5993_v22, %v5993_v22 }
 0x59d   :  { %v3026_v35 = vadd.f32 0.5, %v3023_v58 }
 0x59e   :  { %v3027_v23 = vadd.f32 0.5, %v3024_v56  ;;  %v2929_v21 = vpop.f32.mrf.mxu2  ;;  %v2942_v40 = vpop.f32.mrf.mxu3  ;;  %2953 = vmatmul.bf16.vlgmr.msrb.gmra.mxu0 %v2944_v1  ;;  %2966 = vmatmul.bf16.vlgmr.msrb.gmra.mxu1 %v2944_v1 }
 0x59f   :  { %v4599_v17 = vpop.eup %4598  ;;  %2979 = vmatmul.bf16.vlgmr.msra.gmra.mxu2 %v2944_v1  ;;  %2992 = vmatmul.bf16.vlgmr.msra.gmra.mxu3 %v2944_v1 }
 0x5a0   :  { %v3030_v59 = vmul.f32 %v3027_v23, %v5922_v4  ;;  %v3031_v46 = vmul.f32 %v4599_v17, %v3026_v35 }
 0x5a1   :  { %v4601_v49 = vpop.eup %4600 }
 0x5a2   :  { %v3032_v62 = vadd.f32 %v3031_v46, %v3030_v59  ;;  %v3025_v27 = vmul.f32 0.5, %v4601_v49  ;;  %v3074_v49 = vpack.c.bf16 %v5825_v0, %v5913_v11 }
 0x5a4   :  { %4602 = vtanh.f32 %v3032_v62  ;;  %v3028_v50 = vadd.f32 0.5, %v3025_v27  ;;  %v6444_v62 = vld [vmem:[#allocation65_spill] sm:$0xff]  ;;  %v6445_v27 = vld [vmem:[#allocation63_spill] sm:$0xff] }
 0x5aa   :  { %v4603_v53 = vpop.eup %4602 }
 0x5ab   :  { %v3034_v41 = vmul.f32 %v4603_v53, %v3028_v50  ;;  %v3076_v50 = vpack.c.bf16 %v6445_v27, %v6444_v62  ;;  %v6447_v53 = vld [vmem:[#allocation38_spill] sm:$0xff] }
 0x5ad   :  { %v3077_v4 = vpack.c.bf16 %v3034_v41, %v5933_v8  ;;  %v4424_v8 = vld [vmem:[%s6081_s5 + $0x58] sm:$0xff] }
 0x5ae   :  { %3219 = vmatmul.bf16.vlgmr.msra.gmra.mxu0 %v3071_v24  ;;  %3244 = vmatpush.bf16.msra.mxu1 %v4424_v8  ;;  %v3269_v24 = vlaneseq }
 0x5b0   :  { %v3270_v43 = vand.u32 127, %v3269_v24 }
 0x5b2   :  { %3245 = vmatpush.bf16.msra.mxu1 %v4423_v34  ;;  %vm3271_vm0 = vcmp.lt.s32.totalorder %v3270_v43, 109 }
 0x5b6   :  { %3246 = vmatpush.bf16.msra.mxu1 %v4422_v12 }
 0x5ba   :  { %3247 = vmatpush.bf16.msra.mxu1 %v4421_v36 }
 0x5be   :  { %3224 = vmatmul.bf16.gmra.mxu0 %v3073_v51 }
 0x5ce   :  { %3229 = vmatmul.bf16.gmra.mxu0 %v3075_v47 }
 0x5de   :  { %3234 = vmatmul.bf16.gmra.mxu0 %v3077_v4 }
 0x61b   :  { %v2954_v28 = vpop.f32.mrf.mxu0  ;;  %v2967_v9 = vpop.f32.mrf.mxu1 }
 0x61c   :  { %v3013_v38 = vadd.f32 %v3005_v39, %v2954_v28  ;;  %v3014_v14 = vadd.f32 %v3006_v26, %v2967_v9 }
 0x61e   :  { %v3035_v3 = vmul.f32 0.5, %v3013_v38  ;;  %v3036_v45 = vmul.f32 0.5, %v3014_v14 }
 0x620   :  { %4604 = vtanh.f32 %v3035_v3 }
 0x621   :  { %4606 = vtanh.f32 %v3036_v45 }
 0x622   :  { %v2980_v37 = vpop.f32.mrf.mxu2  ;;  %v2993_v44 = vpop.f32.mrf.mxu3 }
 0x623   :  { %v3015_v48 = vadd.f32 %v3007_v61, %v2980_v37  ;;  %v3016_v29 = vadd.f32 %v3008_v52, %v2993_v44  ;;  %v2956_v63 = vpop.f32.mrf.mxu0  ;;  %v2969_v60 = vpop.f32.mrf.mxu1 }
 0x625   :  { %v3037_v2 = vmul.f32 0.5, %v3015_v48  ;;  %4608 = vtanh.f32 %v3016_v29 }
 0x626   :  { %v4605_v25 = vpop.eup %4604 }
 0x627   :  { %v4607_v31 = vpop.eup %4606  ;;  %v3041_v30 = vmul.f32 0.5, %v4605_v25  ;;  %4610 = vtanh.f32 %v3037_v2 }
 0x628   :  { %v3042_v19 = vmul.f32 0.5, %v4607_v31 }
 0x629   :  { %v3044_v15 = vadd.f32 0.5, %v3041_v30 }
 0x62a   :  { %v3045_v32 = vadd.f32 0.5, %v3042_v19  ;;  %v2982_v10 = vpop.f32.mrf.mxu2  ;;  %v2995_v18 = vpop.f32.mrf.mxu3 }
 0x62b   :  { %v4609_v58 = vpop.eup %4608  ;;  %v3220_v13 = vpop.f32.mrf.mxu0 }
 0x62c   :  { %v3048_v56 = vmul.f32 %v3045_v32, %v5988_v5  ;;  %v3049_v1 = vmul.f32 %v4609_v58, %v3044_v15  ;;  %v6446_v5 = vld [vmem:[#allocation60_spill] sm:$0xff] }
 0x62d   :  { %v4611_v35 = vpop.eup %4610  ;;  %v3078_v41 = vpack.c.bf16 %v6447_v53, %v6446_v5 }
 0x62e   :  { %v3050_v23 = vadd.f32 %v3049_v1, %v3048_v56  ;;  %v3043_v21 = vmul.f32 0.5, %v4611_v35 }
 0x630   :  { %4612 = vtanh.f32 %v3050_v23  ;;  %v3046_v40 = vadd.f32 0.5, %v3043_v21 }
 0x633   :  { %v3222_v54 = vpop.f32.mrf.mxu0 }
 0x636   :  { %v4613_v17 = vpop.eup %4612 }
 0x637   :  { %v3052_v59 = vmul.f32 %v4613_v17, %v3046_v40 }
 0x639   :  { %v3072_v46 = vpack.c.bf16 %v5993_v22, %v3052_v59  ;;  %v4453_v22 = vld [vmem:[%s6082_s6] ss:$0 sm:$0xff] }
 0x63a   :  { %v3221_v7 = vadd.f32 %v4453_v22, %v3220_v13  ;;  %v3223_v47 = vadd.f32 %v4453_v22, %v3222_v54 }
 0x63b   :  { %3248 = vmatmul.bf16.vlgmr.msra.gmra.mxu1 %v3072_v46  ;;  %v3225_v11 = vpop.f32.mrf.mxu0 }
 0x63c   :  { %v3226_v33 = vadd.f32 %v4453_v22, %v3225_v11 }
 0x643   :  { %v3227_v20 = vpop.f32.mrf.mxu0 }
 0x644   :  { %v3228_v6 = vadd.f32 %v4453_v22, %v3227_v20 }
 0x64b   :  { %3253 = vmatmul.bf16.gmra.mxu1 %v3074_v49  ;;  %v3230_v36 = vpop.f32.mrf.mxu0 }
 0x64c   :  { %v3231_v9 = vadd.f32 %v4453_v22, %v3230_v36 }
 0x653   :  { %v3232_v38 = vpop.f32.mrf.mxu0 }
 0x654   :  { %v3233_v42 = vadd.f32 %v4453_v22, %v3232_v38 }
 0x65b   :  { %3258 = vmatmul.bf16.gmra.mxu1 %v3076_v50  ;;  %v3235_v37 = vpop.f32.mrf.mxu0 }
 0x65c   :  { %v3236_v48 = vadd.f32 %v4453_v22, %v3235_v37 }
 0x663   :  { %v3237_v2 = vpop.f32.mrf.mxu0 }
 0x664   :  { %v3238_v25 = vadd.f32 %v4453_v22, %v3237_v2 }
 0x66b   :  { %3263 = vmatmul.bf16.gmra.mxu1 %v3078_v41 }
 0x6b8   :  { %v3249_v51 = vpop.f32.mrf.mxu1 }
 0x6b9   :  { %v3250_v0 = vadd.f32 %v3249_v51, %v3221_v7 }
 0x6bb   :  { %v3272_v55 = vsel %vm3271_vm0, %v3250_v0, -1e+30 }
 0x6bc   :  { %3280 = vmax.xlane.f32.xlu0 %v3272_v55 }
 0x6c0   :  { %v3251_v4 = vpop.f32.mrf.mxu1 }
 0x6c1   :  { %v3252_v16 = vadd.f32 %v3251_v4, %v3223_v47 }
 0x6c3   :  { %v3273_v57 = vsel %vm3271_vm0, %v3252_v16, -1e+30 }
 0x6c4   :  { %3282 = vmax.xlane.f32.xlu0 %v3273_v57 }
 0x6c8   :  { %v3254_v8 = vpop.f32.mrf.mxu1 }
 0x6c9   :  { %v3255_v34 = vadd.f32 %v3254_v8, %v3226_v33 }
 0x6cb   :  { %v3274_v12 = vsel %vm3271_vm0, %v3255_v34, -1e+30 }
 0x6cc   :  { %3284 = vmax.xlane.f32.xlu1 %v3274_v12 }
 0x6d0   :  { %v3256_v39 = vpop.f32.mrf.mxu1 }
 0x6d1   :  { %v3257_v26 = vadd.f32 %v3256_v39, %v3228_v6 }
 0x6d3   :  { %v3275_v28 = vsel %vm3271_vm0, %v3257_v26, -1e+30 }
 0x6d4   :  { %3286 = vmax.xlane.f32.xlu1 %v3275_v28 }
 0x6d8   :  { %v3259_v14 = vpop.f32.mrf.mxu1 }
 0x6d9   :  { %v3260_v3 = vadd.f32 %v3259_v14, %v3231_v9 }
 0x6db   :  { %v3276_v45 = vsel %vm3271_vm0, %v3260_v3, -1e+30 }
 0x6dc   :  { %3288 = vmax.xlane.f32.xlu2 %v3276_v45 }
 0x6e0   :  { %v3261_v61 = vpop.f32.mrf.mxu1 }
 0x6e1   :  { %v3262_v52 = vadd.f32 %v3261_v61, %v3233_v42 }
 0x6e3   :  { %v3277_v44 = vsel %vm3271_vm0, %v3262_v52, -1e+30 }
 0x6e4   :  { %3290 = vmax.xlane.f32.xlu2 %v3277_v44 }
 0x6e8   :  { %v3264_v29 = vpop.f32.mrf.mxu1 }
 0x6e9   :  { %v3265_v63 = vadd.f32 %v3264_v29, %v3236_v48 }
 0x6eb   :  { %v3278_v60 = vsel %vm3271_vm0, %v3265_v63, -1e+30 }
 0x6ec   :  { %3292 = vmax.xlane.f32.xlu0 %v3278_v60 }
 0x6f0   :  { %v3266_v31 = vpop.f32.mrf.mxu1 }
 0x6f1   :  { %v3267_v30 = vadd.f32 %v3266_v31, %v3238_v25 }
 0x6f3   :  { %v3279_v19 = vsel %vm3271_vm0, %v3267_v30, -1e+30 }
 0x6f4   :  { %3294 = vmax.xlane.f32.xlu1 %v3279_v19 }
 0x72f   :  { %v3281_v15 = vpop.xlane.xlu0 %3280 }
 0x730   :  { %v3296_v32 = vsub.f32 %v3272_v55, %v3281_v15 }
 0x732   :  { %v3304_v10 = vmul.f32 1.442695, %v3296_v32 }
 0x734   :  { %4614 = vpow2.f32 %v3304_v10 }
 0x737   :  { %v3283_v18 = vpop.xlane.xlu0 %3282 }
 0x738   :  { %v3297_v58 = vsub.f32 %v3273_v57, %v3283_v18 }
 0x73a   :  { %v4615_v56 = vpop.eup %4614  ;;  %v3306_v1 = vmul.f32 1.442695, %v3297_v58 }
 0x73b   :  { %3320 = vadd.xlane.f32.xlu2 %v4615_v56 }
 0x73c   :  { %4616 = vpow2.f32 %v3306_v1 }
 0x73f   :  { %v3285_v35 = vpop.xlane.xlu1 %3284 }
 0x740   :  { %v3298_v23 = vsub.f32 %v3274_v12, %v3285_v35 }
 0x742   :  { %v4617_v21 = vpop.eup %4616  ;;  %v3308_v40 = vmul.f32 1.442695, %v3298_v23 }
 0x743   :  { %3322 = vadd.xlane.f32.xlu0 %v4617_v21 }
 0x744   :  { %4618 = vpow2.f32 %v3308_v40 }
 0x747   :  { %v3287_v17 = vpop.xlane.xlu1 %3286 }
 0x748   :  { %v3299_v59 = vsub.f32 %v3275_v28, %v3287_v17 }
 0x74a   :  { %v4619_v46 = vpop.eup %4618  ;;  %v3310_v49 = vmul.f32 1.442695, %v3299_v59 }
 0x74b   :  { %3324 = vadd.xlane.f32.xlu1 %v4619_v46 }
 0x74c   :  { %4620 = vpow2.f32 %v3310_v49 }
 0x74f   :  { %v3289_v62 = vpop.xlane.xlu2 %3288 }
 0x750   :  { %v3300_v27 = vsub.f32 %v3276_v45, %v3289_v62 }
 0x752   :  { %v4621_v50 = vpop.eup %4620  ;;  %v3312_v5 = vmul.f32 1.442695, %v3300_v27 }
 0x753   :  { %3326 = vadd.xlane.f32.xlu2 %v4621_v50 }
 0x754   :  { %4622 = vpow2.f32 %v3312_v5 }
 0x757   :  { %v3291_v53 = vpop.xlane.xlu2 %3290 }
 0x758   :  { %v3301_v41 = vsub.f32 %v3277_v44, %v3291_v53 }
 0x75a   :  { %v4623_v13 = vpop.eup %4622  ;;  %v3314_v54 = vmul.f32 1.442695, %v3301_v41 }
 0x75b   :  { %3328 = vadd.xlane.f32.xlu0 %v4623_v13 }
 0x75c   :  { %4624 = vpow2.f32 %v3314_v54 }
 0x75f   :  { %v3293_v24 = vpop.xlane.xlu0 %3292 }
 0x760   :  { %v3302_v22 = vsub.f32 %v3278_v60, %v3293_v24 }
 0x762   :  { %v4625_v43 = vpop.eup %4624  ;;  %v3316_v7 = vmul.f32 1.442695, %v3302_v22 }
 0x763   :  { %3330 = vadd.xlane.f32.xlu1 %v4625_v43 }
 0x764   :  { %4626 = vpow2.f32 %v3316_v7 }
 0x767   :  { %v3295_v51 = vpop.xlane.xlu1 %3294 }
 0x768   :  { %v3303_v0 = vsub.f32 %v3279_v19, %v3295_v51 }
 0x76a   :  { %v4627_v11 = vpop.eup %4626  ;;  %v3318_v55 = vmul.f32 1.442695, %v3303_v0 }
 0x76b   :  { %3332 = vadd.xlane.f32.xlu2 %v4627_v11 }
 0x76c   :  { %4628 = vpow2.f32 %v3318_v55 }
 0x772   :  { %v4629_v47 = vpop.eup %4628 }
 0x773   :  { %3334 = vadd.xlane.f32.xlu0 %v4629_v47 }
 0x7ae   :  { %v3321_v4 = vpop.xlane.xlu2 %3320 }
 0x7af   :  { %4630 = vlog2.f32 %v3321_v4 }
 0x7b5   :  { %v4631_v16 = vpop.eup %4630 }
 0x7b6   :  { %v3337_v57 = vmul.f32 0.6931472, %v4631_v16  ;;  %v3323_v20 = vpop.xlane.xlu0 %3322 }
 0x7b7   :  { %4632 = vlog2.f32 %v3323_v20 }
 0x7b8   :  { %v3352_v33 = vsub.f32 %v3296_v32, %v3337_v57 }
 0x7ba   :  { %3360 = vst [vmem:[%s6083_s7] sm:$0xff] %v3352_v33 }
 0x7bd   :  { %v4633_v8 = vpop.eup %4632 }
 0x7be   :  { %v3339_v34 = vmul.f32 0.6931472, %v4633_v8  ;;  %v3325_v12 = vpop.xlane.xlu1 %3324 }
 0x7bf   :  { %4634 = vlog2.f32 %v3325_v12 }
 0x7c0   :  { %v3353_v36 = vsub.f32 %v3297_v58, %v3339_v34 }
 0x7c2   :  { %3361 = vst [vmem:[%s6083_s7 + $0x8] sm:$0xff] %v3353_v36 }
 0x7c5   :  { %v4635_v6 = vpop.eup %4634 }
 0x7c6   :  { %v3341_v39 = vmul.f32 0.6931472, %v4635_v6  ;;  %v3327_v26 = vpop.xlane.xlu2 %3326 }
 0x7c7   :  { %4636 = vlog2.f32 %v3327_v26 }
 0x7c8   :  { %v3354_v28 = vsub.f32 %v3298_v23, %v3341_v39 }
 0x7ca   :  { %3362 = vst [vmem:[%s6083_s7 + $0x10] sm:$0xff] %v3354_v28 }
 0x7cd   :  { %v4637_v9 = vpop.eup %4636 }
 0x7ce   :  { %v3343_v38 = vmul.f32 0.6931472, %v4637_v9  ;;  %v3329_v14 = vpop.xlane.xlu0 %3328 }
 0x7cf   :  { %4638 = vlog2.f32 %v3329_v14 }
 0x7d0   :  { %v3355_v3 = vsub.f32 %v3299_v59, %v3343_v38 }
 0x7d2   :  { %3363 = vst [vmem:[%s6083_s7 + $0x18] sm:$0xff] %v3355_v3 }
 0x7d5   :  { %v4639_v45 = vpop.eup %4638 }
 0x7d6   :  { %v3345_v42 = vmul.f32 0.6931472, %v4639_v45  ;;  %v3331_v61 = vpop.xlane.xlu1 %3330 }
 0x7d7   :  { %4640 = vlog2.f32 %v3331_v61 }
 0x7d8   :  { %v3356_v52 = vsub.f32 %v3300_v27, %v3345_v42 }
 0x7da   :  { %3364 = vst [vmem:[%s6083_s7 + $0x20] sm:$0xff] %v3356_v52 }
 0x7dd   :  { %v4641_v37 = vpop.eup %4640 }
 0x7de   :  { %v3347_v44 = vmul.f32 0.6931472, %v4641_v37  ;;  %v3333_v48 = vpop.xlane.xlu2 %3332 }
 0x7df   :  { %4642 = vlog2.f32 %v3333_v48 }
 0x7e0   :  { %v3357_v29 = vsub.f32 %v3301_v41, %v3347_v44 }
 0x7e2   :  { %3365 = vst [vmem:[%s6083_s7 + $0x28] sm:$0xff] %v3357_v29 }
 0x7e5   :  { %v4643_v63 = vpop.eup %4642 }
 0x7e6   :  { %v3349_v60 = vmul.f32 0.6931472, %v4643_v63  ;;  %v3335_v2 = vpop.xlane.xlu0 %3334 }
 0x7e7   :  { %4644 = vlog2.f32 %v3335_v2 }
 0x7e8   :  { %v3358_v25 = vsub.f32 %v3302_v22, %v3349_v60 }
 0x7ea   :  { %3366 = vst [vmem:[%s6083_s7 + $0x30] sm:$0xff] %v3358_v25 }
 0x7ed   :  { %v4645_v31 = vpop.eup %4644 }
 0x7ee   :  { %v3351_v30 = vmul.f32 0.6931472, %v4645_v31 }
 0x7f0   :  { %v3359_v19 = vsub.f32 %v3303_v0, %v3351_v30 }
 0x7f2   :  { %3367 = vst [vmem:[%s6083_s7 + $0x38] sm:$0xff] %v3359_v19 }
 0x7f3   :  { %3372 = vsyncpa [#allocation5], 1 }
 0x7f4   :  { %3373 = vsyncpa [#allocation7], 1 }
 0x7f5   :  { %3374 = vsyncpa [#allocation10], 1 }

</bundles_post_ra>
